<compile_context>
chip_gen: v7x
topology: tpu7x:2x2x1
jax: 0.10.0
libtpu: 0.0.40
codegen_flags: <defaults>
</compile_context>

<pallas_src>
import functools

import jax
import jax.numpy as jnp
import numpy as np
from jax.experimental import pallas as pl
from jax.experimental.pallas import tpu as pltpu

# ----------------------------- scaled-down config -----------------------------
INPUT_CHANN = 6          # xyz (3) + extra features (3)
K_SCORE = 1
NUM_CENTROIDS = (64, 32, 16)          # original: (5120, 1024, 256)
RADIUS = (0.2, 0.4, 0.8)              # original: (0.02, 0.08, 0.32)
NUM_NEIGHBOURS = (8, 8, 8)            # original: (64, 64, 64)
SA_CHANNELS = ((32, 32, 64), (64, 64, 128), (128, 128, 256))
FP_CHANNELS = ((256, 256), (128, 128), (64, 64, 64))
NUM_FP_NEIGHBOURS = (3, 3, 3)
SEG_CHANNELS = (128, 64, 64, 32)
BN_EPS = 1e-5

B = 2
N = 128

COMPUTE_DTYPE = jnp.bfloat16   # activation / weight dtype at kernel boundaries


# ------------------------------ tiling helper ----------------------------------
def _pick_tile(total, target=512):
    """Largest multiple-of-8 divisor of `total` that is <= target.

    Row counts <= 128 stay as a SINGLE grid step (avoids the ~0.35us/step
    pipeline overhead on 1-TC v5e/v6e and keeps the MXU M dimension filled).
    Larger row counts are split into tiles of at least 128 rows, which lets a
    'parallel' grid axis shard across v7x's two TensorCores at no cost to MXU
    M utilisation.  Tiles are exact divisors so no pad/slice copies occur."""
    assert total % 8 == 0, f"row count {total} must be a multiple of 8"
    floor = min(128, total, target)
    cap = min(target, total)
    cap -= cap % 8
    for cand in range(cap, floor - 1, -8):
        if total % cand == 0:
            return cand
    return total


# ------------------------------ Pallas kernels ---------------------------------
def _mlp_chain_kernel(x_ref, *refs, num_layers):
    """Fused chain of (1x1 conv) matmul + folded BatchNorm affine + ReLU.

    refs = (w0, scale0, shift0, ..., o_ref).  The activation stays VMEM/vreg
    resident across layers; only the last layer's output is written."""
    o_ref = refs[3 * num_layers]
    y = x_ref[...]                                        # (bm, Cin) bf16
    for l in range(num_layers):
        w = refs[3 * l][...]
        sc = refs[3 * l + 1][...]
        sh = refs[3 * l + 2][...]
        z = jnp.dot(y, w, preferred_element_type=jnp.float32)
        z = jnp.maximum(z * sc + sh, 0.0)                 # BN(eval)+bias fold, f32
        y = z if l + 1 == num_layers else z.astype(COMPUTE_DTYPE)
    o_ref[...] = y.astype(o_ref.dtype)


def mlp_chain(x, layers, out_dtype=COMPUTE_DTYPE, row_target=512):
    """x: [M, Cin] channels-last -> fused ReLU MLP chain -> [M, Cout_last]."""
    m, cin = x.shape
    bm = _pick_tile(m, row_target)
    in_specs = [pl.BlockSpec((bm, cin), lambda i: (i, 0))]
    operands = [x]
    for (w, sc, sh) in layers:
        in_specs.append(pl.BlockSpec(tuple(w.shape), lambda i: (0, 0)))
        in_specs.append(pl.BlockSpec(tuple(sc.shape), lambda i: (0, 0)))
        in_specs.append(pl.BlockSpec(tuple(sh.shape), lambda i: (0, 0)))
        operands += [w, sc, sh]
    cout = layers[-1][0].shape[1]
    return pl.pallas_call(
        functools.partial(_mlp_chain_kernel, num_layers=len(layers)),
        out_shape=jax.ShapeDtypeStruct((m, cout), out_dtype),
        grid_spec=pltpu.PrefetchScalarGridSpec(
            num_scalar_prefetch=0,
            grid=(m // bm,),
            in_specs=in_specs,
            out_specs=pl.BlockSpec((bm, cout), lambda i: (i, 0)),
        ),
        compiler_params=pltpu.CompilerParams(dimension_semantics=("parallel",)),
    )(*operands)


def _sa_fused_kernel(x_ref, *refs, num_layers, num_neighbours):
    """Fused SA SharedMLP + max-pool over neighbours (K-merged matmuls).

    x_ref block: (K, S_tile, Cin), neighbour-major.  The K neighbour slices are
    concatenated along rows so each MLP layer is ONE (K*S_tile, Cin)@(Cin, Cout)
    matmul; the pre-pool [K*S, C] activation never touches HBM.  The max-pool
    is done with static, 8-aligned row slices (no in-kernel reshapes)."""
    o_ref = refs[3 * num_layers]
    st = x_ref.shape[1]
    # Merge the neighbour axis into the matmul M dimension (sublane concat).
    y = jnp.concatenate([x_ref[kk] for kk in range(num_neighbours)], axis=0)
    for l in range(num_layers):
        w = refs[3 * l][...]
        sc = refs[3 * l + 1][...]
        sh = refs[3 * l + 2][...]
        z = jnp.dot(y, w, preferred_element_type=jnp.float32)
        z = jnp.maximum(z * sc + sh, 0.0)                 # BN fold + ReLU, f32
        y = z if l + 1 == num_layers else z.astype(COMPUTE_DTYPE)
    # Max-pool over the K neighbour groups (f32), then cast once.
    acc = y[0:st, :]
    for kk in range(1, num_neighbours):
        acc = jnp.maximum(acc, y[kk * st:(kk + 1) * st, :])
    o_ref[...] = acc.astype(o_ref.dtype)


def sa_mlp_max(x, layers, out_dtype=COMPUTE_DTYPE, centroid_target=128):
    """x: [K, M, Cin] (neighbour-major, M = B*num_centroids) -> [M, Cout_last]."""
    k, m, cin = x.shape
    st = _pick_tile(m, centroid_target)
    in_specs = [pl.BlockSpec((k, st, cin), lambda i: (0, i, 0))]
    operands = [x]
    for (w, sc, sh) in layers:
        in_specs.append(pl.BlockSpec(tuple(w.shape), lambda i: (0, 0)))
        in_specs.append(pl.BlockSpec(tuple(sc.shape), lambda i: (0, 0)))
        in_specs.append(pl.BlockSpec(tuple(sh.shape), lambda i: (0, 0)))
        operands += [w, sc, sh]
    cout = layers[-1][0].shape[1]
    return pl.pallas_call(
        functools.partial(_sa_fused_kernel, num_layers=len(layers), num_neighbours=k),
        out_shape=jax.ShapeDtypeStruct((m, cout), out_dtype),
        grid_spec=pltpu.PrefetchScalarGridSpec(
            num_scalar_prefetch=0,
            grid=(m // st,),
            in_specs=in_specs,
            out_specs=pl.BlockSpec((st, cout), lambda i: (i, 0)),
        ),
        compiler_params=pltpu.CompilerParams(dimension_semantics=("parallel",)),
    )(*operands)


def _final_seg_kernel(x_ref, *refs, n_fp, n_seg):
    """Last FP MLP + seg SharedMLP + conv_score/bn_score/sigmoid in one kernel.

    Emits two outputs: the f32 sparse_feature (last FP layer's activation) and
    the lane-dense (1, bm) score row.  Dropout is identity (eval mode)."""
    n_mm = n_fp + n_seg
    feat_ref = refs[3 * (n_mm + 1)]
    score_ref = refs[3 * (n_mm + 1) + 1]
    y = x_ref[...]                                        # (bm, Cin) bf16
    z = None
    for l in range(n_mm):
        w = refs[3 * l][...]
        sc = refs[3 * l + 1][...]
        sh = refs[3 * l + 2][...]
        z = jnp.maximum(jnp.dot(y, w, preferred_element_type=jnp.float32) * sc + sh, 0.0)
        if l == n_fp - 1:
            feat_ref[...] = z.astype(feat_ref.dtype)      # returned sparse_feature (f32)
        y = z.astype(COMPUTE_DTYPE)
    # Score head (Cout = 1): transpose the last activation and do a sublane
    # reduce against the weight column -> lane-dense (1, bm) output row (no
    # masked 1-lane stores, no degenerate 1-column MXU matmul).
    w_col = refs[3 * n_mm][...].astype(jnp.float32)       # (C_last, 1)
    sc = refs[3 * n_mm + 1][...]                          # (1, 1) f32
    sh = refs[3 * n_mm + 2][...]                          # (1, 1) f32
    zt = z.T                                              # (C_last, bm) f32
    s = jnp.sum(zt * w_col, axis=0, keepdims=True)        # (1, bm) f32
    s = s * sc + sh                                       # BN(eval) + bias fold
    # exact divide (not approx reciprocal) so the result is strictly in [0, 1]
    score_ref[...] = (1.0 / (1.0 + jnp.exp(-s))).astype(score_ref.dtype)


def final_fp_seg(x, fp_layers, seg_layers, score_layer, row_target=128):
    """x: [M, Cin] -> (sparse_feature [M, C_fp] f32, score [1, M] f32)."""
    m, cin = x.shape
    bm = _pick_tile(m, row_target)
    n_fp, n_seg = len(fp_layers), len(seg_layers)
    in_specs = [pl.BlockSpec((bm, cin), lambda i: (i, 0))]
    operands = [x]
    for (w, sc, sh) in list(fp_layers) + list(seg_layers) + [score_layer]:
        in_specs.append(pl.BlockSpec(tuple(w.shape), lambda i: (0, 0)))
        in_specs.append(pl.BlockSpec(tuple(sc.shape), lambda i: (0, 0)))
        in_specs.append(pl.BlockSpec(tuple(sh.shape), lambda i: (0, 0)))
        operands += [w, sc, sh]
    c_feat = fp_layers[-1][0].shape[1]
    feat, score = pl.pallas_call(
        functools.partial(_final_seg_kernel, n_fp=n_fp, n_seg=n_seg),
        out_shape=(jax.ShapeDtypeStruct((m, c_feat), jnp.float32),
                   jax.ShapeDtypeStruct((1, m), jnp.float32)),
        grid_spec=pltpu.PrefetchScalarGridSpec(
            num_scalar_prefetch=0,
            grid=(m // bm,),
            in_specs=in_specs,
            out_specs=[pl.BlockSpec((bm, c_feat), lambda i: (i, 0)),
                       pl.BlockSpec((1, bm), lambda i: (0, i))],
        ),
        compiler_params=pltpu.CompilerParams(dimension_semantics=("parallel",)),
    )(*operands)
    return feat, score


# ------------------------------- JAX glue ---------------------------------------
# TODO(synk): farthest point sampling, ball query / 3-NN selection and the
# data-dependent neighbour gathers stay in plain JAX (in-kernel dynamic gather
# via scalar-prefetched indices is the next step at real scale).
def _sq_dist(a, b):
    # a: [M, 3], b: [N, 3] -> [M, N] squared distances
    return (
        jnp.sum(a * a, axis=-1, keepdims=True)
        + jnp.sum(b * b, axis=-1)[None, :]
        - 2.0 * a @ b.T
    )


def farthest_point_sample(xyz, num_samples):
    # xyz: [N, 3] -> [num_samples] int32 indices (first centroid = index 0)
    n = xyz.shape[0]

    def body(i, carry):
        dists, idxs, last = carry
        d = jnp.sum((xyz - xyz[last]) ** 2, axis=-1)
        dists = jnp.minimum(dists, d)
        nxt = jnp.argmax(dists).astype(jnp.int32)
        idxs = idxs.at[i].set(nxt)
        return dists, idxs, nxt

    carry = (jnp.full((n,), 1e10, jnp.float32),
             jnp.zeros((num_samples,), jnp.int32),
             jnp.int32(0))
    _, idxs, _ = jax.lax.fori_loop(1, num_samples, body, carry)
    return idxs


def ball_query(xyz, centroids, radius, k):
    # xyz: [N, 3], centroids: [S, 3] -> [S, k] int32 indices.
    # First-k-in-index-order within the radius, via top_k selection (no full sort).
    n = xyz.shape[0]
    d2 = _sq_dist(centroids, xyz)                       # [S, N]
    mask = d2 < (radius * radius)
    pos = jnp.where(mask, jnp.arange(n, dtype=jnp.int32)[None, :], n)
    neg_vals, _ = jax.lax.top_k((-pos).astype(jnp.float32), k)
    pos_sorted = (-neg_vals).astype(jnp.int32)          # k smallest positions, ascending
    first = pos_sorted[:, :1]
    first = jnp.where(first >= n, 0, first)             # no neighbour -> index 0
    idx = jnp.where(pos_sorted >= n, first, pos_sorted)
    return idx.astype(jnp.int32)


def _gather_neighbours(arr, idx_t):
    # arr: (B, N, C), idx_t: (K, B, S) -> (K, B, S, C), neighbour-major gather
    return jax.vmap(lambda a, i: a[i], in_axes=(0, 1), out_axes=1)(arr, idx_t)


def sa_module(xyz, feature, layer_params, num_centroids, radius, k):
    """Set Abstraction: FPS -> ball query -> group (use_xyz) -> fused SharedMLP+max."""
    b = xyz.shape[0]
    fps_idx = jax.vmap(lambda p: farthest_point_sample(p, num_centroids))(xyz)  # [B,S]
    new_xyz = jax.vmap(lambda p, i: p[i])(xyz, fps_idx)                         # [B,S,3]
    nbr_idx = jax.vmap(lambda p, c: ball_query(p, c, radius, k))(xyz, new_xyz)  # [B,S,K]

    idx_t = jnp.transpose(nbr_idx, (2, 0, 1))                                   # (K,B,S)
    g_xyz = _gather_neighbours(xyz, idx_t) - new_xyz[None]                      # local coords
    g_feat = _gather_neighbours(feature, idx_t)                                 # (K,B,S,C)
    grouped = jnp.concatenate([g_xyz.astype(COMPUTE_DTYPE), g_feat], axis=-1)   # use_xyz=True
    x = grouped.reshape(k, b * num_centroids, -1)                               # (K, B*S, Cin)

    new_feat = sa_mlp_max(x, layer_params)                                      # (B*S, Cout)
    return new_xyz, new_feat.reshape(b, num_centroids, -1)


def fp_interp_concat(dense_xyz, sparse_xyz, dense_feature, sparse_feature, num_neighbors):
    """FP front-end: 3-NN inverse-distance interpolation + skip concat -> [B*Nd, Cin].

    TODO(synk): fuse the gather/interp/concat into the FP pallas_call (needs an
    in-kernel dynamic gather over a VMEM-resident sparse_feature)."""
    b, nd, _ = dense_xyz.shape
    d2 = jax.vmap(_sq_dist)(dense_xyz, sparse_xyz)                  # [B, Nd, Ns]
    neg_d, idx = jax.lax.top_k(-d2, num_neighbors)                  # 3 nearest
    dist = -neg_d
    w = 1.0 / jnp.maximum(dist, 1e-10)
    w = w / jnp.sum(w, axis=-1, keepdims=True)
    gathered = jax.vmap(lambda f, i: f[i])(sparse_feature, idx)     # [B, Nd, 3, C]
    interp = jnp.sum(gathered.astype(jnp.float32) * w[..., None], axis=2)
    new_feature = jnp.concatenate(
        [interp.astype(COMPUTE_DTYPE), dense_feature.astype(COMPUTE_DTYPE)], axis=-1)
    return new_feature.reshape(b * nd, -1)


# ------------------------------- parameters ------------------------------------
def make_layer_params(key, cin, cout):
    """Conv(1x1) weight + bias and BatchNorm(eval) gamma/beta, folded to scale/shift."""
    kw, kb, kg, kbt = jax.random.split(key, 4)
    w = jax.random.normal(kw, (cin, cout), jnp.float32) * (1.0 / np.sqrt(cin))
    bias = jax.random.normal(kb, (cout,), jnp.float32) * 0.01
    gamma = 1.0 + 0.1 * jax.random.normal(kg, (cout,), jnp.float32)
    beta = 0.1 * jax.random.normal(kbt, (cout,), jnp.float32)
    scale = gamma / jnp.sqrt(1.0 + BN_EPS)         # running_var = 1 (eval mode)
    shift = beta + scale * bias                    # running_mean = 0 (fold conv bias)
    return (w.astype(COMPUTE_DTYPE),
            scale.reshape(1, cout).astype(jnp.float32),
            shift.reshape(1, cout).astype(jnp.float32))


def build_params(key):
    keys = iter(jax.random.split(key, 64))
    params = {"sa": [], "fp": [], "seg": [], "score": None}

    feature_channels = INPUT_CHANN - 3
    for ind in range(len(NUM_CENTROIDS)):
        cin = feature_channels + 3                 # use_xyz=True
        layers = []
        for cout in SA_CHANNELS[ind]:
            layers.append(make_layer_params(next(keys), cin, cout))
            cin = cout
        params["sa"].append(layers)
        feature_channels = SA_CHANNELS[ind][-1]

    inter_channels = [INPUT_CHANN - 3] + [c[-1] for c in SA_CHANNELS]
    feature_channels = inter_channels[-1]
    for ind in range(len(FP_CHANNELS)):
        cin = feature_channels + inter_channels[-2 - ind]
        layers = []
        for cout in FP_CHANNELS[ind]:
            layers.append(make_layer_params(next(keys), cin, cout))
            cin = cout
        params["fp"].append(layers)
        feature_channels = FP_CHANNELS[ind][-1]

    cin = feature_channels
    for cout in SEG_CHANNELS:
        params["seg"].append(make_layer_params(next(keys), cin, cout))
        cin = cout
    params["score"] = make_layer_params(next(keys), cin, K_SCORE)
    return params


# --------------------------------- forward -------------------------------------
def pointnet2_seg_forward(points, params):
    """points: [B, 6, N] channels-first (PyTorch layout).

    Returns (sparse_feature [B, C_feat, N] channels-first, x_score [B, N])."""
    b, _, n = points.shape
    xyz = jnp.transpose(points[:, :3, :], (0, 2, 1)).astype(jnp.float32)         # [B, N, 3]
    feature = jnp.transpose(points[:, 3:6, :], (0, 2, 1)).astype(COMPUTE_DTYPE)  # [B, N, 3]

    inter_xyz = [xyz]
    inter_feature = [feature]
    for i, sa_p in enumerate(params["sa"]):
        xyz, feature = sa_module(xyz, feature, sa_p,
                                 NUM_CENTROIDS[i], RADIUS[i], NUM_NEIGHBOURS[i])
        inter_xyz.append(xyz)
        inter_feature.append(feature)

    sparse_xyz, sparse_feature = xyz, feature
    n_fp = len(params["fp"])
    x_score = None
    for i, fp_p in enumerate(params["fp"]):
        dense_xyz = inter_xyz[-2 - i]
        dense_feature = inter_feature[-2 - i]
        x = fp_interp_concat(dense_xyz, sparse_xyz, dense_feature,
                             sparse_feature, NUM_FP_NEIGHBOURS[i])
        if i < n_fp - 1:
            nd = dense_xyz.shape[1]
            sparse_feature = mlp_chain(x, fp_p).reshape(b, nd, -1)
        else:
            # Last FP MLP + seg SharedMLP + conv_score/bn_score/sigmoid fused in
            # ONE kernel with two outputs (dropout = identity in eval mode).
            feat_flat, score = final_fp_seg(x, fp_p, params["seg"], params["score"])
            sparse_feature = feat_flat.reshape(b, n, -1)
            x_score = score.reshape(b, n)
        sparse_xyz = dense_xyz

    sparse_feature_out = jnp.transpose(sparse_feature, (0, 2, 1))   # back to (B, C, N)
    return sparse_feature_out, x_score


# ----------------------------------- main ---------------------------------------
if __name__ == "__main__":
    key = jax.random.PRNGKey(0)
    kxyz, kfeat = jax.random.split(key)
    xyz_in = jax.random.uniform(kxyz, (B, 3, N), jnp.float32)          # points in unit cube
    feat_in = jax.random.normal(kfeat, (B, 3, N), jnp.float32) * 0.5
    points = jnp.concatenate([xyz_in, feat_in], axis=1)                # [B, 6, N]

    params = build_params(jax.random.PRNGKey(42))

    fwd = jax.jit(pointnet2_seg_forward)
    sparse_feature, x_score = fwd(points, params)
    jax.block_until_ready((sparse_feature, x_score))

    assert sparse_feature.shape == (B, FP_CHANNELS[-1][-1], N)
    assert x_score.shape == (B, N)
    assert bool(jnp.all(jnp.isfinite(sparse_feature)))
    assert bool(jnp.all((x_score >= 0.0) & (x_score <= 1.0)))
    print("KERNEL_OK")
</pallas_src>

<mosaic_0001>
module attributes {stable_mosaic.version = 11 : i64} {
  func.func @_sa_fused_kernel(%arg0: i32, %arg1: memref<8x128x6xbf16, #tpu.memory_space<vmem>>, %arg2: memref<6x32xbf16, #tpu.memory_space<vmem>>, %arg3: memref<1x32xf32, #tpu.memory_space<vmem>>, %arg4: memref<1x32xf32, #tpu.memory_space<vmem>>, %arg5: memref<32x32xbf16, #tpu.memory_space<vmem>>, %arg6: memref<1x32xf32, #tpu.memory_space<vmem>>, %arg7: memref<1x32xf32, #tpu.memory_space<vmem>>, %arg8: memref<32x64xbf16, #tpu.memory_space<vmem>>, %arg9: memref<1x64xf32, #tpu.memory_space<vmem>>, %arg10: memref<1x64xf32, #tpu.memory_space<vmem>>, %arg11: memref<128x64xbf16, #tpu.memory_space<vmem>>) attributes {dimension_semantics = [#tpu.dimension_semantics<parallel>], iteration_bounds = array<i64: 1>, scalar_prefetch = 0 : i64, scratch_operands = 0 : i64, tpu.core_type = #tpu.core_type<tc>, window_params = [{transform_indices = @transform_0, window_bounds = array<i64: 8, 128, 6>}, {pipeline_mode = #tpu.pipeline_mode<synchronous>, transform_indices = @transform_1, window_bounds = array<i64: 6, 32>}, {pipeline_mode = #tpu.pipeline_mode<synchronous>, transform_indices = @transform_2, window_bounds = array<i64: 1, 32>}, {pipeline_mode = #tpu.pipeline_mode<synchronous>, transform_indices = @transform_3, window_bounds = array<i64: 1, 32>}, {pipeline_mode = #tpu.pipeline_mode<synchronous>, transform_indices = @transform_4, window_bounds = array<i64: 32, 32>}, {pipeline_mode = #tpu.pipeline_mode<synchronous>, transform_indices = @transform_5, window_bounds = array<i64: 1, 32>}, {pipeline_mode = #tpu.pipeline_mode<synchronous>, transform_indices = @transform_6, window_bounds = array<i64: 1, 32>}, {pipeline_mode = #tpu.pipeline_mode<synchronous>, transform_indices = @transform_7, window_bounds = array<i64: 32, 64>}, {pipeline_mode = #tpu.pipeline_mode<synchronous>, transform_indices = @transform_8, window_bounds = array<i64: 1, 64>}, {pipeline_mode = #tpu.pipeline_mode<synchronous>, transform_indices = @transform_9, window_bounds = array<i64: 1, 64>}, {transform_indices = @transform_10, window_bounds = array<i64: 128, 64>}]} {
    %c0 = arith.constant 0 : index
    %c0_0 = arith.constant 0 : index
    %c0_1 = arith.constant 0 : index
    %0 = vector.load %arg1[%c0, %c0_0, %c0_1] : memref<8x128x6xbf16, #tpu.memory_space<vmem>>, vector<1x128x6xbf16>
    %1 = vector.shape_cast %0 : vector<1x128x6xbf16> to vector<128x6xbf16>
    %c1 = arith.constant 1 : index
    %c0_2 = arith.constant 0 : index
    %c0_3 = arith.constant 0 : index
    %2 = vector.load %arg1[%c1, %c0_2, %c0_3] : memref<8x128x6xbf16, #tpu.memory_space<vmem>>, vector<1x128x6xbf16>
    %3 = vector.shape_cast %2 : vector<1x128x6xbf16> to vector<128x6xbf16>
    %c2 = arith.constant 2 : index
    %c0_4 = arith.constant 0 : index
    %c0_5 = arith.constant 0 : index
    %4 = vector.load %arg1[%c2, %c0_4, %c0_5] : memref<8x128x6xbf16, #tpu.memory_space<vmem>>, vector<1x128x6xbf16>
    %5 = vector.shape_cast %4 : vector<1x128x6xbf16> to vector<128x6xbf16>
    %c3 = arith.constant 3 : index
    %c0_6 = arith.constant 0 : index
    %c0_7 = arith.constant 0 : index
    %6 = vector.load %arg1[%c3, %c0_6, %c0_7] : memref<8x128x6xbf16, #tpu.memory_space<vmem>>, vector<1x128x6xbf16>
    %7 = vector.shape_cast %6 : vector<1x128x6xbf16> to vector<128x6xbf16>
    %c4 = arith.constant 4 : index
    %c0_8 = arith.constant 0 : index
    %c0_9 = arith.constant 0 : index
    %8 = vector.load %arg1[%c4, %c0_8, %c0_9] : memref<8x128x6xbf16, #tpu.memory_space<vmem>>, vector<1x128x6xbf16>
    %9 = vector.shape_cast %8 : vector<1x128x6xbf16> to vector<128x6xbf16>
    %c5 = arith.constant 5 : index
    %c0_10 = arith.constant 0 : index
    %c0_11 = arith.constant 0 : index
    %10 = vector.load %arg1[%c5, %c0_10, %c0_11] : memref<8x128x6xbf16, #tpu.memory_space<vmem>>, vector<1x128x6xbf16>
    %11 = vector.shape_cast %10 : vector<1x128x6xbf16> to vector<128x6xbf16>
    %c6 = arith.constant 6 : index
    %c0_12 = arith.constant 0 : index
    %c0_13 = arith.constant 0 : index
    %12 = vector.load %arg1[%c6, %c0_12, %c0_13] : memref<8x128x6xbf16, #tpu.memory_space<vmem>>, vector<1x128x6xbf16>
    %13 = vector.shape_cast %12 : vector<1x128x6xbf16> to vector<128x6xbf16>
    %c7 = arith.constant 7 : index
    %c0_14 = arith.constant 0 : index
    %c0_15 = arith.constant 0 : index
    %14 = vector.load %arg1[%c7, %c0_14, %c0_15] : memref<8x128x6xbf16, #tpu.memory_space<vmem>>, vector<1x128x6xbf16>
    %15 = vector.shape_cast %14 : vector<1x128x6xbf16> to vector<128x6xbf16>
    %16 = tpu.concatenate %1, %3, %5, %7, %9, %11, %13, %15 in 0 : vector<128x6xbf16>, vector<128x6xbf16>, vector<128x6xbf16>, vector<128x6xbf16>, vector<128x6xbf16>, vector<128x6xbf16>, vector<128x6xbf16>, vector<128x6xbf16> -> vector<1024x6xbf16>
    %c0_16 = arith.constant 0 : index
    %c0_17 = arith.constant 0 : index
    %17 = vector.load %arg2[%c0_16, %c0_17] : memref<6x32xbf16, #tpu.memory_space<vmem>>, vector<6x32xbf16>
    %c0_18 = arith.constant 0 : index
    %c0_19 = arith.constant 0 : index
    %18 = vector.load %arg3[%c0_18, %c0_19] : memref<1x32xf32, #tpu.memory_space<vmem>>, vector<1x32xf32>
    %c0_20 = arith.constant 0 : index
    %c0_21 = arith.constant 0 : index
    %19 = vector.load %arg4[%c0_20, %c0_21] : memref<1x32xf32, #tpu.memory_space<vmem>>, vector<1x32xf32>
    %cst = arith.constant dense<0.000000e+00> : vector<1024x32xf32>
    %20 = tpu.matmul %16, %17, %cst {dimension_numbers = #tpu.dot_dimension_numbers<[1], [0], [0], [1], [0, 0, 1, 1], [], []>} : vector<1024x6xbf16>, vector<6x32xbf16>, vector<1024x32xf32> -> vector<1024x32xf32>
    %21 = vector.broadcast %18 : vector<1x32xf32> to vector<1024x32xf32>
    %22 = arith.mulf %20, %21 : vector<1024x32xf32>
    %23 = vector.broadcast %19 : vector<1x32xf32> to vector<1024x32xf32>
    %24 = arith.addf %22, %23 : vector<1024x32xf32>
    %cst_22 = arith.constant 0.000000e+00 : f32
    %25 = vector.broadcast %cst_22 : f32 to vector<1024x32xf32>
    %26 = arith.maximumf %24, %25 : vector<1024x32xf32>
    %27 = arith.truncf %26 : vector<1024x32xf32> to vector<1024x32xbf16>
    %c0_23 = arith.constant 0 : index
    %c0_24 = arith.constant 0 : index
    %28 = vector.load %arg5[%c0_23, %c0_24] : memref<32x32xbf16, #tpu.memory_space<vmem>>, vector<32x32xbf16>
    %c0_25 = arith.constant 0 : index
    %c0_26 = arith.constant 0 : index
    %29 = vector.load %arg6[%c0_25, %c0_26] : memref<1x32xf32, #tpu.memory_space<vmem>>, vector<1x32xf32>
    %c0_27 = arith.constant 0 : index
    %c0_28 = arith.constant 0 : index
    %30 = vector.load %arg7[%c0_27, %c0_28] : memref<1x32xf32, #tpu.memory_space<vmem>>, vector<1x32xf32>
    %cst_29 = arith.constant dense<0.000000e+00> : vector<1024x32xf32>
    %31 = tpu.matmul %27, %28, %cst_29 {dimension_numbers = #tpu.dot_dimension_numbers<[1], [0], [0], [1], [0, 0, 1, 1], [], []>} : vector<1024x32xbf16>, vector<32x32xbf16>, vector<1024x32xf32> -> vector<1024x32xf32>
    %32 = vector.broadcast %29 : vector<1x32xf32> to vector<1024x32xf32>
    %33 = arith.mulf %31, %32 : vector<1024x32xf32>
    %34 = vector.broadcast %30 : vector<1x32xf32> to vector<1024x32xf32>
    %35 = arith.addf %33, %34 : vector<1024x32xf32>
    %cst_30 = arith.constant 0.000000e+00 : f32
    %36 = vector.broadcast %cst_30 : f32 to vector<1024x32xf32>
    %37 = arith.maximumf %35, %36 : vector<1024x32xf32>
    %38 = arith.truncf %37 : vector<1024x32xf32> to vector<1024x32xbf16>
    %c0_31 = arith.constant 0 : index
    %c0_32 = arith.constant 0 : index
    %39 = vector.load %arg8[%c0_31, %c0_32] : memref<32x64xbf16, #tpu.memory_space<vmem>>, vector<32x64xbf16>
    %c0_33 = arith.constant 0 : index
    %c0_34 = arith.constant 0 : index
    %40 = vector.load %arg9[%c0_33, %c0_34] : memref<1x64xf32, #tpu.memory_space<vmem>>, vector<1x64xf32>
    %c0_35 = arith.constant 0 : index
    %c0_36 = arith.constant 0 : index
    %41 = vector.load %arg10[%c0_35, %c0_36] : memref<1x64xf32, #tpu.memory_space<vmem>>, vector<1x64xf32>
    %cst_37 = arith.constant dense<0.000000e+00> : vector<1024x64xf32>
    %42 = tpu.matmul %38, %39, %cst_37 {dimension_numbers = #tpu.dot_dimension_numbers<[1], [0], [0], [1], [0, 0, 1, 1], [], []>} : vector<1024x32xbf16>, vector<32x64xbf16>, vector<1024x64xf32> -> vector<1024x64xf32>
    %43 = vector.broadcast %40 : vector<1x64xf32> to vector<1024x64xf32>
    %44 = arith.mulf %42, %43 : vector<1024x64xf32>
    %45 = vector.broadcast %41 : vector<1x64xf32> to vector<1024x64xf32>
    %46 = arith.addf %44, %45 : vector<1024x64xf32>
    %cst_38 = arith.constant 0.000000e+00 : f32
    %47 = vector.broadcast %cst_38 : f32 to vector<1024x64xf32>
    %48 = arith.maximumf %46, %47 : vector<1024x64xf32>
    %49 = vector.extract_strided_slice %48 {offsets = [0, 0], sizes = [128, 64], strides = [1, 1]} : vector<1024x64xf32> to vector<128x64xf32>
    %50 = vector.extract_strided_slice %48 {offsets = [128, 0], sizes = [128, 64], strides = [1, 1]} : vector<1024x64xf32> to vector<128x64xf32>
    %51 = arith.maximumf %49, %50 : vector<128x64xf32>
    %52 = vector.extract_strided_slice %48 {offsets = [256, 0], sizes = [128, 64], strides = [1, 1]} : vector<1024x64xf32> to vector<128x64xf32>
    %53 = arith.maximumf %51, %52 : vector<128x64xf32>
    %54 = vector.extract_strided_slice %48 {offsets = [384, 0], sizes = [128, 64], strides = [1, 1]} : vector<1024x64xf32> to vector<128x64xf32>
    %55 = arith.maximumf %53, %54 : vector<128x64xf32>
    %56 = vector.extract_strided_slice %48 {offsets = [512, 0], sizes = [128, 64], strides = [1, 1]} : vector<1024x64xf32> to vector<128x64xf32>
    %57 = arith.maximumf %55, %56 : vector<128x64xf32>
    %58 = vector.extract_strided_slice %48 {offsets = [640, 0], sizes = [128, 64], strides = [1, 1]} : vector<1024x64xf32> to vector<128x64xf32>
    %59 = arith.maximumf %57, %58 : vector<128x64xf32>
    %60 = vector.extract_strided_slice %48 {offsets = [768, 0], sizes = [128, 64], strides = [1, 1]} : vector<1024x64xf32> to vector<128x64xf32>
    %61 = arith.maximumf %59, %60 : vector<128x64xf32>
    %62 = vector.extract_strided_slice %48 {offsets = [896, 0], sizes = [128, 64], strides = [1, 1]} : vector<1024x64xf32> to vector<128x64xf32>
    %63 = arith.maximumf %61, %62 : vector<128x64xf32>
    %64 = arith.truncf %63 : vector<128x64xf32> to vector<128x64xbf16>
    %c0_39 = arith.constant 0 : index
    %c0_40 = arith.constant 0 : index
    %65 = vector.load %arg11[%c0_39, %c0_40] : memref<128x64xbf16, #tpu.memory_space<vmem>>, vector<128x64xbf16>
    tpu.vector_store %arg11[%c0_39, %c0_40], %64 {strides = array<i32>} : memref<128x64xbf16, #tpu.memory_space<vmem>>, vector<128x64xbf16>,
    return
  }
  func.func @transform_0(%arg0: i32) -> (i32, i32, i32) {
    %c0_i32 = arith.constant 0 : i32
    %c0_i32_0 = arith.constant 0 : i32
    %c0_i32_1 = arith.constant 0 : i32
    return %c0_i32, %arg0, %c0_i32_0 : i32, i32, i32
  }
  func.func @transform_1(%arg0: i32) -> (i32, i32) {
    %c0_i32 = arith.constant 0 : i32
    %c0_i32_0 = arith.constant 0 : i32
    %c0_i32_1 = arith.constant 0 : i32
    return %c0_i32, %c0_i32_0 : i32, i32
  }
  func.func @transform_2(%arg0: i32) -> (i32, i32) {
    %c0_i32 = arith.constant 0 : i32
    %c0_i32_0 = arith.constant 0 : i32
    %c0_i32_1 = arith.constant 0 : i32
    return %c0_i32, %c0_i32_0 : i32, i32
  }
  func.func @transform_3(%arg0: i32) -> (i32, i32) {
    %c0_i32 = arith.constant 0 : i32
    %c0_i32_0 = arith.constant 0 : i32
    %c0_i32_1 = arith.constant 0 : i32
    return %c0_i32, %c0_i32_0 : i32, i32
  }
  func.func @transform_4(%arg0: i32) -> (i32, i32) {
    %c0_i32 = arith.constant 0 : i32
    %c0_i32_0 = arith.constant 0 : i32
    %c0_i32_1 = arith.constant 0 : i32
    return %c0_i32, %c0_i32_0 : i32, i32
  }
  func.func @transform_5(%arg0: i32) -> (i32, i32) {
    %c0_i32 = arith.constant 0 : i32
    %c0_i32_0 = arith.constant 0 : i32
    %c0_i32_1 = arith.constant 0 : i32
    return %c0_i32, %c0_i32_0 : i32, i32
  }
  func.func @transform_6(%arg0: i32) -> (i32, i32) {
    %c0_i32 = arith.constant 0 : i32
    %c0_i32_0 = arith.constant 0 : i32
    %c0_i32_1 = arith.constant 0 : i32
    return %c0_i32, %c0_i32_0 : i32, i32
  }
  func.func @transform_7(%arg0: i32) -> (i32, i32) {
    %c0_i32 = arith.constant 0 : i32
    %c0_i32_0 = arith.constant 0 : i32
    %c0_i32_1 = arith.constant 0 : i32
    return %c0_i32, %c0_i32_0 : i32, i32
  }
  func.func @transform_8(%arg0: i32) -> (i32, i32) {
    %c0_i32 = arith.constant 0 : i32
    %c0_i32_0 = arith.constant 0 : i32
    %c0_i32_1 = arith.constant 0 : i32
    return %c0_i32, %c0_i32_0 : i32, i32
  }
  func.func @transform_9(%arg0: i32) -> (i32, i32) {
    %c0_i32 = arith.constant 0 : i32
    %c0_i32_0 = arith.constant 0 : i32
    %c0_i32_1 = arith.constant 0 : i32
    return %c0_i32, %c0_i32_0 : i32, i32
  }
  func.func @transform_10(%arg0: i32) -> (i32, i32) {
    %c0_i32 = arith.constant 0 : i32
    %c0_i32_0 = arith.constant 0 : i32
    return %arg0, %c0_i32 : i32, i32
  }
}

module attributes {stable_mosaic.version = 11 : i64} {
  func.func @_sa_fused_kernel(%arg0: i32, %arg1: memref<8x64x67xbf16, #tpu.memory_space<vmem>>, %arg2: memref<67x64xbf16, #tpu.memory_space<vmem>>, %arg3: memref<1x64xf32, #tpu.memory_space<vmem>>, %arg4: memref<1x64xf32, #tpu.memory_space<vmem>>, %arg5: memref<64x64xbf16, #tpu.memory_space<vmem>>, %arg6: memref<1x64xf32, #tpu.memory_space<vmem>>, %arg7: memref<1x64xf32, #tpu.memory_space<vmem>>, %arg8: memref<64x128xbf16, #tpu.memory_space<vmem>>, %arg9: memref<1x128xf32, #tpu.memory_space<vmem>>, %arg10: memref<1x128xf32, #tpu.memory_space<vmem>>, %arg11: memref<64x128xbf16, #tpu.memory_space<vmem>>) attributes {dimension_semantics = [#tpu.dimension_semantics<parallel>], iteration_bounds = array<i64: 1>, scalar_prefetch = 0 : i64, scratch_operands = 0 : i64, tpu.core_type = #tpu.core_type<tc>, window_params = [{transform_indices = @transform_0, window_bounds = array<i64: 8, 64, 67>}, {pipeline_mode = #tpu.pipeline_mode<synchronous>, transform_indices = @transform_1, window_bounds = array<i64: 67, 64>}, {pipeline_mode = #tpu.pipeline_mode<synchronous>, transform_indices = @transform_2, window_bounds = array<i64: 1, 64>}, {pipeline_mode = #tpu.pipeline_mode<synchronous>, transform_indices = @transform_3, window_bounds = array<i64: 1, 64>}, {pipeline_mode = #tpu.pipeline_mode<synchronous>, transform_indices = @transform_4, window_bounds = array<i64: 64, 64>}, {pipeline_mode = #tpu.pipeline_mode<synchronous>, transform_indices = @transform_5, window_bounds = array<i64: 1, 64>}, {pipeline_mode = #tpu.pipeline_mode<synchronous>, transform_indices = @transform_6, window_bounds = array<i64: 1, 64>}, {pipeline_mode = #tpu.pipeline_mode<synchronous>, transform_indices = @transform_7, window_bounds = array<i64: 64, 128>}, {pipeline_mode = #tpu.pipeline_mode<synchronous>, transform_indices = @transform_8, window_bounds = array<i64: 1, 128>}, {pipeline_mode = #tpu.pipeline_mode<synchronous>, transform_indices = @transform_9, window_bounds = array<i64: 1, 128>}, {transform_indices = @transform_10, window_bounds = array<i64: 64, 128>}]} {
    %c0 = arith.constant 0 : index
    %c0_0 = arith.constant 0 : index
    %c0_1 = arith.constant 0 : index
    %0 = vector.load %arg1[%c0, %c0_0, %c0_1] : memref<8x64x67xbf16, #tpu.memory_space<vmem>>, vector<1x64x67xbf16>
    %1 = vector.shape_cast %0 : vector<1x64x67xbf16> to vector<64x67xbf16>
    %c1 = arith.constant 1 : index
    %c0_2 = arith.constant 0 : index
    %c0_3 = arith.constant 0 : index
    %2 = vector.load %arg1[%c1, %c0_2, %c0_3] : memref<8x64x67xbf16, #tpu.memory_space<vmem>>, vector<1x64x67xbf16>
    %3 = vector.shape_cast %2 : vector<1x64x67xbf16> to vector<64x67xbf16>
    %c2 = arith.constant 2 : index
    %c0_4 = arith.constant 0 : index
    %c0_5 = arith.constant 0 : index
    %4 = vector.load %arg1[%c2, %c0_4, %c0_5] : memref<8x64x67xbf16, #tpu.memory_space<vmem>>, vector<1x64x67xbf16>
    %5 = vector.shape_cast %4 : vector<1x64x67xbf16> to vector<64x67xbf16>
    %c3 = arith.constant 3 : index
    %c0_6 = arith.constant 0 : index
    %c0_7 = arith.constant 0 : index
    %6 = vector.load %arg1[%c3, %c0_6, %c0_7] : memref<8x64x67xbf16, #tpu.memory_space<vmem>>, vector<1x64x67xbf16>
    %7 = vector.shape_cast %6 : vector<1x64x67xbf16> to vector<64x67xbf16>
    %c4 = arith.constant 4 : index
    %c0_8 = arith.constant 0 : index
    %c0_9 = arith.constant 0 : index
    %8 = vector.load %arg1[%c4, %c0_8, %c0_9] : memref<8x64x67xbf16, #tpu.memory_space<vmem>>, vector<1x64x67xbf16>
    %9 = vector.shape_cast %8 : vector<1x64x67xbf16> to vector<64x67xbf16>
    %c5 = arith.constant 5 : index
    %c0_10 = arith.constant 0 : index
    %c0_11 = arith.constant 0 : index
    %10 = vector.load %arg1[%c5, %c0_10, %c0_11] : memref<8x64x67xbf16, #tpu.memory_space<vmem>>, vector<1x64x67xbf16>
    %11 = vector.shape_cast %10 : vector<1x64x67xbf16> to vector<64x67xbf16>
    %c6 = arith.constant 6 : index
    %c0_12 = arith.constant 0 : index
    %c0_13 = arith.constant 0 : index
    %12 = vector.load %arg1[%c6, %c0_12, %c0_13] : memref<8x64x67xbf16, #tpu.memory_space<vmem>>, vector<1x64x67xbf16>
    %13 = vector.shape_cast %12 : vector<1x64x67xbf16> to vector<64x67xbf16>
    %c7 = arith.constant 7 : index
    %c0_14 = arith.constant 0 : index
    %c0_15 = arith.constant 0 : index
    %14 = vector.load %arg1[%c7, %c0_14, %c0_15] : memref<8x64x67xbf16, #tpu.memory_space<vmem>>, vector<1x64x67xbf16>
    %15 = vector.shape_cast %14 : vector<1x64x67xbf16> to vector<64x67xbf16>
    %16 = tpu.concatenate %1, %3, %5, %7, %9, %11, %13, %15 in 0 : vector<64x67xbf16>, vector<64x67xbf16>, vector<64x67xbf16>, vector<64x67xbf16>, vector<64x67xbf16>, vector<64x67xbf16>, vector<64x67xbf16>, vector<64x67xbf16> -> vector<512x67xbf16>
    %c0_16 = arith.constant 0 : index
    %c0_17 = arith.constant 0 : index
    %17 = vector.load %arg2[%c0_16, %c0_17] : memref<67x64xbf16, #tpu.memory_space<vmem>>, vector<67x64xbf16>
    %c0_18 = arith.constant 0 : index
    %c0_19 = arith.constant 0 : index
    %18 = vector.load %arg3[%c0_18, %c0_19] : memref<1x64xf32, #tpu.memory_space<vmem>>, vector<1x64xf32>
    %c0_20 = arith.constant 0 : index
    %c0_21 = arith.constant 0 : index
    %19 = vector.load %arg4[%c0_20, %c0_21] : memref<1x64xf32, #tpu.memory_space<vmem>>, vector<1x64xf32>
    %cst = arith.constant dense<0.000000e+00> : vector<512x64xf32>
    %20 = tpu.matmul %16, %17, %cst {dimension_numbers = #tpu.dot_dimension_numbers<[1], [0], [0], [1], [0, 0, 1, 1], [], []>} : vector<512x67xbf16>, vector<67x64xbf16>, vector<512x64xf32> -> vector<512x64xf32>
    %21 = vector.broadcast %18 : vector<1x64xf32> to vector<512x64xf32>
    %22 = arith.mulf %20, %21 : vector<512x64xf32>
    %23 = vector.broadcast %19 : vector<1x64xf32> to vector<512x64xf32>
    %24 = arith.addf %22, %23 : vector<512x64xf32>
    %cst_22 = arith.constant 0.000000e+00 : f32
    %25 = vector.broadcast %cst_22 : f32 to vector<512x64xf32>
    %26 = arith.maximumf %24, %25 : vector<512x64xf32>
    %27 = arith.truncf %26 : vector<512x64xf32> to vector<512x64xbf16>
    %c0_23 = arith.constant 0 : index
    %c0_24 = arith.constant 0 : index
    %28 = vector.load %arg5[%c0_23, %c0_24] : memref<64x64xbf16, #tpu.memory_space<vmem>>, vector<64x64xbf16>
    %c0_25 = arith.constant 0 : index
    %c0_26 = arith.constant 0 : index
    %29 = vector.load %arg6[%c0_25, %c0_26] : memref<1x64xf32, #tpu.memory_space<vmem>>, vector<1x64xf32>
    %c0_27 = arith.constant 0 : index
    %c0_28 = arith.constant 0 : index
    %30 = vector.load %arg7[%c0_27, %c0_28] : memref<1x64xf32, #tpu.memory_space<vmem>>, vector<1x64xf32>
    %cst_29 = arith.constant dense<0.000000e+00> : vector<512x64xf32>
    %31 = tpu.matmul %27, %28, %cst_29 {dimension_numbers = #tpu.dot_dimension_numbers<[1], [0], [0], [1], [0, 0, 1, 1], [], []>} : vector<512x64xbf16>, vector<64x64xbf16>, vector<512x64xf32> -> vector<512x64xf32>
    %32 = vector.broadcast %29 : vector<1x64xf32> to vector<512x64xf32>
    %33 = arith.mulf %31, %32 : vector<512x64xf32>
    %34 = vector.broadcast %30 : vector<1x64xf32> to vector<512x64xf32>
    %35 = arith.addf %33, %34 : vector<512x64xf32>
    %cst_30 = arith.constant 0.000000e+00 : f32
    %36 = vector.broadcast %cst_30 : f32 to vector<512x64xf32>
    %37 = arith.maximumf %35, %36 : vector<512x64xf32>
    %38 = arith.truncf %37 : vector<512x64xf32> to vector<512x64xbf16>
    %c0_31 = arith.constant 0 : index
    %c0_32 = arith.constant 0 : index
    %39 = vector.load %arg8[%c0_31, %c0_32] : memref<64x128xbf16, #tpu.memory_space<vmem>>, vector<64x128xbf16>
    %c0_33 = arith.constant 0 : index
    %c0_34 = arith.constant 0 : index
    %40 = vector.load %arg9[%c0_33, %c0_34] : memref<1x128xf32, #tpu.memory_space<vmem>>, vector<1x128xf32>
    %c0_35 = arith.constant 0 : index
    %c0_36 = arith.constant 0 : index
    %41 = vector.load %arg10[%c0_35, %c0_36] : memref<1x128xf32, #tpu.memory_space<vmem>>, vector<1x128xf32>
    %cst_37 = arith.constant dense<0.000000e+00> : vector<512x128xf32>
    %42 = tpu.matmul %38, %39, %cst_37 {dimension_numbers = #tpu.dot_dimension_numbers<[1], [0], [0], [1], [0, 0, 1, 1], [], []>} : vector<512x64xbf16>, vector<64x128xbf16>, vector<512x128xf32> -> vector<512x128xf32>
    %43 = vector.broadcast %40 : vector<1x128xf32> to vector<512x128xf32>
    %44 = arith.mulf %42, %43 : vector<512x128xf32>
    %45 = vector.broadcast %41 : vector<1x128xf32> to vector<512x128xf32>
    %46 = arith.addf %44, %45 : vector<512x128xf32>
    %cst_38 = arith.constant 0.000000e+00 : f32
    %47 = vector.broadcast %cst_38 : f32 to vector<512x128xf32>
    %48 = arith.maximumf %46, %47 : vector<512x128xf32>
    %49 = vector.extract_strided_slice %48 {offsets = [0, 0], sizes = [64, 128], strides = [1, 1]} : vector<512x128xf32> to vector<64x128xf32>
    %50 = vector.extract_strided_slice %48 {offsets = [64, 0], sizes = [64, 128], strides = [1, 1]} : vector<512x128xf32> to vector<64x128xf32>
    %51 = arith.maximumf %49, %50 : vector<64x128xf32>
    %52 = vector.extract_strided_slice %48 {offsets = [128, 0], sizes = [64, 128], strides = [1, 1]} : vector<512x128xf32> to vector<64x128xf32>
    %53 = arith.maximumf %51, %52 : vector<64x128xf32>
    %54 = vector.extract_strided_slice %48 {offsets = [192, 0], sizes = [64, 128], strides = [1, 1]} : vector<512x128xf32> to vector<64x128xf32>
    %55 = arith.maximumf %53, %54 : vector<64x128xf32>
    %56 = vector.extract_strided_slice %48 {offsets = [256, 0], sizes = [64, 128], strides = [1, 1]} : vector<512x128xf32> to vector<64x128xf32>
    %57 = arith.maximumf %55, %56 : vector<64x128xf32>
    %58 = vector.extract_strided_slice %48 {offsets = [320, 0], sizes = [64, 128], strides = [1, 1]} : vector<512x128xf32> to vector<64x128xf32>
    %59 = arith.maximumf %57, %58 : vector<64x128xf32>
    %60 = vector.extract_strided_slice %48 {offsets = [384, 0], sizes = [64, 128], strides = [1, 1]} : vector<512x128xf32> to vector<64x128xf32>
    %61 = arith.maximumf %59, %60 : vector<64x128xf32>
    %62 = vector.extract_strided_slice %48 {offsets = [448, 0], sizes = [64, 128], strides = [1, 1]} : vector<512x128xf32> to vector<64x128xf32>
    %63 = arith.maximumf %61, %62 : vector<64x128xf32>
    %64 = arith.truncf %63 : vector<64x128xf32> to vector<64x128xbf16>
    %c0_39 = arith.constant 0 : index
    %c0_40 = arith.constant 0 : index
    %65 = vector.load %arg11[%c0_39, %c0_40] : memref<64x128xbf16, #tpu.memory_space<vmem>>, vector<64x128xbf16>
    tpu.vector_store %arg11[%c0_39, %c0_40], %64 {strides = array<i32>} : memref<64x128xbf16, #tpu.memory_space<vmem>>, vector<64x128xbf16>,
    return
  }
  func.func @transform_0(%arg0: i32) -> (i32, i32, i32) {
    %c0_i32 = arith.constant 0 : i32
    %c0_i32_0 = arith.constant 0 : i32
    %c0_i32_1 = arith.constant 0 : i32
    return %c0_i32, %arg0, %c0_i32_0 : i32, i32, i32
  }
  func.func @transform_1(%arg0: i32) -> (i32, i32) {
    %c0_i32 = arith.constant 0 : i32
    %c0_i32_0 = arith.constant 0 : i32
    %c0_i32_1 = arith.constant 0 : i32
    return %c0_i32, %c0_i32_0 : i32, i32
  }
  func.func @transform_2(%arg0: i32) -> (i32, i32) {
    %c0_i32 = arith.constant 0 : i32
    %c0_i32_0 = arith.constant 0 : i32
    %c0_i32_1 = arith.constant 0 : i32
    return %c0_i32, %c0_i32_0 : i32, i32
  }
  func.func @transform_3(%arg0: i32) -> (i32, i32) {
    %c0_i32 = arith.constant 0 : i32
    %c0_i32_0 = arith.constant 0 : i32
    %c0_i32_1 = arith.constant 0 : i32
    return %c0_i32, %c0_i32_0 : i32, i32
  }
  func.func @transform_4(%arg0: i32) -> (i32, i32) {
    %c0_i32 = arith.constant 0 : i32
    %c0_i32_0 = arith.constant 0 : i32
    %c0_i32_1 = arith.constant 0 : i32
    return %c0_i32, %c0_i32_0 : i32, i32
  }
  func.func @transform_5(%arg0: i32) -> (i32, i32) {
    %c0_i32 = arith.constant 0 : i32
    %c0_i32_0 = arith.constant 0 : i32
    %c0_i32_1 = arith.constant 0 : i32
    return %c0_i32, %c0_i32_0 : i32, i32
  }
  func.func @transform_6(%arg0: i32) -> (i32, i32) {
    %c0_i32 = arith.constant 0 : i32
    %c0_i32_0 = arith.constant 0 : i32
    %c0_i32_1 = arith.constant 0 : i32
    return %c0_i32, %c0_i32_0 : i32, i32
  }
  func.func @transform_7(%arg0: i32) -> (i32, i32) {
    %c0_i32 = arith.constant 0 : i32
    %c0_i32_0 = arith.constant 0 : i32
    %c0_i32_1 = arith.constant 0 : i32
    return %c0_i32, %c0_i32_0 : i32, i32
  }
  func.func @transform_8(%arg0: i32) -> (i32, i32) {
    %c0_i32 = arith.constant 0 : i32
    %c0_i32_0 = arith.constant 0 : i32
    %c0_i32_1 = arith.constant 0 : i32
    return %c0_i32, %c0_i32_0 : i32, i32
  }
  func.func @transform_9(%arg0: i32) -> (i32, i32) {
    %c0_i32 = arith.constant 0 : i32
    %c0_i32_0 = arith.constant 0 : i32
    %c0_i32_1 = arith.constant 0 : i32
    return %c0_i32, %c0_i32_0 : i32, i32
  }
  func.func @transform_10(%arg0: i32) -> (i32, i32) {
    %c0_i32 = arith.constant 0 : i32
    %c0_i32_0 = arith.constant 0 : i32
    return %arg0, %c0_i32 : i32, i32
  }
}

module attributes {stable_mosaic.version = 11 : i64} {
  func.func @_sa_fused_kernel(%arg0: i32, %arg1: memref<8x32x131xbf16, #tpu.memory_space<vmem>>, %arg2: memref<131x128xbf16, #tpu.memory_space<vmem>>, %arg3: memref<1x128xf32, #tpu.memory_space<vmem>>, %arg4: memref<1x128xf32, #tpu.memory_space<vmem>>, %arg5: memref<128x128xbf16, #tpu.memory_space<vmem>>, %arg6: memref<1x128xf32, #tpu.memory_space<vmem>>, %arg7: memref<1x128xf32, #tpu.memory_space<vmem>>, %arg8: memref<128x256xbf16, #tpu.memory_space<vmem>>, %arg9: memref<1x256xf32, #tpu.memory_space<vmem>>, %arg10: memref<1x256xf32, #tpu.memory_space<vmem>>, %arg11: memref<32x256xbf16, #tpu.memory_space<vmem>>) attributes {dimension_semantics = [#tpu.dimension_semantics<parallel>], iteration_bounds = array<i64: 1>, scalar_prefetch = 0 : i64, scratch_operands = 0 : i64, tpu.core_type = #tpu.core_type<tc>, window_params = [{transform_indices = @transform_0, window_bounds = array<i64: 8, 32, 131>}, {pipeline_mode = #tpu.pipeline_mode<synchronous>, transform_indices = @transform_1, window_bounds = array<i64: 131, 128>}, {pipeline_mode = #tpu.pipeline_mode<synchronous>, transform_indices = @transform_2, window_bounds = array<i64: 1, 128>}, {pipeline_mode = #tpu.pipeline_mode<synchronous>, transform_indices = @transform_3, window_bounds = array<i64: 1, 128>}, {pipeline_mode = #tpu.pipeline_mode<synchronous>, transform_indices = @transform_4, window_bounds = array<i64: 128, 128>}, {pipeline_mode = #tpu.pipeline_mode<synchronous>, transform_indices = @transform_5, window_bounds = array<i64: 1, 128>}, {pipeline_mode = #tpu.pipeline_mode<synchronous>, transform_indices = @transform_6, window_bounds = array<i64: 1, 128>}, {pipeline_mode = #tpu.pipeline_mode<synchronous>, transform_indices = @transform_7, window_bounds = array<i64: 128, 256>}, {pipeline_mode = #tpu.pipeline_mode<synchronous>, transform_indices = @transform_8, window_bounds = array<i64: 1, 256>}, {pipeline_mode = #tpu.pipeline_mode<synchronous>, transform_indices = @transform_9, window_bounds = array<i64: 1, 256>}, {transform_indices = @transform_10, window_bounds = array<i64: 32, 256>}]} {
    %c0 = arith.constant 0 : index
    %c0_0 = arith.constant 0 : index
    %c0_1 = arith.constant 0 : index
    %0 = vector.load %arg1[%c0, %c0_0, %c0_1] : memref<8x32x131xbf16, #tpu.memory_space<vmem>>, vector<1x32x131xbf16>
    %1 = vector.shape_cast %0 : vector<1x32x131xbf16> to vector<32x131xbf16>
    %c1 = arith.constant 1 : index
    %c0_2 = arith.constant 0 : index
    %c0_3 = arith.constant 0 : index
    %2 = vector.load %arg1[%c1, %c0_2, %c0_3] : memref<8x32x131xbf16, #tpu.memory_space<vmem>>, vector<1x32x131xbf16>
    %3 = vector.shape_cast %2 : vector<1x32x131xbf16> to vector<32x131xbf16>
    %c2 = arith.constant 2 : index
    %c0_4 = arith.constant 0 : index
    %c0_5 = arith.constant 0 : index
    %4 = vector.load %arg1[%c2, %c0_4, %c0_5] : memref<8x32x131xbf16, #tpu.memory_space<vmem>>, vector<1x32x131xbf16>
    %5 = vector.shape_cast %4 : vector<1x32x131xbf16> to vector<32x131xbf16>
    %c3 = arith.constant 3 : index
    %c0_6 = arith.constant 0 : index
    %c0_7 = arith.constant 0 : index
    %6 = vector.load %arg1[%c3, %c0_6, %c0_7] : memref<8x32x131xbf16, #tpu.memory_space<vmem>>, vector<1x32x131xbf16>
    %7 = vector.shape_cast %6 : vector<1x32x131xbf16> to vector<32x131xbf16>
    %c4 = arith.constant 4 : index
    %c0_8 = arith.constant 0 : index
    %c0_9 = arith.constant 0 : index
    %8 = vector.load %arg1[%c4, %c0_8, %c0_9] : memref<8x32x131xbf16, #tpu.memory_space<vmem>>, vector<1x32x131xbf16>
    %9 = vector.shape_cast %8 : vector<1x32x131xbf16> to vector<32x131xbf16>
    %c5 = arith.constant 5 : index
    %c0_10 = arith.constant 0 : index
    %c0_11 = arith.constant 0 : index
    %10 = vector.load %arg1[%c5, %c0_10, %c0_11] : memref<8x32x131xbf16, #tpu.memory_space<vmem>>, vector<1x32x131xbf16>
    %11 = vector.shape_cast %10 : vector<1x32x131xbf16> to vector<32x131xbf16>
    %c6 = arith.constant 6 : index
    %c0_12 = arith.constant 0 : index
    %c0_13 = arith.constant 0 : index
    %12 = vector.load %arg1[%c6, %c0_12, %c0_13] : memref<8x32x131xbf16, #tpu.memory_space<vmem>>, vector<1x32x131xbf16>
    %13 = vector.shape_cast %12 : vector<1x32x131xbf16> to vector<32x131xbf16>
    %c7 = arith.constant 7 : index
    %c0_14 = arith.constant 0 : index
    %c0_15 = arith.constant 0 : index
    %14 = vector.load %arg1[%c7, %c0_14, %c0_15] : memref<8x32x131xbf16, #tpu.memory_space<vmem>>, vector<1x32x131xbf16>
    %15 = vector.shape_cast %14 : vector<1x32x131xbf16> to vector<32x131xbf16>
    %16 = tpu.concatenate %1, %3, %5, %7, %9, %11, %13, %15 in 0 : vector<32x131xbf16>, vector<32x131xbf16>, vector<32x131xbf16>, vector<32x131xbf16>, vector<32x131xbf16>, vector<32x131xbf16>, vector<32x131xbf16>, vector<32x131xbf16> -> vector<256x131xbf16>
    %c0_16 = arith.constant 0 : index
    %c0_17 = arith.constant 0 : index
    %17 = vector.load %arg2[%c0_16, %c0_17] : memref<131x128xbf16, #tpu.memory_space<vmem>>, vector<131x128xbf16>
    %c0_18 = arith.constant 0 : index
    %c0_19 = arith.constant 0 : index
    %18 = vector.load %arg3[%c0_18, %c0_19] : memref<1x128xf32, #tpu.memory_space<vmem>>, vector<1x128xf32>
    %c0_20 = arith.constant 0 : index
    %c0_21 = arith.constant 0 : index
    %19 = vector.load %arg4[%c0_20, %c0_21] : memref<1x128xf32, #tpu.memory_space<vmem>>, vector<1x128xf32>
    %cst = arith.constant dense<0.000000e+00> : vector<256x128xf32>
    %20 = tpu.matmul %16, %17, %cst {dimension_numbers = #tpu.dot_dimension_numbers<[1], [0], [0], [1], [0, 0, 1, 1], [], []>} : vector<256x131xbf16>, vector<131x128xbf16>, vector<256x128xf32> -> vector<256x128xf32>
    %21 = vector.broadcast %18 : vector<1x128xf32> to vector<256x128xf32>
    %22 = arith.mulf %20, %21 : vector<256x128xf32>
    %23 = vector.broadcast %19 : vector<1x128xf32> to vector<256x128xf32>
    %24 = arith.addf %22, %23 : vector<256x128xf32>
    %cst_22 = arith.constant 0.000000e+00 : f32
    %25 = vector.broadcast %cst_22 : f32 to vector<256x128xf32>
    %26 = arith.maximumf %24, %25 : vector<256x128xf32>
    %27 = arith.truncf %26 : vector<256x128xf32> to vector<256x128xbf16>
    %c0_23 = arith.constant 0 : index
    %c0_24 = arith.constant 0 : index
    %28 = vector.load %arg5[%c0_23, %c0_24] : memref<128x128xbf16, #tpu.memory_space<vmem>>, vector<128x128xbf16>
    %c0_25 = arith.constant 0 : index
    %c0_26 = arith.constant 0 : index
    %29 = vector.load %arg6[%c0_25, %c0_26] : memref<1x128xf32, #tpu.memory_space<vmem>>, vector<1x128xf32>
    %c0_27 = arith.constant 0 : index
    %c0_28 = arith.constant 0 : index
    %30 = vector.load %arg7[%c0_27, %c0_28] : memref<1x128xf32, #tpu.memory_space<vmem>>, vector<1x128xf32>
    %cst_29 = arith.constant dense<0.000000e+00> : vector<256x128xf32>
    %31 = tpu.matmul %27, %28, %cst_29 {dimension_numbers = #tpu.dot_dimension_numbers<[1], [0], [0], [1], [0, 0, 1, 1], [], []>} : vector<256x128xbf16>, vector<128x128xbf16>, vector<256x128xf32> -> vector<256x128xf32>
    %32 = vector.broadcast %29 : vector<1x128xf32> to vector<256x128xf32>
    %33 = arith.mulf %31, %32 : vector<256x128xf32>
    %34 = vector.broadcast %30 : vector<1x128xf32> to vector<256x128xf32>
    %35 = arith.addf %33, %34 : vector<256x128xf32>
    %cst_30 = arith.constant 0.000000e+00 : f32
    %36 = vector.broadcast %cst_30 : f32 to vector<256x128xf32>
    %37 = arith.maximumf %35, %36 : vector<256x128xf32>
    %38 = arith.truncf %37 : vector<256x128xf32> to vector<256x128xbf16>
    %c0_31 = arith.constant 0 : index
    %c0_32 = arith.constant 0 : index
    %39 = vector.load %arg8[%c0_31, %c0_32] : memref<128x256xbf16, #tpu.memory_space<vmem>>, vector<128x256xbf16>
    %c0_33 = arith.constant 0 : index
    %c0_34 = arith.constant 0 : index
    %40 = vector.load %arg9[%c0_33, %c0_34] : memref<1x256xf32, #tpu.memory_space<vmem>>, vector<1x256xf32>
    %c0_35 = arith.constant 0 : index
    %c0_36 = arith.constant 0 : index
    %41 = vector.load %arg10[%c0_35, %c0_36] : memref<1x256xf32, #tpu.memory_space<vmem>>, vector<1x256xf32>
    %cst_37 = arith.constant dense<0.000000e+00> : vector<256x256xf32>
    %42 = tpu.matmul %38, %39, %cst_37 {dimension_numbers = #tpu.dot_dimension_numbers<[1], [0], [0], [1], [0, 0, 1, 1], [], []>} : vector<256x128xbf16>, vector<128x256xbf16>, vector<256x256xf32> -> vector<256x256xf32>
    %43 = vector.broadcast %40 : vector<1x256xf32> to vector<256x256xf32>
    %44 = arith.mulf %42, %43 : vector<256x256xf32>
    %45 = vector.broadcast %41 : vector<1x256xf32> to vector<256x256xf32>
    %46 = arith.addf %44, %45 : vector<256x256xf32>
    %cst_38 = arith.constant 0.000000e+00 : f32
    %47 = vector.broadcast %cst_38 : f32 to vector<256x256xf32>
    %48 = arith.maximumf %46, %47 : vector<256x256xf32>
    %49 = vector.extract_strided_slice %48 {offsets = [0, 0], sizes = [32, 256], strides = [1, 1]} : vector<256x256xf32> to vector<32x256xf32>
    %50 = vector.extract_strided_slice %48 {offsets = [32, 0], sizes = [32, 256], strides = [1, 1]} : vector<256x256xf32> to vector<32x256xf32>
    %51 = arith.maximumf %49, %50 : vector<32x256xf32>
    %52 = vector.extract_strided_slice %48 {offsets = [64, 0], sizes = [32, 256], strides = [1, 1]} : vector<256x256xf32> to vector<32x256xf32>
    %53 = arith.maximumf %51, %52 : vector<32x256xf32>
    %54 = vector.extract_strided_slice %48 {offsets = [96, 0], sizes = [32, 256], strides = [1, 1]} : vector<256x256xf32> to vector<32x256xf32>
    %55 = arith.maximumf %53, %54 : vector<32x256xf32>
    %56 = vector.extract_strided_slice %48 {offsets = [128, 0], sizes = [32, 256], strides = [1, 1]} : vector<256x256xf32> to vector<32x256xf32>
    %57 = arith.maximumf %55, %56 : vector<32x256xf32>
    %58 = vector.extract_strided_slice %48 {offsets = [160, 0], sizes = [32, 256], strides = [1, 1]} : vector<256x256xf32> to vector<32x256xf32>
    %59 = arith.maximumf %57, %58 : vector<32x256xf32>
    %60 = vector.extract_strided_slice %48 {offsets = [192, 0], sizes = [32, 256], strides = [1, 1]} : vector<256x256xf32> to vector<32x256xf32>
    %61 = arith.maximumf %59, %60 : vector<32x256xf32>
    %62 = vector.extract_strided_slice %48 {offsets = [224, 0], sizes = [32, 256], strides = [1, 1]} : vector<256x256xf32> to vector<32x256xf32>
    %63 = arith.maximumf %61, %62 : vector<32x256xf32>
    %64 = arith.truncf %63 : vector<32x256xf32> to vector<32x256xbf16>
    %c0_39 = arith.constant 0 : index
    %c0_40 = arith.constant 0 : index
    %65 = vector.load %arg11[%c0_39, %c0_40] : memref<32x256xbf16, #tpu.memory_space<vmem>>, vector<32x256xbf16>
    tpu.vector_store %arg11[%c0_39, %c0_40], %64 {strides = array<i32>} : memref<32x256xbf16, #tpu.memory_space<vmem>>, vector<32x256xbf16>,
    return
  }
  func.func @transform_0(%arg0: i32) -> (i32, i32, i32) {
    %c0_i32 = arith.constant 0 : i32
    %c0_i32_0 = arith.constant 0 : i32
    %c0_i32_1 = arith.constant 0 : i32
    return %c0_i32, %arg0, %c0_i32_0 : i32, i32, i32
  }
  func.func @transform_1(%arg0: i32) -> (i32, i32) {
    %c0_i32 = arith.constant 0 : i32
    %c0_i32_0 = arith.constant 0 : i32
    %c0_i32_1 = arith.constant 0 : i32
    return %c0_i32, %c0_i32_0 : i32, i32
  }
  func.func @transform_2(%arg0: i32) -> (i32, i32) {
    %c0_i32 = arith.constant 0 : i32
    %c0_i32_0 = arith.constant 0 : i32
    %c0_i32_1 = arith.constant 0 : i32
    return %c0_i32, %c0_i32_0 : i32, i32
  }
  func.func @transform_3(%arg0: i32) -> (i32, i32) {
    %c0_i32 = arith.constant 0 : i32
    %c0_i32_0 = arith.constant 0 : i32
    %c0_i32_1 = arith.constant 0 : i32
    return %c0_i32, %c0_i32_0 : i32, i32
  }
  func.func @transform_4(%arg0: i32) -> (i32, i32) {
    %c0_i32 = arith.constant 0 : i32
    %c0_i32_0 = arith.constant 0 : i32
    %c0_i32_1 = arith.constant 0 : i32
    return %c0_i32, %c0_i32_0 : i32, i32
  }
  func.func @transform_5(%arg0: i32) -> (i32, i32) {
    %c0_i32 = arith.constant 0 : i32
    %c0_i32_0 = arith.constant 0 : i32
    %c0_i32_1 = arith.constant 0 : i32
    return %c0_i32, %c0_i32_0 : i32, i32
  }
  func.func @transform_6(%arg0: i32) -> (i32, i32) {
    %c0_i32 = arith.constant 0 : i32
    %c0_i32_0 = arith.constant 0 : i32
    %c0_i32_1 = arith.constant 0 : i32
    return %c0_i32, %c0_i32_0 : i32, i32
  }
  func.func @transform_7(%arg0: i32) -> (i32, i32) {
    %c0_i32 = arith.constant 0 : i32
    %c0_i32_0 = arith.constant 0 : i32
    %c0_i32_1 = arith.constant 0 : i32
    return %c0_i32, %c0_i32_0 : i32, i32
  }
  func.func @transform_8(%arg0: i32) -> (i32, i32) {
    %c0_i32 = arith.constant 0 : i32
    %c0_i32_0 = arith.constant 0 : i32
    %c0_i32_1 = arith.constant 0 : i32
    return %c0_i32, %c0_i32_0 : i32, i32
  }
  func.func @transform_9(%arg0: i32) -> (i32, i32) {
    %c0_i32 = arith.constant 0 : i32
    %c0_i32_0 = arith.constant 0 : i32
    %c0_i32_1 = arith.constant 0 : i32
    return %c0_i32, %c0_i32_0 : i32, i32
  }
  func.func @transform_10(%arg0: i32) -> (i32, i32) {
    %c0_i32 = arith.constant 0 : i32
    %c0_i32_0 = arith.constant 0 : i32
    return %arg0, %c0_i32 : i32, i32
  }
}

module attributes {stable_mosaic.version = 11 : i64} {
  func.func @_mlp_chain_kernel(%arg0: i32, %arg1: memref<64x384xbf16, #tpu.memory_space<vmem>>, %arg2: memref<384x256xbf16, #tpu.memory_space<vmem>>, %arg3: memref<1x256xf32, #tpu.memory_space<vmem>>, %arg4: memref<1x256xf32, #tpu.memory_space<vmem>>, %arg5: memref<256x256xbf16, #tpu.memory_space<vmem>>, %arg6: memref<1x256xf32, #tpu.memory_space<vmem>>, %arg7: memref<1x256xf32, #tpu.memory_space<vmem>>, %arg8: memref<64x256xbf16, #tpu.memory_space<vmem>>) attributes {dimension_semantics = [#tpu.dimension_semantics<parallel>], iteration_bounds = array<i64: 1>, scalar_prefetch = 0 : i64, scratch_operands = 0 : i64, tpu.core_type = #tpu.core_type<tc>, window_params = [{transform_indices = @transform_0, window_bounds = array<i64: 64, 384>}, {pipeline_mode = #tpu.pipeline_mode<synchronous>, transform_indices = @transform_1, window_bounds = array<i64: 384, 256>}, {pipeline_mode = #tpu.pipeline_mode<synchronous>, transform_indices = @transform_2, window_bounds = array<i64: 1, 256>}, {pipeline_mode = #tpu.pipeline_mode<synchronous>, transform_indices = @transform_3, window_bounds = array<i64: 1, 256>}, {pipeline_mode = #tpu.pipeline_mode<synchronous>, transform_indices = @transform_4, window_bounds = array<i64: 256, 256>}, {pipeline_mode = #tpu.pipeline_mode<synchronous>, transform_indices = @transform_5, window_bounds = array<i64: 1, 256>}, {pipeline_mode = #tpu.pipeline_mode<synchronous>, transform_indices = @transform_6, window_bounds = array<i64: 1, 256>}, {transform_indices = @transform_7, window_bounds = array<i64: 64, 256>}]} {
    %c0 = arith.constant 0 : index
    %c0_0 = arith.constant 0 : index
    %0 = vector.load %arg1[%c0, %c0_0] : memref<64x384xbf16, #tpu.memory_space<vmem>>, vector<64x384xbf16>
    %c0_1 = arith.constant 0 : index
    %c0_2 = arith.constant 0 : index
    %1 = vector.load %arg2[%c0_1, %c0_2] : memref<384x256xbf16, #tpu.memory_space<vmem>>, vector<384x256xbf16>
    %c0_3 = arith.constant 0 : index
    %c0_4 = arith.constant 0 : index
    %2 = vector.load %arg3[%c0_3, %c0_4] : memref<1x256xf32, #tpu.memory_space<vmem>>, vector<1x256xf32>
    %c0_5 = arith.constant 0 : index
    %c0_6 = arith.constant 0 : index
    %3 = vector.load %arg4[%c0_5, %c0_6] : memref<1x256xf32, #tpu.memory_space<vmem>>, vector<1x256xf32>
    %cst = arith.constant dense<0.000000e+00> : vector<64x256xf32>
    %4 = tpu.matmul %0, %1, %cst {dimension_numbers = #tpu.dot_dimension_numbers<[1], [0], [0], [1], [0, 0, 1, 1], [], []>} : vector<64x384xbf16>, vector<384x256xbf16>, vector<64x256xf32> -> vector<64x256xf32>
    %5 = vector.broadcast %2 : vector<1x256xf32> to vector<64x256xf32>
    %6 = arith.mulf %4, %5 : vector<64x256xf32>
    %7 = vector.broadcast %3 : vector<1x256xf32> to vector<64x256xf32>
    %8 = arith.addf %6, %7 : vector<64x256xf32>
    %cst_7 = arith.constant 0.000000e+00 : f32
    %9 = vector.broadcast %cst_7 : f32 to vector<64x256xf32>
    %10 = arith.maximumf %8, %9 : vector<64x256xf32>
    %11 = arith.truncf %10 : vector<64x256xf32> to vector<64x256xbf16>
    %c0_8 = arith.constant 0 : index
    %c0_9 = arith.constant 0 : index
    %12 = vector.load %arg5[%c0_8, %c0_9] : memref<256x256xbf16, #tpu.memory_space<vmem>>, vector<256x256xbf16>
    %c0_10 = arith.constant 0 : index
    %c0_11 = arith.constant 0 : index
    %13 = vector.load %arg6[%c0_10, %c0_11] : memref<1x256xf32, #tpu.memory_space<vmem>>, vector<1x256xf32>
    %c0_12 = arith.constant 0 : index
    %c0_13 = arith.constant 0 : index
    %14 = vector.load %arg7[%c0_12, %c0_13] : memref<1x256xf32, #tpu.memory_space<vmem>>, vector<1x256xf32>
    %cst_14 = arith.constant dense<0.000000e+00> : vector<64x256xf32>
    %15 = tpu.matmul %11, %12, %cst_14 {dimension_numbers = #tpu.dot_dimension_numbers<[1], [0], [0], [1], [0, 0, 1, 1], [], []>} : vector<64x256xbf16>, vector<256x256xbf16>, vector<64x256xf32> -> vector<64x256xf32>
    %16 = vector.broadcast %13 : vector<1x256xf32> to vector<64x256xf32>
    %17 = arith.mulf %15, %16 : vector<64x256xf32>
    %18 = vector.broadcast %14 : vector<1x256xf32> to vector<64x256xf32>
    %19 = arith.addf %17, %18 : vector<64x256xf32>
    %cst_15 = arith.constant 0.000000e+00 : f32
    %20 = vector.broadcast %cst_15 : f32 to vector<64x256xf32>
    %21 = arith.maximumf %19, %20 : vector<64x256xf32>
    %22 = arith.truncf %21 : vector<64x256xf32> to vector<64x256xbf16>
    %c0_16 = arith.constant 0 : index
    %c0_17 = arith.constant 0 : index
    %23 = vector.load %arg8[%c0_16, %c0_17] : memref<64x256xbf16, #tpu.memory_space<vmem>>, vector<64x256xbf16>
    tpu.vector_store %arg8[%c0_16, %c0_17], %22 {strides = array<i32>} : memref<64x256xbf16, #tpu.memory_space<vmem>>, vector<64x256xbf16>,
    return
  }
  func.func @transform_0(%arg0: i32) -> (i32, i32) {
    %c0_i32 = arith.constant 0 : i32
    %c0_i32_0 = arith.constant 0 : i32
    return %arg0, %c0_i32 : i32, i32
  }
  func.func @transform_1(%arg0: i32) -> (i32, i32) {
    %c0_i32 = arith.constant 0 : i32
    %c0_i32_0 = arith.constant 0 : i32
    %c0_i32_1 = arith.constant 0 : i32
    return %c0_i32, %c0_i32_0 : i32, i32
  }
  func.func @transform_2(%arg0: i32) -> (i32, i32) {
    %c0_i32 = arith.constant 0 : i32
    %c0_i32_0 = arith.constant 0 : i32
    %c0_i32_1 = arith.constant 0 : i32
    return %c0_i32, %c0_i32_0 : i32, i32
  }
  func.func @transform_3(%arg0: i32) -> (i32, i32) {
    %c0_i32 = arith.constant 0 : i32
    %c0_i32_0 = arith.constant 0 : i32
    %c0_i32_1 = arith.constant 0 : i32
    return %c0_i32, %c0_i32_0 : i32, i32
  }
  func.func @transform_4(%arg0: i32) -> (i32, i32) {
    %c0_i32 = arith.constant 0 : i32
    %c0_i32_0 = arith.constant 0 : i32
    %c0_i32_1 = arith.constant 0 : i32
    return %c0_i32, %c0_i32_0 : i32, i32
  }
  func.func @transform_5(%arg0: i32) -> (i32, i32) {
    %c0_i32 = arith.constant 0 : i32
    %c0_i32_0 = arith.constant 0 : i32
    %c0_i32_1 = arith.constant 0 : i32
    return %c0_i32, %c0_i32_0 : i32, i32
  }
  func.func @transform_6(%arg0: i32) -> (i32, i32) {
    %c0_i32 = arith.constant 0 : i32
    %c0_i32_0 = arith.constant 0 : i32
    %c0_i32_1 = arith.constant 0 : i32
    return %c0_i32, %c0_i32_0 : i32, i32
  }
  func.func @transform_7(%arg0: i32) -> (i32, i32) {
    %c0_i32 = arith.constant 0 : i32
    %c0_i32_0 = arith.constant 0 : i32
    return %arg0, %c0_i32 : i32, i32
  }
}

module attributes {stable_mosaic.version = 11 : i64} {
  func.func @_mlp_chain_kernel(%arg0: i32, %arg1: memref<128x320xbf16, #tpu.memory_space<vmem>>, %arg2: memref<320x128xbf16, #tpu.memory_space<vmem>>, %arg3: memref<1x128xf32, #tpu.memory_space<vmem>>, %arg4: memref<1x128xf32, #tpu.memory_space<vmem>>, %arg5: memref<128x128xbf16, #tpu.memory_space<vmem>>, %arg6: memref<1x128xf32, #tpu.memory_space<vmem>>, %arg7: memref<1x128xf32, #tpu.memory_space<vmem>>, %arg8: memref<128x128xbf16, #tpu.memory_space<vmem>>) attributes {dimension_semantics = [#tpu.dimension_semantics<parallel>], iteration_bounds = array<i64: 1>, scalar_prefetch = 0 : i64, scratch_operands = 0 : i64, tpu.core_type = #tpu.core_type<tc>, window_params = [{transform_indices = @transform_0, window_bounds = array<i64: 128, 320>}, {pipeline_mode = #tpu.pipeline_mode<synchronous>, transform_indices = @transform_1, window_bounds = array<i64: 320, 128>}, {pipeline_mode = #tpu.pipeline_mode<synchronous>, transform_indices = @transform_2, window_bounds = array<i64: 1, 128>}, {pipeline_mode = #tpu.pipeline_mode<synchronous>, transform_indices = @transform_3, window_bounds = array<i64: 1, 128>}, {pipeline_mode = #tpu.pipeline_mode<synchronous>, transform_indices = @transform_4, window_bounds = array<i64: 128, 128>}, {pipeline_mode = #tpu.pipeline_mode<synchronous>, transform_indices = @transform_5, window_bounds = array<i64: 1, 128>}, {pipeline_mode = #tpu.pipeline_mode<synchronous>, transform_indices = @transform_6, window_bounds = array<i64: 1, 128>}, {transform_indices = @transform_7, window_bounds = array<i64: 128, 128>}]} {
    %c0 = arith.constant 0 : index
    %c0_0 = arith.constant 0 : index
    %0 = vector.load %arg1[%c0, %c0_0] : memref<128x320xbf16, #tpu.memory_space<vmem>>, vector<128x320xbf16>
    %c0_1 = arith.constant 0 : index
    %c0_2 = arith.constant 0 : index
    %1 = vector.load %arg2[%c0_1, %c0_2] : memref<320x128xbf16, #tpu.memory_space<vmem>>, vector<320x128xbf16>
    %c0_3 = arith.constant 0 : index
    %c0_4 = arith.constant 0 : index
    %2 = vector.load %arg3[%c0_3, %c0_4] : memref<1x128xf32, #tpu.memory_space<vmem>>, vector<1x128xf32>
    %c0_5 = arith.constant 0 : index
    %c0_6 = arith.constant 0 : index
    %3 = vector.load %arg4[%c0_5, %c0_6] : memref<1x128xf32, #tpu.memory_space<vmem>>, vector<1x128xf32>
    %cst = arith.constant dense<0.000000e+00> : vector<128x128xf32>
    %4 = tpu.matmul %0, %1, %cst {dimension_numbers = #tpu.dot_dimension_numbers<[1], [0], [0], [1], [0, 0, 1, 1], [], []>} : vector<128x320xbf16>, vector<320x128xbf16>, vector<128x128xf32> -> vector<128x128xf32>
    %5 = vector.broadcast %2 : vector<1x128xf32> to vector<128x128xf32>
    %6 = arith.mulf %4, %5 : vector<128x128xf32>
    %7 = vector.broadcast %3 : vector<1x128xf32> to vector<128x128xf32>
    %8 = arith.addf %6, %7 : vector<128x128xf32>
    %cst_7 = arith.constant 0.000000e+00 : f32
    %9 = vector.broadcast %cst_7 : f32 to vector<128x128xf32>
    %10 = arith.maximumf %8, %9 : vector<128x128xf32>
    %11 = arith.truncf %10 : vector<128x128xf32> to vector<128x128xbf16>
    %c0_8 = arith.constant 0 : index
    %c0_9 = arith.constant 0 : index
    %12 = vector.load %arg5[%c0_8, %c0_9] : memref<128x128xbf16, #tpu.memory_space<vmem>>, vector<128x128xbf16>
    %c0_10 = arith.constant 0 : index
    %c0_11 = arith.constant 0 : index
    %13 = vector.load %arg6[%c0_10, %c0_11] : memref<1x128xf32, #tpu.memory_space<vmem>>, vector<1x128xf32>
    %c0_12 = arith.constant 0 : index
    %c0_13 = arith.constant 0 : index
    %14 = vector.load %arg7[%c0_12, %c0_13] : memref<1x128xf32, #tpu.memory_space<vmem>>, vector<1x128xf32>
    %cst_14 = arith.constant dense<0.000000e+00> : vector<128x128xf32>
    %15 = tpu.matmul %11, %12, %cst_14 {dimension_numbers = #tpu.dot_dimension_numbers<[1], [0], [0], [1], [0, 0, 1, 1], [], []>} : vector<128x128xbf16>, vector<128x128xbf16>, vector<128x128xf32> -> vector<128x128xf32>
    %16 = vector.broadcast %13 : vector<1x128xf32> to vector<128x128xf32>
    %17 = arith.mulf %15, %16 : vector<128x128xf32>
    %18 = vector.broadcast %14 : vector<1x128xf32> to vector<128x128xf32>
    %19 = arith.addf %17, %18 : vector<128x128xf32>
    %cst_15 = arith.constant 0.000000e+00 : f32
    %20 = vector.broadcast %cst_15 : f32 to vector<128x128xf32>
    %21 = arith.maximumf %19, %20 : vector<128x128xf32>
    %22 = arith.truncf %21 : vector<128x128xf32> to vector<128x128xbf16>
    %c0_16 = arith.constant 0 : index
    %c0_17 = arith.constant 0 : index
    %23 = vector.load %arg8[%c0_16, %c0_17] : memref<128x128xbf16, #tpu.memory_space<vmem>>, vector<128x128xbf16>
    tpu.vector_store %arg8[%c0_16, %c0_17], %22 {strides = array<i32>} : memref<128x128xbf16, #tpu.memory_space<vmem>>, vector<128x128xbf16>,
    return
  }
  func.func @transform_0(%arg0: i32) -> (i32, i32) {
    %c0_i32 = arith.constant 0 : i32
    %c0_i32_0 = arith.constant 0 : i32
    return %arg0, %c0_i32 : i32, i32
  }
  func.func @transform_1(%arg0: i32) -> (i32, i32) {
    %c0_i32 = arith.constant 0 : i32
    %c0_i32_0 = arith.constant 0 : i32
    %c0_i32_1 = arith.constant 0 : i32
    return %c0_i32, %c0_i32_0 : i32, i32
  }
  func.func @transform_2(%arg0: i32) -> (i32, i32) {
    %c0_i32 = arith.constant 0 : i32
    %c0_i32_0 = arith.constant 0 : i32
    %c0_i32_1 = arith.constant 0 : i32
    return %c0_i32, %c0_i32_0 : i32, i32
  }
  func.func @transform_3(%arg0: i32) -> (i32, i32) {
    %c0_i32 = arith.constant 0 : i32
    %c0_i32_0 = arith.constant 0 : i32
    %c0_i32_1 = arith.constant 0 : i32
    return %c0_i32, %c0_i32_0 : i32, i32
  }
  func.func @transform_4(%arg0: i32) -> (i32, i32) {
    %c0_i32 = arith.constant 0 : i32
    %c0_i32_0 = arith.constant 0 : i32
    %c0_i32_1 = arith.constant 0 : i32
    return %c0_i32, %c0_i32_0 : i32, i32
  }
  func.func @transform_5(%arg0: i32) -> (i32, i32) {
    %c0_i32 = arith.constant 0 : i32
    %c0_i32_0 = arith.constant 0 : i32
    %c0_i32_1 = arith.constant 0 : i32
    return %c0_i32, %c0_i32_0 : i32, i32
  }
  func.func @transform_6(%arg0: i32) -> (i32, i32) {
    %c0_i32 = arith.constant 0 : i32
    %c0_i32_0 = arith.constant 0 : i32
    %c0_i32_1 = arith.constant 0 : i32
    return %c0_i32, %c0_i32_0 : i32, i32
  }
  func.func @transform_7(%arg0: i32) -> (i32, i32) {
    %c0_i32 = arith.constant 0 : i32
    %c0_i32_0 = arith.constant 0 : i32
    return %arg0, %c0_i32 : i32, i32
  }
}

module attributes {stable_mosaic.version = 11 : i64} {
  func.func @_final_seg_kernel(%arg0: i32, %arg1: memref<128x131xbf16, #tpu.memory_space<vmem>>, %arg2: memref<131x64xbf16, #tpu.memory_space<vmem>>, %arg3: memref<1x64xf32, #tpu.memory_space<vmem>>, %arg4: memref<1x64xf32, #tpu.memory_space<vmem>>, %arg5: memref<64x64xbf16, #tpu.memory_space<vmem>>, %arg6: memref<1x64xf32, #tpu.memory_space<vmem>>, %arg7: memref<1x64xf32, #tpu.memory_space<vmem>>, %arg8: memref<64x64xbf16, #tpu.memory_space<vmem>>, %arg9: memref<1x64xf32, #tpu.memory_space<vmem>>, %arg10: memref<1x64xf32, #tpu.memory_space<vmem>>, %arg11: memref<64x128xbf16, #tpu.memory_space<vmem>>, %arg12: memref<1x128xf32, #tpu.memory_space<vmem>>, %arg13: memref<1x128xf32, #tpu.memory_space<vmem>>, %arg14: memref<128x64xbf16, #tpu.memory_space<vmem>>, %arg15: memref<1x64xf32, #tpu.memory_space<vmem>>, %arg16: memref<1x64xf32, #tpu.memory_space<vmem>>, %arg17: memref<64x64xbf16, #tpu.memory_space<vmem>>, %arg18: memref<1x64xf32, #tpu.memory_space<vmem>>, %arg19: memref<1x64xf32, #tpu.memory_space<vmem>>, %arg20: memref<64x32xbf16, #tpu.memory_space<vmem>>, %arg21: memref<1x32xf32, #tpu.memory_space<vmem>>, %arg22: memref<1x32xf32, #tpu.memory_space<vmem>>, %arg23: memref<32x1xbf16, #tpu.memory_space<vmem>>, %arg24: memref<1x1xf32, #tpu.memory_space<vmem>>, %arg25: memref<1x1xf32, #tpu.memory_space<vmem>>, %arg26: memref<128x64xf32, #tpu.memory_space<vmem>>, %arg27: memref<1x128xf32, #tpu.memory_space<vmem>>) attributes {dimension_semantics = [#tpu.dimension_semantics<parallel>], iteration_bounds = array<i64: 2>, scalar_prefetch = 0 : i64, scratch_operands = 0 : i64, tpu.core_type = #tpu.core_type<tc>, window_params = [{transform_indices = @transform_0, window_bounds = array<i64: 128, 131>}, {pipeline_mode = #tpu.pipeline_mode<synchronous>, transform_indices = @transform_1, window_bounds = array<i64: 131, 64>}, {pipeline_mode = #tpu.pipeline_mode<synchronous>, transform_indices = @transform_2, window_bounds = array<i64: 1, 64>}, {pipeline_mode = #tpu.pipeline_mode<synchronous>, transform_indices = @transform_3, window_bounds = array<i64: 1, 64>}, {pipeline_mode = #tpu.pipeline_mode<synchronous>, transform_indices = @transform_4, window_bounds = array<i64: 64, 64>}, {pipeline_mode = #tpu.pipeline_mode<synchronous>, transform_indices = @transform_5, window_bounds = array<i64: 1, 64>}, {pipeline_mode = #tpu.pipeline_mode<synchronous>, transform_indices = @transform_6, window_bounds = array<i64: 1, 64>}, {pipeline_mode = #tpu.pipeline_mode<synchronous>, transform_indices = @transform_7, window_bounds = array<i64: 64, 64>}, {pipeline_mode = #tpu.pipeline_mode<synchronous>, transform_indices = @transform_8, window_bounds = array<i64: 1, 64>}, {pipeline_mode = #tpu.pipeline_mode<synchronous>, transform_indices = @transform_9, window_bounds = array<i64: 1, 64>}, {pipeline_mode = #tpu.pipeline_mode<synchronous>, transform_indices = @transform_10, window_bounds = array<i64: 64, 128>}, {pipeline_mode = #tpu.pipeline_mode<synchronous>, transform_indices = @transform_11, window_bounds = array<i64: 1, 128>}, {pipeline_mode = #tpu.pipeline_mode<synchronous>, transform_indices = @transform_12, window_bounds = array<i64: 1, 128>}, {pipeline_mode = #tpu.pipeline_mode<synchronous>, transform_indices = @transform_13, window_bounds = array<i64: 128, 64>}, {pipeline_mode = #tpu.pipeline_mode<synchronous>, transform_indices = @transform_14, window_bounds = array<i64: 1, 64>}, {pipeline_mode = #tpu.pipeline_mode<synchronous>, transform_indices = @transform_15, window_bounds = array<i64: 1, 64>}, {pipeline_mode = #tpu.pipeline_mode<synchronous>, transform_indices = @transform_16, window_bounds = array<i64: 64, 64>}, {pipeline_mode = #tpu.pipeline_mode<synchronous>, transform_indices = @transform_17, window_bounds = array<i64: 1, 64>}, {pipeline_mode = #tpu.pipeline_mode<synchronous>, transform_indices = @transform_18, window_bounds = array<i64: 1, 64>}, {pipeline_mode = #tpu.pipeline_mode<synchronous>, transform_indices = @transform_19, window_bounds = array<i64: 64, 32>}, {pipeline_mode = #tpu.pipeline_mode<synchronous>, transform_indices = @transform_20, window_bounds = array<i64: 1, 32>}, {pipeline_mode = #tpu.pipeline_mode<synchronous>, transform_indices = @transform_21, window_bounds = array<i64: 1, 32>}, {pipeline_mode = #tpu.pipeline_mode<synchronous>, transform_indices = @transform_22, window_bounds = array<i64: 32, 1>}, {pipeline_mode = #tpu.pipeline_mode<synchronous>, transform_indices = @transform_23, window_bounds = array<i64: 1, 1>}, {pipeline_mode = #tpu.pipeline_mode<synchronous>, transform_indices = @transform_24, window_bounds = array<i64: 1, 1>}, {transform_indices = @transform_25, window_bounds = array<i64: 128, 64>}, {transform_indices = @transform_26, window_bounds = array<i64: 1, 128>}]} {
    %c0 = arith.constant 0 : index
    %c0_0 = arith.constant 0 : index
    %0 = vector.load %arg1[%c0, %c0_0] : memref<128x131xbf16, #tpu.memory_space<vmem>>, vector<128x131xbf16>
    %c0_1 = arith.constant 0 : index
    %c0_2 = arith.constant 0 : index
    %1 = vector.load %arg2[%c0_1, %c0_2] : memref<131x64xbf16, #tpu.memory_space<vmem>>, vector<131x64xbf16>
    %c0_3 = arith.constant 0 : index
    %c0_4 = arith.constant 0 : index
    %2 = vector.load %arg3[%c0_3, %c0_4] : memref<1x64xf32, #tpu.memory_space<vmem>>, vector<1x64xf32>
    %c0_5 = arith.constant 0 : index
    %c0_6 = arith.constant 0 : index
    %3 = vector.load %arg4[%c0_5, %c0_6] : memref<1x64xf32, #tpu.memory_space<vmem>>, vector<1x64xf32>
    %cst = arith.constant dense<0.000000e+00> : vector<128x64xf32>
    %4 = tpu.matmul %0, %1, %cst {dimension_numbers = #tpu.dot_dimension_numbers<[1], [0], [0], [1], [0, 0, 1, 1], [], []>} : vector<128x131xbf16>, vector<131x64xbf16>, vector<128x64xf32> -> vector<128x64xf32>
    %5 = vector.broadcast %2 : vector<1x64xf32> to vector<128x64xf32>
    %6 = arith.mulf %4, %5 : vector<128x64xf32>
    %7 = vector.broadcast %3 : vector<1x64xf32> to vector<128x64xf32>
    %8 = arith.addf %6, %7 : vector<128x64xf32>
    %cst_7 = arith.constant 0.000000e+00 : f32
    %9 = vector.broadcast %cst_7 : f32 to vector<128x64xf32>
    %10 = arith.maximumf %8, %9 : vector<128x64xf32>
    %11 = arith.truncf %10 : vector<128x64xf32> to vector<128x64xbf16>
    %c0_8 = arith.constant 0 : index
    %c0_9 = arith.constant 0 : index
    %12 = vector.load %arg5[%c0_8, %c0_9] : memref<64x64xbf16, #tpu.memory_space<vmem>>, vector<64x64xbf16>
    %c0_10 = arith.constant 0 : index
    %c0_11 = arith.constant 0 : index
    %13 = vector.load %arg6[%c0_10, %c0_11] : memref<1x64xf32, #tpu.memory_space<vmem>>, vector<1x64xf32>
    %c0_12 = arith.constant 0 : index
    %c0_13 = arith.constant 0 : index
    %14 = vector.load %arg7[%c0_12, %c0_13] : memref<1x64xf32, #tpu.memory_space<vmem>>, vector<1x64xf32>
    %cst_14 = arith.constant dense<0.000000e+00> : vector<128x64xf32>
    %15 = tpu.matmul %11, %12, %cst_14 {dimension_numbers = #tpu.dot_dimension_numbers<[1], [0], [0], [1], [0, 0, 1, 1], [], []>} : vector<128x64xbf16>, vector<64x64xbf16>, vector<128x64xf32> -> vector<128x64xf32>
    %16 = vector.broadcast %13 : vector<1x64xf32> to vector<128x64xf32>
    %17 = arith.mulf %15, %16 : vector<128x64xf32>
    %18 = vector.broadcast %14 : vector<1x64xf32> to vector<128x64xf32>
    %19 = arith.addf %17, %18 : vector<128x64xf32>
    %cst_15 = arith.constant 0.000000e+00 : f32
    %20 = vector.broadcast %cst_15 : f32 to vector<128x64xf32>
    %21 = arith.maximumf %19, %20 : vector<128x64xf32>
    %22 = arith.truncf %21 : vector<128x64xf32> to vector<128x64xbf16>
    %c0_16 = arith.constant 0 : index
    %c0_17 = arith.constant 0 : index
    %23 = vector.load %arg8[%c0_16, %c0_17] : memref<64x64xbf16, #tpu.memory_space<vmem>>, vector<64x64xbf16>
    %c0_18 = arith.constant 0 : index
    %c0_19 = arith.constant 0 : index
    %24 = vector.load %arg9[%c0_18, %c0_19] : memref<1x64xf32, #tpu.memory_space<vmem>>, vector<1x64xf32>
    %c0_20 = arith.constant 0 : index
    %c0_21 = arith.constant 0 : index
    %25 = vector.load %arg10[%c0_20, %c0_21] : memref<1x64xf32, #tpu.memory_space<vmem>>, vector<1x64xf32>
    %cst_22 = arith.constant dense<0.000000e+00> : vector<128x64xf32>
    %26 = tpu.matmul %22, %23, %cst_22 {dimension_numbers = #tpu.dot_dimension_numbers<[1], [0], [0], [1], [0, 0, 1, 1], [], []>} : vector<128x64xbf16>, vector<64x64xbf16>, vector<128x64xf32> -> vector<128x64xf32>
    %27 = vector.broadcast %24 : vector<1x64xf32> to vector<128x64xf32>
    %28 = arith.mulf %26, %27 : vector<128x64xf32>
    %29 = vector.broadcast %25 : vector<1x64xf32> to vector<128x64xf32>
    %30 = arith.addf %28, %29 : vector<128x64xf32>
    %cst_23 = arith.constant 0.000000e+00 : f32
    %31 = vector.broadcast %cst_23 : f32 to vector<128x64xf32>
    %32 = arith.maximumf %30, %31 : vector<128x64xf32>
    %c0_24 = arith.constant 0 : index
    %c0_25 = arith.constant 0 : index
    %33 = vector.load %arg26[%c0_24, %c0_25] : memref<128x64xf32, #tpu.memory_space<vmem>>, vector<128x64xf32>
    tpu.vector_store %arg26[%c0_24, %c0_25], %32 {strides = array<i32>} : memref<128x64xf32, #tpu.memory_space<vmem>>, vector<128x64xf32>,
    %34 = arith.truncf %32 : vector<128x64xf32> to vector<128x64xbf16>
    %c0_26 = arith.constant 0 : index
    %c0_27 = arith.constant 0 : index
    %35 = vector.load %arg11[%c0_26, %c0_27] : memref<64x128xbf16, #tpu.memory_space<vmem>>, vector<64x128xbf16>
    %c0_28 = arith.constant 0 : index
    %c0_29 = arith.constant 0 : index
    %36 = vector.load %arg12[%c0_28, %c0_29] : memref<1x128xf32, #tpu.memory_space<vmem>>, vector<1x128xf32>
    %c0_30 = arith.constant 0 : index
    %c0_31 = arith.constant 0 : index
    %37 = vector.load %arg13[%c0_30, %c0_31] : memref<1x128xf32, #tpu.memory_space<vmem>>, vector<1x128xf32>
    %cst_32 = arith.constant dense<0.000000e+00> : vector<128x128xf32>
    %38 = tpu.matmul %34, %35, %cst_32 {dimension_numbers = #tpu.dot_dimension_numbers<[1], [0], [0], [1], [0, 0, 1, 1], [], []>} : vector<128x64xbf16>, vector<64x128xbf16>, vector<128x128xf32> -> vector<128x128xf32>
    %39 = vector.broadcast %36 : vector<1x128xf32> to vector<128x128xf32>
    %40 = arith.mulf %38, %39 : vector<128x128xf32>
    %41 = vector.broadcast %37 : vector<1x128xf32> to vector<128x128xf32>
    %42 = arith.addf %40, %41 : vector<128x128xf32>
    %cst_33 = arith.constant 0.000000e+00 : f32
    %43 = vector.broadcast %cst_33 : f32 to vector<128x128xf32>
    %44 = arith.maximumf %42, %43 : vector<128x128xf32>
    %45 = arith.truncf %44 : vector<128x128xf32> to vector<128x128xbf16>
    %c0_34 = arith.constant 0 : index
    %c0_35 = arith.constant 0 : index
    %46 = vector.load %arg14[%c0_34, %c0_35] : memref<128x64xbf16, #tpu.memory_space<vmem>>, vector<128x64xbf16>
    %c0_36 = arith.constant 0 : index
    %c0_37 = arith.constant 0 : index
    %47 = vector.load %arg15[%c0_36, %c0_37] : memref<1x64xf32, #tpu.memory_space<vmem>>, vector<1x64xf32>
    %c0_38 = arith.constant 0 : index
    %c0_39 = arith.constant 0 : index
    %48 = vector.load %arg16[%c0_38, %c0_39] : memref<1x64xf32, #tpu.memory_space<vmem>>, vector<1x64xf32>
    %cst_40 = arith.constant dense<0.000000e+00> : vector<128x64xf32>
    %49 = tpu.matmul %45, %46, %cst_40 {dimension_numbers = #tpu.dot_dimension_numbers<[1], [0], [0], [1], [0, 0, 1, 1], [], []>} : vector<128x128xbf16>, vector<128x64xbf16>, vector<128x64xf32> -> vector<128x64xf32>
    %50 = vector.broadcast %47 : vector<1x64xf32> to vector<128x64xf32>
    %51 = arith.mulf %49, %50 : vector<128x64xf32>
    %52 = vector.broadcast %48 : vector<1x64xf32> to vector<128x64xf32>
    %53 = arith.addf %51, %52 : vector<128x64xf32>
    %cst_41 = arith.constant 0.000000e+00 : f32
    %54 = vector.broadcast %cst_41 : f32 to vector<128x64xf32>
    %55 = arith.maximumf %53, %54 : vector<128x64xf32>
    %56 = arith.truncf %55 : vector<128x64xf32> to vector<128x64xbf16>
    %c0_42 = arith.constant 0 : index
    %c0_43 = arith.constant 0 : index
    %57 = vector.load %arg17[%c0_42, %c0_43] : memref<64x64xbf16, #tpu.memory_space<vmem>>, vector<64x64xbf16>
    %c0_44 = arith.constant 0 : index
    %c0_45 = arith.constant 0 : index
    %58 = vector.load %arg18[%c0_44, %c0_45] : memref<1x64xf32, #tpu.memory_space<vmem>>, vector<1x64xf32>
    %c0_46 = arith.constant 0 : index
    %c0_47 = arith.constant 0 : index
    %59 = vector.load %arg19[%c0_46, %c0_47] : memref<1x64xf32, #tpu.memory_space<vmem>>, vector<1x64xf32>
    %cst_48 = arith.constant dense<0.000000e+00> : vector<128x64xf32>
    %60 = tpu.matmul %56, %57, %cst_48 {dimension_numbers = #tpu.dot_dimension_numbers<[1], [0], [0], [1], [0, 0, 1, 1], [], []>} : vector<128x64xbf16>, vector<64x64xbf16>, vector<128x64xf32> -> vector<128x64xf32>
    %61 = vector.broadcast %58 : vector<1x64xf32> to vector<128x64xf32>
    %62 = arith.mulf %60, %61 : vector<128x64xf32>
    %63 = vector.broadcast %59 : vector<1x64xf32> to vector<128x64xf32>
    %64 = arith.addf %62, %63 : vector<128x64xf32>
    %cst_49 = arith.constant 0.000000e+00 : f32
    %65 = vector.broadcast %cst_49 : f32 to vector<128x64xf32>
    %66 = arith.maximumf %64, %65 : vector<128x64xf32>
    %67 = arith.truncf %66 : vector<128x64xf32> to vector<128x64xbf16>
    %c0_50 = arith.constant 0 : index
    %c0_51 = arith.constant 0 : index
    %68 = vector.load %arg20[%c0_50, %c0_51] : memref<64x32xbf16, #tpu.memory_space<vmem>>, vector<64x32xbf16>
    %c0_52 = arith.constant 0 : index
    %c0_53 = arith.constant 0 : index
    %69 = vector.load %arg21[%c0_52, %c0_53] : memref<1x32xf32, #tpu.memory_space<vmem>>, vector<1x32xf32>
    %c0_54 = arith.constant 0 : index
    %c0_55 = arith.constant 0 : index
    %70 = vector.load %arg22[%c0_54, %c0_55] : memref<1x32xf32, #tpu.memory_space<vmem>>, vector<1x32xf32>
    %cst_56 = arith.constant dense<0.000000e+00> : vector<128x32xf32>
    %71 = tpu.matmul %67, %68, %cst_56 {dimension_numbers = #tpu.dot_dimension_numbers<[1], [0], [0], [1], [0, 0, 1, 1], [], []>} : vector<128x64xbf16>, vector<64x32xbf16>, vector<128x32xf32> -> vector<128x32xf32>
    %72 = vector.broadcast %69 : vector<1x32xf32> to vector<128x32xf32>
    %73 = arith.mulf %71, %72 : vector<128x32xf32>
    %74 = vector.broadcast %70 : vector<1x32xf32> to vector<128x32xf32>
    %75 = arith.addf %73, %74 : vector<128x32xf32>
    %cst_57 = arith.constant 0.000000e+00 : f32
    %76 = vector.broadcast %cst_57 : f32 to vector<128x32xf32>
    %77 = arith.maximumf %75, %76 : vector<128x32xf32>
    %c0_58 = arith.constant 0 : index
    %c0_59 = arith.constant 0 : index
    %78 = vector.load %arg23[%c0_58, %c0_59] : memref<32x1xbf16, #tpu.memory_space<vmem>>, vector<32x1xbf16>
    %79 = arith.extf %78 : vector<32x1xbf16> to vector<32x1xf32>
    %c0_60 = arith.constant 0 : index
    %c0_61 = arith.constant 0 : index
    %80 = vector.load %arg24[%c0_60, %c0_61] : memref<1x1xf32, #tpu.memory_space<vmem>>, vector<1x1xf32>
    %c0_62 = arith.constant 0 : index
    %c0_63 = arith.constant 0 : index
    %81 = vector.load %arg25[%c0_62, %c0_63] : memref<1x1xf32, #tpu.memory_space<vmem>>, vector<1x1xf32>
    %82 = tpu.transpose %77, [1, 0] : vector<128x32xf32> -> vector<32x128xf32>
    %83 = vector.broadcast %79 : vector<32x1xf32> to vector<32x128xf32>
    %84 = arith.mulf %82, %83 : vector<32x128xf32>
    %cst_64 = arith.constant dense<0.000000e+00> : vector<128xf32>
    %85 = vector.multi_reduction <add>, %84, %cst_64 [0] : vector<32x128xf32> to vector<128xf32>
    %86 = vector.shape_cast %85 : vector<128xf32> to vector<1x128xf32>
    %87 = vector.broadcast %80 : vector<1x1xf32> to vector<1x128xf32>
    %88 = arith.mulf %86, %87 : vector<1x128xf32>
    %89 = vector.broadcast %81 : vector<1x1xf32> to vector<1x128xf32>
    %90 = arith.addf %88, %89 : vector<1x128xf32>
    %cst_65 = arith.constant 0.000000e+00 : f32
    %91 = vector.broadcast %cst_65 : f32 to vector<1x128xf32>
    %92 = arith.subf %91, %90 : vector<1x128xf32>
    %93 = math.exp %92 : vector<1x128xf32>
    %cst_66 = arith.constant 1.000000e+00 : f32
    %94 = vector.broadcast %cst_66 : f32 to vector<1x128xf32>
    %95 = arith.addf %94, %93 : vector<1x128xf32>
    %cst_67 = arith.constant 1.000000e+00 : f32
    %96 = vector.broadcast %cst_67 : f32 to vector<1x128xf32>
    %97 = arith.divf %96, %95 : vector<1x128xf32>
    %c0_68 = arith.constant 0 : index
    %c0_69 = arith.constant 0 : index
    %98 = vector.load %arg27[%c0_68, %c0_69] : memref<1x128xf32, #tpu.memory_space<vmem>>, vector<1x128xf32>
    tpu.vector_store %arg27[%c0_68, %c0_69], %97 {strides = array<i32>} : memref<1x128xf32, #tpu.memory_space<vmem>>, vector<1x128xf32>,
    return
  }
  func.func @transform_0(%arg0: i32) -> (i32, i32) {
    %c0_i32 = arith.constant 0 : i32
    %c0_i32_0 = arith.constant 0 : i32
    return %arg0, %c0_i32 : i32, i32
  }
  func.func @transform_1(%arg0: i32) -> (i32, i32) {
    %c0_i32 = arith.constant 0 : i32
    %c0_i32_0 = arith.constant 0 : i32
    %c0_i32_1 = arith.constant 0 : i32
    return %c0_i32, %c0_i32_0 : i32, i32
  }
  func.func @transform_2(%arg0: i32) -> (i32, i32) {
    %c0_i32 = arith.constant 0 : i32
    %c0_i32_0 = arith.constant 0 : i32
    %c0_i32_1 = arith.constant 0 : i32
    return %c0_i32, %c0_i32_0 : i32, i32
  }
  func.func @transform_3(%arg0: i32) -> (i32, i32) {
    %c0_i32 = arith.constant 0 : i32
    %c0_i32_0 = arith.constant 0 : i32
    %c0_i32_1 = arith.constant 0 : i32
    return %c0_i32, %c0_i32_0 : i32, i32
  }
  func.func @transform_4(%arg0: i32) -> (i32, i32) {
    %c0_i32 = arith.constant 0 : i32
    %c0_i32_0 = arith.constant 0 : i32
    %c0_i32_1 = arith.constant 0 : i32
    return %c0_i32, %c0_i32_0 : i32, i32
  }
  func.func @transform_5(%arg0: i32) -> (i32, i32) {
    %c0_i32 = arith.constant 0 : i32
    %c0_i32_0 = arith.constant 0 : i32
    %c0_i32_1 = arith.constant 0 : i32
    return %c0_i32, %c0_i32_0 : i32, i32
  }
  func.func @transform_6(%arg0: i32) -> (i32, i32) {
    %c0_i32 = arith.constant 0 : i32
    %c0_i32_0 = arith.constant 0 : i32
    %c0_i32_1 = arith.constant 0 : i32
    return %c0_i32, %c0_i32_0 : i32, i32
  }
  func.func @transform_7(%arg0: i32) -> (i32, i32) {
    %c0_i32 = arith.constant 0 : i32
    %c0_i32_0 = arith.constant 0 : i32
    %c0_i32_1 = arith.constant 0 : i32
    return %c0_i32, %c0_i32_0 : i32, i32
  }
  func.func @transform_8(%arg0: i32) -> (i32, i32) {
    %c0_i32 = arith.constant 0 : i32
    %c0_i32_0 = arith.constant 0 : i32
    %c0_i32_1 = arith.constant 0 : i32
    return %c0_i32, %c0_i32_0 : i32, i32
  }
  func.func @transform_9(%arg0: i32) -> (i32, i32) {
    %c0_i32 = arith.constant 0 : i32
    %c0_i32_0 = arith.constant 0 : i32
    %c0_i32_1 = arith.constant 0 : i32
    return %c0_i32, %c0_i32_0 : i32, i32
  }
  func.func @transform_10(%arg0: i32) -> (i32, i32) {
    %c0_i32 = arith.constant 0 : i32
    %c0_i32_0 = arith.constant 0 : i32
    %c0_i32_1 = arith.constant 0 : i32
    return %c0_i32, %c0_i32_0 : i32, i32
  }
  func.func @transform_11(%arg0: i32) -> (i32, i32) {
    %c0_i32 = arith.constant 0 : i32
    %c0_i32_0 = arith.constant 0 : i32
    %c0_i32_1 = arith.constant 0 : i32
    return %c0_i32, %c0_i32_0 : i32, i32
  }
  func.func @transform_12(%arg0: i32) -> (i32, i32) {
    %c0_i32 = arith.constant 0 : i32
    %c0_i32_0 = arith.constant 0 : i32
    %c0_i32_1 = arith.constant 0 : i32
    return %c0_i32, %c0_i32_0 : i32, i32
  }
  func.func @transform_13(%arg0: i32) -> (i32, i32) {
    %c0_i32 = arith.constant 0 : i32
    %c0_i32_0 = arith.constant 0 : i32
    %c0_i32_1 = arith.constant 0 : i32
    return %c0_i32, %c0_i32_0 : i32, i32
  }
  func.func @transform_14(%arg0: i32) -> (i32, i32) {
    %c0_i32 = arith.constant 0 : i32
    %c0_i32_0 = arith.constant 0 : i32
    %c0_i32_1 = arith.constant 0 : i32
    return %c0_i32, %c0_i32_0 : i32, i32
  }
  func.func @transform_15(%arg0: i32) -> (i32, i32) {
    %c0_i32 = arith.constant 0 : i32
    %c0_i32_0 = arith.constant 0 : i32
    %c0_i32_1 = arith.constant 0 : i32
    return %c0_i32, %c0_i32_0 : i32, i32
  }
  func.func @transform_16(%arg0: i32) -> (i32, i32) {
    %c0_i32 = arith.constant 0 : i32
    %c0_i32_0 = arith.constant 0 : i32
    %c0_i32_1 = arith.constant 0 : i32
    return %c0_i32, %c0_i32_0 : i32, i32
  }
  func.func @transform_17(%arg0: i32) -> (i32, i32) {
    %c0_i32 = arith.constant 0 : i32
    %c0_i32_0 = arith.constant 0 : i32
    %c0_i32_1 = arith.constant 0 : i32
    return %c0_i32, %c0_i32_0 : i32, i32
  }
  func.func @transform_18(%arg0: i32) -> (i32, i32) {
    %c0_i32 = arith.constant 0 : i32
    %c0_i32_0 = arith.constant 0 : i32
    %c0_i32_1 = arith.constant 0 : i32
    return %c0_i32, %c0_i32_0 : i32, i32
  }
  func.func @transform_19(%arg0: i32) -> (i32, i32) {
    %c0_i32 = arith.constant 0 : i32
    %c0_i32_0 = arith.constant 0 : i32
    %c0_i32_1 = arith.constant 0 : i32
    return %c0_i32, %c0_i32_0 : i32, i32
  }
  func.func @transform_20(%arg0: i32) -> (i32, i32) {
    %c0_i32 = arith.constant 0 : i32
    %c0_i32_0 = arith.constant 0 : i32
    %c0_i32_1 = arith.constant 0 : i32
    return %c0_i32, %c0_i32_0 : i32, i32
  }
  func.func @transform_21(%arg0: i32) -> (i32, i32) {
    %c0_i32 = arith.constant 0 : i32
    %c0_i32_0 = arith.constant 0 : i32
    %c0_i32_1 = arith.constant 0 : i32
    return %c0_i32, %c0_i32_0 : i32, i32
  }
  func.func @transform_22(%arg0: i32) -> (i32, i32) {
    %c0_i32 = arith.constant 0 : i32
    %c0_i32_0 = arith.constant 0 : i32
    %c0_i32_1 = arith.constant 0 : i32
    return %c0_i32, %c0_i32_0 : i32, i32
  }
  func.func @transform_23(%arg0: i32) -> (i32, i32) {
    %c0_i32 = arith.constant 0 : i32
    %c0_i32_0 = arith.constant 0 : i32
    %c0_i32_1 = arith.constant 0 : i32
    return %c0_i32, %c0_i32_0 : i32, i32
  }
  func.func @transform_24(%arg0: i32) -> (i32, i32) {
    %c0_i32 = arith.constant 0 : i32
    %c0_i32_0 = arith.constant 0 : i32
    %c0_i32_1 = arith.constant 0 : i32
    return %c0_i32, %c0_i32_0 : i32, i32
  }
  func.func @transform_25(%arg0: i32) -> (i32, i32) {
    %c0_i32 = arith.constant 0 : i32
    %c0_i32_0 = arith.constant 0 : i32
    return %arg0, %c0_i32 : i32, i32
  }
  func.func @transform_26(%arg0: i32) -> (i32, i32) {
    %c0_i32 = arith.constant 0 : i32
    %c0_i32_0 = arith.constant 0 : i32
    return %c0_i32, %arg0 : i32, i32
  }
}

</mosaic_0001>

<bundles_post_ra>
// kernel: custom-call.30
= control target key start
LH: loop header
LB: loop body
LE: loop exit
PB: predicated region body
PF: predicated region fallthrough
CT: control target
= control target key end

     0   :  { %s6_s0 = inlined_call_operand.vmem [shape: f32[2,128], index: 0, kind: output, shape index: {}]  }

// kernel: custom-call.31
= control target key start
LH: loop header
LB: loop body
LE: loop exit
PB: predicated region body
PF: predicated region fallthrough
CT: control target
= control target key end

     0   :  { %s6_s0 = inlined_call_operand.vmem [shape: f32[2,64], index: 0, kind: output, shape index: {}]  }

// kernel: pointnet2_seg_forward.6
= control target key start
LH: loop header
LB: loop body
LE: loop exit
PB: predicated region body
PF: predicated region fallthrough
CT: control target
= control target key end

     0   :  { %vm687_vm0 = vcmask 1042432   ;;  %vm494_vm1 = vcmask 48128   ;;  %vm1714_vm2 = vcmask 261120   ;;  %vm4239_vm3 = vcmask 519168   ;;  %s7117_s1 = inlined_call_operand.vmem [shape: bf16[6,32], index: 1, kind: input, shape index: {}]   ;;  %s7118_s0 = inlined_call_operand.vmem [shape: bf16[8,128,6], index: 0, kind: input, shape index: {}]   ;;  %s7119_s4 = inlined_call_operand.vmem [shape: bf16[32,32], index: 4, kind: input, shape index: {}]   ;;  %s7120_s7 = inlined_call_operand.vmem [shape: bf16[32,64], index: 7, kind: input, shape index: {}]   ;;  %s7121_s2 = inlined_call_operand.vmem [shape: f32[1,32], index: 2, kind: input, shape index: {}]   ;;  %s7122_s3 = inlined_call_operand.vmem [shape: f32[1,32], index: 3, kind: input, shape index: {}]   ;;  %s7123_s5 = inlined_call_operand.vmem [shape: f32[1,32], index: 5, kind: input, shape index: {}]   ;;  %s7124_s6 = inlined_call_operand.vmem [shape: f32[1,32], index: 6, kind: input, shape index: {}]   ;;  %s7125_s8 = inlined_call_operand.vmem [shape: f32[1,64], index: 8, kind: input, shape index: {}]   ;;  %s7126_s9 = inlined_call_operand.vmem [shape: f32[1,64], index: 9, kind: input, shape index: {}]   ;;  %s7127_s10 = inlined_call_operand.vmem [shape: bf16[128,64], index: 10, kind: output, shape index: {}]  }
   0x1   :  { %v491_v0 = vld [vmem:[%s7117_s1] sm:$0x7]  ;;  %v5266_v3 = vld [vmem:[%s7118_s0 + $0x8] sm:$0xff]   ;;  %v5267_v4 = vld [vmem:[%s7118_s0 + $0x10] sm:$0xff]  }
   0x2   :  { %5263 = vmatprep.subr.msk.bf16.mxu0 %vm687_vm0, %v491_v0  ;;  %v689_v1 = vsel %vm687_vm0, %v491_v0, 0  ;;  %v5265_v2 = vld [vmem:[%s7118_s0] sm:$0xff]   ;;  %5264 = vmatprep.subr.msk.bf16.mxu1 %vm687_vm0, %v491_v0  ;;  %v5268_v5 = vld [vmem:[%s7118_s0 + $0x18] sm:$0xff]   ;;  %v5270_v7 = vld [vmem:[%s7118_s0 + $0x28] sm:$0xff]  }
   0x3   :  { %4868 = vmatpush3.bf16.msra.mxu0 %v689_v1  ;;  %5262 = vmatpush3.bf16.msra.mxu1 %v689_v1  ;;  %v5269_v6 = vld [vmem:[%s7118_s0 + $0x20] sm:$0xff]   ;;  %v5271_v8 = vld [vmem:[%s7118_s0 + $0x30] sm:$0xff]   ;;  %v5272_v9 = vld [vmem:[%s7118_s0 + $0x38] sm:$0xff]  }
   0x4   :  { %4869 = vmatprep.mubr.msk.bf16.mxu0 %vm494_vm1, %v5265_v2  ;;  %v5273_v10 = vld [vmem:[%s7118_s0 + $0x40] sm:$0xff]   ;;  %v5290_v12 = vld [vmem:[%s7118_s0 + $0x108] sm:$0xff]   ;;  %v5294_v14 = vld [vmem:[%s7118_s0 + $0x110] sm:$0xff]  }
   0x5   :  { %v5289_v11 = vld [vmem:[%s7118_s0 + $0x100] sm:$0xff]   ;;  %v5274_v15 = vld [vmem:[%s7118_s0 + $0x48] sm:$0xff]   ;;  %v5295_v16 = vld [vmem:[%s7118_s0 + $0x118] sm:$0xff]  }
   0x6   :  { %4870 = vmatmul.mubr.msk.bf16.vlgmr.msra.gmra.mrb[0].mxu0 %vm494_vm1, %v5266_v3  ;;  %4933 = vmatprep.mubr.msk.bf16.mxu1 %vm494_vm1, %v5289_v11  ;;  %v5292_v13 = vld [vmem:[%s7119_s4] sm:$0xff]   ;;  %v5275_v17 = vld [vmem:[%s7118_s0 + $0x50] sm:$0xff]   ;;  %v5276_v19 = vld [vmem:[%s7118_s0 + $0x58] sm:$0xff]  }
   0x7   :  { %4873 = vmatprep.mubr.msk.bf16.mxu0 %vm494_vm1, %v5267_v4  ;;  %4934 = vmatmul.mubr.msk.bf16.vlgmr.msra.gmra.mrb[0].mxu1 %vm494_vm1, %v5290_v12  ;;  %v5298_v18 = vld [vmem:[%s7118_s0 + $0x120] sm:$0xff]   ;;  %v5299_v20 = vld [vmem:[%s7118_s0 + $0x128] sm:$0xff]   ;;  %v5302_v21 = vld [vmem:[%s7118_s0 + $0x130] sm:$0xff]  }
   0x8   :  { %4997 = vmatprep.subr.bf16.mxu1 %v5292_v13  ;;  %4937 = vmatprep.mubr.msk.bf16.mxu1 %vm494_vm1, %v5294_v14  ;;  %v5277_v22 = vld [vmem:[%s7118_s0 + $0x60] sm:$0xff]   ;;  %v5278_v23 = vld [vmem:[%s7118_s0 + $0x68] sm:$0xff]   ;;  %v5303_v24 = vld [vmem:[%s7118_s0 + $0x138] sm:$0xff]  }
   0x9   :  { %4998 = vmatpush3.bf16.msra.mxu1 %v5292_v13  ;;  %v5306_v25 = vld [vmem:[%s7118_s0 + $0x140] sm:$0xff]   ;;  %v5279_v26 = vld [vmem:[%s7118_s0 + $0x70] sm:$0xff]   ;;  %v5316_v27 = vld [vmem:[%s7119_s4 + $0x8] sm:$0xff]  }
   0xa   :  { %4999 = vmatprep.subr.bf16.mxu1 %v5316_v27  ;;  %v5280_v28 = vld [vmem:[%s7118_s0 + $0x78] sm:$0xff]   ;;  %v5307_v29 = vld [vmem:[%s7118_s0 + $0x148] sm:$0xff]   ;;  %v5308_v30 = vld [vmem:[%s7118_s0 + $0x150] sm:$0xff]  }
   0xb   :  { %v5281_v31 = vld [vmem:[%s7118_s0 + $0x80] sm:$0xff]   ;;  %v5282_v32 = vld [vmem:[%s7118_s0 + $0x88] sm:$0xff]   ;;  %v5309_v33 = vld [vmem:[%s7118_s0 + $0x158] sm:$0xff]  }
   0xc   :  { %v5310_v34 = vld [vmem:[%s7118_s0 + $0x160] sm:$0xff]   ;;  %v5283_v35 = vld [vmem:[%s7118_s0 + $0x90] sm:$0xff]   ;;  %v5311_v36 = vld [vmem:[%s7118_s0 + $0x168] sm:$0xff]  }
   0xd   :  { %5000 = vmatpush3.bf16.msra.mxu1 %v5316_v27  ;;  %v5284_v37 = vld [vmem:[%s7118_s0 + $0x98] sm:$0xff]   ;;  %v5312_v38 = vld [vmem:[%s7118_s0 + $0x170] sm:$0xff]   ;;  %v5285_v39 = vld [vmem:[%s7118_s0 + $0xa0] sm:$0xff]  }
   0xe   :  { %4874 = vmatmul.mubr.msk.bf16.gmra.mrb[4].mxu0 %vm494_vm1, %v5268_v5  ;;  %v5313_v40 = vld [vmem:[%s7118_s0 + $0x178] sm:$0xff]   ;;  %v5286_v41 = vld [vmem:[%s7118_s0 + $0xa8] sm:$0xff]   ;;  %v5314_v42 = vld [vmem:[%s7118_s0 + $0x180] sm:$0xff]  }
   0xf   :  { %4877 = vmatprep.mubr.msk.bf16.mxu0 %vm494_vm1, %v5269_v6  ;;  %4938 = vmatmul.mubr.msk.bf16.gmra.mrb[4].mxu1 %vm494_vm1, %v5295_v16  ;;  %v5287_v43 = vld [vmem:[%s7118_s0 + $0xb0] sm:$0xff]   ;;  %v5315_v44 = vld [vmem:[%s7118_s0 + $0x188] sm:$0xff]   ;;  %v5288_v45 = vld [vmem:[%s7118_s0 + $0xb8] sm:$0xff]  }
  0x10   :  { %4941 = vmatprep.mubr.msk.bf16.mxu1 %vm494_vm1, %v5298_v18  ;;  %v5317_v46 = vld [vmem:[%s7118_s0 + $0x190] sm:$0xff]   ;;  %v5291_v47 = vld [vmem:[%s7118_s0 + $0xc0] sm:$0xff]   ;;  %v5318_v48 = vld [vmem:[%s7118_s0 + $0x198] sm:$0xff]  }
  0x11   :  { %v5293_v49 = vld [vmem:[%s7118_s0 + $0xc8] sm:$0xff]   ;;  %v5319_v50 = vld [vmem:[%s7118_s0 + $0x1a0] sm:$0xff]   ;;  %v5296_v51 = vld [vmem:[%s7118_s0 + $0xd0] sm:$0xff]  }
  0x12   :  { %v5320_v52 = vld [vmem:[%s7118_s0 + $0x1a8] sm:$0xff]   ;;  %v5297_v53 = vld [vmem:[%s7118_s0 + $0xd8] sm:$0xff]   ;;  %v5321_v54 = vld [vmem:[%s7118_s0 + $0x1b0] sm:$0xff]  }
  0x13   :  { %v5300_v55 = vld [vmem:[%s7118_s0 + $0xe0] sm:$0xff]   ;;  %v5322_v56 = vld [vmem:[%s7118_s0 + $0x1b8] sm:$0xff]   ;;  %v5301_v57 = vld [vmem:[%s7118_s0 + $0xe8] sm:$0xff]  }
  0x14   :  { %v5323_v58 = vld [vmem:[%s7118_s0 + $0x1c0] sm:$0xff]   ;;  %v5304_v59 = vld [vmem:[%s7118_s0 + $0xf0] sm:$0xff]   ;;  %v5324_v60 = vld [vmem:[%s7118_s0 + $0x1c8] sm:$0xff]  }
  0x15   :  { %v5305_v61 = vld [vmem:[%s7118_s0 + $0xf8] sm:$0xff]   ;;  %v5325_v62 = vld [vmem:[%s7118_s0 + $0x1d0] sm:$0xff]   ;;  %v5327_v0 = vld [vmem:[%s7118_s0 + $0x1e0] sm:$0xff]  }
  0x16   :  { %4878 = vmatmul.mubr.msk.bf16.gmra.mrb[8].mxu0 %vm494_vm1, %v5270_v7  ;;  %v5326_v63 = vld [vmem:[%s7118_s0 + $0x1d8] sm:$0xff]   ;;  %v5328_v1 = vld [vmem:[%s7118_s0 + $0x1e8] sm:$0xff]   ;;  %v5329_v2 = vld [vmem:[%s7118_s0 + $0x1f0] sm:$0xff]  }
  0x17   :  { %4881 = vmatprep.mubr.msk.bf16.mxu0 %vm494_vm1, %v5271_v8  ;;  %4942 = vmatmul.mubr.msk.bf16.gmra.mrb[8].mxu1 %vm494_vm1, %v5299_v20  ;;  %v5330_v3 = vld [vmem:[%s7118_s0 + $0x1f8] sm:$0xff]   ;;  %v5331_v4 = vld [vmem:[%s7120_s7] sm:$0xff]  }
  0x18   :  { %4945 = vmatprep.mubr.msk.bf16.mxu1 %vm494_vm1, %v5302_v21  ;;  %5129 = vmatprep.subr.bf16.mxu0 %v5331_v4  ;;  %v5665_v5 = vld [vmem:[%s7121_s2] ss:$0 sm:$0xff] }
  0x19   :  { %5130 = vmatpush3.bf16.msra.mxu0 %v5331_v4  ;;  %v5670_v6 = vld [vmem:[%s7122_s3] ss:$0 sm:$0xff] }
  0x1e   :  { %4882 = vmatmul.mubr.msk.bf16.gmra.mrb[12].mxu0 %vm494_vm1, %v5272_v9 }
  0x1f   :  { %4885 = vmatprep.mubr.msk.bf16.mxu0 %vm494_vm1, %v5273_v10  ;;  %4946 = vmatmul.mubr.msk.bf16.gmra.mrb[12].mxu1 %vm494_vm1, %v5303_v24 }
  0x20   :  { %4949 = vmatprep.mubr.msk.bf16.mxu1 %vm494_vm1, %v5306_v25 }
  0x26   :  { %4886 = vmatmul.mubr.msk.bf16.gmra.mrb[16].mxu0 %vm494_vm1, %v5274_v15 }
  0x27   :  { %4889 = vmatprep.mubr.msk.bf16.mxu0 %vm494_vm1, %v5275_v17  ;;  %4950 = vmatmul.mubr.msk.bf16.gmra.mrb[16].mxu1 %vm494_vm1, %v5307_v29 }
  0x28   :  { %4953 = vmatprep.mubr.msk.bf16.mxu1 %vm494_vm1, %v5308_v30 }
  0x2e   :  { %4890 = vmatmul.mubr.msk.bf16.gmra.mrb[20].mxu0 %vm494_vm1, %v5276_v19 }
  0x2f   :  { %4893 = vmatprep.mubr.msk.bf16.mxu0 %vm494_vm1, %v5277_v22  ;;  %4954 = vmatmul.mubr.msk.bf16.gmra.mrb[20].mxu1 %vm494_vm1, %v5309_v33 }
  0x30   :  { %4957 = vmatprep.mubr.msk.bf16.mxu1 %vm494_vm1, %v5310_v34 }
  0x36   :  { %4894 = vmatmul.mubr.msk.bf16.gmra.mrb[24].mxu0 %vm494_vm1, %v5278_v23 }
  0x37   :  { %4897 = vmatprep.mubr.msk.bf16.mxu0 %vm494_vm1, %v5279_v26  ;;  %4958 = vmatmul.mubr.msk.bf16.gmra.mrb[24].mxu1 %vm494_vm1, %v5311_v36 }
  0x38   :  { %4961 = vmatprep.mubr.msk.bf16.mxu1 %vm494_vm1, %v5312_v38 }
  0x3e   :  { %4898 = vmatmul.mubr.msk.bf16.gmra.mrb[28].mxu0 %vm494_vm1, %v5280_v28 }
  0x3f   :  { %4901 = vmatprep.mubr.msk.bf16.mxu0 %vm494_vm1, %v5281_v31  ;;  %4962 = vmatmul.mubr.msk.bf16.gmra.mrb[28].mxu1 %vm494_vm1, %v5313_v40 }
  0x40   :  { %4965 = vmatprep.mubr.msk.bf16.mxu1 %vm494_vm1, %v5314_v42 }
  0x46   :  { %4902 = vmatmul.mubr.msk.bf16.gmra.mrb[32].mxu0 %vm494_vm1, %v5282_v32 }
  0x47   :  { %4905 = vmatprep.mubr.msk.bf16.mxu0 %vm494_vm1, %v5283_v35  ;;  %4966 = vmatmul.mubr.msk.bf16.gmra.mrb[32].mxu1 %vm494_vm1, %v5315_v44 }
  0x48   :  { %4969 = vmatprep.mubr.msk.bf16.mxu1 %vm494_vm1, %v5317_v46 }
  0x4e   :  { %4906 = vmatmul.mubr.msk.bf16.gmra.mrb[36].mxu0 %vm494_vm1, %v5284_v37 }
  0x4f   :  { %4909 = vmatprep.mubr.msk.bf16.mxu0 %vm494_vm1, %v5285_v39  ;;  %4970 = vmatmul.mubr.msk.bf16.gmra.mrb[36].mxu1 %vm494_vm1, %v5318_v48 }
  0x50   :  { %4973 = vmatprep.mubr.msk.bf16.mxu1 %vm494_vm1, %v5319_v50 }
  0x56   :  { %4910 = vmatmul.mubr.msk.bf16.gmra.mrb[40].mxu0 %vm494_vm1, %v5286_v41 }
  0x57   :  { %4913 = vmatprep.mubr.msk.bf16.mxu0 %vm494_vm1, %v5287_v43  ;;  %4974 = vmatmul.mubr.msk.bf16.gmra.mrb[40].mxu1 %vm494_vm1, %v5320_v52 }
  0x58   :  { %4977 = vmatprep.mubr.msk.bf16.mxu1 %vm494_vm1, %v5321_v54 }
  0x5e   :  { %4914 = vmatmul.mubr.msk.bf16.gmra.mrb[44].mxu0 %vm494_vm1, %v5288_v45 }
  0x5f   :  { %4917 = vmatprep.mubr.msk.bf16.mxu0 %vm494_vm1, %v5291_v47  ;;  %4978 = vmatmul.mubr.msk.bf16.gmra.mrb[44].mxu1 %vm494_vm1, %v5322_v56 }
  0x60   :  { %4981 = vmatprep.mubr.msk.bf16.mxu1 %vm494_vm1, %v5323_v58 }
  0x66   :  { %4918 = vmatmul.mubr.msk.bf16.gmra.mrb[48].mxu0 %vm494_vm1, %v5293_v49 }
  0x67   :  { %4921 = vmatprep.mubr.msk.bf16.mxu0 %vm494_vm1, %v5296_v51  ;;  %4982 = vmatmul.mubr.msk.bf16.gmra.mrb[48].mxu1 %vm494_vm1, %v5324_v60 }
  0x68   :  { %4985 = vmatprep.mubr.msk.bf16.mxu1 %vm494_vm1, %v5325_v62 }
  0x6e   :  { %4922 = vmatmul.mubr.msk.bf16.gmra.mrb[52].mxu0 %vm494_vm1, %v5297_v53 }
  0x6f   :  { %4925 = vmatprep.mubr.msk.bf16.mxu0 %vm494_vm1, %v5300_v55  ;;  %4986 = vmatmul.mubr.msk.bf16.gmra.mrb[52].mxu1 %vm494_vm1, %v5326_v63 }
  0x70   :  { %4989 = vmatprep.mubr.msk.bf16.mxu1 %vm494_vm1, %v5327_v0 }
  0x76   :  { %4926 = vmatmul.mubr.msk.bf16.gmra.mrb[56].mxu0 %vm494_vm1, %v5301_v57 }
  0x77   :  { %4929 = vmatprep.mubr.msk.bf16.mxu0 %vm494_vm1, %v5304_v59  ;;  %4990 = vmatmul.mubr.msk.bf16.gmra.mrb[56].mxu1 %vm494_vm1, %v5328_v1 }
  0x78   :  { %4993 = vmatprep.mubr.msk.bf16.mxu1 %vm494_vm1, %v5329_v2 }
  0x7e   :  { %4930 = vmatmul.mubr.msk.bf16.gmra.mrb[60].mxu0 %vm494_vm1, %v5305_v61 }
  0x7f   :  { %4994 = vmatmul.mubr.msk.bf16.gmra.mrb[60].mxu1 %vm494_vm1, %v5330_v3 }
  0xd9   :  { %v4871_v7 = vpop.f32.mrb[0].mxu0 }
  0xda   :  { %v1244_v8 = vmul.f32 %v4871_v7, %v5665_v5  ;;  %v725_v9 = vpop.f32.mrb[1].mxu0  ;;  %v4935_v57 = vpop.f32.mrb[0].mxu1 }
  0xdb   :  { %v1242_v10 = vmul.f32 %v5665_v5, %v725_v9  ;;  %v4872_v11 = vpop.f32.mrb[2].mxu0  ;;  %v1308_v61 = vmul.f32 %v4935_v57, %v5665_v5  ;;  %v981_v62 = vpop.f32.mrb[1].mxu1 }
  0xdc   :  { %v1378_v12 = vadd.f32 %v5670_v6, %v1244_v8  ;;  %v1245_v13 = vmul.f32 %v4872_v11, %v5665_v5  ;;  %v728_v14 = vpop.f32.mrb[3].mxu0  ;;  %v1306_v2 = vmul.f32 %v5665_v5, %v981_v62  ;;  %v4936_v3 = vpop.f32.mrb[2].mxu1  ;;  %v5332_v62 = vld [vmem:[%s7120_s7 + $0x8] sm:$0xff]  }
  0xdd   :  { %v1376_v15 = vadd.f32 %v5670_v6, %v1242_v10  ;;  %v1243_v16 = vmul.f32 %v5665_v5, %v728_v14  ;;  %v1442_v9 = vadd.f32 %v5670_v6, %v1308_v61  ;;  %v1309_v10 = vmul.f32 %v4936_v3, %v5665_v5  ;;  %v984_v11 = vpop.f32.mrb[3].mxu1  ;;  %5131 = vmatprep.subr.bf16.mxu0 %v5332_v62 }
  0xde   :  { %v1379_v17 = vadd.f32 %v5670_v6, %v1245_v13  ;;  %v1506_v19 = vmax.f32 %v1378_v12, 0.0  ;;  %5132 = vmatpush3.bf16.msra.mxu0 %v5332_v62 }
  0xdf   :  { %v1377_v18 = vadd.f32 %v5670_v6, %v1243_v16  ;;  %v1504_v21 = vmax.f32 %v1376_v15, 0.0  ;;  %v1440_v15 = vadd.f32 %v5670_v6, %v1306_v2  ;;  %v1307_v16 = vmul.f32 %v5665_v5, %v984_v11 }
  0xe0   :  { %v1507_v20 = vmax.f32 %v1379_v17, 0.0 }
  0xe1   :  { %v1505_v22 = vmax.f32 %v1377_v18, 0.0  ;;  %v4875_v23 = vpop.f32.mrb[4].mxu0 }
  0xe2   :  { %v1633_v24 = vpack.c.bf16 %v1507_v20, %v1506_v19  ;;  %v1248_v25 = vmul.f32 %v4875_v23, %v5665_v5  ;;  %v741_v26 = vpop.f32.mrb[5].mxu0  ;;  %v1570_v19 = vmax.f32 %v1442_v9, 0.0  ;;  %v1443_v20 = vadd.f32 %v5670_v6, %v1309_v10 }
  0xe3   :  { %v1632_v27 = vpack.c.bf16 %v1505_v22, %v1504_v21  ;;  %v1246_v28 = vmul.f32 %v5665_v5, %v741_v26  ;;  %v4876_v29 = vpop.f32.mrb[6].mxu0  ;;  %v1568_v22 = vmax.f32 %v1440_v15, 0.0  ;;  %v1441_v23 = vadd.f32 %v5670_v6, %v1307_v16 }
  0xe4   :  { %v1382_v30 = vadd.f32 %v5670_v6, %v1248_v25  ;;  %v1249_v31 = vmul.f32 %v4876_v29, %v5665_v5  ;;  %v744_v32 = vpop.f32.mrb[7].mxu0  ;;  %v1571_v25 = vmax.f32 %v1443_v20, 0.0  ;;  %v4939_v29 = vpop.f32.mrb[4].mxu1 }
  0xe5   :  { %v1380_v33 = vadd.f32 %v5670_v6, %v1246_v28  ;;  %v1247_v34 = vmul.f32 %v5665_v5, %v744_v32  ;;  %5001 = vmatprep.mubr.msk.bf16.mxu1 %vm1714_vm2, %v1632_v27  ;;  %v1569_v28 = vmax.f32 %v1441_v23, 0.0 }
  0xe6   :  { %v1383_v35 = vadd.f32 %v5670_v6, %v1249_v31  ;;  %5002 = vmatmul.mubr.msk.bf16.vlgmr.msra.gmra.mrb[64].mxu1 %vm1714_vm2, %v1633_v24  ;;  %v1510_v37 = vmax.f32 %v1382_v30, 0.0 }
  0xe7   :  { %v1381_v36 = vadd.f32 %v5670_v6, %v1247_v34  ;;  %v1508_v39 = vmax.f32 %v1380_v33, 0.0  ;;  %v5718_v33 = vpack.c.bf16 %v1571_v25, %v1570_v19  ;;  %v1312_v34 = vmul.f32 %v4939_v29, %v5665_v5 }
  0xe8   :  { %v1511_v38 = vmax.f32 %v1383_v35, 0.0  ;;  %v997_v35 = vpop.f32.mrb[5].mxu1 }
  0xe9   :  { %v1509_v40 = vmax.f32 %v1381_v36, 0.0  ;;  %v4879_v41 = vpop.f32.mrb[8].mxu0 }
  0xea   :  { %v1635_v42 = vpack.c.bf16 %v1511_v38, %v1510_v37  ;;  %v1252_v43 = vmul.f32 %v4879_v41, %v5665_v5  ;;  %v757_v44 = vpop.f32.mrb[9].mxu0  ;;  %v4940_v41 = vpop.f32.mrb[6].mxu1 }
  0xeb   :  { %v1634_v45 = vpack.c.bf16 %v1509_v40, %v1508_v39  ;;  %v1250_v46 = vmul.f32 %v5665_v5, %v757_v44  ;;  %v4880_v47 = vpop.f32.mrb[10].mxu0  ;;  %v5722_v39 = vpack.c.bf16 %v1569_v28, %v1568_v22  ;;  %v1310_v40 = vmul.f32 %v5665_v5, %v997_v35 }
  0xec   :  { %v1386_v48 = vadd.f32 %v5670_v6, %v1252_v43  ;;  %v1253_v49 = vmul.f32 %v4880_v47, %v5665_v5  ;;  %v760_v50 = vpop.f32.mrb[11].mxu0  ;;  %v1000_v47 = vpop.f32.mrb[7].mxu1 }
  0xed   :  { %v1384_v51 = vadd.f32 %v5670_v6, %v1250_v46  ;;  %v1251_v52 = vmul.f32 %v5665_v5, %v760_v50  ;;  %5005 = vmatprep.mubr.msk.bf16.mxu1 %vm1714_vm2, %v1634_v45  ;;  %v1446_v45 = vadd.f32 %v5670_v6, %v1312_v34  ;;  %v1313_v46 = vmul.f32 %v4940_v41, %v5665_v5  ;;  %v4943_v2 = vpop.f32.mrb[8].mxu1 }
  0xee   :  { %v1387_v53 = vadd.f32 %v5670_v6, %v1253_v49  ;;  %5006 = vmatmul.mubr.msk.bf16.gmra.mrb[68].mxu1 %vm1714_vm2, %v1635_v42  ;;  %v1514_v55 = vmax.f32 %v1386_v48, 0.0  ;;  %v1316_v9 = vmul.f32 %v4943_v2, %v5665_v5  ;;  %v1013_v10 = vpop.f32.mrb[9].mxu1 }
  0xef   :  { %v1385_v54 = vadd.f32 %v5670_v6, %v1251_v52  ;;  %v1512_v58 = vmax.f32 %v1384_v51, 0.0  ;;  %v1444_v51 = vadd.f32 %v5670_v6, %v1310_v40  ;;  %v1311_v52 = vmul.f32 %v5665_v5, %v1000_v47  ;;  %v4944_v16 = vpop.f32.mrb[10].mxu1 }
  0xf0   :  { %v1515_v56 = vmax.f32 %v1387_v53, 0.0  ;;  %v1314_v15 = vmul.f32 %v5665_v5, %v1013_v10  ;;  %v1450_v20 = vadd.f32 %v5670_v6, %v1316_v9  ;;  %v1016_v22 = vpop.f32.mrb[11].mxu1 }
  0xf1   :  { %v1513_v59 = vmax.f32 %v1385_v54, 0.0  ;;  %v4883_v60 = vpop.f32.mrb[12].mxu0 }
  0xf2   :  { %v1637_v63 = vpack.c.bf16 %v1515_v56, %v1514_v55  ;;  %v1256_v0 = vmul.f32 %v4883_v60, %v5665_v5  ;;  %v773_v1 = vpop.f32.mrb[13].mxu0  ;;  %v1574_v55 = vmax.f32 %v1446_v45, 0.0  ;;  %v1447_v56 = vadd.f32 %v5670_v6, %v1313_v46 }
  0xf3   :  { %v1636_v4 = vpack.c.bf16 %v1513_v59, %v1512_v58  ;;  %v1254_v7 = vmul.f32 %v5665_v5, %v773_v1  ;;  %v4884_v8 = vpop.f32.mrb[14].mxu0  ;;  %v1572_v58 = vmax.f32 %v1444_v51, 0.0  ;;  %v1445_v59 = vadd.f32 %v5670_v6, %v1311_v52 }
  0xf4   :  { %v1390_v12 = vadd.f32 %v5670_v6, %v1256_v0  ;;  %v1257_v13 = vmul.f32 %v4884_v8, %v5665_v5  ;;  %v776_v14 = vpop.f32.mrb[15].mxu0  ;;  %v1575_v61 = vmax.f32 %v1447_v56, 0.0 }
  0xf5   :  { %v1388_v17 = vadd.f32 %v5670_v6, %v1254_v7  ;;  %v1255_v18 = vmul.f32 %v5665_v5, %v776_v14  ;;  %5009 = vmatprep.mubr.msk.bf16.mxu1 %vm1714_vm2, %v1636_v4  ;;  %v1573_v1 = vmax.f32 %v1445_v59, 0.0 }
  0xf6   :  { %v1391_v21 = vadd.f32 %v5670_v6, %v1257_v13  ;;  %5010 = vmatmul.mubr.msk.bf16.gmra.mrb[72].mxu1 %vm1714_vm2, %v1637_v63  ;;  %v1518_v26 = vmax.f32 %v1390_v12, 0.0  ;;  %v5743_v8 = vpack.c.bf16 %v1575_v61, %v1574_v55 }
  0xf7   :  { %v1389_v24 = vadd.f32 %v5670_v6, %v1255_v18  ;;  %v1516_v30 = vmax.f32 %v1388_v17, 0.0  ;;  %v5747_v14 = vpack.c.bf16 %v1573_v1, %v1572_v58 }
  0xf8   :  { %v1519_v27 = vmax.f32 %v1391_v21, 0.0  ;;  %v1317_v21 = vmul.f32 %v4944_v16, %v5665_v5 }
  0xf9   :  { %v1517_v31 = vmax.f32 %v1389_v24, 0.0  ;;  %v4887_v32 = vpop.f32.mrb[16].mxu0 }
  0xfa   :  { %v1639_v36 = vpack.c.bf16 %v1519_v27, %v1518_v26  ;;  %v1260_v37 = vmul.f32 %v4887_v32, %v5665_v5  ;;  %v789_v38 = vpop.f32.mrb[17].mxu0  ;;  %v1448_v26 = vadd.f32 %v5670_v6, %v1314_v15  ;;  %v1315_v27 = vmul.f32 %v5665_v5, %v1016_v22 }
  0xfb   :  { %v1638_v42 = vpack.c.bf16 %v1517_v31, %v1516_v30  ;;  %v1258_v43 = vmul.f32 %v5665_v5, %v789_v38  ;;  %v4888_v44 = vpop.f32.mrb[18].mxu0  ;;  %v1578_v30 = vmax.f32 %v1450_v20, 0.0  ;;  %v1451_v31 = vadd.f32 %v5670_v6, %v1317_v21 }
  0xfc   :  { %v1394_v48 = vadd.f32 %v5670_v6, %v1260_v37  ;;  %v1261_v49 = vmul.f32 %v4888_v44, %v5665_v5  ;;  %v792_v50 = vpop.f32.mrb[19].mxu0  ;;  %v1576_v34 = vmax.f32 %v1448_v26, 0.0  ;;  %v1449_v35 = vadd.f32 %v5670_v6, %v1315_v27 }
  0xfd   :  { %v1392_v53 = vadd.f32 %v5670_v6, %v1258_v43  ;;  %v1259_v54 = vmul.f32 %v5665_v5, %v792_v50  ;;  %5013 = vmatprep.mubr.msk.bf16.mxu1 %vm1714_vm2, %v1638_v42  ;;  %v1579_v37 = vmax.f32 %v1451_v31, 0.0  ;;  %v4947_v42 = vpop.f32.mrb[12].mxu1 }
  0xfe   :  { %v1395_v57 = vadd.f32 %v5670_v6, %v1261_v49  ;;  %5014 = vmatmul.mubr.msk.bf16.gmra.mrb[76].mxu1 %vm1714_vm2, %v1639_v36  ;;  %v1522_v63 = vmax.f32 %v1394_v48, 0.0  ;;  %v1577_v41 = vmax.f32 %v1449_v35, 0.0  ;;  %v1320_v47 = vmul.f32 %v4947_v42, %v5665_v5  ;;  %v1029_v48 = vpop.f32.mrb[13].mxu1 }
  0xff   :  { %v1393_v60 = vadd.f32 %v5670_v6, %v1259_v54  ;;  %v1520_v3 = vmax.f32 %v1392_v53, 0.0  ;;  %v5765_v46 = vpack.c.bf16 %v1579_v37, %v1578_v30  ;;  %v1318_v53 = vmul.f32 %v5665_v5, %v1029_v48  ;;  %v4948_v54 = vpop.f32.mrb[14].mxu1 }
 0x100   :  { %v1523_v0 = vmax.f32 %v1395_v57, 0.0  ;;  %v5769_v52 = vpack.c.bf16 %v1577_v41, %v1576_v34  ;;  %v1454_v58 = vadd.f32 %v5670_v6, %v1320_v47  ;;  %v1321_v59 = vmul.f32 %v4948_v54, %v5665_v5 }
 0x101   :  { %v1521_v4 = vmax.f32 %v1393_v60, 0.0  ;;  %v4891_v7 = vpop.f32.mrb[20].mxu0  ;;  %v1032_v60 = vpop.f32.mrb[15].mxu1 }
 0x102   :  { %v1641_v11 = vpack.c.bf16 %v1523_v0, %v1522_v63  ;;  %v1264_v12 = vmul.f32 %v4891_v7, %v5665_v5  ;;  %v805_v13 = vpop.f32.mrb[21].mxu0  ;;  %v1452_v0 = vadd.f32 %v5670_v6, %v1318_v53  ;;  %v1319_v1 = vmul.f32 %v5665_v5, %v1032_v60 }
 0x103   :  { %v1640_v17 = vpack.c.bf16 %v1521_v4, %v1520_v3  ;;  %v1262_v18 = vmul.f32 %v5665_v5, %v805_v13  ;;  %v4892_v19 = vpop.f32.mrb[22].mxu0  ;;  %v1582_v4 = vmax.f32 %v1454_v58, 0.0  ;;  %v1455_v7 = vadd.f32 %v5670_v6, %v1321_v59 }
 0x104   :  { %v1398_v23 = vadd.f32 %v5670_v6, %v1264_v12  ;;  %v1265_v24 = vmul.f32 %v4892_v19, %v5665_v5  ;;  %v808_v25 = vpop.f32.mrb[23].mxu0  ;;  %v1580_v10 = vmax.f32 %v1452_v0, 0.0 }
 0x105   :  { %v1396_v28 = vadd.f32 %v5670_v6, %v1262_v18  ;;  %v1263_v29 = vmul.f32 %v5665_v5, %v808_v25  ;;  %5017 = vmatprep.mubr.msk.bf16.mxu1 %vm1714_vm2, %v1640_v17  ;;  %v1583_v13 = vmax.f32 %v1455_v7, 0.0  ;;  %v4951_v18 = vpop.f32.mrb[16].mxu1 }
 0x106   :  { %v1399_v32 = vadd.f32 %v5670_v6, %v1265_v24  ;;  %5018 = vmatmul.mubr.msk.bf16.gmra.mrb[80].mxu1 %vm1714_vm2, %v1641_v11  ;;  %v1526_v38 = vmax.f32 %v1398_v23, 0.0  ;;  %v1453_v11 = vadd.f32 %v5670_v6, %v1319_v1  ;;  %v1324_v23 = vmul.f32 %v4951_v18, %v5665_v5  ;;  %v1045_v24 = vpop.f32.mrb[17].mxu1 }
 0x107   :  { %v1397_v36 = vadd.f32 %v5670_v6, %v1263_v29  ;;  %v1524_v43 = vmax.f32 %v1396_v28, 0.0  ;;  %v5787_v22 = vpack.c.bf16 %v1583_v13, %v1582_v4  ;;  %v1322_v29 = vmul.f32 %v5665_v5, %v1045_v24  ;;  %v4952_v30 = vpop.f32.mrb[18].mxu1 }
 0x108   :  { %v1527_v40 = vmax.f32 %v1399_v32, 0.0  ;;  %v1581_v17 = vmax.f32 %v1453_v11, 0.0  ;;  %v1458_v35 = vadd.f32 %v5670_v6, %v1324_v23  ;;  %v1048_v37 = vpop.f32.mrb[19].mxu1 }
 0x109   :  { %v1525_v44 = vmax.f32 %v1397_v36, 0.0  ;;  %v4895_v45 = vpop.f32.mrb[24].mxu0  ;;  %v1325_v36 = vmul.f32 %v4952_v30, %v5665_v5  ;;  %v1456_v42 = vadd.f32 %v5670_v6, %v1322_v29  ;;  %v4955_v58 = vpop.f32.mrb[20].mxu1 }
 0x10a   :  { %v1643_v49 = vpack.c.bf16 %v1527_v40, %v1526_v38  ;;  %v1268_v50 = vmul.f32 %v4895_v45, %v5665_v5  ;;  %v821_v51 = vpop.f32.mrb[25].mxu0  ;;  %v5791_v28 = vpack.c.bf16 %v1581_v17, %v1580_v10  ;;  %v1586_v47 = vmax.f32 %v1458_v35, 0.0  ;;  %v1061_v0 = vpop.f32.mrb[21].mxu1 }
 0x10b   :  { %v1642_v55 = vpack.c.bf16 %v1525_v44, %v1524_v43  ;;  %v1266_v56 = vmul.f32 %v5665_v5, %v821_v51  ;;  %v4896_v57 = vpop.f32.mrb[26].mxu0  ;;  %v1323_v43 = vmul.f32 %v5665_v5, %v1048_v37  ;;  %v1459_v48 = vadd.f32 %v5670_v6, %v1325_v36 }
 0x10c   :  { %v1402_v61 = vadd.f32 %v5670_v6, %v1268_v50  ;;  %v1269_v62 = vmul.f32 %v4896_v57, %v5665_v5  ;;  %v824_v63 = vpop.f32.mrb[27].mxu0  ;;  %v1584_v50 = vmax.f32 %v1456_v42, 0.0  ;;  %v1326_v7 = vmul.f32 %v5665_v5, %v1061_v0 }
 0x10d   :  { %v1400_v2 = vadd.f32 %v5670_v6, %v1266_v56  ;;  %v1267_v3 = vmul.f32 %v5665_v5, %v824_v63  ;;  %5021 = vmatprep.mubr.msk.bf16.mxu1 %vm1714_vm2, %v1642_v55  ;;  %v1457_v51 = vadd.f32 %v5670_v6, %v1323_v43  ;;  %v1587_v54 = vmax.f32 %v1459_v48, 0.0 }
 0x10e   :  { %v1403_v9 = vadd.f32 %v5670_v6, %v1269_v62  ;;  %5022 = vmatmul.mubr.msk.bf16.gmra.mrb[84].mxu1 %vm1714_vm2, %v1643_v49  ;;  %v1530_v15 = vmax.f32 %v1402_v61, 0.0  ;;  %v1328_v63 = vmul.f32 %v4955_v58, %v5665_v5 }
 0x10f   :  { %v1401_v12 = vadd.f32 %v5670_v6, %v1267_v3  ;;  %v1528_v19 = vmax.f32 %v1400_v2, 0.0  ;;  %v1585_v57 = vmax.f32 %v1457_v51, 0.0  ;;  %v5809_v62 = vpack.c.bf16 %v1587_v54, %v1586_v47 }
 0x110   :  { %v1531_v16 = vmax.f32 %v1403_v9, 0.0  ;;  %v4956_v9 = vpop.f32.mrb[22].mxu1  ;;  %v1462_v13 = vadd.f32 %v5670_v6, %v1328_v63 }
 0x111   :  { %v1529_v20 = vmax.f32 %v1401_v12, 0.0  ;;  %v4899_v21 = vpop.f32.mrb[28].mxu0  ;;  %v5813_v4 = vpack.c.bf16 %v1585_v57, %v1584_v50 }
 0x112   :  { %v1645_v25 = vpack.c.bf16 %v1531_v16, %v1530_v15  ;;  %v1272_v26 = vmul.f32 %v4899_v21, %v5665_v5  ;;  %v837_v27 = vpop.f32.mrb[29].mxu0  ;;  %v1329_v15 = vmul.f32 %v4956_v9, %v5665_v5  ;;  %v1064_v16 = vpop.f32.mrb[23].mxu1 }
 0x113   :  { %v1644_v31 = vpack.c.bf16 %v1529_v20, %v1528_v19  ;;  %v1270_v32 = vmul.f32 %v5665_v5, %v837_v27  ;;  %v4900_v34 = vpop.f32.mrb[30].mxu0  ;;  %v1460_v20 = vadd.f32 %v5670_v6, %v1326_v7  ;;  %v1327_v21 = vmul.f32 %v5665_v5, %v1064_v16  ;;  %v4959_v37 = vpop.f32.mrb[24].mxu1 }
 0x114   :  { %v1406_v38 = vadd.f32 %v5670_v6, %v1272_v26  ;;  %v1273_v40 = vmul.f32 %v4900_v34, %v5665_v5  ;;  %v840_v41 = vpop.f32.mrb[31].mxu0  ;;  %v1463_v26 = vadd.f32 %v5670_v6, %v1329_v15  ;;  %v1332_v43 = vmul.f32 %v4959_v37, %v5665_v5 }
 0x115   :  { %v1404_v44 = vadd.f32 %v5670_v6, %v1270_v32  ;;  %v1271_v45 = vmul.f32 %v5665_v5, %v840_v41  ;;  %5025 = vmatprep.mubr.msk.bf16.mxu1 %vm1714_vm2, %v1644_v31  ;;  %v1588_v29 = vmax.f32 %v1460_v20, 0.0  ;;  %v1461_v30 = vadd.f32 %v5670_v6, %v1327_v21 }
 0x116   :  { %v1407_v49 = vadd.f32 %v5670_v6, %v1273_v40  ;;  %5026 = vmatmul.mubr.msk.bf16.gmra.mrb[88].mxu1 %vm1714_vm2, %v1645_v25  ;;  %v1534_v55 = vmax.f32 %v1406_v38, 0.0  ;;  %v1590_v25 = vmax.f32 %v1462_v13, 0.0  ;;  %v1591_v32 = vmax.f32 %v1463_v26, 0.0 }
 0x117   :  { %v1405_v53 = vadd.f32 %v5670_v6, %v1271_v45  ;;  %v1532_v59 = vmax.f32 %v1404_v44, 0.0  ;;  %v1589_v36 = vmax.f32 %v1461_v30, 0.0  ;;  %v1077_v44 = vpop.f32.mrb[25].mxu1 }
 0x118   :  { %v1535_v56 = vmax.f32 %v1407_v49, 0.0  ;;  %v5831_v42 = vpack.c.bf16 %v1591_v32, %v1590_v25  ;;  %v1330_v50 = vmul.f32 %v5665_v5, %v1077_v44  ;;  %v4960_v51 = vpop.f32.mrb[26].mxu1 }
 0x119   :  { %v1533_v60 = vmax.f32 %v1405_v53, 0.0  ;;  %v4903_v61 = vpop.f32.mrb[32].mxu0  ;;  %v5835_v49 = vpack.c.bf16 %v1589_v36, %v1588_v29  ;;  %v1333_v57 = vmul.f32 %v4960_v51, %v5665_v5  ;;  %v1080_v58 = vpop.f32.mrb[27].mxu1 }
 0x11a   :  { %v1647_v1 = vpack.c.bf16 %v1535_v56, %v1534_v55  ;;  %v1276_v2 = vmul.f32 %v4903_v61, %v5665_v5  ;;  %v853_v3 = vpop.f32.mrb[33].mxu0  ;;  %v1466_v56 = vadd.f32 %v5670_v6, %v1332_v43  ;;  %v1464_v63 = vadd.f32 %v5670_v6, %v1330_v50 }
 0x11b   :  { %v1646_v10 = vpack.c.bf16 %v1533_v60, %v1532_v59  ;;  %v1274_v11 = vmul.f32 %v5665_v5, %v853_v3  ;;  %v4904_v12 = vpop.f32.mrb[34].mxu0  ;;  %v1331_v0 = vmul.f32 %v5665_v5, %v1080_v58  ;;  %v1467_v7 = vadd.f32 %v5670_v6, %v1333_v57 }
 0x11c   :  { %v1410_v17 = vadd.f32 %v5670_v6, %v1276_v2  ;;  %v1277_v18 = vmul.f32 %v4904_v12, %v5665_v5  ;;  %v856_v19 = vpop.f32.mrb[35].mxu0  ;;  %v1594_v3 = vmax.f32 %v1466_v56, 0.0 }
 0x11d   :  { %v1408_v23 = vadd.f32 %v5670_v6, %v1274_v11  ;;  %v1275_v24 = vmul.f32 %v5665_v5, %v856_v19  ;;  %5029 = vmatprep.mubr.msk.bf16.mxu1 %vm1714_vm2, %v1646_v10  ;;  %v1592_v10 = vmax.f32 %v1464_v63, 0.0  ;;  %v1465_v11 = vadd.f32 %v5670_v6, %v1331_v0 }
 0x11e   :  { %v1411_v27 = vadd.f32 %v5670_v6, %v1277_v18  ;;  %5030 = vmatmul.mubr.msk.bf16.gmra.mrb[92].mxu1 %vm1714_vm2, %v1647_v1  ;;  %v1538_v34 = vmax.f32 %v1410_v17, 0.0  ;;  %v1595_v13 = vmax.f32 %v1467_v7, 0.0  ;;  %v4963_v18 = vpop.f32.mrb[28].mxu1 }
 0x11f   :  { %v1409_v31 = vadd.f32 %v5670_v6, %v1275_v24  ;;  %v1536_v38 = vmax.f32 %v1408_v23, 0.0  ;;  %v1593_v17 = vmax.f32 %v1465_v11, 0.0  ;;  %v1336_v24 = vmul.f32 %v4963_v18, %v5665_v5  ;;  %v1093_v25 = vpop.f32.mrb[29].mxu1 }
 0x120   :  { %v1539_v35 = vmax.f32 %v1411_v27, 0.0  ;;  %v5853_v23 = vpack.c.bf16 %v1595_v13, %v1594_v3  ;;  %v4964_v32 = vpop.f32.mrb[30].mxu1 }
 0x121   :  { %v1537_v40 = vmax.f32 %v1409_v31, 0.0  ;;  %v4907_v41 = vpop.f32.mrb[36].mxu0  ;;  %v5857_v30 = vpack.c.bf16 %v1593_v17, %v1592_v10  ;;  %v1334_v31 = vmul.f32 %v5665_v5, %v1093_v25  ;;  %v1470_v37 = vadd.f32 %v5670_v6, %v1336_v24 }
 0x122   :  { %v1649_v45 = vpack.c.bf16 %v1539_v35, %v1538_v34  ;;  %v1280_v47 = vmul.f32 %v4907_v41, %v5665_v5  ;;  %v869_v48 = vpop.f32.mrb[37].mxu0 }
 0x123   :  { %v1648_v53 = vpack.c.bf16 %v1537_v40, %v1536_v38  ;;  %v1278_v54 = vmul.f32 %v5665_v5, %v869_v48  ;;  %v4908_v55 = vpop.f32.mrb[38].mxu0  ;;  %v1337_v38 = vmul.f32 %v4964_v32, %v5665_v5  ;;  %v1096_v40 = vpop.f32.mrb[31].mxu1  ;;  %v1598_v51 = vmax.f32 %v1470_v37, 0.0 }
 0x124   :  { %v1414_v59 = vadd.f32 %v5670_v6, %v1280_v47  ;;  %v1281_v60 = vmul.f32 %v4908_v55, %v5665_v5  ;;  %v872_v61 = vpop.f32.mrb[39].mxu0  ;;  %v1335_v47 = vmul.f32 %v5665_v5, %v1096_v40  ;;  %v4967_v63 = vpop.f32.mrb[32].mxu1 }
 0x125   :  { %v1412_v1 = vadd.f32 %v5670_v6, %v1278_v54  ;;  %v1279_v2 = vmul.f32 %v5665_v5, %v872_v61  ;;  %5033 = vmatprep.mubr.msk.bf16.mxu1 %vm1714_vm2, %v1648_v53  ;;  %v1471_v53 = vadd.f32 %v5670_v6, %v1337_v38  ;;  %v1340_v7 = vmul.f32 %v4967_v63, %v5665_v5 }
 0x126   :  { %v1415_v9 = vadd.f32 %v5670_v6, %v1281_v60  ;;  %5034 = vmatmul.mubr.msk.bf16.gmra.mrb[96].mxu1 %vm1714_vm2, %v1649_v45  ;;  %v1542_v15 = vmax.f32 %v1414_v59, 0.0  ;;  %v1468_v45 = vadd.f32 %v5670_v6, %v1334_v31  ;;  %v1469_v56 = vadd.f32 %v5670_v6, %v1335_v47 }
 0x127   :  { %v1413_v12 = vadd.f32 %v5670_v6, %v1279_v2  ;;  %v1540_v19 = vmax.f32 %v1412_v1, 0.0  ;;  %v1599_v58 = vmax.f32 %v1471_v53, 0.0 }
 0x128   :  { %v1543_v16 = vmax.f32 %v1415_v9, 0.0  ;;  %v1596_v55 = vmax.f32 %v1468_v45, 0.0  ;;  %v1597_v61 = vmax.f32 %v1469_v56, 0.0  ;;  %v1109_v9 = vpop.f32.mrb[33].mxu1 }
 0x129   :  { %v1541_v20 = vmax.f32 %v1413_v12, 0.0  ;;  %v4911_v21 = vpop.f32.mrb[40].mxu0  ;;  %v5875_v3 = vpack.c.bf16 %v1599_v58, %v1598_v51 }
 0x12a   :  { %v1651_v26 = vpack.c.bf16 %v1543_v16, %v1542_v15  ;;  %v1284_v27 = vmul.f32 %v4911_v21, %v5665_v5  ;;  %v885_v29 = vpop.f32.mrb[41].mxu0  ;;  %v5879_v13 = vpack.c.bf16 %v1597_v61, %v1596_v55  ;;  %v1338_v15 = vmul.f32 %v5665_v5, %v1109_v9  ;;  %v4968_v16 = vpop.f32.mrb[34].mxu1 }
 0x12b   :  { %v1650_v34 = vpack.c.bf16 %v1541_v20, %v1540_v19  ;;  %v1282_v35 = vmul.f32 %v5665_v5, %v885_v29  ;;  %v4912_v36 = vpop.f32.mrb[42].mxu0  ;;  %v1474_v20 = vadd.f32 %v5670_v6, %v1340_v7  ;;  %v1341_v21 = vmul.f32 %v4968_v16, %v5665_v5  ;;  %v1112_v24 = vpop.f32.mrb[35].mxu1 }
 0x12c   :  { %v1418_v41 = vadd.f32 %v5670_v6, %v1284_v27  ;;  %v1285_v43 = vmul.f32 %v4912_v36, %v5665_v5  ;;  %v888_v44 = vpop.f32.mrb[43].mxu0  ;;  %v1472_v29 = vadd.f32 %v5670_v6, %v1338_v15  ;;  %v1339_v31 = vmul.f32 %v5665_v5, %v1112_v24 }
 0x12d   :  { %v1416_v48 = vadd.f32 %v5670_v6, %v1282_v35  ;;  %v1283_v50 = vmul.f32 %v5665_v5, %v888_v44  ;;  %5037 = vmatprep.mubr.msk.bf16.mxu1 %vm1714_vm2, %v1650_v34  ;;  %v1602_v35 = vmax.f32 %v1474_v20, 0.0  ;;  %v1475_v36 = vadd.f32 %v5670_v6, %v1341_v21 }
 0x12e   :  { %v1419_v54 = vadd.f32 %v5670_v6, %v1285_v43  ;;  %5038 = vmatmul.mubr.msk.bf16.gmra.mrb[100].mxu1 %vm1714_vm2, %v1651_v26  ;;  %v1546_v59 = vmax.f32 %v1418_v41, 0.0  ;;  %v1600_v38 = vmax.f32 %v1472_v29, 0.0  ;;  %v1473_v40 = vadd.f32 %v5670_v6, %v1339_v31 }
 0x12f   :  { %v1417_v57 = vadd.f32 %v5670_v6, %v1283_v50  ;;  %v1544_v0 = vmax.f32 %v1416_v48, 0.0  ;;  %v1603_v43 = vmax.f32 %v1475_v36, 0.0  ;;  %v4971_v48 = vpop.f32.mrb[36].mxu1 }
 0x130   :  { %v1547_v60 = vmax.f32 %v1419_v54, 0.0  ;;  %v1601_v47 = vmax.f32 %v1473_v40, 0.0  ;;  %v1344_v55 = vmul.f32 %v4971_v48, %v5665_v5  ;;  %v1125_v56 = vpop.f32.mrb[37].mxu1 }
 0x131   :  { %v1545_v1 = vmax.f32 %v1417_v57, 0.0  ;;  %v4915_v2 = vpop.f32.mrb[44].mxu0  ;;  %v5897_v54 = vpack.c.bf16 %v1603_v43, %v1602_v35  ;;  %v1342_v61 = vmul.f32 %v5665_v5, %v1125_v56  ;;  %v4972_v63 = vpop.f32.mrb[38].mxu1 }
 0x132   :  { %v1653_v10 = vpack.c.bf16 %v1547_v60, %v1546_v59  ;;  %v1288_v11 = vmul.f32 %v4915_v2, %v5665_v5  ;;  %v901_v12 = vpop.f32.mrb[45].mxu0  ;;  %v5901_v60 = vpack.c.bf16 %v1601_v47, %v1600_v38  ;;  %v1478_v7 = vadd.f32 %v5670_v6, %v1344_v55 }
 0x133   :  { %v1652_v17 = vpack.c.bf16 %v1545_v1, %v1544_v0  ;;  %v1286_v18 = vmul.f32 %v5665_v5, %v901_v12  ;;  %v4916_v19 = vpop.f32.mrb[46].mxu0  ;;  %v1345_v9 = vmul.f32 %v4972_v63, %v5665_v5  ;;  %v1476_v16 = vadd.f32 %v5670_v6, %v1342_v61 }
 0x134   :  { %v1422_v25 = vadd.f32 %v5670_v6, %v1288_v11  ;;  %v1289_v26 = vmul.f32 %v4916_v19, %v5665_v5  ;;  %v904_v27 = vpop.f32.mrb[47].mxu0  ;;  %v1606_v20 = vmax.f32 %v1478_v7, 0.0 }
 0x135   :  { %v1420_v32 = vadd.f32 %v5670_v6, %v1286_v18  ;;  %v1287_v34 = vmul.f32 %v5665_v5, %v904_v27  ;;  %5041 = vmatprep.mubr.msk.bf16.mxu1 %vm1714_vm2, %v1652_v17  ;;  %v1479_v21 = vadd.f32 %v5670_v6, %v1345_v9 }
 0x136   :  { %v1423_v37 = vadd.f32 %v5670_v6, %v1289_v26  ;;  %5042 = vmatmul.mubr.msk.bf16.gmra.mrb[104].mxu1 %vm1714_vm2, %v1653_v10  ;;  %v1550_v44 = vmax.f32 %v1422_v25, 0.0  ;;  %v1128_v10 = vpop.f32.mrb[39].mxu1  ;;  %v1604_v25 = vmax.f32 %v1476_v16, 0.0 }
 0x137   :  { %v1421_v41 = vadd.f32 %v5670_v6, %v1287_v34  ;;  %v1548_v50 = vmax.f32 %v1420_v32, 0.0  ;;  %v1343_v17 = vmul.f32 %v5665_v5, %v1128_v10  ;;  %v1607_v29 = vmax.f32 %v1479_v21, 0.0  ;;  %v4975_v35 = vpop.f32.mrb[40].mxu1 }
 0x138   :  { %v1551_v45 = vmax.f32 %v1423_v37, 0.0  ;;  %v1141_v43 = vpop.f32.mrb[41].mxu1 }
 0x139   :  { %v1549_v51 = vmax.f32 %v1421_v41, 0.0  ;;  %v4919_v53 = vpop.f32.mrb[48].mxu0  ;;  %v1477_v26 = vadd.f32 %v5670_v6, %v1343_v17  ;;  %v5919_v40 = vpack.c.bf16 %v1607_v29, %v1606_v20  ;;  %v1348_v41 = vmul.f32 %v4975_v35, %v5665_v5 }
 0x13a   :  { %v1655_v57 = vpack.c.bf16 %v1551_v45, %v1550_v44  ;;  %v1292_v58 = vmul.f32 %v4919_v53, %v5665_v5  ;;  %v917_v59 = vpop.f32.mrb[49].mxu0 }
 0x13b   :  { %v1654_v0 = vpack.c.bf16 %v1549_v51, %v1548_v50  ;;  %v1290_v1 = vmul.f32 %v5665_v5, %v917_v59  ;;  %v4920_v2 = vpop.f32.mrb[50].mxu0  ;;  %v1605_v34 = vmax.f32 %v1477_v26, 0.0  ;;  %v1346_v50 = vmul.f32 %v5665_v5, %v1141_v43  ;;  %v4976_v51 = vpop.f32.mrb[42].mxu1 }
 0x13c   :  { %v1426_v11 = vadd.f32 %v5670_v6, %v1292_v58  ;;  %v1293_v12 = vmul.f32 %v4920_v2, %v5665_v5  ;;  %v920_v15 = vpop.f32.mrb[51].mxu0  ;;  %v1349_v58 = vmul.f32 %v4976_v51, %v5665_v5  ;;  %v1144_v59 = vpop.f32.mrb[43].mxu1 }
 0x13d   :  { %v1424_v18 = vadd.f32 %v5670_v6, %v1290_v1  ;;  %v1291_v19 = vmul.f32 %v5665_v5, %v920_v15  ;;  %5045 = vmatprep.mubr.msk.bf16.mxu1 %vm1714_vm2, %v1654_v0  ;;  %v5923_v48 = vpack.c.bf16 %v1605_v34, %v1604_v25  ;;  %v1480_v1 = vadd.f32 %v5670_v6, %v1346_v50 }
 0x13e   :  { %v1427_v24 = vadd.f32 %v5670_v6, %v1293_v12  ;;  %5046 = vmatmul.mubr.msk.bf16.gmra.mrb[108].mxu1 %vm1714_vm2, %v1655_v57  ;;  %v1554_v31 = vmax.f32 %v1426_v11, 0.0  ;;  %v1482_v57 = vadd.f32 %v5670_v6, %v1348_v41  ;;  %v1347_v2 = vmul.f32 %v5665_v5, %v1144_v59 }
 0x13f   :  { %v1425_v27 = vadd.f32 %v5670_v6, %v1291_v19  ;;  %v1552_v36 = vmax.f32 %v1424_v18, 0.0  ;;  %v1483_v11 = vadd.f32 %v5670_v6, %v1349_v58  ;;  %v1608_v15 = vmax.f32 %v1480_v1, 0.0 }
 0x140   :  { %v1555_v32 = vmax.f32 %v1427_v24, 0.0  ;;  %v1610_v10 = vmax.f32 %v1482_v57, 0.0  ;;  %v1481_v16 = vadd.f32 %v5670_v6, %v1347_v2  ;;  %v4979_v24 = vpop.f32.mrb[44].mxu1 }
 0x141   :  { %v1553_v37 = vmax.f32 %v1425_v27, 0.0  ;;  %v4923_v38 = vpop.f32.mrb[52].mxu0  ;;  %v1611_v18 = vmax.f32 %v1483_v11, 0.0 }
 0x142   :  { %v1657_v44 = vpack.c.bf16 %v1555_v32, %v1554_v31  ;;  %v1296_v45 = vmul.f32 %v4923_v38, %v5665_v5  ;;  %v933_v47 = vpop.f32.mrb[53].mxu0  ;;  %v1609_v21 = vmax.f32 %v1481_v16, 0.0  ;;  %v1352_v31 = vmul.f32 %v4979_v24, %v5665_v5  ;;  %v1157_v32 = vpop.f32.mrb[45].mxu1 }
 0x143   :  { %v1656_v53 = vpack.c.bf16 %v1553_v37, %v1552_v36  ;;  %v1294_v55 = vmul.f32 %v5665_v5, %v933_v47  ;;  %v4924_v56 = vpop.f32.mrb[54].mxu0  ;;  %v5941_v29 = vpack.c.bf16 %v1611_v18, %v1610_v10  ;;  %v1350_v38 = vmul.f32 %v5665_v5, %v1157_v32  ;;  %v4980_v41 = vpop.f32.mrb[46].mxu1 }
 0x144   :  { %v1430_v61 = vadd.f32 %v5670_v6, %v1296_v45  ;;  %v1297_v63 = vmul.f32 %v4924_v56, %v5665_v5  ;;  %v936_v0 = vpop.f32.mrb[55].mxu0  ;;  %v5945_v37 = vpack.c.bf16 %v1609_v21, %v1608_v15  ;;  %v1486_v47 = vadd.f32 %v5670_v6, %v1352_v31  ;;  %v1160_v51 = vpop.f32.mrb[47].mxu1 }
 0x145   :  { %v1428_v7 = vadd.f32 %v5670_v6, %v1294_v55  ;;  %v1295_v9 = vmul.f32 %v5665_v5, %v936_v0  ;;  %5049 = vmatprep.mubr.msk.bf16.mxu1 %vm1714_vm2, %v1656_v53  ;;  %v1353_v50 = vmul.f32 %v4980_v41, %v5665_v5  ;;  %v1484_v57 = vadd.f32 %v5670_v6, %v1350_v38  ;;  %v4983_v16 = vpop.f32.mrb[48].mxu1  ;;  %v5979_v38 = vld [vmem:[%s7122_s3] ss:$0 sm:$0xff] }
 0x146   :  { %v1431_v12 = vadd.f32 %v5670_v6, %v1297_v63  ;;  %5050 = vmatmul.mubr.msk.bf16.gmra.mrb[112].mxu1 %vm1714_vm2, %v1657_v44  ;;  %v1558_v19 = vmax.f32 %v1430_v61, 0.0  ;;  %v1351_v58 = vmul.f32 %v5665_v5, %v1160_v51  ;;  %v1614_v63 = vmax.f32 %v1486_v47, 0.0  ;;  %v1173_v24 = vpop.f32.mrb[49].mxu1 }
 0x147   :  { %v1429_v17 = vadd.f32 %v5670_v6, %v1295_v9  ;;  %v1556_v25 = vmax.f32 %v1428_v7, 0.0  ;;  %v1487_v0 = vadd.f32 %v5670_v6, %v1353_v50  ;;  %v1612_v2 = vmax.f32 %v1484_v57, 0.0  ;;  %v4984_v32 = vpop.f32.mrb[50].mxu1 }
 0x148   :  { %v1559_v20 = vmax.f32 %v1431_v12, 0.0  ;;  %v1485_v7 = vadd.f32 %v5670_v6, %v1351_v58 }
 0x149   :  { %v1557_v26 = vmax.f32 %v1429_v17, 0.0  ;;  %v4927_v27 = vpop.f32.mrb[56].mxu0  ;;  %v1615_v10 = vmax.f32 %v1487_v0, 0.0 }
 0x14a   :  { %v1659_v34 = vpack.c.bf16 %v1559_v20, %v1558_v19  ;;  %v1300_v35 = vmul.f32 %v4927_v27, %v5665_v5  ;;  %v949_v36 = vpop.f32.mrb[57].mxu0  ;;  %v1613_v15 = vmax.f32 %v1485_v7, 0.0  ;;  %v5968_v20 = vld [vmem:[%s7121_s2] ss:$0 sm:$0xff] }
 0x14b   :  { %v1658_v43 = vpack.c.bf16 %v1557_v26, %v1556_v25  ;;  %v1298_v44 = vmul.f32 %v5665_v5, %v949_v36  ;;  %v4928_v45 = vpop.f32.mrb[58].mxu0  ;;  %v5963_v19 = vpack.c.bf16 %v1615_v10, %v1614_v63  ;;  %v1356_v21 = vmul.f32 %v5968_v20, %v4983_v16 }
 0x14c   :  { %v1434_v53 = vadd.f32 %v5670_v6, %v1300_v35  ;;  %v1301_v55 = vmul.f32 %v4928_v45, %v5665_v5  ;;  %v952_v56 = vpop.f32.mrb[59].mxu0  ;;  %v5972_v27 = vpack.c.bf16 %v1613_v15, %v1612_v2  ;;  %v1354_v31 = vmul.f32 %v5968_v20, %v1173_v24 }
 0x14d   :  { %v1432_v59 = vadd.f32 %v5670_v6, %v1298_v44  ;;  %v1299_v61 = vmul.f32 %v5665_v5, %v952_v56  ;;  %5053 = vmatprep.mubr.msk.bf16.mxu1 %vm1714_vm2, %v1658_v43  ;;  %v1490_v41 = vadd.f32 %v5979_v38, %v1356_v21  ;;  %v1357_v43 = vmul.f32 %v5968_v20, %v4984_v32  ;;  %v1176_v44 = vpop.f32.mrb[51].mxu1 }
 0x14e   :  { %v1435_v1 = vadd.f32 %v5670_v6, %v1301_v55  ;;  %5054 = vmatmul.mubr.msk.bf16.gmra.mrb[116].mxu1 %vm1714_vm2, %v1659_v34  ;;  %v1562_v11 = vmax.f32 %v1434_v53, 0.0  ;;  %v1488_v51 = vadd.f32 %v5979_v38, %v1354_v31  ;;  %v1355_v53 = vmul.f32 %v5968_v20, %v1176_v44  ;;  %v4987_v10 = vpop.f32.mrb[52].mxu1 }
 0x14f   :  { %v1433_v9 = vadd.f32 %v5670_v6, %v1299_v61  ;;  %v1560_v5 = vmax.f32 %v1432_v59, 0.0  ;;  %v1618_v57 = vmax.f32 %v1490_v41, 0.0  ;;  %v1491_v58 = vadd.f32 %v5979_v38, %v1357_v43 }
 0x150   :  { %v1563_v12 = vmax.f32 %v1435_v1, 0.0  ;;  %v1616_v61 = vmax.f32 %v1488_v51, 0.0  ;;  %v1489_v63 = vadd.f32 %v5979_v38, %v1355_v53  ;;  %v1360_v16 = vmul.f32 %v5968_v20, %v4987_v10 }
 0x151   :  { %v1561_v17 = vmax.f32 %v1433_v9, 0.0  ;;  %v4931_v18 = vpop.f32.mrb[60].mxu0  ;;  %v1619_v1 = vmax.f32 %v1491_v58, 0.0 }
 0x152   :  { %v1661_v25 = vpack.c.bf16 %v1563_v12, %v1562_v11  ;;  %v1304_v6 = vmul.f32 %v5968_v20, %v4931_v18  ;;  %v965_v26 = vpop.f32.mrb[61].mxu0  ;;  %v1617_v9 = vmax.f32 %v1489_v63, 0.0 }
 0x153   :  { %v1660_v34 = vpack.c.bf16 %v1561_v17, %v1560_v5  ;;  %v1302_v35 = vmul.f32 %v5968_v20, %v965_v26  ;;  %v4932_v36 = vpop.f32.mrb[62].mxu0  ;;  %v5995_v15 = vpack.c.bf16 %v1619_v1, %v1618_v57  ;;  %v1189_v5 = vpop.f32.mrb[53].mxu1 }
 0x154   :  { %v1438_v45 = vadd.f32 %v5979_v38, %v1304_v6  ;;  %v1305_v47 = vmul.f32 %v5968_v20, %v4932_v36  ;;  %v968_v50 = vpop.f32.mrb[63].mxu0  ;;  %v5998_v18 = vpack.c.bf16 %v1617_v9, %v1616_v61  ;;  %v1358_v21 = vmul.f32 %v5968_v20, %v1189_v5  ;;  %v4988_v24 = vpop.f32.mrb[54].mxu1 }
 0x155   :  { %v1436_v55 = vadd.f32 %v5979_v38, %v1302_v35  ;;  %v1303_v56 = vmul.f32 %v5968_v20, %v968_v50  ;;  %5057 = vmatprep.mubr.msk.bf16.mxu1 %vm1714_vm2, %v1660_v34  ;;  %v1494_v6 = vadd.f32 %v5979_v38, %v1360_v16  ;;  %v1361_v26 = vmul.f32 %v5968_v20, %v4988_v24  ;;  %v1192_v31 = vpop.f32.mrb[55].mxu1 }
 0x156   :  { %v1439_v59 = vadd.f32 %v5979_v38, %v1305_v47  ;;  %5058 = vmatmul.mubr.msk.bf16.gmra.mrb[120].mxu1 %vm1714_vm2, %v1661_v25  ;;  %v1566_v2 = vmax.f32 %v1438_v45, 0.0  ;;  %v1492_v32 = vadd.f32 %v5979_v38, %v1358_v21  ;;  %v1359_v34 = vmul.f32 %v5968_v20, %v1192_v31  ;;  %v4991_v47 = vpop.f32.mrb[56].mxu1 }
 0x157   :  { %v1437_v0 = vadd.f32 %v5979_v38, %v1303_v56  ;;  %v1564_v11 = vmax.f32 %v1436_v55, 0.0  ;;  %v1622_v35 = vmax.f32 %v1494_v6, 0.0  ;;  %v1495_v36 = vadd.f32 %v5979_v38, %v1361_v26  ;;  %v1205_v53 = vpop.f32.mrb[57].mxu1 }
 0x158   :  { %v1567_v7 = vmax.f32 %v1439_v59, 0.0  ;;  %v1620_v41 = vmax.f32 %v1492_v32, 0.0  ;;  %v1493_v43 = vadd.f32 %v5979_v38, %v1359_v34  ;;  %v1364_v51 = vmul.f32 %v5968_v20, %v4991_v47  ;;  %v4992_v57 = vpop.f32.mrb[58].mxu1 }
 0x159   :  { %v1565_v12 = vmax.f32 %v1437_v0, 0.0  ;;  %v1623_v44 = vmax.f32 %v1495_v36, 0.0  ;;  %v1362_v56 = vmul.f32 %v5968_v20, %v1205_v53  ;;  %v1365_v59 = vmul.f32 %v5968_v20, %v4992_v57  ;;  %v1208_v61 = vpop.f32.mrb[59].mxu1 }
 0x15a   :  { %v1663_v17 = vpack.c.bf16 %v1567_v7, %v1566_v2  ;;  %v1621_v45 = vmax.f32 %v1493_v43, 0.0  ;;  %v1498_v58 = vadd.f32 %v5979_v38, %v1364_v51  ;;  %v1363_v63 = vmul.f32 %v5968_v20, %v1208_v61 }
 0x15b   :  { %v1662_v25 = vpack.c.bf16 %v1565_v12, %v1564_v11  ;;  %v6011_v50 = vpack.c.bf16 %v1623_v44, %v1622_v35  ;;  %v1499_v1 = vadd.f32 %v5979_v38, %v1365_v59  ;;  %v4995_v11 = vpop.f32.mrb[60].mxu1 }
 0x15c   :  { %v6014_v55 = vpack.c.bf16 %v1621_v45, %v1620_v41  ;;  %v1626_v0 = vmax.f32 %v1498_v58, 0.0  ;;  %v1497_v7 = vadd.f32 %v5979_v38, %v1363_v63  ;;  %v1368_v16 = vmul.f32 %v5968_v20, %v4995_v11  ;;  %v1221_v5 = vpop.f32.mrb[61].mxu1 }
 0x15d   :  { %5061 = vmatprep.mubr.msk.bf16.mxu1 %vm1714_vm2, %v1662_v25  ;;  %v1627_v9 = vmax.f32 %v1499_v1, 0.0  ;;  %v1366_v21 = vmul.f32 %v5968_v20, %v1221_v5  ;;  %v4996_v24 = vpop.f32.mrb[62].mxu1 }
 0x15e   :  { %5062 = vmatmul.mubr.msk.bf16.gmra.mrb[124].mxu1 %vm1714_vm2, %v1663_v17  ;;  %v1625_v10 = vmax.f32 %v1497_v7, 0.0  ;;  %v1369_v25 = vmul.f32 %v5968_v20, %v4996_v24  ;;  %v1224_v6 = vpop.f32.mrb[63].mxu1 }
 0x15f   :  { %5065 = vmatprep.mubr.msk.bf16.mxu1 %vm1714_vm2, %v5722_v39  ;;  %v1496_v39 = vadd.f32 %v5979_v38, %v1362_v56  ;;  %v6027_v12 = vpack.c.bf16 %v1627_v9, %v1626_v0  ;;  %v1367_v26 = vmul.f32 %v5968_v20, %v1224_v6 }
 0x160   :  { %v1503_v32 = vadd.f32 %v5979_v38, %v1369_v25 }
 0x161   :  { %v1624_v2 = vmax.f32 %v1496_v39, 0.0  ;;  %v1501_v35 = vadd.f32 %v5979_v38, %v1367_v26 }
 0x162   :  { %v1631_v36 = vmax.f32 %v1503_v32, 0.0 }
 0x163   :  { %v6030_v17 = vpack.c.bf16 %v1625_v10, %v1624_v2  ;;  %v1629_v41 = vmax.f32 %v1501_v35, 0.0 }
 0x166   :  { %5066 = vmatmul.mubr.msk.bf16.gmra.mrb[128].mxu1 %vm1714_vm2, %v5718_v33  ;;  %v1502_v33 = vadd.f32 %v5979_v38, %v1368_v16 }
 0x167   :  { %5069 = vmatprep.mubr.msk.bf16.mxu1 %vm1714_vm2, %v5747_v14  ;;  %v1500_v14 = vadd.f32 %v5979_v38, %v1366_v21 }
 0x168   :  { %v1630_v31 = vmax.f32 %v1502_v33, 0.0 }
 0x169   :  { %v1628_v34 = vmax.f32 %v1500_v14, 0.0 }
 0x16a   :  { %v6043_v43 = vpack.c.bf16 %v1631_v36, %v1630_v31 }
 0x16b   :  { %v6045_v44 = vpack.c.bf16 %v1629_v41, %v1628_v34 }
 0x16e   :  { %5070 = vmatmul.mubr.msk.bf16.gmra.mrb[132].mxu1 %vm1714_vm2, %v5743_v8  ;;  %v6086_v8 = vld [vmem:[%s7123_s5] ss:$0 sm:$0xff] }
 0x16f   :  { %5073 = vmatprep.mubr.msk.bf16.mxu1 %vm1714_vm2, %v5769_v52 }
 0x176   :  { %5074 = vmatmul.mubr.msk.bf16.gmra.mrb[136].mxu1 %vm1714_vm2, %v5765_v46  ;;  %v6091_v46 = vld [vmem:[%s7124_s6] ss:$0 sm:$0xff] }
 0x177   :  { %5077 = vmatprep.mubr.msk.bf16.mxu1 %vm1714_vm2, %v5791_v28 }
 0x17e   :  { %5078 = vmatmul.mubr.msk.bf16.gmra.mrb[140].mxu1 %vm1714_vm2, %v5787_v22 }
 0x17f   :  { %5081 = vmatprep.mubr.msk.bf16.mxu1 %vm1714_vm2, %v5813_v4 }
 0x186   :  { %5082 = vmatmul.mubr.msk.bf16.gmra.mrb[144].mxu1 %vm1714_vm2, %v5809_v62 }
 0x187   :  { %5085 = vmatprep.mubr.msk.bf16.mxu1 %vm1714_vm2, %v5835_v49 }
 0x18e   :  { %5086 = vmatmul.mubr.msk.bf16.gmra.mrb[148].mxu1 %vm1714_vm2, %v5831_v42 }
 0x18f   :  { %5089 = vmatprep.mubr.msk.bf16.mxu1 %vm1714_vm2, %v5857_v30 }
 0x196   :  { %5090 = vmatmul.mubr.msk.bf16.gmra.mrb[152].mxu1 %vm1714_vm2, %v5853_v23 }
 0x197   :  { %5093 = vmatprep.mubr.msk.bf16.mxu1 %vm1714_vm2, %v5879_v13 }
 0x19e   :  { %5094 = vmatmul.mubr.msk.bf16.gmra.mrb[156].mxu1 %vm1714_vm2, %v5875_v3 }
 0x19f   :  { %5097 = vmatprep.mubr.msk.bf16.mxu1 %vm1714_vm2, %v5901_v60 }
 0x1a6   :  { %5098 = vmatmul.mubr.msk.bf16.gmra.mrb[160].mxu1 %vm1714_vm2, %v5897_v54 }
 0x1a7   :  { %5101 = vmatprep.mubr.msk.bf16.mxu1 %vm1714_vm2, %v5923_v48 }
 0x1ae   :  { %5102 = vmatmul.mubr.msk.bf16.gmra.mrb[164].mxu1 %vm1714_vm2, %v5919_v40 }
 0x1af   :  { %5105 = vmatprep.mubr.msk.bf16.mxu1 %vm1714_vm2, %v5945_v37 }
 0x1b6   :  { %5106 = vmatmul.mubr.msk.bf16.gmra.mrb[168].mxu1 %vm1714_vm2, %v5941_v29 }
 0x1b7   :  { %5109 = vmatprep.mubr.msk.bf16.mxu1 %vm1714_vm2, %v5972_v27 }
 0x1b9   :  { %v5003_v52 = vpop.f32.mrb[64].mxu1 }
 0x1ba   :  { %v2460_v22 = vmul.f32 %v5003_v52, %v6086_v8  ;;  %v1941_v28 = vpop.f32.mrb[65].mxu1 }
 0x1bb   :  { %v2458_v62 = vmul.f32 %v6086_v8, %v1941_v28  ;;  %v5004_v4 = vpop.f32.mrb[66].mxu1 }
 0x1bc   :  { %v2594_v42 = vadd.f32 %v6091_v46, %v2460_v22  ;;  %v2461_v49 = vmul.f32 %v5004_v4, %v6086_v8  ;;  %v1944_v23 = vpop.f32.mrb[67].mxu1 }
 0x1bd   :  { %v2592_v30 = vadd.f32 %v6091_v46, %v2458_v62  ;;  %v2459_v3 = vmul.f32 %v6086_v8, %v1944_v23 }
 0x1be   :  { %v2595_v13 = vadd.f32 %v6091_v46, %v2461_v49  ;;  %5110 = vmatmul.mubr.msk.bf16.gmra.mrb[172].mxu1 %vm1714_vm2, %v5963_v19  ;;  %v2722_v60 = vmax.f32 %v2594_v42, 0.0 }
 0x1bf   :  { %v2593_v54 = vadd.f32 %v6091_v46, %v2459_v3  ;;  %5113 = vmatprep.mubr.msk.bf16.mxu1 %vm1714_vm2, %v5998_v18  ;;  %v2720_v48 = vmax.f32 %v2592_v30, 0.0 }
 0x1c0   :  { %v2723_v40 = vmax.f32 %v2595_v13, 0.0 }
 0x1c1   :  { %v2721_v29 = vmax.f32 %v2593_v54, 0.0  ;;  %v5007_v37 = vpop.f32.mrb[68].mxu1 }
 0x1c2   :  { %v2849_v20 = vpack.c.bf16 %v2723_v40, %v2722_v60  ;;  %v2464_v27 = vmul.f32 %v5007_v37, %v6086_v8  ;;  %v1957_v38 = vpop.f32.mrb[69].mxu1 }
 0x1c3   :  { %v2848_v45 = vpack.c.bf16 %v2721_v29, %v2720_v48  ;;  %v2462_v47 = vmul.f32 %v6086_v8, %v1957_v38  ;;  %v5008_v51 = vpop.f32.mrb[70].mxu1 }
 0x1c4   :  { %v2598_v19 = vadd.f32 %v6091_v46, %v2464_v27  ;;  %v2465_v53 = vmul.f32 %v5008_v51, %v6086_v8  ;;  %v1960_v56 = vpop.f32.mrb[71].mxu1 }
 0x1c5   :  { %v2596_v18 = vadd.f32 %v6091_v46, %v2462_v47  ;;  %v2463_v57 = vmul.f32 %v6086_v8, %v1960_v56  ;;  %5133 = vmatprep.mubr.msk.bf16.mxu0 %vm1714_vm2, %v2848_v45 }
 0x1c6   :  { %v2599_v58 = vadd.f32 %v6091_v46, %v2465_v53  ;;  %5114 = vmatmul.mubr.msk.bf16.gmra.mrb[176].mxu1 %vm1714_vm2, %v5995_v15  ;;  %5134 = vmatmul.mubr.msk.bf16.vlgmr.msra.gmra.mrb[64].mxu0 %vm1714_vm2, %v2849_v20  ;;  %v2726_v61 = vmax.f32 %v2598_v19, 0.0 }
 0x1c7   :  { %v2597_v59 = vadd.f32 %v6091_v46, %v2463_v57  ;;  %5117 = vmatprep.mubr.msk.bf16.mxu1 %vm1714_vm2, %v6014_v55  ;;  %v2724_v63 = vmax.f32 %v2596_v18, 0.0 }
 0x1c8   :  { %v2727_v39 = vmax.f32 %v2599_v58, 0.0 }
 0x1c9   :  { %v2725_v0 = vmax.f32 %v2597_v59, 0.0  ;;  %v5011_v1 = vpop.f32.mrb[72].mxu1 }
 0x1ca   :  { %v2851_v2 = vpack.c.bf16 %v2727_v39, %v2726_v61  ;;  %v2468_v7 = vmul.f32 %v5011_v1, %v6086_v8  ;;  %v1973_v9 = vpop.f32.mrb[73].mxu1 }
 0x1cb   :  { %v2850_v10 = vpack.c.bf16 %v2725_v0, %v2724_v63  ;;  %v2466_v11 = vmul.f32 %v6086_v8, %v1973_v9  ;;  %v5012_v15 = vpop.f32.mrb[74].mxu1 }
 0x1cc   :  { %v2602_v16 = vadd.f32 %v6091_v46, %v2468_v7  ;;  %v2469_v5 = vmul.f32 %v5012_v15, %v6086_v8  ;;  %v1976_v21 = vpop.f32.mrb[75].mxu1 }
 0x1cd   :  { %v2600_v55 = vadd.f32 %v6091_v46, %v2466_v11  ;;  %v2467_v24 = vmul.f32 %v6086_v8, %v1976_v21  ;;  %5137 = vmatprep.mubr.msk.bf16.mxu0 %vm1714_vm2, %v2850_v10 }
 0x1ce   :  { %v2603_v33 = vadd.f32 %v6091_v46, %v2469_v5  ;;  %5118 = vmatmul.mubr.msk.bf16.gmra.mrb[180].mxu1 %vm1714_vm2, %v6011_v50  ;;  %5138 = vmatmul.mubr.msk.bf16.gmra.mrb[68].mxu0 %vm1714_vm2, %v2851_v2  ;;  %v2730_v6 = vmax.f32 %v2602_v16, 0.0 }
 0x1cf   :  { %v2601_v25 = vadd.f32 %v6091_v46, %v2467_v24  ;;  %5121 = vmatprep.mubr.msk.bf16.mxu1 %vm1714_vm2, %v6030_v17  ;;  %v2728_v26 = vmax.f32 %v2600_v55, 0.0 }
 0x1d0   :  { %v2731_v14 = vmax.f32 %v2603_v33, 0.0 }
 0x1d1   :  { %v2729_v31 = vmax.f32 %v2601_v25, 0.0  ;;  %v5015_v32 = vpop.f32.mrb[76].mxu1 }
 0x1d2   :  { %v2853_v34 = vpack.c.bf16 %v2731_v14, %v2730_v6  ;;  %v2472_v35 = vmul.f32 %v5015_v32, %v6086_v8  ;;  %v1989_v36 = vpop.f32.mrb[77].mxu1 }
 0x1d3   :  { %v2852_v41 = vpack.c.bf16 %v2729_v31, %v2728_v26  ;;  %v2470_v52 = vmul.f32 %v6086_v8, %v1989_v36  ;;  %v5016_v50 = vpop.f32.mrb[78].mxu1 }
 0x1d4   :  { %v2606_v22 = vadd.f32 %v6091_v46, %v2472_v35  ;;  %v2473_v28 = vmul.f32 %v5016_v50, %v6086_v8  ;;  %v1992_v62 = vpop.f32.mrb[79].mxu1 }
 0x1d5   :  { %v2604_v17 = vadd.f32 %v6091_v46, %v2470_v52  ;;  %v2471_v4 = vmul.f32 %v6086_v8, %v1992_v62  ;;  %5141 = vmatprep.mubr.msk.bf16.mxu0 %vm1714_vm2, %v2852_v41 }
 0x1d6   :  { %v2607_v42 = vadd.f32 %v6091_v46, %v2473_v28  ;;  %5122 = vmatmul.mubr.msk.bf16.gmra.mrb[184].mxu1 %vm1714_vm2, %v6027_v12  ;;  %5142 = vmatmul.mubr.msk.bf16.gmra.mrb[72].mxu0 %vm1714_vm2, %v2853_v34  ;;  %v2734_v23 = vmax.f32 %v2606_v22, 0.0 }
 0x1d7   :  { %v2605_v49 = vadd.f32 %v6091_v46, %v2471_v4  ;;  %5125 = vmatprep.mubr.msk.bf16.mxu1 %vm1714_vm2, %v6045_v44  ;;  %v2732_v3 = vmax.f32 %v2604_v17, 0.0 }
 0x1d8   :  { %v2735_v30 = vmax.f32 %v2607_v42, 0.0 }
 0x1d9   :  { %v2733_v13 = vmax.f32 %v2605_v49, 0.0  ;;  %v5019_v54 = vpop.f32.mrb[80].mxu1 }
 0x1da   :  { %v2855_v60 = vpack.c.bf16 %v2735_v30, %v2734_v23  ;;  %v2476_v40 = vmul.f32 %v5019_v54, %v6086_v8  ;;  %v2005_v48 = vpop.f32.mrb[81].mxu1 }
 0x1db   :  { %v2854_v29 = vpack.c.bf16 %v2733_v13, %v2732_v3  ;;  %v2474_v37 = vmul.f32 %v6086_v8, %v2005_v48  ;;  %v5020_v12 = vpop.f32.mrb[82].mxu1 }
 0x1dc   :  { %v2610_v20 = vadd.f32 %v6091_v46, %v2476_v40  ;;  %v2477_v27 = vmul.f32 %v5020_v12, %v6086_v8  ;;  %v2008_v38 = vpop.f32.mrb[83].mxu1 }
 0x1dd   :  { %v2608_v44 = vadd.f32 %v6091_v46, %v2474_v37  ;;  %v2475_v45 = vmul.f32 %v6086_v8, %v2008_v38  ;;  %5145 = vmatprep.mubr.msk.bf16.mxu0 %vm1714_vm2, %v2854_v29 }
 0x1de   :  { %v2611_v47 = vadd.f32 %v6091_v46, %v2477_v27  ;;  %5126 = vmatmul.mubr.msk.bf16.gmra.mrb[188].mxu1 %vm1714_vm2, %v6043_v43  ;;  %5146 = vmatmul.mubr.msk.bf16.gmra.mrb[76].mxu0 %vm1714_vm2, %v2855_v60  ;;  %v2738_v19 = vmax.f32 %v2610_v20, 0.0 }
 0x1df   :  { %v2609_v51 = vadd.f32 %v6091_v46, %v2475_v45  ;;  %v2736_v56 = vmax.f32 %v2608_v44, 0.0 }
 0x1e0   :  { %v2739_v53 = vmax.f32 %v2611_v47, 0.0 }
 0x1e1   :  { %v2737_v18 = vmax.f32 %v2609_v51, 0.0  ;;  %v5023_v57 = vpop.f32.mrb[84].mxu1 }
 0x1e2   :  { %v2857_v58 = vpack.c.bf16 %v2739_v53, %v2738_v19  ;;  %v2480_v59 = vmul.f32 %v5023_v57, %v6086_v8  ;;  %v2021_v61 = vpop.f32.mrb[85].mxu1 }
 0x1e3   :  { %v2856_v39 = vpack.c.bf16 %v2737_v18, %v2736_v56  ;;  %v2478_v63 = vmul.f32 %v6086_v8, %v2021_v61  ;;  %v5024_v0 = vpop.f32.mrb[86].mxu1 }
 0x1e4   :  { %v2614_v1 = vadd.f32 %v6091_v46, %v2480_v59  ;;  %v2481_v43 = vmul.f32 %v5024_v0, %v6086_v8  ;;  %v2024_v2 = vpop.f32.mrb[87].mxu1 }
 0x1e5   :  { %v2612_v7 = vadd.f32 %v6091_v46, %v2478_v63  ;;  %v2479_v9 = vmul.f32 %v6086_v8, %v2024_v2  ;;  %5149 = vmatprep.mubr.msk.bf16.mxu0 %vm1714_vm2, %v2856_v39 }
 0x1e6   :  { %v2615_v10 = vadd.f32 %v6091_v46, %v2481_v43  ;;  %5150 = vmatmul.mubr.msk.bf16.gmra.mrb[80].mxu0 %vm1714_vm2, %v2857_v58  ;;  %v2742_v15 = vmax.f32 %v2614_v1, 0.0 }
 0x1e7   :  { %v2613_v11 = vadd.f32 %v6091_v46, %v2479_v9  ;;  %v2740_v5 = vmax.f32 %v2612_v7, 0.0 }
 0x1e8   :  { %v2743_v16 = vmax.f32 %v2615_v10, 0.0 }
 0x1e9   :  { %v2741_v21 = vmax.f32 %v2613_v11, 0.0  ;;  %v5027_v55 = vpop.f32.mrb[88].mxu1 }
 0x1ea   :  { %v2859_v24 = vpack.c.bf16 %v2743_v16, %v2742_v15  ;;  %v2484_v33 = vmul.f32 %v5027_v55, %v6086_v8  ;;  %v2037_v25 = vpop.f32.mrb[89].mxu1 }
 0x1eb   :  { %v2858_v6 = vpack.c.bf16 %v2741_v21, %v2740_v5  ;;  %v2482_v14 = vmul.f32 %v6086_v8, %v2037_v25  ;;  %v5028_v26 = vpop.f32.mrb[90].mxu1 }
 0x1ec   :  { %v2618_v31 = vadd.f32 %v6091_v46, %v2484_v33  ;;  %v2485_v32 = vmul.f32 %v5028_v26, %v6086_v8  ;;  %v2040_v34 = vpop.f32.mrb[91].mxu1 }
 0x1ed   :  { %v2616_v35 = vadd.f32 %v6091_v46, %v2482_v14  ;;  %v2483_v36 = vmul.f32 %v6086_v8, %v2040_v34  ;;  %5153 = vmatprep.mubr.msk.bf16.mxu0 %vm1714_vm2, %v2858_v6 }
 0x1ee   :  { %v2619_v41 = vadd.f32 %v6091_v46, %v2485_v32  ;;  %5154 = vmatmul.mubr.msk.bf16.gmra.mrb[84].mxu0 %vm1714_vm2, %v2859_v24  ;;  %v2746_v50 = vmax.f32 %v2618_v31, 0.0 }
 0x1ef   :  { %v2617_v52 = vadd.f32 %v6091_v46, %v2483_v36  ;;  %v2744_v28 = vmax.f32 %v2616_v35, 0.0 }
 0x1f0   :  { %v2747_v22 = vmax.f32 %v2619_v41, 0.0 }
 0x1f1   :  { %v2745_v62 = vmax.f32 %v2617_v52, 0.0  ;;  %v5031_v17 = vpop.f32.mrb[92].mxu1 }
 0x1f2   :  { %v2861_v4 = vpack.c.bf16 %v2747_v22, %v2746_v50  ;;  %v2488_v42 = vmul.f32 %v5031_v17, %v6086_v8  ;;  %v2053_v49 = vpop.f32.mrb[93].mxu1 }
 0x1f3   :  { %v2860_v23 = vpack.c.bf16 %v2745_v62, %v2744_v28  ;;  %v2486_v30 = vmul.f32 %v6086_v8, %v2053_v49  ;;  %v5032_v3 = vpop.f32.mrb[94].mxu1 }
 0x1f4   :  { %v2622_v13 = vadd.f32 %v6091_v46, %v2488_v42  ;;  %v2489_v54 = vmul.f32 %v5032_v3, %v6086_v8  ;;  %v2056_v60 = vpop.f32.mrb[95].mxu1 }
 0x1f5   :  { %v2620_v40 = vadd.f32 %v6091_v46, %v2486_v30  ;;  %v2487_v48 = vmul.f32 %v6086_v8, %v2056_v60  ;;  %5157 = vmatprep.mubr.msk.bf16.mxu0 %vm1714_vm2, %v2860_v23 }
 0x1f6   :  { %v2623_v29 = vadd.f32 %v6091_v46, %v2489_v54  ;;  %5158 = vmatmul.mubr.msk.bf16.gmra.mrb[88].mxu0 %vm1714_vm2, %v2861_v4  ;;  %v2750_v12 = vmax.f32 %v2622_v13, 0.0 }
 0x1f7   :  { %v2621_v37 = vadd.f32 %v6091_v46, %v2487_v48  ;;  %v2748_v27 = vmax.f32 %v2620_v40, 0.0 }
 0x1f8   :  { %v2751_v20 = vmax.f32 %v2623_v29, 0.0 }
 0x1f9   :  { %v2749_v38 = vmax.f32 %v2621_v37, 0.0  ;;  %v5035_v44 = vpop.f32.mrb[96].mxu1 }
 0x1fa   :  { %v2863_v45 = vpack.c.bf16 %v2751_v20, %v2750_v12  ;;  %v2492_v47 = vmul.f32 %v5035_v44, %v6086_v8  ;;  %v2069_v51 = vpop.f32.mrb[97].mxu1 }
 0x1fb   :  { %v2862_v19 = vpack.c.bf16 %v2749_v38, %v2748_v27  ;;  %v2490_v53 = vmul.f32 %v6086_v8, %v2069_v51  ;;  %v5036_v56 = vpop.f32.mrb[98].mxu1 }
 0x1fc   :  { %v2626_v18 = vadd.f32 %v6091_v46, %v2492_v47  ;;  %v2493_v57 = vmul.f32 %v5036_v56, %v6086_v8  ;;  %v2072_v58 = vpop.f32.mrb[99].mxu1 }
 0x1fd   :  { %v2624_v59 = vadd.f32 %v6091_v46, %v2490_v53  ;;  %v2491_v61 = vmul.f32 %v6086_v8, %v2072_v58  ;;  %5161 = vmatprep.mubr.msk.bf16.mxu0 %vm1714_vm2, %v2862_v19 }
 0x1fe   :  { %v2627_v39 = vadd.f32 %v6091_v46, %v2493_v57  ;;  %5162 = vmatmul.mubr.msk.bf16.gmra.mrb[92].mxu0 %vm1714_vm2, %v2863_v45  ;;  %v2754_v0 = vmax.f32 %v2626_v18, 0.0 }
 0x1ff   :  { %v2625_v63 = vadd.f32 %v6091_v46, %v2491_v61  ;;  %v2752_v43 = vmax.f32 %v2624_v59, 0.0 }
 0x200   :  { %v2755_v1 = vmax.f32 %v2627_v39, 0.0 }
 0x201   :  { %v2753_v2 = vmax.f32 %v2625_v63, 0.0  ;;  %v5039_v7 = vpop.f32.mrb[100].mxu1 }
 0x202   :  { %v2865_v9 = vpack.c.bf16 %v2755_v1, %v2754_v0  ;;  %v2496_v10 = vmul.f32 %v5039_v7, %v6086_v8  ;;  %v2085_v11 = vpop.f32.mrb[101].mxu1 }
 0x203   :  { %v2864_v15 = vpack.c.bf16 %v2753_v2, %v2752_v43  ;;  %v2494_v16 = vmul.f32 %v6086_v8, %v2085_v11  ;;  %v5040_v5 = vpop.f32.mrb[102].mxu1 }
 0x204   :  { %v2630_v21 = vadd.f32 %v6091_v46, %v2496_v10  ;;  %v2497_v55 = vmul.f32 %v5040_v5, %v6086_v8  ;;  %v2088_v24 = vpop.f32.mrb[103].mxu1 }
 0x205   :  { %v2628_v33 = vadd.f32 %v6091_v46, %v2494_v16  ;;  %v2495_v25 = vmul.f32 %v6086_v8, %v2088_v24  ;;  %5165 = vmatprep.mubr.msk.bf16.mxu0 %vm1714_vm2, %v2864_v15 }
 0x206   :  { %v2631_v6 = vadd.f32 %v6091_v46, %v2497_v55  ;;  %5166 = vmatmul.mubr.msk.bf16.gmra.mrb[96].mxu0 %vm1714_vm2, %v2865_v9  ;;  %v2758_v26 = vmax.f32 %v2630_v21, 0.0 }
 0x207   :  { %v2629_v14 = vadd.f32 %v6091_v46, %v2495_v25  ;;  %v2756_v32 = vmax.f32 %v2628_v33, 0.0 }
 0x208   :  { %v2759_v31 = vmax.f32 %v2631_v6, 0.0 }
 0x209   :  { %v2757_v34 = vmax.f32 %v2629_v14, 0.0  ;;  %v5043_v35 = vpop.f32.mrb[104].mxu1 }
 0x20a   :  { %v2867_v36 = vpack.c.bf16 %v2759_v31, %v2758_v26  ;;  %v2500_v41 = vmul.f32 %v5043_v35, %v6086_v8  ;;  %v2101_v52 = vpop.f32.mrb[105].mxu1 }
 0x20b   :  { %v2866_v50 = vpack.c.bf16 %v2757_v34, %v2756_v32  ;;  %v2498_v22 = vmul.f32 %v6086_v8, %v2101_v52  ;;  %v5044_v28 = vpop.f32.mrb[106].mxu1 }
 0x20c   :  { %v2634_v62 = vadd.f32 %v6091_v46, %v2500_v41  ;;  %v2501_v17 = vmul.f32 %v5044_v28, %v6086_v8  ;;  %v2104_v4 = vpop.f32.mrb[107].mxu1 }
 0x20d   :  { %v2632_v42 = vadd.f32 %v6091_v46, %v2498_v22  ;;  %v2499_v49 = vmul.f32 %v6086_v8, %v2104_v4  ;;  %5169 = vmatprep.mubr.msk.bf16.mxu0 %vm1714_vm2, %v2866_v50 }
 0x20e   :  { %v2635_v23 = vadd.f32 %v6091_v46, %v2501_v17  ;;  %5170 = vmatmul.mubr.msk.bf16.gmra.mrb[100].mxu0 %vm1714_vm2, %v2867_v36  ;;  %v2762_v3 = vmax.f32 %v2634_v62, 0.0 }
 0x20f   :  { %v2633_v30 = vadd.f32 %v6091_v46, %v2499_v49  ;;  %v2760_v54 = vmax.f32 %v2632_v42, 0.0 }
 0x210   :  { %v2763_v13 = vmax.f32 %v2635_v23, 0.0 }
 0x211   :  { %v2761_v60 = vmax.f32 %v2633_v30, 0.0  ;;  %v5047_v40 = vpop.f32.mrb[108].mxu1 }
 0x212   :  { %v2869_v48 = vpack.c.bf16 %v2763_v13, %v2762_v3  ;;  %v2504_v29 = vmul.f32 %v5047_v40, %v6086_v8  ;;  %v2117_v37 = vpop.f32.mrb[109].mxu1 }
 0x213   :  { %v2868_v12 = vpack.c.bf16 %v2761_v60, %v2760_v54  ;;  %v2502_v20 = vmul.f32 %v6086_v8, %v2117_v37  ;;  %v5048_v27 = vpop.f32.mrb[110].mxu1 }
 0x214   :  { %v2638_v38 = vadd.f32 %v6091_v46, %v2504_v29  ;;  %v2505_v44 = vmul.f32 %v5048_v27, %v6086_v8  ;;  %v2120_v45 = vpop.f32.mrb[111].mxu1 }
 0x215   :  { %v2636_v47 = vadd.f32 %v6091_v46, %v2502_v20  ;;  %v2503_v51 = vmul.f32 %v6086_v8, %v2120_v45  ;;  %5173 = vmatprep.mubr.msk.bf16.mxu0 %vm1714_vm2, %v2868_v12 }
 0x216   :  { %v2639_v19 = vadd.f32 %v6091_v46, %v2505_v44  ;;  %5174 = vmatmul.mubr.msk.bf16.gmra.mrb[104].mxu0 %vm1714_vm2, %v2869_v48  ;;  %v2766_v56 = vmax.f32 %v2638_v38, 0.0 }
 0x217   :  { %v2637_v53 = vadd.f32 %v6091_v46, %v2503_v51  ;;  %v2764_v57 = vmax.f32 %v2636_v47, 0.0 }
 0x218   :  { %v2767_v18 = vmax.f32 %v2639_v19, 0.0 }
 0x219   :  { %v2765_v58 = vmax.f32 %v2637_v53, 0.0  ;;  %v5051_v59 = vpop.f32.mrb[112].mxu1 }
 0x21a   :  { %v2871_v61 = vpack.c.bf16 %v2767_v18, %v2766_v56  ;;  %v2508_v39 = vmul.f32 %v5051_v59, %v6086_v8  ;;  %v2133_v63 = vpop.f32.mrb[113].mxu1 }
 0x21b   :  { %v2870_v0 = vpack.c.bf16 %v2765_v58, %v2764_v57  ;;  %v2506_v1 = vmul.f32 %v6086_v8, %v2133_v63  ;;  %v5052_v43 = vpop.f32.mrb[114].mxu1 }
 0x21c   :  { %v2642_v2 = vadd.f32 %v6091_v46, %v2508_v39  ;;  %v2509_v7 = vmul.f32 %v5052_v43, %v6086_v8  ;;  %v2136_v9 = vpop.f32.mrb[115].mxu1 }
 0x21d   :  { %v2640_v10 = vadd.f32 %v6091_v46, %v2506_v1  ;;  %v2507_v11 = vmul.f32 %v6086_v8, %v2136_v9  ;;  %5177 = vmatprep.mubr.msk.bf16.mxu0 %vm1714_vm2, %v2870_v0 }
 0x21e   :  { %v2643_v15 = vadd.f32 %v6091_v46, %v2509_v7  ;;  %5178 = vmatmul.mubr.msk.bf16.gmra.mrb[108].mxu0 %vm1714_vm2, %v2871_v61  ;;  %v2770_v5 = vmax.f32 %v2642_v2, 0.0 }
 0x21f   :  { %v2641_v16 = vadd.f32 %v6091_v46, %v2507_v11  ;;  %v2768_v55 = vmax.f32 %v2640_v10, 0.0 }
 0x220   :  { %v2771_v21 = vmax.f32 %v2643_v15, 0.0 }
 0x221   :  { %v2769_v24 = vmax.f32 %v2641_v16, 0.0  ;;  %v5055_v33 = vpop.f32.mrb[116].mxu1 }
 0x222   :  { %v2873_v25 = vpack.c.bf16 %v2771_v21, %v2770_v5  ;;  %v2512_v6 = vmul.f32 %v5055_v33, %v6086_v8  ;;  %v2149_v14 = vpop.f32.mrb[117].mxu1 }
 0x223   :  { %v2872_v26 = vpack.c.bf16 %v2769_v24, %v2768_v55  ;;  %v2510_v31 = vmul.f32 %v6086_v8, %v2149_v14  ;;  %v5056_v32 = vpop.f32.mrb[118].mxu1 }
 0x224   :  { %v2646_v34 = vadd.f32 %v6091_v46, %v2512_v6  ;;  %v2513_v35 = vmul.f32 %v5056_v32, %v6086_v8  ;;  %v2152_v36 = vpop.f32.mrb[119].mxu1 }
 0x225   :  { %v2644_v41 = vadd.f32 %v6091_v46, %v2510_v31  ;;  %v2511_v52 = vmul.f32 %v6086_v8, %v2152_v36  ;;  %5181 = vmatprep.mubr.msk.bf16.mxu0 %vm1714_vm2, %v2872_v26 }
 0x226   :  { %v2647_v50 = vadd.f32 %v6091_v46, %v2513_v35  ;;  %5182 = vmatmul.mubr.msk.bf16.gmra.mrb[112].mxu0 %vm1714_vm2, %v2873_v25  ;;  %v2774_v28 = vmax.f32 %v2646_v34, 0.0 }
 0x227   :  { %v2645_v22 = vadd.f32 %v6091_v46, %v2511_v52  ;;  %v2772_v17 = vmax.f32 %v2644_v41, 0.0 }
 0x228   :  { %v2775_v62 = vmax.f32 %v2647_v50, 0.0 }
 0x229   :  { %v2773_v4 = vmax.f32 %v2645_v22, 0.0  ;;  %v5059_v42 = vpop.f32.mrb[120].mxu1 }
 0x22a   :  { %v2875_v49 = vpack.c.bf16 %v2775_v62, %v2774_v28  ;;  %v2516_v23 = vmul.f32 %v5059_v42, %v6086_v8  ;;  %v2165_v30 = vpop.f32.mrb[121].mxu1 }
 0x22b   :  { %v2874_v3 = vpack.c.bf16 %v2773_v4, %v2772_v17  ;;  %v2514_v13 = vmul.f32 %v6086_v8, %v2165_v30  ;;  %v5060_v54 = vpop.f32.mrb[122].mxu1 }
 0x22c   :  { %v2650_v60 = vadd.f32 %v6091_v46, %v2516_v23  ;;  %v2517_v40 = vmul.f32 %v5060_v54, %v6086_v8  ;;  %v2168_v48 = vpop.f32.mrb[123].mxu1 }
 0x22d   :  { %v2648_v29 = vadd.f32 %v6091_v46, %v2514_v13  ;;  %v2515_v37 = vmul.f32 %v6086_v8, %v2168_v48  ;;  %5185 = vmatprep.mubr.msk.bf16.mxu0 %vm1714_vm2, %v2874_v3 }
 0x22e   :  { %v2651_v12 = vadd.f32 %v6091_v46, %v2517_v40  ;;  %5186 = vmatmul.mubr.msk.bf16.gmra.mrb[116].mxu0 %vm1714_vm2, %v2875_v49  ;;  %v2778_v27 = vmax.f32 %v2650_v60, 0.0 }
 0x22f   :  { %v2649_v20 = vadd.f32 %v6091_v46, %v2515_v37  ;;  %v2776_v44 = vmax.f32 %v2648_v29, 0.0 }
 0x230   :  { %v2779_v38 = vmax.f32 %v2651_v12, 0.0 }
 0x231   :  { %v2777_v45 = vmax.f32 %v2649_v20, 0.0  ;;  %v5063_v47 = vpop.f32.mrb[124].mxu1 }
 0x232   :  { %v2877_v51 = vpack.c.bf16 %v2779_v38, %v2778_v27  ;;  %v2520_v19 = vmul.f32 %v5063_v47, %v6086_v8  ;;  %v2181_v53 = vpop.f32.mrb[125].mxu1 }
 0x233   :  { %v2876_v56 = vpack.c.bf16 %v2777_v45, %v2776_v44  ;;  %v2518_v18 = vmul.f32 %v6086_v8, %v2181_v53  ;;  %v5064_v57 = vpop.f32.mrb[126].mxu1 }
 0x234   :  { %v2654_v58 = vadd.f32 %v6091_v46, %v2520_v19  ;;  %v2521_v59 = vmul.f32 %v5064_v57, %v6086_v8  ;;  %v2184_v61 = vpop.f32.mrb[127].mxu1 }
 0x235   :  { %v2652_v39 = vadd.f32 %v6091_v46, %v2518_v18  ;;  %v2519_v63 = vmul.f32 %v6086_v8, %v2184_v61  ;;  %5189 = vmatprep.mubr.msk.bf16.mxu0 %vm1714_vm2, %v2876_v56 }
 0x236   :  { %v2655_v0 = vadd.f32 %v6091_v46, %v2521_v59  ;;  %5190 = vmatmul.mubr.msk.bf16.gmra.mrb[120].mxu0 %vm1714_vm2, %v2877_v51  ;;  %v2782_v43 = vmax.f32 %v2654_v58, 0.0 }
 0x237   :  { %v2653_v1 = vadd.f32 %v6091_v46, %v2519_v63  ;;  %v2780_v7 = vmax.f32 %v2652_v39, 0.0 }
 0x238   :  { %v2783_v2 = vmax.f32 %v2655_v0, 0.0 }
 0x239   :  { %v2781_v9 = vmax.f32 %v2653_v1, 0.0  ;;  %v5067_v10 = vpop.f32.mrb[128].mxu1 }
 0x23a   :  { %v2879_v11 = vpack.c.bf16 %v2783_v2, %v2782_v43  ;;  %v2524_v15 = vmul.f32 %v5067_v10, %v6086_v8  ;;  %v2197_v16 = vpop.f32.mrb[129].mxu1 }
 0x23b   :  { %v2878_v5 = vpack.c.bf16 %v2781_v9, %v2780_v7  ;;  %v2522_v21 = vmul.f32 %v6086_v8, %v2197_v16  ;;  %v5068_v55 = vpop.f32.mrb[130].mxu1 }
 0x23c   :  { %v2658_v24 = vadd.f32 %v6091_v46, %v2524_v15  ;;  %v2525_v33 = vmul.f32 %v5068_v55, %v6086_v8  ;;  %v2200_v25 = vpop.f32.mrb[131].mxu1 }
 0x23d   :  { %v2656_v6 = vadd.f32 %v6091_v46, %v2522_v21  ;;  %v2523_v14 = vmul.f32 %v6086_v8, %v2200_v25  ;;  %5193 = vmatprep.mubr.msk.bf16.mxu0 %vm1714_vm2, %v2878_v5 }
 0x23e   :  { %v2659_v26 = vadd.f32 %v6091_v46, %v2525_v33  ;;  %5194 = vmatmul.mubr.msk.bf16.gmra.mrb[124].mxu0 %vm1714_vm2, %v2879_v11  ;;  %v2786_v32 = vmax.f32 %v2658_v24, 0.0 }
 0x23f   :  { %v2657_v31 = vadd.f32 %v6091_v46, %v2523_v14  ;;  %v2784_v35 = vmax.f32 %v2656_v6, 0.0 }
 0x240   :  { %v2787_v34 = vmax.f32 %v2659_v26, 0.0 }
 0x241   :  { %v2785_v36 = vmax.f32 %v2657_v31, 0.0  ;;  %v5071_v41 = vpop.f32.mrb[132].mxu1 }
 0x242   :  { %v2881_v52 = vpack.c.bf16 %v2787_v34, %v2786_v32  ;;  %v2528_v50 = vmul.f32 %v5071_v41, %v6086_v8  ;;  %v2213_v22 = vpop.f32.mrb[133].mxu1 }
 0x243   :  { %v2880_v28 = vpack.c.bf16 %v2785_v36, %v2784_v35  ;;  %v2526_v62 = vmul.f32 %v6086_v8, %v2213_v22  ;;  %v5072_v17 = vpop.f32.mrb[134].mxu1 }
 0x244   :  { %v2662_v4 = vadd.f32 %v6091_v46, %v2528_v50  ;;  %v2529_v42 = vmul.f32 %v5072_v17, %v6086_v8  ;;  %v2216_v49 = vpop.f32.mrb[135].mxu1 }
 0x245   :  { %v2660_v23 = vadd.f32 %v6091_v46, %v2526_v62  ;;  %v2527_v30 = vmul.f32 %v6086_v8, %v2216_v49  ;;  %5197 = vmatprep.mubr.msk.bf16.mxu0 %vm1714_vm2, %v2880_v28 }
 0x246   :  { %v2663_v3 = vadd.f32 %v6091_v46, %v2529_v42  ;;  %5198 = vmatmul.mubr.msk.bf16.gmra.mrb[128].mxu0 %vm1714_vm2, %v2881_v52  ;;  %v2790_v54 = vmax.f32 %v2662_v4, 0.0 }
 0x247   :  { %v2661_v13 = vadd.f32 %v6091_v46, %v2527_v30  ;;  %v2788_v40 = vmax.f32 %v2660_v23, 0.0 }
 0x248   :  { %v2791_v60 = vmax.f32 %v2663_v3, 0.0 }
 0x249   :  { %v2789_v48 = vmax.f32 %v2661_v13, 0.0  ;;  %v5075_v29 = vpop.f32.mrb[136].mxu1 }
 0x24a   :  { %v2883_v37 = vpack.c.bf16 %v2791_v60, %v2790_v54  ;;  %v2532_v12 = vmul.f32 %v5075_v29, %v6086_v8  ;;  %v2229_v20 = vpop.f32.mrb[137].mxu1 }
 0x24b   :  { %v2882_v27 = vpack.c.bf16 %v2789_v48, %v2788_v40  ;;  %v2530_v38 = vmul.f32 %v6086_v8, %v2229_v20  ;;  %v5076_v44 = vpop.f32.mrb[138].mxu1 }
 0x24c   :  { %v2666_v45 = vadd.f32 %v6091_v46, %v2532_v12  ;;  %v2533_v47 = vmul.f32 %v5076_v44, %v6086_v8  ;;  %v2232_v51 = vpop.f32.mrb[139].mxu1 }
 0x24d   :  { %v2664_v19 = vadd.f32 %v6091_v46, %v2530_v38  ;;  %v2531_v53 = vmul.f32 %v6086_v8, %v2232_v51  ;;  %5201 = vmatprep.mubr.msk.bf16.mxu0 %vm1714_vm2, %v2882_v27 }
 0x24e   :  { %v2667_v56 = vadd.f32 %v6091_v46, %v2533_v47  ;;  %5202 = vmatmul.mubr.msk.bf16.gmra.mrb[132].mxu0 %vm1714_vm2, %v2883_v37  ;;  %v2794_v57 = vmax.f32 %v2666_v45, 0.0 }
 0x24f   :  { %v2665_v18 = vadd.f32 %v6091_v46, %v2531_v53  ;;  %v2792_v59 = vmax.f32 %v2664_v19, 0.0 }
 0x250   :  { %v2795_v58 = vmax.f32 %v2667_v56, 0.0 }
 0x251   :  { %v2793_v61 = vmax.f32 %v2665_v18, 0.0  ;;  %v5079_v39 = vpop.f32.mrb[140].mxu1 }
 0x252   :  { %v2885_v63 = vpack.c.bf16 %v2795_v58, %v2794_v57  ;;  %v2536_v0 = vmul.f32 %v5079_v39, %v6086_v8  ;;  %v2245_v1 = vpop.f32.mrb[141].mxu1 }
 0x253   :  { %v2884_v43 = vpack.c.bf16 %v2793_v61, %v2792_v59  ;;  %v2534_v2 = vmul.f32 %v6086_v8, %v2245_v1  ;;  %v5080_v7 = vpop.f32.mrb[142].mxu1 }
 0x254   :  { %v2670_v9 = vadd.f32 %v6091_v46, %v2536_v0  ;;  %v2537_v10 = vmul.f32 %v5080_v7, %v6086_v8  ;;  %v2248_v11 = vpop.f32.mrb[143].mxu1 }
 0x255   :  { %v2668_v15 = vadd.f32 %v6091_v46, %v2534_v2  ;;  %v2535_v16 = vmul.f32 %v6086_v8, %v2248_v11  ;;  %5205 = vmatprep.mubr.msk.bf16.mxu0 %vm1714_vm2, %v2884_v43 }
 0x256   :  { %v2671_v5 = vadd.f32 %v6091_v46, %v2537_v10  ;;  %5206 = vmatmul.mubr.msk.bf16.gmra.mrb[136].mxu0 %vm1714_vm2, %v2885_v63  ;;  %v2798_v55 = vmax.f32 %v2670_v9, 0.0 }
 0x257   :  { %v2669_v21 = vadd.f32 %v6091_v46, %v2535_v16  ;;  %v2796_v33 = vmax.f32 %v2668_v15, 0.0 }
 0x258   :  { %v2799_v24 = vmax.f32 %v2671_v5, 0.0 }
 0x259   :  { %v2797_v25 = vmax.f32 %v2669_v21, 0.0  ;;  %v5083_v6 = vpop.f32.mrb[144].mxu1 }
 0x25a   :  { %v2887_v14 = vpack.c.bf16 %v2799_v24, %v2798_v55  ;;  %v2540_v26 = vmul.f32 %v5083_v6, %v6086_v8  ;;  %v2261_v31 = vpop.f32.mrb[145].mxu1 }
 0x25b   :  { %v2886_v32 = vpack.c.bf16 %v2797_v25, %v2796_v33  ;;  %v2538_v34 = vmul.f32 %v6086_v8, %v2261_v31  ;;  %v5084_v35 = vpop.f32.mrb[146].mxu1 }
 0x25c   :  { %v2674_v36 = vadd.f32 %v6091_v46, %v2540_v26  ;;  %v2541_v41 = vmul.f32 %v5084_v35, %v6086_v8  ;;  %v2264_v52 = vpop.f32.mrb[147].mxu1 }
 0x25d   :  { %v2672_v50 = vadd.f32 %v6091_v46, %v2538_v34  ;;  %v2539_v22 = vmul.f32 %v6086_v8, %v2264_v52  ;;  %5209 = vmatprep.mubr.msk.bf16.mxu0 %vm1714_vm2, %v2886_v32 }
 0x25e   :  { %v2675_v28 = vadd.f32 %v6091_v46, %v2541_v41  ;;  %5210 = vmatmul.mubr.msk.bf16.gmra.mrb[140].mxu0 %vm1714_vm2, %v2887_v14  ;;  %v2802_v17 = vmax.f32 %v2674_v36, 0.0 }
 0x25f   :  { %v2673_v62 = vadd.f32 %v6091_v46, %v2539_v22  ;;  %v2800_v42 = vmax.f32 %v2672_v50, 0.0 }
 0x260   :  { %v2803_v4 = vmax.f32 %v2675_v28, 0.0 }
 0x261   :  { %v2801_v49 = vmax.f32 %v2673_v62, 0.0  ;;  %v5087_v23 = vpop.f32.mrb[148].mxu1 }
 0x262   :  { %v2889_v30 = vpack.c.bf16 %v2803_v4, %v2802_v17  ;;  %v2544_v3 = vmul.f32 %v5087_v23, %v6086_v8  ;;  %v2277_v13 = vpop.f32.mrb[149].mxu1 }
 0x263   :  { %v2888_v54 = vpack.c.bf16 %v2801_v49, %v2800_v42  ;;  %v2542_v60 = vmul.f32 %v6086_v8, %v2277_v13  ;;  %v5088_v40 = vpop.f32.mrb[150].mxu1 }
 0x264   :  { %v2678_v48 = vadd.f32 %v6091_v46, %v2544_v3  ;;  %v2545_v29 = vmul.f32 %v5088_v40, %v6086_v8  ;;  %v2280_v37 = vpop.f32.mrb[151].mxu1 }
 0x265   :  { %v2676_v12 = vadd.f32 %v6091_v46, %v2542_v60  ;;  %v2543_v20 = vmul.f32 %v6086_v8, %v2280_v37  ;;  %5213 = vmatprep.mubr.msk.bf16.mxu0 %vm1714_vm2, %v2888_v54 }
 0x266   :  { %v2679_v27 = vadd.f32 %v6091_v46, %v2545_v29  ;;  %5214 = vmatmul.mubr.msk.bf16.gmra.mrb[144].mxu0 %vm1714_vm2, %v2889_v30  ;;  %v2806_v44 = vmax.f32 %v2678_v48, 0.0 }
 0x267   :  { %v2677_v38 = vadd.f32 %v6091_v46, %v2543_v20  ;;  %v2804_v47 = vmax.f32 %v2676_v12, 0.0 }
 0x268   :  { %v2807_v45 = vmax.f32 %v2679_v27, 0.0 }
 0x269   :  { %v2805_v51 = vmax.f32 %v2677_v38, 0.0  ;;  %v5091_v19 = vpop.f32.mrb[152].mxu1 }
 0x26a   :  { %v2891_v53 = vpack.c.bf16 %v2807_v45, %v2806_v44  ;;  %v2548_v56 = vmul.f32 %v5091_v19, %v6086_v8  ;;  %v2293_v18 = vpop.f32.mrb[153].mxu1  ;;  %v6363_v45 = vld [vmem:[%s7123_s5] ss:$0 sm:$0xff] }
 0x26b   :  { %v2890_v57 = vpack.c.bf16 %v2805_v51, %v2804_v47  ;;  %v2546_v58 = vmul.f32 %v6086_v8, %v2293_v18  ;;  %v5092_v59 = vpop.f32.mrb[154].mxu1 }
 0x26c   :  { %v2682_v61 = vadd.f32 %v6091_v46, %v2548_v56  ;;  %v2549_v39 = vmul.f32 %v5092_v59, %v6086_v8  ;;  %v2296_v63 = vpop.f32.mrb[155].mxu1 }
 0x26d   :  { %v2680_v0 = vadd.f32 %v6091_v46, %v2546_v58  ;;  %v2547_v1 = vmul.f32 %v6086_v8, %v2296_v63  ;;  %5217 = vmatprep.mubr.msk.bf16.mxu0 %vm1714_vm2, %v2890_v57 }
 0x26e   :  { %v2683_v43 = vadd.f32 %v6091_v46, %v2549_v39  ;;  %5218 = vmatmul.mubr.msk.bf16.gmra.mrb[148].mxu0 %vm1714_vm2, %v2891_v53  ;;  %v2810_v7 = vmax.f32 %v2682_v61, 0.0 }
 0x26f   :  { %v2681_v2 = vadd.f32 %v6091_v46, %v2547_v1  ;;  %v2808_v10 = vmax.f32 %v2680_v0, 0.0 }
 0x270   :  { %v2811_v9 = vmax.f32 %v2683_v43, 0.0 }
 0x271   :  { %v2809_v11 = vmax.f32 %v2681_v2, 0.0  ;;  %v5095_v15 = vpop.f32.mrb[156].mxu1 }
 0x272   :  { %v2893_v16 = vpack.c.bf16 %v2811_v9, %v2810_v7  ;;  %v2552_v5 = vmul.f32 %v5095_v15, %v6086_v8  ;;  %v2309_v21 = vpop.f32.mrb[157].mxu1 }
 0x273   :  { %v2892_v55 = vpack.c.bf16 %v2809_v11, %v2808_v10  ;;  %v2550_v24 = vmul.f32 %v6086_v8, %v2309_v21  ;;  %v5096_v33 = vpop.f32.mrb[158].mxu1 }
 0x274   :  { %v2686_v25 = vadd.f32 %v6091_v46, %v2552_v5  ;;  %v2553_v6 = vmul.f32 %v5096_v33, %v6086_v8  ;;  %v2312_v14 = vpop.f32.mrb[159].mxu1 }
 0x275   :  { %v2684_v26 = vadd.f32 %v6091_v46, %v2550_v24  ;;  %v2551_v31 = vmul.f32 %v6086_v8, %v2312_v14  ;;  %5221 = vmatprep.mubr.msk.bf16.mxu0 %vm1714_vm2, %v2892_v55 }
 0x276   :  { %v2687_v32 = vadd.f32 %v6091_v46, %v2553_v6  ;;  %5222 = vmatmul.mubr.msk.bf16.gmra.mrb[152].mxu0 %vm1714_vm2, %v2893_v16  ;;  %v2814_v35 = vmax.f32 %v2686_v25, 0.0 }
 0x277   :  { %v2685_v34 = vadd.f32 %v6091_v46, %v2551_v31  ;;  %v2812_v41 = vmax.f32 %v2684_v26, 0.0 }
 0x278   :  { %v2815_v36 = vmax.f32 %v2687_v32, 0.0 }
 0x279   :  { %v2813_v52 = vmax.f32 %v2685_v34, 0.0  ;;  %v5099_v50 = vpop.f32.mrb[160].mxu1 }
 0x27a   :  { %v2895_v22 = vpack.c.bf16 %v2815_v36, %v2814_v35  ;;  %v2556_v28 = vmul.f32 %v5099_v50, %v6086_v8  ;;  %v2325_v62 = vpop.f32.mrb[161].mxu1 }
 0x27b   :  { %v2894_v17 = vpack.c.bf16 %v2813_v52, %v2812_v41  ;;  %v2554_v4 = vmul.f32 %v6086_v8, %v2325_v62  ;;  %v5100_v42 = vpop.f32.mrb[162].mxu1 }
 0x27c   :  { %v2690_v49 = vadd.f32 %v6091_v46, %v2556_v28  ;;  %v2557_v23 = vmul.f32 %v5100_v42, %v6086_v8  ;;  %v2328_v30 = vpop.f32.mrb[163].mxu1 }
 0x27d   :  { %v2688_v3 = vadd.f32 %v6091_v46, %v2554_v4  ;;  %v2555_v13 = vmul.f32 %v6086_v8, %v2328_v30  ;;  %5225 = vmatprep.mubr.msk.bf16.mxu0 %vm1714_vm2, %v2894_v17 }
 0x27e   :  { %v2691_v54 = vadd.f32 %v6091_v46, %v2557_v23  ;;  %5226 = vmatmul.mubr.msk.bf16.gmra.mrb[156].mxu0 %vm1714_vm2, %v2895_v22  ;;  %v2818_v40 = vmax.f32 %v2690_v49, 0.0 }
 0x27f   :  { %v2689_v60 = vadd.f32 %v6091_v46, %v2555_v13  ;;  %v2816_v29 = vmax.f32 %v2688_v3, 0.0  ;;  %v6369_v46 = vld [vmem:[%s7124_s6] ss:$0 sm:$0xff] }
 0x280   :  { %v2819_v48 = vmax.f32 %v2691_v54, 0.0 }
 0x281   :  { %v2817_v37 = vmax.f32 %v2689_v60, 0.0  ;;  %v5103_v12 = vpop.f32.mrb[164].mxu1 }
 0x282   :  { %v2897_v20 = vpack.c.bf16 %v2819_v48, %v2818_v40  ;;  %v2560_v27 = vmul.f32 %v5103_v12, %v6086_v8  ;;  %v2341_v38 = vpop.f32.mrb[165].mxu1 }
 0x283   :  { %v2896_v44 = vpack.c.bf16 %v2817_v37, %v2816_v29  ;;  %v2558_v47 = vmul.f32 %v6363_v45, %v2341_v38  ;;  %v5104_v51 = vpop.f32.mrb[166].mxu1 }
 0x284   :  { %v2694_v19 = vadd.f32 %v6369_v46, %v2560_v27  ;;  %v2561_v53 = vmul.f32 %v6363_v45, %v5104_v51  ;;  %v2344_v8 = vpop.f32.mrb[167].mxu1 }
 0x285   :  { %v2692_v56 = vadd.f32 %v6369_v46, %v2558_v47  ;;  %v2559_v18 = vmul.f32 %v6363_v45, %v2344_v8  ;;  %5229 = vmatprep.mubr.msk.bf16.mxu0 %vm1714_vm2, %v2896_v44 }
 0x286   :  { %v2695_v57 = vadd.f32 %v6369_v46, %v2561_v53  ;;  %5230 = vmatmul.mubr.msk.bf16.gmra.mrb[160].mxu0 %vm1714_vm2, %v2897_v20  ;;  %v2822_v59 = vmax.f32 %v2694_v19, 0.0 }
 0x287   :  { %v2693_v58 = vadd.f32 %v6369_v46, %v2559_v18  ;;  %v2820_v39 = vmax.f32 %v2692_v56, 0.0 }
 0x288   :  { %v2823_v61 = vmax.f32 %v2695_v57, 0.0 }
 0x289   :  { %v2821_v63 = vmax.f32 %v2693_v58, 0.0  ;;  %v5107_v0 = vpop.f32.mrb[168].mxu1 }
 0x28a   :  { %v2899_v1 = vpack.c.bf16 %v2823_v61, %v2822_v59  ;;  %v2564_v43 = vmul.f32 %v6363_v45, %v5107_v0  ;;  %v2357_v2 = vpop.f32.mrb[169].mxu1 }
 0x28b   :  { %v2898_v7 = vpack.c.bf16 %v2821_v63, %v2820_v39  ;;  %v2562_v9 = vmul.f32 %v6363_v45, %v2357_v2  ;;  %v5108_v10 = vpop.f32.mrb[170].mxu1 }
 0x28c   :  { %v2698_v11 = vadd.f32 %v6369_v46, %v2564_v43  ;;  %v2565_v15 = vmul.f32 %v6363_v45, %v5108_v10  ;;  %v2360_v16 = vpop.f32.mrb[171].mxu1 }
 0x28d   :  { %v2696_v5 = vadd.f32 %v6369_v46, %v2562_v9  ;;  %v2563_v21 = vmul.f32 %v6363_v45, %v2360_v16  ;;  %5233 = vmatprep.mubr.msk.bf16.mxu0 %vm1714_vm2, %v2898_v7 }
 0x28e   :  { %v2699_v55 = vadd.f32 %v6369_v46, %v2565_v15  ;;  %5234 = vmatmul.mubr.msk.bf16.gmra.mrb[164].mxu0 %vm1714_vm2, %v2899_v1  ;;  %v2826_v33 = vmax.f32 %v2698_v11, 0.0 }
 0x28f   :  { %v2697_v24 = vadd.f32 %v6369_v46, %v2563_v21  ;;  %v2824_v6 = vmax.f32 %v2696_v5, 0.0 }
 0x290   :  { %v2827_v25 = vmax.f32 %v2699_v55, 0.0 }
 0x291   :  { %v2825_v14 = vmax.f32 %v2697_v24, 0.0  ;;  %v5111_v26 = vpop.f32.mrb[172].mxu1 }
 0x292   :  { %v2901_v31 = vpack.c.bf16 %v2827_v25, %v2826_v33  ;;  %v2568_v32 = vmul.f32 %v6363_v45, %v5111_v26  ;;  %v2373_v34 = vpop.f32.mrb[173].mxu1 }
 0x293   :  { %v2900_v35 = vpack.c.bf16 %v2825_v14, %v2824_v6  ;;  %v2566_v36 = vmul.f32 %v6363_v45, %v2373_v34  ;;  %v5112_v41 = vpop.f32.mrb[174].mxu1 }
 0x294   :  { %v2702_v52 = vadd.f32 %v6369_v46, %v2568_v32  ;;  %v2569_v50 = vmul.f32 %v6363_v45, %v5112_v41  ;;  %v2376_v22 = vpop.f32.mrb[175].mxu1 }
 0x295   :  { %v2700_v28 = vadd.f32 %v6369_v46, %v2566_v36  ;;  %v2567_v62 = vmul.f32 %v6363_v45, %v2376_v22  ;;  %5237 = vmatprep.mubr.msk.bf16.mxu0 %vm1714_vm2, %v2900_v35 }
 0x296   :  { %v2703_v17 = vadd.f32 %v6369_v46, %v2569_v50  ;;  %5238 = vmatmul.mubr.msk.bf16.gmra.mrb[168].mxu0 %vm1714_vm2, %v2901_v31  ;;  %v2830_v42 = vmax.f32 %v2702_v52, 0.0 }
 0x297   :  { %v2701_v4 = vadd.f32 %v6369_v46, %v2567_v62  ;;  %v2828_v23 = vmax.f32 %v2700_v28, 0.0 }
 0x298   :  { %v2831_v49 = vmax.f32 %v2703_v17, 0.0 }
 0x299   :  { %v2829_v30 = vmax.f32 %v2701_v4, 0.0  ;;  %v5115_v3 = vpop.f32.mrb[176].mxu1  ;;  %v6399_v13 = vpop.f32.mrb[64].mxu0 }
 0x29a   :  { %v2903_v54 = vpack.c.bf16 %v2831_v49, %v2830_v42  ;;  %v2572_v60 = vmul.f32 %v6363_v45, %v5115_v3  ;;  %v2389_v40 = vpop.f32.mrb[177].mxu1  ;;  %v6402_v48 = vpop.f32.mrb[65].mxu0 }
 0x29b   :  { %v2902_v29 = vpack.c.bf16 %v2829_v30, %v2828_v23  ;;  %v2570_v37 = vmul.f32 %v6363_v45, %v2389_v40  ;;  %v5116_v12 = vpop.f32.mrb[178].mxu1  ;;  %v6405_v20 = vpop.f32.mrb[66].mxu0 }
 0x29c   :  { %v2706_v27 = vadd.f32 %v6369_v46, %v2572_v60  ;;  %v2573_v38 = vmul.f32 %v6363_v45, %v5116_v12  ;;  %v2392_v44 = vpop.f32.mrb[179].mxu1  ;;  %v6409_v47 = vpop.f32.mrb[67].mxu0 }
 0x29d   :  { %v2704_v51 = vadd.f32 %v6369_v46, %v2570_v37  ;;  %v2571_v19 = vmul.f32 %v6363_v45, %v2392_v44  ;;  %5241 = vmatprep.mubr.msk.bf16.mxu0 %vm1714_vm2, %v2902_v29 }
 0x29e   :  { %v2707_v53 = vadd.f32 %v6369_v46, %v2573_v38  ;;  %5242 = vmatmul.mubr.msk.bf16.gmra.mrb[172].mxu0 %vm1714_vm2, %v2903_v54  ;;  %v2834_v56 = vmax.f32 %v2706_v27, 0.0 }
 0x29f   :  { %v2705_v8 = vadd.f32 %v6369_v46, %v2571_v19  ;;  %v2832_v57 = vmax.f32 %v2704_v51, 0.0  ;;  %v6461_v51 = vld [vmem:[%s7125_s8] ss:$0 sm:$0xff] }
 0x2a0   :  { %v2835_v18 = vmax.f32 %v2707_v53, 0.0 }
 0x2a1   :  { %v2833_v58 = vmax.f32 %v2705_v8, 0.0  ;;  %v5119_v59 = vpop.f32.mrb[180].mxu1  ;;  %v6417_v61 = vpop.f32.mrb[68].mxu0 }
 0x2a2   :  { %v2905_v39 = vpack.c.bf16 %v2835_v18, %v2834_v56  ;;  %v2576_v63 = vmul.f32 %v6363_v45, %v5119_v59  ;;  %v2405_v0 = vpop.f32.mrb[181].mxu1  ;;  %v6420_v1 = vpop.f32.mrb[69].mxu0 }
 0x2a3   :  { %v2904_v43 = vpack.c.bf16 %v2833_v58, %v2832_v57  ;;  %v2574_v2 = vmul.f32 %v6363_v45, %v2405_v0  ;;  %v5120_v7 = vpop.f32.mrb[182].mxu1  ;;  %v6423_v9 = vpop.f32.mrb[70].mxu0  ;;  %v3675_v0 = vmul.f32 %v6399_v13, %v6461_v51  ;;  %v3674_v13 = vmul.f32 %v6461_v51, %v6409_v47 }
 0x2a4   :  { %v2710_v10 = vadd.f32 %v6369_v46, %v2576_v63  ;;  %v2577_v11 = vmul.f32 %v6363_v45, %v5120_v7  ;;  %v2408_v15 = vpop.f32.mrb[183].mxu1  ;;  %v6427_v16 = vpop.f32.mrb[71].mxu0  ;;  %v3673_v7 = vmul.f32 %v6461_v51, %v6402_v48 }
 0x2a5   :  { %v2708_v5 = vadd.f32 %v6369_v46, %v2574_v2  ;;  %v2575_v21 = vmul.f32 %v6363_v45, %v2408_v15  ;;  %5245 = vmatprep.mubr.msk.bf16.mxu0 %vm1714_vm2, %v2904_v43  ;;  %v6480_v2 = vld [vmem:[%s7126_s9] ss:$0 sm:$0xff] }
 0x2a6   :  { %v2711_v55 = vadd.f32 %v6369_v46, %v2577_v11  ;;  %5246 = vmatmul.mubr.msk.bf16.gmra.mrb[176].mxu0 %vm1714_vm2, %v2905_v39  ;;  %v2838_v33 = vmax.f32 %v2710_v10, 0.0  ;;  %v3807_v48 = vadd.f32 %v6480_v2, %v3673_v7 }
 0x2a7   :  { %v2709_v24 = vadd.f32 %v6369_v46, %v2575_v21  ;;  %v2836_v6 = vmax.f32 %v2708_v5, 0.0 }
 0x2a8   :  { %v2839_v25 = vmax.f32 %v2711_v55, 0.0 }
 0x2a9   :  { %v2837_v14 = vmax.f32 %v2709_v24, 0.0  ;;  %v5123_v26 = vpop.f32.mrb[184].mxu1  ;;  %v6435_v31 = vpop.f32.mrb[72].mxu0  ;;  %v3809_v24 = vadd.f32 %v6480_v2, %v3675_v0 }
 0x2aa   :  { %v2907_v32 = vpack.c.bf16 %v2839_v25, %v2838_v33  ;;  %v2580_v34 = vmul.f32 %v6363_v45, %v5123_v26  ;;  %v2421_v35 = vpop.f32.mrb[185].mxu1  ;;  %v6438_v36 = vpop.f32.mrb[73].mxu0 }
 0x2ab   :  { %v2906_v41 = vpack.c.bf16 %v2837_v14, %v2836_v6  ;;  %v2578_v52 = vmul.f32 %v6363_v45, %v2421_v35  ;;  %v5124_v50 = vpop.f32.mrb[186].mxu1  ;;  %v6441_v22 = vpop.f32.mrb[74].mxu0  ;;  %v3808_v35 = vadd.f32 %v6480_v2, %v3674_v13 }
 0x2ac   :  { %v2714_v28 = vadd.f32 %v6369_v46, %v2580_v34  ;;  %v2581_v62 = vmul.f32 %v6363_v45, %v5124_v50  ;;  %v2424_v17 = vpop.f32.mrb[187].mxu1  ;;  %v6445_v4 = vpop.f32.mrb[75].mxu0  ;;  %v3937_v50 = vmax.f32 %v3809_v24, 0.0 }
 0x2ad   :  { %v2712_v42 = vadd.f32 %v6369_v46, %v2578_v52  ;;  %v2579_v49 = vmul.f32 %v6363_v45, %v2424_v17  ;;  %5249 = vmatprep.mubr.msk.bf16.mxu0 %vm1714_vm2, %v2906_v41 }
 0x2ae   :  { %v2715_v23 = vadd.f32 %v6369_v46, %v2581_v62  ;;  %5250 = vmatmul.mubr.msk.bf16.gmra.mrb[180].mxu0 %vm1714_vm2, %v2907_v32  ;;  %v2842_v3 = vmax.f32 %v2714_v28, 0.0  ;;  %v3679_v28 = vmul.f32 %v6417_v61, %v6461_v51  ;;  %v3936_v61 = vmax.f32 %v3808_v35, 0.0 }
 0x2af   :  { %v2713_v30 = vadd.f32 %v6369_v46, %v2579_v49  ;;  %v2840_v60 = vmax.f32 %v2712_v42, 0.0  ;;  %v3935_v42 = vmax.f32 %v3807_v48, 0.0  ;;  %v3677_v49 = vmul.f32 %v6461_v51, %v6420_v1 }
 0x2b0   :  { %v2843_v54 = vmax.f32 %v2715_v23, 0.0  ;;  %v3813_v1 = vadd.f32 %v6480_v2, %v3679_v28 }
 0x2b1   :  { %v2841_v40 = vmax.f32 %v2713_v30, 0.0  ;;  %v5127_v29 = vpop.f32.mrb[188].mxu1  ;;  %v6453_v37 = vpop.f32.mrb[76].mxu0 }
 0x2b2   :  { %v2909_v12 = vpack.c.bf16 %v2843_v54, %v2842_v3  ;;  %v2584_v27 = vmul.f32 %v6363_v45, %v5127_v29  ;;  %v2437_v38 = vpop.f32.mrb[189].mxu1  ;;  %v6456_v44 = vpop.f32.mrb[77].mxu0  ;;  %v3680_v54 = vmul.f32 %v6423_v9, %v6461_v51  ;;  %v3678_v29 = vmul.f32 %v6461_v51, %v6427_v16 }
 0x2b3   :  { %v2908_v19 = vpack.c.bf16 %v2841_v40, %v2840_v60  ;;  %v2582_v53 = vmul.f32 %v6363_v45, %v2437_v38  ;;  %v5128_v8 = vpop.f32.mrb[190].mxu1  ;;  %v6464_v56 = vpop.f32.mrb[78].mxu0  ;;  %v3811_v9 = vadd.f32 %v6480_v2, %v3677_v49 }
 0x2b4   :  { %v2718_v18 = vadd.f32 %v6369_v46, %v2584_v27  ;;  %v2585_v57 = vmul.f32 %v6363_v45, %v5128_v8  ;;  %v2440_v58 = vpop.f32.mrb[191].mxu1  ;;  %v6468_v59 = vpop.f32.mrb[79].mxu0  ;;  %v3814_v16 = vadd.f32 %v6480_v2, %v3680_v54 }
 0x2b5   :  { %v2716_v39 = vadd.f32 %v6369_v46, %v2582_v53  ;;  %v2583_v63 = vmul.f32 %v6363_v45, %v2440_v58  ;;  %5253 = vmatprep.mubr.msk.bf16.mxu0 %vm1714_vm2, %v2908_v19  ;;  %v3676_v45 = vmul.f32 %v6405_v20, %v6461_v51 }
 0x2b6   :  { %v2719_v43 = vadd.f32 %v6369_v46, %v2585_v57  ;;  %5254 = vmatmul.mubr.msk.bf16.gmra.mrb[184].mxu0 %vm1714_vm2, %v2909_v12  ;;  %v2846_v11 = vmax.f32 %v2718_v18, 0.0 }
 0x2b7   :  { %v2717_v10 = vadd.f32 %v6369_v46, %v2583_v63  ;;  %v2844_v5 = vmax.f32 %v2716_v39, 0.0  ;;  %v3810_v26 = vadd.f32 %v6480_v2, %v3676_v45  ;;  %v3941_v45 = vmax.f32 %v3813_v1, 0.0 }
 0x2b8   :  { %v2847_v15 = vmax.f32 %v2719_v43, 0.0  ;;  %v3812_v43 = vadd.f32 %v6480_v2, %v3678_v29  ;;  %v3688_v1 = vmul.f32 %v6464_v56, %v6461_v51 }
 0x2b9   :  { %v2845_v21 = vmax.f32 %v2717_v10, 0.0  ;;  %v5151_v55 = vpop.f32.mrb[80].mxu0  ;;  %v3938_v3 = vmax.f32 %v3810_v26, 0.0 }
 0x2ba   :  { %v2911_v33 = vpack.c.bf16 %v2847_v15, %v2846_v11  ;;  %v3691_v25 = vmul.f32 %v5151_v55, %v6461_v51  ;;  %v3220_v6 = vpop.f32.mrb[81].mxu0  ;;  %v3683_v11 = vmul.f32 %v6435_v31, %v6461_v51  ;;  %v3682_v31 = vmul.f32 %v6461_v51, %v6445_v4 }
 0x2bb   :  { %v2910_v46 = vpack.c.bf16 %v2845_v21, %v2844_v5  ;;  %v3689_v14 = vmul.f32 %v6461_v51, %v3220_v6  ;;  %v5152_v20 = vpop.f32.mrb[82].mxu0  ;;  %v3939_v5 = vmax.f32 %v3811_v9, 0.0  ;;  %v3681_v21 = vmul.f32 %v6461_v51, %v6438_v36 }
 0x2bc   :  { %v3825_v32 = vadd.f32 %v6480_v2, %v3691_v25  ;;  %v3692_v47 = vmul.f32 %v5152_v20, %v6461_v51  ;;  %v3223_v34 = vpop.f32.mrb[83].mxu0  ;;  %v3684_v25 = vmul.f32 %v6441_v22, %v6461_v51  ;;  %v3817_v36 = vadd.f32 %v6480_v2, %v3683_v11 }
 0x2bd   :  { %v3823_v41 = vadd.f32 %v6480_v2, %v3689_v14  ;;  %v3690_v52 = vmul.f32 %v6461_v51, %v3223_v34  ;;  %5257 = vmatprep.mubr.msk.bf16.mxu0 %vm1714_vm2, %v2910_v46  ;;  %v3940_v46 = vmax.f32 %v3812_v43, 0.0  ;;  %v3815_v22 = vadd.f32 %v6480_v2, %v3681_v21 }
 0x2be   :  { %v3953_v62 = vmax.f32 %v3825_v32, 0.0  ;;  %v3826_v17 = vadd.f32 %v6480_v2, %v3692_v47  ;;  %5258 = vmatmul.mubr.msk.bf16.gmra.mrb[188].mxu0 %vm1714_vm2, %v2911_v33  ;;  %v3942_v33 = vmax.f32 %v3814_v16, 0.0  ;;  %v3818_v4 = vadd.f32 %v6480_v2, %v3684_v25 }
 0x2bf   :  { %v3951_v23 = vmax.f32 %v3823_v41, 0.0  ;;  %v3824_v30 = vadd.f32 %v6480_v2, %v3690_v52 }
 0x2c0   :  { %v6509_v60 = vmax.f32 %v3937_v50, %v3953_v62  ;;  %v3954_v40 = vmax.f32 %v3826_v17, 0.0  ;;  %v3816_v17 = vadd.f32 %v6480_v2, %v3682_v31 }
 0x2c1   :  { %v6513_v12 = vmax.f32 %v3935_v42, %v3951_v23  ;;  %v3952_v27 = vmax.f32 %v3824_v30, 0.0  ;;  %v5155_v38 = vpop.f32.mrb[84].mxu0  ;;  %v3945_v23 = vmax.f32 %v3817_v36, 0.0  ;;  %v3687_v30 = vmul.f32 %v6453_v37, %v6461_v51 }
 0x2c2   :  { %v6516_v19 = vmax.f32 %v3938_v3, %v3954_v40  ;;  %v3695_v53 = vmul.f32 %v5155_v38, %v6461_v51  ;;  %v3236_v8 = vpop.f32.mrb[85].mxu0  ;;  %v3943_v40 = vmax.f32 %v3815_v22, 0.0  ;;  %v3946_v38 = vmax.f32 %v3818_v4, 0.0 }
 0x2c3   :  { %v6520_v18 = vmax.f32 %v3936_v61, %v3952_v27  ;;  %v3693_v57 = vmul.f32 %v6461_v51, %v3236_v8  ;;  %v5156_v58 = vpop.f32.mrb[86].mxu0  ;;  %v3685_v61 = vmul.f32 %v6461_v51, %v6456_v44  ;;  %v3944_v9 = vmax.f32 %v3816_v17, 0.0 }
 0x2c4   :  { %v3829_v39 = vadd.f32 %v6480_v2, %v3695_v53  ;;  %v3696_v63 = vmul.f32 %v5156_v58, %v6461_v51  ;;  %v3239_v0 = vpop.f32.mrb[87].mxu0  ;;  %v3686_v37 = vmul.f32 %v6461_v51, %v6468_v59  ;;  %v3821_v44 = vadd.f32 %v6480_v2, %v3687_v30 }
 0x2c5   :  { %v3827_v7 = vadd.f32 %v6480_v2, %v3693_v57  ;;  %v3694_v10 = vmul.f32 %v6461_v51, %v3239_v0  ;;  %v3819_v56 = vadd.f32 %v6480_v2, %v3685_v61  ;;  %v3822_v59 = vadd.f32 %v6480_v2, %v3688_v1 }
 0x2c6   :  { %v3957_v15 = vmax.f32 %v3829_v39, 0.0  ;;  %v3830_v13 = vadd.f32 %v6480_v2, %v3696_v63 }
 0x2c7   :  { %v3955_v55 = vmax.f32 %v3827_v7, 0.0  ;;  %v3828_v24 = vadd.f32 %v6480_v2, %v3694_v10  ;;  %v3947_v25 = vmax.f32 %v3819_v56, 0.0  ;;  %v3950_v31 = vmax.f32 %v3822_v59, 0.0 }
 0x2c8   :  { %v6537_v6 = vmax.f32 %v3941_v45, %v3957_v15  ;;  %v3958_v48 = vmax.f32 %v3830_v13, 0.0  ;;  %v3820_v13 = vadd.f32 %v6480_v2, %v3686_v37 }
 0x2c9   :  { %v6541_v14 = vmax.f32 %v3939_v5, %v3955_v55  ;;  %v3956_v20 = vmax.f32 %v3828_v24, 0.0  ;;  %v5159_v26 = vpop.f32.mrb[88].mxu0  ;;  %v3949_v55 = vmax.f32 %v3821_v44, 0.0 }
 0x2ca   :  { %v6544_v32 = vmax.f32 %v3942_v33, %v3958_v48  ;;  %v3699_v47 = vmul.f32 %v5159_v26, %v6461_v51  ;;  %v3252_v34 = vpop.f32.mrb[89].mxu0  ;;  %v3948_v36 = vmax.f32 %v3820_v13, 0.0 }
 0x2cb   :  { %v6548_v35 = vmax.f32 %v3940_v46, %v3956_v20  ;;  %v3697_v41 = vmul.f32 %v6461_v51, %v3252_v34  ;;  %v5160_v52 = vpop.f32.mrb[90].mxu0 }
 0x2cc   :  { %v3833_v50 = vadd.f32 %v6480_v2, %v3699_v47  ;;  %v3700_v28 = vmul.f32 %v5160_v52, %v6461_v51  ;;  %v3255_v62 = vpop.f32.mrb[91].mxu0 }
 0x2cd   :  { %v3831_v42 = vadd.f32 %v6480_v2, %v3697_v41  ;;  %v3698_v49 = vmul.f32 %v6461_v51, %v3255_v62 }
 0x2ce   :  { %v3961_v3 = vmax.f32 %v3833_v50, 0.0  ;;  %v3834_v54 = vadd.f32 %v6480_v2, %v3700_v28 }
 0x2cf   :  { %v3959_v29 = vmax.f32 %v3831_v42, 0.0  ;;  %v3832_v27 = vadd.f32 %v6480_v2, %v3698_v49 }
 0x2d0   :  { %v6565_v53 = vmax.f32 %v3945_v23, %v3961_v3  ;;  %v3962_v8 = vmax.f32 %v3834_v54, 0.0 }
 0x2d1   :  { %v6569_v57 = vmax.f32 %v3943_v40, %v3959_v29  ;;  %v3960_v58 = vmax.f32 %v3832_v27, 0.0  ;;  %v5163_v16 = vpop.f32.mrb[92].mxu0 }
 0x2d2   :  { %v6572_v39 = vmax.f32 %v3946_v38, %v3962_v8  ;;  %v3703_v63 = vmul.f32 %v5163_v16, %v6461_v51  ;;  %v3268_v0 = vpop.f32.mrb[93].mxu0 }
 0x2d3   :  { %v6576_v43 = vmax.f32 %v3944_v9, %v3960_v58  ;;  %v3701_v7 = vmul.f32 %v6461_v51, %v3268_v0  ;;  %v5164_v10 = vpop.f32.mrb[94].mxu0 }
 0x2d4   :  { %v3837_v45 = vadd.f32 %v6480_v2, %v3703_v63  ;;  %v3704_v11 = vmul.f32 %v5164_v10, %v6461_v51  ;;  %v3271_v15 = vpop.f32.mrb[95].mxu0 }
 0x2d5   :  { %v3835_v5 = vadd.f32 %v6480_v2, %v3701_v7  ;;  %v3702_v21 = vmul.f32 %v6461_v51, %v3271_v15 }
 0x2d6   :  { %v3965_v24 = vmax.f32 %v3837_v45, 0.0  ;;  %v3838_v33 = vadd.f32 %v6480_v2, %v3704_v11 }
 0x2d7   :  { %v3963_v48 = vmax.f32 %v3835_v5, 0.0  ;;  %v3836_v46 = vadd.f32 %v6480_v2, %v3702_v21 }
 0x2d8   :  { %v6587_v20 = vmax.f32 %v3949_v55, %v3965_v24  ;;  %v3966_v26 = vmax.f32 %v3838_v33, 0.0 }
 0x2d9   :  { %v6589_v47 = vmax.f32 %v3947_v25, %v3963_v48  ;;  %v3964_v34 = vmax.f32 %v3836_v46, 0.0  ;;  %v5167_v22 = vpop.f32.mrb[96].mxu0 }
 0x2da   :  { %v6591_v41 = vmax.f32 %v3950_v31, %v3966_v26  ;;  %v3707_v52 = vmul.f32 %v5167_v22, %v6461_v51  ;;  %v3284_v4 = vpop.f32.mrb[97].mxu0 }
 0x2db   :  { %v6594_v50 = vmax.f32 %v3948_v36, %v3964_v34  ;;  %v3705_v28 = vmul.f32 %v6461_v51, %v3284_v4  ;;  %v5168_v62 = vpop.f32.mrb[98].mxu0 }
 0x2dc   :  { %v3841_v17 = vadd.f32 %v6480_v2, %v3707_v52  ;;  %v3708_v42 = vmul.f32 %v5168_v62, %v6461_v51  ;;  %v3287_v49 = vpop.f32.mrb[99].mxu0 }
 0x2dd   :  { %v3839_v23 = vadd.f32 %v6480_v2, %v3705_v28  ;;  %v3706_v30 = vmul.f32 %v6461_v51, %v3287_v49 }
 0x2de   :  { %v3969_v3 = vmax.f32 %v3841_v17, 0.0  ;;  %v3842_v54 = vadd.f32 %v6480_v2, %v3708_v42 }
 0x2df   :  { %v3967_v40 = vmax.f32 %v3839_v23, 0.0  ;;  %v3840_v61 = vadd.f32 %v6480_v2, %v3706_v30 }
 0x2e0   :  { %v6604_v29 = vmax.f32 %v6509_v60, %v3969_v3  ;;  %v3970_v27 = vmax.f32 %v3842_v54, 0.0 }
 0x2e1   :  { %v6607_v38 = vmax.f32 %v6513_v12, %v3967_v40  ;;  %v3968_v1 = vmax.f32 %v3840_v61, 0.0  ;;  %v5171_v8 = vpop.f32.mrb[100].mxu0 }
 0x2e2   :  { %v6610_v9 = vmax.f32 %v6516_v19, %v3970_v27  ;;  %v3711_v37 = vmul.f32 %v5171_v8, %v6461_v51  ;;  %v3300_v58 = vpop.f32.mrb[101].mxu0 }
 0x2e3   :  { %v6614_v16 = vmax.f32 %v6520_v18, %v3968_v1  ;;  %v3709_v44 = vmul.f32 %v6461_v51, %v3300_v58  ;;  %v5172_v63 = vpop.f32.mrb[102].mxu0 }
 0x2e4   :  { %v3845_v60 = vadd.f32 %v6480_v2, %v3711_v37  ;;  %v3712_v0 = vmul.f32 %v5172_v63, %v6461_v51  ;;  %v3303_v12 = vpop.f32.mrb[103].mxu0 }
 0x2e5   :  { %v3843_v56 = vadd.f32 %v6480_v2, %v3709_v44  ;;  %v3710_v7 = vmul.f32 %v6461_v51, %v3303_v12 }
 0x2e6   :  { %v3973_v19 = vmax.f32 %v3845_v60, 0.0  ;;  %v3846_v10 = vadd.f32 %v6480_v2, %v3712_v0 }
 0x2e7   :  { %v3971_v59 = vmax.f32 %v3843_v56, 0.0  ;;  %v3844_v45 = vadd.f32 %v6480_v2, %v3710_v7 }
 0x2e8   :  { %v6624_v18 = vmax.f32 %v6537_v6, %v3973_v19  ;;  %v3974_v11 = vmax.f32 %v3846_v10, 0.0 }
 0x2e9   :  { %v6627_v15 = vmax.f32 %v6541_v14, %v3971_v59  ;;  %v3972_v13 = vmax.f32 %v3844_v45, 0.0  ;;  %v5175_v5 = vpop.f32.mrb[104].mxu0 }
 0x2ea   :  { %v6630_v21 = vmax.f32 %v6544_v32, %v3974_v11  ;;  %v3715_v55 = vmul.f32 %v5175_v5, %v6461_v51  ;;  %v3316_v24 = vpop.f32.mrb[105].mxu0 }
 0x2eb   :  { %v6634_v33 = vmax.f32 %v6548_v35, %v3972_v13  ;;  %v3713_v25 = vmul.f32 %v6461_v51, %v3316_v24  ;;  %v5176_v48 = vpop.f32.mrb[106].mxu0 }
 0x2ec   :  { %v3849_v6 = vadd.f32 %v6480_v2, %v3715_v55  ;;  %v3716_v46 = vmul.f32 %v5176_v48, %v6461_v51  ;;  %v3319_v14 = vpop.f32.mrb[107].mxu0 }
 0x2ed   :  { %v3847_v31 = vadd.f32 %v6480_v2, %v3713_v25  ;;  %v3714_v26 = vmul.f32 %v6461_v51, %v3319_v14 }
 0x2ee   :  { %v3977_v32 = vmax.f32 %v3849_v6, 0.0  ;;  %v3850_v36 = vadd.f32 %v6480_v2, %v3716_v46 }
 0x2ef   :  { %v3975_v34 = vmax.f32 %v3847_v31, 0.0  ;;  %v3848_v22 = vadd.f32 %v6480_v2, %v3714_v26 }
 0x2f0   :  { %v6644_v35 = vmax.f32 %v6565_v53, %v3977_v32  ;;  %v3978_v52 = vmax.f32 %v3850_v36, 0.0 }
 0x2f1   :  { %v6647_v4 = vmax.f32 %v6569_v57, %v3975_v34  ;;  %v3976_v28 = vmax.f32 %v3848_v22, 0.0  ;;  %v5179_v62 = vpop.f32.mrb[108].mxu0 }
 0x2f2   :  { %v6650_v17 = vmax.f32 %v6572_v39, %v3978_v52  ;;  %v3719_v42 = vmul.f32 %v5179_v62, %v6461_v51  ;;  %v3332_v49 = vpop.f32.mrb[109].mxu0 }
 0x2f3   :  { %v6654_v23 = vmax.f32 %v6576_v43, %v3976_v28  ;;  %v3717_v30 = vmul.f32 %v6461_v51, %v3332_v49  ;;  %v5180_v3 = vpop.f32.mrb[110].mxu0 }
 0x2f4   :  { %v3853_v53 = vadd.f32 %v6480_v2, %v3719_v42  ;;  %v3720_v54 = vmul.f32 %v5180_v3, %v6461_v51  ;;  %v3335_v57 = vpop.f32.mrb[111].mxu0 }
 0x2f5   :  { %v3851_v40 = vadd.f32 %v6480_v2, %v3717_v30  ;;  %v3718_v61 = vmul.f32 %v6461_v51, %v3335_v57 }
 0x2f6   :  { %v3981_v39 = vmax.f32 %v3853_v53, 0.0  ;;  %v3854_v27 = vadd.f32 %v6480_v2, %v3720_v54 }
 0x2f7   :  { %v3979_v1 = vmax.f32 %v3851_v40, 0.0  ;;  %v3852_v8 = vadd.f32 %v6480_v2, %v3718_v61 }
 0x2f8   :  { %v6664_v43 = vmax.f32 %v6587_v20, %v3981_v39  ;;  %v3982_v37 = vmax.f32 %v3854_v27, 0.0 }
 0x2f9   :  { %v6667_v58 = vmax.f32 %v6589_v47, %v3979_v1  ;;  %v3980_v44 = vmax.f32 %v3852_v8, 0.0  ;;  %v5183_v63 = vpop.f32.mrb[112].mxu0 }
 0x2fa   :  { %v6670_v60 = vmax.f32 %v6591_v41, %v3982_v37  ;;  %v3723_v0 = vmul.f32 %v5183_v63, %v6461_v51  ;;  %v3348_v12 = vpop.f32.mrb[113].mxu0 }
 0x2fb   :  { %v6674_v56 = vmax.f32 %v6594_v50, %v3980_v44  ;;  %v3721_v7 = vmul.f32 %v6461_v51, %v3348_v12  ;;  %v5184_v19 = vpop.f32.mrb[114].mxu0 }
 0x2fc   :  { %v3857_v20 = vadd.f32 %v6480_v2, %v3723_v0  ;;  %v3724_v10 = vmul.f32 %v5184_v19, %v6461_v51  ;;  %v3351_v47 = vpop.f32.mrb[115].mxu0 }
 0x2fd   :  { %v3855_v59 = vadd.f32 %v6480_v2, %v3721_v7  ;;  %v3722_v45 = vmul.f32 %v6461_v51, %v3351_v47 }
 0x2fe   :  { %v3985_v41 = vmax.f32 %v3857_v20, 0.0  ;;  %v3858_v11 = vadd.f32 %v6480_v2, %v3724_v10 }
 0x2ff   :  { %v3983_v13 = vmax.f32 %v3855_v59, 0.0  ;;  %v3856_v5 = vadd.f32 %v6480_v2, %v3722_v45 }
 0x300   :  { %v6684_v50 = vmax.f32 %v6604_v29, %v3985_v41  ;;  %v3986_v55 = vmax.f32 %v3858_v11, 0.0 }
 0x301   :  { %v6687_v24 = vmax.f32 %v6607_v38, %v3983_v13  ;;  %v3984_v25 = vmax.f32 %v3856_v5, 0.0  ;;  %v5187_v48 = vpop.f32.mrb[116].mxu0 }
 0x302   :  { %v6690_v6 = vmax.f32 %v6610_v9, %v3986_v55  ;;  %v3727_v46 = vmul.f32 %v5187_v48, %v6461_v51  ;;  %v3364_v14 = vpop.f32.mrb[117].mxu0 }
 0x303   :  { %v6694_v31 = vmax.f32 %v6614_v16, %v3984_v25  ;;  %v3725_v26 = vmul.f32 %v6461_v51, %v3364_v14  ;;  %v5188_v32 = vpop.f32.mrb[118].mxu0 }
 0x304   :  { %v3861_v29 = vadd.f32 %v6480_v2, %v3727_v46  ;;  %v3728_v36 = vmul.f32 %v5188_v32, %v6461_v51  ;;  %v3367_v38 = vpop.f32.mrb[119].mxu0 }
 0x305   :  { %v3859_v34 = vadd.f32 %v6480_v2, %v3725_v26  ;;  %v3726_v22 = vmul.f32 %v6461_v51, %v3367_v38 }
 0x306   :  { %v3989_v9 = vmax.f32 %v3861_v29, 0.0  ;;  %v3862_v52 = vadd.f32 %v6480_v2, %v3728_v36 }
 0x307   :  { %v3987_v28 = vmax.f32 %v3859_v34, 0.0  ;;  %v3860_v62 = vadd.f32 %v6480_v2, %v3726_v22 }
 0x308   :  { %v6704_v16 = vmax.f32 %v6624_v18, %v3989_v9  ;;  %v3990_v42 = vmax.f32 %v3862_v52, 0.0 }
 0x309   :  { %v6707_v49 = vmax.f32 %v6627_v15, %v3987_v28  ;;  %v3988_v30 = vmax.f32 %v3860_v62, 0.0  ;;  %v5191_v3 = vpop.f32.mrb[120].mxu0 }
 0x30a   :  { %v6710_v53 = vmax.f32 %v6630_v21, %v3990_v42  ;;  %v3731_v54 = vmul.f32 %v5191_v3, %v6461_v51  ;;  %v3380_v57 = vpop.f32.mrb[121].mxu0 }
 0x30b   :  { %v6714_v40 = vmax.f32 %v6634_v33, %v3988_v30  ;;  %v3729_v61 = vmul.f32 %v6461_v51, %v3380_v57  ;;  %v5192_v39 = vpop.f32.mrb[122].mxu0 }
 0x30c   :  { %v3865_v18 = vadd.f32 %v6480_v2, %v3731_v54  ;;  %v3732_v27 = vmul.f32 %v5192_v39, %v6461_v51  ;;  %v3383_v15 = vpop.f32.mrb[123].mxu0 }
 0x30d   :  { %v3863_v1 = vadd.f32 %v6480_v2, %v3729_v61  ;;  %v3730_v8 = vmul.f32 %v6461_v51, %v3383_v15 }
 0x30e   :  { %v3993_v21 = vmax.f32 %v3865_v18, 0.0  ;;  %v3866_v37 = vadd.f32 %v6480_v2, %v3732_v27 }
 0x30f   :  { %v3991_v44 = vmax.f32 %v3863_v1, 0.0  ;;  %v3864_v63 = vadd.f32 %v6480_v2, %v3730_v8 }
 0x310   :  { %v6724_v33 = vmax.f32 %v6644_v35, %v3993_v21  ;;  %v3994_v0 = vmax.f32 %v3866_v37, 0.0 }
 0x311   :  { %v6727_v12 = vmax.f32 %v6647_v4, %v3991_v44  ;;  %v3992_v7 = vmax.f32 %v3864_v63, 0.0  ;;  %v5195_v19 = vpop.f32.mrb[124].mxu0 }
 0x312   :  { %v6730_v20 = vmax.f32 %v6650_v17, %v3994_v0  ;;  %v3735_v10 = vmul.f32 %v5195_v19, %v6461_v51  ;;  %v3396_v47 = vpop.f32.mrb[125].mxu0 }
 0x313   :  { %v6734_v59 = vmax.f32 %v6654_v23, %v3992_v7  ;;  %v3733_v45 = vmul.f32 %v6461_v51, %v3396_v47  ;;  %v5196_v41 = vpop.f32.mrb[126].mxu0 }
 0x314   :  { %v3869_v35 = vadd.f32 %v6480_v2, %v3735_v10  ;;  %v3736_v11 = vmul.f32 %v5196_v41, %v6461_v51  ;;  %v3399_v4 = vpop.f32.mrb[127].mxu0 }
 0x315   :  { %v3867_v13 = vadd.f32 %v6480_v2, %v3733_v45  ;;  %v3734_v5 = vmul.f32 %v6461_v51, %v3399_v4 }
 0x316   :  { %v3997_v17 = vmax.f32 %v3869_v35, 0.0  ;;  %v3870_v55 = vadd.f32 %v6480_v2, %v3736_v11 }
 0x317   :  { %v3995_v25 = vmax.f32 %v3867_v13, 0.0  ;;  %v3868_v48 = vadd.f32 %v6480_v2, %v3734_v5 }
 0x318   :  { %v6744_v23 = vmax.f32 %v6664_v43, %v3997_v17  ;;  %v3998_v46 = vmax.f32 %v3870_v55, 0.0 }
 0x319   :  { %v6747_v14 = vmax.f32 %v6667_v58, %v3995_v25  ;;  %v3996_v26 = vmax.f32 %v3868_v48, 0.0  ;;  %v5199_v32 = vpop.f32.mrb[128].mxu0 }
 0x31a   :  { %v6750_v29 = vmax.f32 %v6670_v60, %v3998_v46  ;;  %v3739_v36 = vmul.f32 %v5199_v32, %v6461_v51  ;;  %v3412_v38 = vpop.f32.mrb[129].mxu0 }
 0x31b   :  { %v6754_v34 = vmax.f32 %v6674_v56, %v3996_v26  ;;  %v3737_v22 = vmul.f32 %v6461_v51, %v3412_v38  ;;  %v5200_v9 = vpop.f32.mrb[130].mxu0 }
 0x31c   :  { %v3873_v43 = vadd.f32 %v6480_v2, %v3739_v36  ;;  %v3740_v52 = vmul.f32 %v5200_v9, %v6461_v51  ;;  %v3415_v58 = vpop.f32.mrb[131].mxu0 }
 0x31d   :  { %v3871_v28 = vadd.f32 %v6480_v2, %v3737_v22  ;;  %v3738_v62 = vmul.f32 %v6461_v51, %v3415_v58 }
 0x31e   :  { %v4001_v60 = vmax.f32 %v3873_v43, 0.0  ;;  %v3874_v42 = vadd.f32 %v6480_v2, %v3740_v52 }
 0x31f   :  { %v3999_v30 = vmax.f32 %v3871_v28, 0.0  ;;  %v3872_v3 = vadd.f32 %v6480_v2, %v3738_v62 }
 0x320   :  { %v6764_v56 = vmax.f32 %v6684_v50, %v4001_v60  ;;  %v4002_v54 = vmax.f32 %v3874_v42, 0.0 }
 0x321   :  { %v6767_v57 = vmax.f32 %v6687_v24, %v3999_v30  ;;  %v4000_v61 = vmax.f32 %v3872_v3, 0.0  ;;  %v5203_v39 = vpop.f32.mrb[132].mxu0 }
 0x322   :  { %v6770_v18 = vmax.f32 %v6690_v6, %v4002_v54  ;;  %v3743_v27 = vmul.f32 %v5203_v39, %v6461_v51  ;;  %v3428_v15 = vpop.f32.mrb[133].mxu0 }
 0x323   :  { %v6774_v1 = vmax.f32 %v6694_v31, %v4000_v61  ;;  %v3741_v8 = vmul.f32 %v6461_v51, %v3428_v15  ;;  %v5204_v21 = vpop.f32.mrb[134].mxu0 }
 0x324   :  { %v3877_v50 = vadd.f32 %v6480_v2, %v3743_v27  ;;  %v3744_v37 = vmul.f32 %v5204_v21, %v6461_v51  ;;  %v3431_v24 = vpop.f32.mrb[135].mxu0 }
 0x325   :  { %v3875_v44 = vadd.f32 %v6480_v2, %v3741_v8  ;;  %v3742_v63 = vmul.f32 %v6461_v51, %v3431_v24 }
 0x326   :  { %v4005_v6 = vmax.f32 %v3877_v50, 0.0  ;;  %v3878_v0 = vadd.f32 %v6480_v2, %v3744_v37 }
 0x327   :  { %v4003_v7 = vmax.f32 %v3875_v44, 0.0  ;;  %v3876_v19 = vadd.f32 %v6480_v2, %v3742_v63 }
 0x328   :  { %v6784_v31 = vmax.f32 %v6704_v16, %v4005_v6  ;;  %v4006_v10 = vmax.f32 %v3878_v0, 0.0 }
 0x329   :  { %v6787_v47 = vmax.f32 %v6707_v49, %v4003_v7  ;;  %v4004_v45 = vmax.f32 %v3876_v19, 0.0  ;;  %v5207_v41 = vpop.f32.mrb[136].mxu0 }
 0x32a   :  { %v6790_v35 = vmax.f32 %v6710_v53, %v4006_v10  ;;  %v3747_v11 = vmul.f32 %v5207_v41, %v6461_v51  ;;  %v3444_v4 = vpop.f32.mrb[137].mxu0 }
 0x32b   :  { %v6794_v13 = vmax.f32 %v6714_v40, %v4004_v45  ;;  %v3745_v5 = vmul.f32 %v6461_v51, %v3444_v4  ;;  %v5208_v17 = vpop.f32.mrb[138].mxu0 }
 0x32c   :  { %v3881_v16 = vadd.f32 %v6480_v2, %v3747_v11  ;;  %v3748_v55 = vmul.f32 %v5208_v17, %v6461_v51  ;;  %v3447_v49 = vpop.f32.mrb[139].mxu0 }
 0x32d   :  { %v3879_v25 = vadd.f32 %v6480_v2, %v3745_v5  ;;  %v3746_v48 = vmul.f32 %v6461_v51, %v3447_v49 }
 0x32e   :  { %v4009_v53 = vmax.f32 %v3881_v16, 0.0  ;;  %v3882_v46 = vadd.f32 %v6480_v2, %v3748_v55 }
 0x32f   :  { %v4007_v26 = vmax.f32 %v3879_v25, 0.0  ;;  %v3880_v32 = vadd.f32 %v6480_v2, %v3746_v48 }
 0x330   :  { %v6804_v40 = vmax.f32 %v6724_v33, %v4009_v53  ;;  %v4010_v36 = vmax.f32 %v3882_v46, 0.0 }
 0x331   :  { %v6807_v38 = vmax.f32 %v6727_v12, %v4007_v26  ;;  %v4008_v22 = vmax.f32 %v3880_v32, 0.0  ;;  %v5211_v9 = vpop.f32.mrb[140].mxu0 }
 0x332   :  { %v6810_v43 = vmax.f32 %v6730_v20, %v4010_v36  ;;  %v3751_v52 = vmul.f32 %v5211_v9, %v6461_v51  ;;  %v3460_v58 = vpop.f32.mrb[141].mxu0 }
 0x333   :  { %v6814_v28 = vmax.f32 %v6734_v59, %v4008_v22  ;;  %v3749_v62 = vmul.f32 %v6461_v51, %v3460_v58  ;;  %v5212_v60 = vpop.f32.mrb[142].mxu0 }
 0x334   :  { %v3885_v33 = vadd.f32 %v6480_v2, %v3751_v52  ;;  %v3752_v42 = vmul.f32 %v5212_v60, %v6461_v51  ;;  %v3463_v12 = vpop.f32.mrb[143].mxu0 }
 0x335   :  { %v3883_v30 = vadd.f32 %v6480_v2, %v3749_v62  ;;  %v3750_v3 = vmul.f32 %v6461_v51, %v3463_v12 }
 0x336   :  { %v4013_v20 = vmax.f32 %v3885_v33, 0.0  ;;  %v3886_v54 = vadd.f32 %v6480_v2, %v3752_v42 }
 0x337   :  { %v4011_v61 = vmax.f32 %v3883_v30, 0.0  ;;  %v3884_v39 = vadd.f32 %v6480_v2, %v3750_v3 }
 0x338   :  { %v6824_v59 = vmax.f32 %v6744_v23, %v4013_v20  ;;  %v4014_v27 = vmax.f32 %v3886_v54, 0.0 }
 0x339   :  { %v6827_v15 = vmax.f32 %v6747_v14, %v4011_v61  ;;  %v4012_v8 = vmax.f32 %v3884_v39, 0.0  ;;  %v5215_v21 = vpop.f32.mrb[144].mxu0 }
 0x33a   :  { %v6830_v50 = vmax.f32 %v6750_v29, %v4014_v27  ;;  %v3755_v37 = vmul.f32 %v5215_v21, %v6461_v51  ;;  %v3476_v24 = vpop.f32.mrb[145].mxu0 }
 0x33b   :  { %v6834_v44 = vmax.f32 %v6754_v34, %v4012_v8  ;;  %v3753_v63 = vmul.f32 %v6461_v51, %v3476_v24  ;;  %v5216_v6 = vpop.f32.mrb[146].mxu0 }
 0x33c   :  { %v3889_v23 = vadd.f32 %v6480_v2, %v3755_v37  ;;  %v3756_v0 = vmul.f32 %v5216_v6, %v6461_v51  ;;  %v3479_v14 = vpop.f32.mrb[147].mxu0 }
 0x33d   :  { %v3887_v7 = vadd.f32 %v6480_v2, %v3753_v63  ;;  %v3754_v19 = vmul.f32 %v6461_v51, %v3479_v14 }
 0x33e   :  { %v4017_v29 = vmax.f32 %v3889_v23, 0.0  ;;  %v3890_v10 = vadd.f32 %v6480_v2, %v3756_v0 }
 0x33f   :  { %v4015_v45 = vmax.f32 %v3887_v7, 0.0  ;;  %v3888_v41 = vadd.f32 %v6480_v2, %v3754_v19 }
 0x340   :  { %v6844_v34 = vmax.f32 %v6764_v56, %v4017_v29  ;;  %v4018_v11 = vmax.f32 %v3890_v10, 0.0 }
 0x341   :  { %v6847_v4 = vmax.f32 %v6767_v57, %v4015_v45  ;;  %v4016_v5 = vmax.f32 %v3888_v41, 0.0  ;;  %v5219_v17 = vpop.f32.mrb[148].mxu0 }
 0x342   :  { %v6850_v16 = vmax.f32 %v6770_v18, %v4018_v11  ;;  %v3759_v55 = vmul.f32 %v5219_v17, %v6461_v51  ;;  %v3492_v49 = vpop.f32.mrb[149].mxu0 }
 0x343   :  { %v6854_v25 = vmax.f32 %v6774_v1, %v4016_v5  ;;  %v3757_v48 = vmul.f32 %v6461_v51, %v3492_v49  ;;  %v5220_v53 = vpop.f32.mrb[150].mxu0 }
 0x344   :  { %v3893_v56 = vadd.f32 %v6480_v2, %v3759_v55  ;;  %v3760_v46 = vmul.f32 %v5220_v53, %v6461_v51  ;;  %v3495_v57 = vpop.f32.mrb[151].mxu0 }
 0x345   :  { %v3891_v26 = vadd.f32 %v6480_v2, %v3757_v48  ;;  %v3758_v32 = vmul.f32 %v6461_v51, %v3495_v57 }
 0x346   :  { %v4021_v18 = vmax.f32 %v3893_v56, 0.0  ;;  %v3894_v36 = vadd.f32 %v6480_v2, %v3760_v46 }
 0x347   :  { %v4019_v22 = vmax.f32 %v3891_v26, 0.0  ;;  %v3892_v9 = vadd.f32 %v6480_v2, %v3758_v32 }
 0x348   :  { %v6864_v1 = vmax.f32 %v6784_v31, %v4021_v18  ;;  %v4022_v52 = vmax.f32 %v3894_v36, 0.0 }
 0x349   :  { %v6867_v58 = vmax.f32 %v6787_v47, %v4019_v22  ;;  %v4020_v62 = vmax.f32 %v3892_v9, 0.0  ;;  %v5223_v60 = vpop.f32.mrb[152].mxu0 }
 0x34a   :  { %v6870_v33 = vmax.f32 %v6790_v35, %v4022_v52  ;;  %v3763_v42 = vmul.f32 %v5223_v60, %v6461_v51  ;;  %v3508_v12 = vpop.f32.mrb[153].mxu0 }
 0x34b   :  { %v6874_v30 = vmax.f32 %v6794_v13, %v4020_v62  ;;  %v3761_v3 = vmul.f32 %v6461_v51, %v3508_v12  ;;  %v5224_v20 = vpop.f32.mrb[154].mxu0 }
 0x34c   :  { %v3897_v31 = vadd.f32 %v6480_v2, %v3763_v42  ;;  %v3764_v54 = vmul.f32 %v5224_v20, %v6461_v51  ;;  %v3511_v47 = vpop.f32.mrb[155].mxu0 }
 0x34d   :  { %v3895_v61 = vadd.f32 %v6480_v2, %v3761_v3  ;;  %v3762_v39 = vmul.f32 %v6461_v51, %v3511_v47 }
 0x34e   :  { %v4025_v35 = vmax.f32 %v3897_v31, 0.0  ;;  %v3898_v27 = vadd.f32 %v6480_v2, %v3764_v54 }
 0x34f   :  { %v4023_v8 = vmax.f32 %v3895_v61, 0.0  ;;  %v3896_v21 = vadd.f32 %v6480_v2, %v3762_v39 }
 0x350   :  { %v6884_v13 = vmax.f32 %v6804_v40, %v4025_v35  ;;  %v4026_v37 = vmax.f32 %v3898_v27, 0.0 }
 0x351   :  { %v6887_v24 = vmax.f32 %v6807_v38, %v4023_v8  ;;  %v4024_v63 = vmax.f32 %v3896_v21, 0.0  ;;  %v5227_v6 = vpop.f32.mrb[156].mxu0 }
 0x352   :  { %v6890_v23 = vmax.f32 %v6810_v43, %v4026_v37  ;;  %v3767_v0 = vmul.f32 %v5227_v6, %v6461_v51  ;;  %v3524_v14 = vpop.f32.mrb[157].mxu0 }
 0x353   :  { %v6894_v7 = vmax.f32 %v6814_v28, %v4024_v63  ;;  %v3765_v19 = vmul.f32 %v6461_v51, %v3524_v14  ;;  %v5228_v29 = vpop.f32.mrb[158].mxu0 }
 0x354   :  { %v3901_v40 = vadd.f32 %v6480_v2, %v3767_v0  ;;  %v3768_v10 = vmul.f32 %v5228_v29, %v6461_v51  ;;  %v3527_v38 = vpop.f32.mrb[159].mxu0 }
 0x355   :  { %v3899_v45 = vadd.f32 %v6480_v2, %v3765_v19  ;;  %v3766_v41 = vmul.f32 %v6461_v51, %v3527_v38 }
 0x356   :  { %v4029_v43 = vmax.f32 %v3901_v40, 0.0  ;;  %v3902_v11 = vadd.f32 %v6480_v2, %v3768_v10 }
 0x357   :  { %v4027_v5 = vmax.f32 %v3899_v45, 0.0  ;;  %v3900_v17 = vadd.f32 %v6480_v2, %v3766_v41 }
 0x358   :  { %v6904_v28 = vmax.f32 %v6824_v59, %v4029_v43  ;;  %v4030_v55 = vmax.f32 %v3902_v11, 0.0 }
 0x359   :  { %v6907_v49 = vmax.f32 %v6827_v15, %v4027_v5  ;;  %v4028_v48 = vmax.f32 %v3900_v17, 0.0  ;;  %v5231_v53 = vpop.f32.mrb[160].mxu0 }
 0x35a   :  { %v6910_v56 = vmax.f32 %v6830_v50, %v4030_v55  ;;  %v3771_v46 = vmul.f32 %v5231_v53, %v6461_v51  ;;  %v3540_v57 = vpop.f32.mrb[161].mxu0 }
 0x35b   :  { %v6914_v26 = vmax.f32 %v6834_v44, %v4028_v48  ;;  %v3769_v32 = vmul.f32 %v6461_v51, %v3540_v57  ;;  %v5232_v18 = vpop.f32.mrb[162].mxu0 }
 0x35c   :  { %v3905_v59 = vadd.f32 %v6480_v2, %v3771_v46  ;;  %v3772_v36 = vmul.f32 %v5232_v18, %v6461_v51  ;;  %v3543_v15 = vpop.f32.mrb[163].mxu0 }
 0x35d   :  { %v3903_v22 = vadd.f32 %v6480_v2, %v3769_v32  ;;  %v3770_v9 = vmul.f32 %v6461_v51, %v3543_v15 }
 0x35e   :  { %v4033_v50 = vmax.f32 %v3905_v59, 0.0  ;;  %v3906_v52 = vadd.f32 %v6480_v2, %v3772_v36 }
 0x35f   :  { %v4031_v62 = vmax.f32 %v3903_v22, 0.0  ;;  %v3904_v60 = vadd.f32 %v6480_v2, %v3770_v9 }
 0x360   :  { %v6924_v44 = vmax.f32 %v6844_v34, %v4033_v50  ;;  %v4034_v42 = vmax.f32 %v3906_v52, 0.0 }
 0x361   :  { %v6927_v12 = vmax.f32 %v6847_v4, %v4031_v62  ;;  %v4032_v3 = vmax.f32 %v3904_v60, 0.0  ;;  %v5235_v20 = vpop.f32.mrb[164].mxu0 }
 0x362   :  { %v6930_v31 = vmax.f32 %v6850_v16, %v4034_v42  ;;  %v3775_v54 = vmul.f32 %v5235_v20, %v6461_v51  ;;  %v3556_v47 = vpop.f32.mrb[165].mxu0 }
 0x363   :  { %v6934_v61 = vmax.f32 %v6854_v25, %v4032_v3  ;;  %v3773_v39 = vmul.f32 %v6461_v51, %v3556_v47  ;;  %v5236_v35 = vpop.f32.mrb[166].mxu0 }
 0x364   :  { %v3909_v34 = vadd.f32 %v6480_v2, %v3775_v54  ;;  %v3776_v27 = vmul.f32 %v5236_v35, %v6461_v51  ;;  %v3559_v4 = vpop.f32.mrb[167].mxu0 }
 0x365   :  { %v3907_v8 = vadd.f32 %v6480_v2, %v3773_v39  ;;  %v3774_v21 = vmul.f32 %v6461_v51, %v3559_v4  ;;  %v6955_v51 = vld [vmem:[%s7125_s8] ss:$0 sm:$0xff] }
 0x366   :  { %v4037_v16 = vmax.f32 %v3909_v34, 0.0  ;;  %v3910_v37 = vadd.f32 %v6480_v2, %v3776_v27 }
 0x367   :  { %v4035_v63 = vmax.f32 %v3907_v8, 0.0  ;;  %v3908_v6 = vadd.f32 %v6480_v2, %v3774_v21 }
 0x368   :  { %v6944_v25 = vmax.f32 %v6864_v1, %v4037_v16  ;;  %v4038_v0 = vmax.f32 %v3910_v37, 0.0 }
 0x369   :  { %v6947_v14 = vmax.f32 %v6867_v58, %v4035_v63  ;;  %v4036_v19 = vmax.f32 %v3908_v6, 0.0  ;;  %v5239_v29 = vpop.f32.mrb[168].mxu0 }
 0x36a   :  { %v6950_v40 = vmax.f32 %v6870_v33, %v4038_v0  ;;  %v3779_v10 = vmul.f32 %v6955_v51, %v5239_v29  ;;  %v3572_v38 = vpop.f32.mrb[169].mxu0 }
 0x36b   :  { %v6959_v1 = vmax.f32 %v6874_v30, %v4036_v19  ;;  %v3777_v45 = vmul.f32 %v6955_v51, %v3572_v38  ;;  %v5240_v58 = vpop.f32.mrb[170].mxu0 }
 0x36c   :  { %v3913_v41 = vadd.f32 %v6480_v2, %v3779_v10  ;;  %v3780_v43 = vmul.f32 %v6955_v51, %v5240_v58  ;;  %v3575_v33 = vpop.f32.mrb[171].mxu0 }
 0x36d   :  { %v3911_v11 = vadd.f32 %v6480_v2, %v3777_v45  ;;  %v3778_v5 = vmul.f32 %v6955_v51, %v3575_v33 }
 0x36e   :  { %v4041_v17 = vmax.f32 %v3913_v41, 0.0  ;;  %v3914_v55 = vadd.f32 %v6480_v2, %v3780_v43 }
 0x36f   :  { %v4039_v48 = vmax.f32 %v3911_v11, 0.0  ;;  %v3912_v53 = vadd.f32 %v6480_v2, %v3778_v5 }
 0x370   :  { %v6969_v30 = vmax.f32 %v6884_v13, %v4041_v17  ;;  %v4042_v46 = vmax.f32 %v3914_v55, 0.0  ;;  %v6985_v13 = vld [vmem:[%s7126_s9] ss:$0 sm:$0xff] }
 0x371   :  { %v6972_v57 = vmax.f32 %v6887_v24, %v4039_v48  ;;  %v4040_v32 = vmax.f32 %v3912_v53, 0.0  ;;  %v5243_v18 = vpop.f32.mrb[172].mxu0 }
 0x372   :  { %v6975_v59 = vmax.f32 %v6890_v23, %v4042_v46  ;;  %v3783_v36 = vmul.f32 %v6955_v51, %v5243_v18  ;;  %v3588_v15 = vpop.f32.mrb[173].mxu0 }
 0x373   :  { %v6979_v22 = vmax.f32 %v6894_v7, %v4040_v32  ;;  %v3781_v2 = vmul.f32 %v6955_v51, %v3588_v15  ;;  %v5244_v9 = vpop.f32.mrb[174].mxu0 }
 0x374   :  { %v3917_v24 = vadd.f32 %v6985_v13, %v3783_v36  ;;  %v3784_v50 = vmul.f32 %v6955_v51, %v5244_v9  ;;  %v3591_v23 = vpop.f32.mrb[175].mxu0 }
 0x375   :  { %v3915_v52 = vadd.f32 %v6985_v13, %v3781_v2  ;;  %v3782_v62 = vmul.f32 %v6955_v51, %v3591_v23 }
 0x376   :  { %v4045_v60 = vmax.f32 %v3917_v24, 0.0  ;;  %v3918_v7 = vadd.f32 %v6985_v13, %v3784_v50 }
 0x377   :  { %v4043_v42 = vmax.f32 %v3915_v52, 0.0  ;;  %v3916_v3 = vadd.f32 %v6985_v13, %v3782_v62 }
 0x378   :  { %v6994_v20 = vmax.f32 %v6904_v28, %v4045_v60  ;;  %v4046_v54 = vmax.f32 %v3918_v7, 0.0 }
 0x379   :  { %v6997_v47 = vmax.f32 %v6907_v49, %v4043_v42  ;;  %v4044_v39 = vmax.f32 %v3916_v3, 0.0  ;;  %v5247_v35 = vpop.f32.mrb[176].mxu0 }
 0x37a   :  { %v7000_v34 = vmax.f32 %v6910_v56, %v4046_v54  ;;  %v3787_v27 = vmul.f32 %v6955_v51, %v5247_v35  ;;  %v3604_v4 = vpop.f32.mrb[177].mxu0 }
 0x37b   :  { %v7004_v8 = vmax.f32 %v6914_v26, %v4044_v39  ;;  %v3785_v21 = vmul.f32 %v6955_v51, %v3604_v4  ;;  %v5248_v16 = vpop.f32.mrb[178].mxu0 }
 0x37c   :  { %v3921_v28 = vadd.f32 %v6985_v13, %v3787_v27  ;;  %v3788_v37 = vmul.f32 %v6955_v51, %v5248_v16  ;;  %v3607_v49 = vpop.f32.mrb[179].mxu0 }
 0x37d   :  { %v3919_v63 = vadd.f32 %v6985_v13, %v3785_v21  ;;  %v3786_v6 = vmul.f32 %v6955_v51, %v3607_v49 }
 0x37e   :  { %v4049_v56 = vmax.f32 %v3921_v28, 0.0  ;;  %v3922_v0 = vadd.f32 %v6985_v13, %v3788_v37 }
 0x37f   :  { %v4047_v19 = vmax.f32 %v3919_v63, 0.0  ;;  %v3920_v29 = vadd.f32 %v6985_v13, %v3786_v6 }
 0x380   :  { %v4161_v26 = vmax.f32 %v6924_v44, %v4049_v56  ;;  %v4050_v10 = vmax.f32 %v3922_v0, 0.0 }
 0x381   :  { %v4159_v38 = vmax.f32 %v6927_v12, %v4047_v19  ;;  %v4048_v45 = vmax.f32 %v3920_v29, 0.0  ;;  %v5251_v58 = vpop.f32.mrb[180].mxu0 }
 0x382   :  { %v4656_v41 = vpack.c.bf16 %v4161_v26, %v4161_v26  ;;  %v4162_v43 = vmax.f32 %v6930_v31, %v4050_v10  ;;  %v3791_v33 = vmul.f32 %v6955_v51, %v5251_v58  ;;  %v3620_v11 = vpop.f32.mrb[181].mxu0 }
 0x383   :  { %v4654_v5 = vpack.c.bf16 %v4159_v38, %v4159_v38  ;;  %v4160_v17 = vmax.f32 %v6934_v61, %v4048_v45  ;;  %v3789_v55 = vmul.f32 %v6955_v51, %v3620_v11  ;;  %v5252_v48 = vpop.f32.mrb[182].mxu0 }
 0x384   :  { %4242 = vst.msk [vmem:[%s7127_s10 + $0x8] sm:$0xf] %vm4239_vm3, %v4656_v41  ;;  %v4657_v44 = vpack.c.bf16 %v4162_v43, %v4162_v43  ;;  %v3925_v12 = vadd.f32 %v6985_v13, %v3791_v33  ;;  %v3792_v53 = vmul.f32 %v6955_v51, %v5252_v48  ;;  %v3623_v31 = vpop.f32.mrb[183].mxu0 }
 0x385   :  { %4240 = vst.msk [vmem:[%s7127_s10] sm:$0xf] %vm4239_vm3, %v4654_v5  ;;  %v4655_v61 = vpack.c.bf16 %v4160_v17, %v4160_v17  ;;  %v3923_v46 = vadd.f32 %v6985_v13, %v3789_v55  ;;  %v3790_v32 = vmul.f32 %v6955_v51, %v3623_v31 }
 0x386   :  { %4243 = vst.msk [vmem:[%s7127_s10 + $0xc] sm:$0xf] %vm4239_vm3, %v4657_v44  ;;  %v4053_v18 = vmax.f32 %v3925_v12, 0.0  ;;  %v3926_v36 = vadd.f32 %v6985_v13, %v3792_v53 }
 0x387   :  { %4241 = vst.msk [vmem:[%s7127_s10 + $0x4] sm:$0xf] %vm4239_vm3, %v4655_v61  ;;  %v4051_v15 = vmax.f32 %v3923_v46, 0.0  ;;  %v3924_v2 = vadd.f32 %v6985_v13, %v3790_v32 }
 0x388   :  { %v4165_v9 = vmax.f32 %v6944_v25, %v4053_v18  ;;  %v4054_v24 = vmax.f32 %v3926_v36, 0.0 }
 0x389   :  { %v4163_v50 = vmax.f32 %v6947_v14, %v4051_v15  ;;  %v4052_v23 = vmax.f32 %v3924_v2, 0.0  ;;  %v5255_v52 = vpop.f32.mrb[184].mxu0 }
 0x38a   :  { %v4660_v62 = vpack.c.bf16 %v4165_v9, %v4165_v9  ;;  %v4166_v60 = vmax.f32 %v6950_v40, %v4054_v24  ;;  %v3795_v7 = vmul.f32 %v6955_v51, %v5255_v52  ;;  %v3636_v42 = vpop.f32.mrb[185].mxu0 }
 0x38b   :  { %v4658_v3 = vpack.c.bf16 %v4163_v50, %v4163_v50  ;;  %v4164_v54 = vmax.f32 %v6959_v1, %v4052_v23  ;;  %v3793_v39 = vmul.f32 %v6955_v51, %v3636_v42  ;;  %v5256_v35 = vpop.f32.mrb[186].mxu0 }
 0x38c   :  { %4246 = vst.msk [vmem:[%s7127_s10 + $0x18] sm:$0xf] %vm4239_vm3, %v4660_v62  ;;  %v4661_v25 = vpack.c.bf16 %v4166_v60, %v4166_v60  ;;  %v3929_v14 = vadd.f32 %v6985_v13, %v3795_v7  ;;  %v3796_v27 = vmul.f32 %v6955_v51, %v5256_v35  ;;  %v3639_v40 = vpop.f32.mrb[187].mxu0 }
 0x38d   :  { %4244 = vst.msk [vmem:[%s7127_s10 + $0x10] sm:$0xf] %vm4239_vm3, %v4658_v3  ;;  %v4659_v1 = vpack.c.bf16 %v4164_v54, %v4164_v54  ;;  %v3927_v4 = vadd.f32 %v6985_v13, %v3793_v39  ;;  %v3794_v21 = vmul.f32 %v6955_v51, %v3639_v40 }
 0x38e   :  { %4247 = vst.msk [vmem:[%s7127_s10 + $0x1c] sm:$0xf] %vm4239_vm3, %v4661_v25  ;;  %v4057_v16 = vmax.f32 %v3929_v14, 0.0  ;;  %v3930_v28 = vadd.f32 %v6985_v13, %v3796_v27 }
 0x38f   :  { %4245 = vst.msk [vmem:[%s7127_s10 + $0x14] sm:$0xf] %vm4239_vm3, %v4659_v1  ;;  %v4055_v37 = vmax.f32 %v3927_v4, 0.0  ;;  %v3928_v49 = vadd.f32 %v6985_v13, %v3794_v21 }
 0x390   :  { %v4169_v63 = vmax.f32 %v6969_v30, %v4057_v16  ;;  %v4058_v6 = vmax.f32 %v3930_v28, 0.0 }
 0x391   :  { %v4167_v56 = vmax.f32 %v6972_v57, %v4055_v37  ;;  %v4056_v0 = vmax.f32 %v3928_v49, 0.0  ;;  %v5259_v19 = vpop.f32.mrb[188].mxu0 }
 0x392   :  { %v4664_v29 = vpack.c.bf16 %v4169_v63, %v4169_v63  ;;  %v4170_v26 = vmax.f32 %v6975_v59, %v4058_v6  ;;  %v3799_v10 = vmul.f32 %v6955_v51, %v5259_v19  ;;  %v3652_v38 = vpop.f32.mrb[189].mxu0 }
 0x393   :  { %v4662_v45 = vpack.c.bf16 %v4167_v56, %v4167_v56  ;;  %v4168_v58 = vmax.f32 %v6979_v22, %v4056_v0  ;;  %v3797_v41 = vmul.f32 %v6955_v51, %v3652_v38  ;;  %v5260_v43 = vpop.f32.mrb[190].mxu0 }
 0x394   :  { %4250 = vst.msk [vmem:[%s7127_s10 + $0x28] sm:$0xf] %vm4239_vm3, %v4664_v29  ;;  %v4665_v30 = vpack.c.bf16 %v4170_v26, %v4170_v26  ;;  %v3933_v57 = vadd.f32 %v6985_v13, %v3799_v10  ;;  %v3800_v33 = vmul.f32 %v6955_v51, %v5260_v43  ;;  %v3655_v59 = vpop.f32.mrb[191].mxu0 }
 0x395   :  { %4248 = vst.msk [vmem:[%s7127_s10 + $0x20] sm:$0xf] %vm4239_vm3, %v4662_v45  ;;  %v4663_v22 = vpack.c.bf16 %v4168_v58, %v4168_v58  ;;  %v3931_v11 = vadd.f32 %v6985_v13, %v3797_v41  ;;  %v3798_v5 = vmul.f32 %v6955_v51, %v3655_v59 }
 0x396   :  { %4251 = vst.msk [vmem:[%s7127_s10 + $0x2c] sm:$0xf] %vm4239_vm3, %v4665_v30  ;;  %v4061_v17 = vmax.f32 %v3933_v57, 0.0  ;;  %v3934_v55 = vadd.f32 %v6985_v13, %v3800_v33 }
 0x397   :  { %4249 = vst.msk [vmem:[%s7127_s10 + $0x24] sm:$0xf] %vm4239_vm3, %v4663_v22  ;;  %v4059_v48 = vmax.f32 %v3931_v11, 0.0  ;;  %v3932_v44 = vadd.f32 %v6985_v13, %v3798_v5 }
 0x398   :  { %v4173_v12 = vmax.f32 %v6994_v20, %v4061_v17  ;;  %v4062_v53 = vmax.f32 %v3934_v55, 0.0 }
 0x399   :  { %v4171_v51 = vmax.f32 %v6997_v47, %v4059_v48  ;;  %v4060_v31 = vmax.f32 %v3932_v44, 0.0 }
 0x39a   :  { %v4668_v61 = vpack.c.bf16 %v4173_v12, %v4173_v12  ;;  %v4174_v46 = vmax.f32 %v7000_v34, %v4062_v53 }
 0x39b   :  { %v4666_v32 = vpack.c.bf16 %v4171_v51, %v4171_v51  ;;  %v4172_v18 = vmax.f32 %v7004_v8, %v4060_v31 }
 0x39c   :  { %4254 = vst.msk [vmem:[%s7127_s10 + $0x38] sm:$0xf] %vm4239_vm3, %v4668_v61  ;;  %v4669_v36 = vpack.c.bf16 %v4174_v46, %v4174_v46 }
 0x39d   :  { %4252 = vst.msk [vmem:[%s7127_s10 + $0x30] sm:$0xf] %vm4239_vm3, %v4666_v32  ;;  %v4667_v13 = vpack.c.bf16 %v4172_v18, %v4172_v18 }
 0x39e   :  { %4255 = vst.msk [vmem:[%s7127_s10 + $0x3c] sm:$0xf] %vm4239_vm3, %v4669_v36 }
 0x39f   :  { %4253 = vst.msk [vmem:[%s7127_s10 + $0x34] sm:$0xf] %vm4239_vm3, %v4667_v13 }

// kernel: custom-call.32
= control target key start
LH: loop header
LB: loop body
LE: loop exit
PB: predicated region body
PF: predicated region fallthrough
CT: control target
= control target key end

     0   :  { %s6_s0 = inlined_call_operand.vmem [shape: f32[2,32], index: 0, kind: output, shape index: {}]  }

// kernel: pointnet2_seg_forward.7
= control target key start
LH: loop header
LB: loop body
LE: loop exit
PB: predicated region body
PF: predicated region fallthrough
CT: control target
= control target key end

     0   :  { %vm402_vm0 = vcmask 1040384   ;;  %vm305_vm1 = vcmask 547840   ;;  %vm403_vm2 = vcmask 1041408   ;;  %v2936_v5 = vmov 65535   ;;  %s3653_s1 = inlined_call_operand.vmem [shape: bf16[67,64], index: 1, kind: input, shape index: {}]   ;;  %s3654_s0 = inlined_call_operand.vmem [shape: bf16[8,64,67], index: 0, kind: input, shape index: {}]   ;;  %s3655_s4 = inlined_call_operand.vmem [shape: bf16[64,64], index: 4, kind: input, shape index: {}]   ;;  %s3656_s2 = inlined_call_operand.vmem [shape: f32[1,64], index: 2, kind: input, shape index: {}]   ;;  %s3657_s3 = inlined_call_operand.vmem [shape: f32[1,64], index: 3, kind: input, shape index: {}]   ;;  %s3658_s7 = inlined_call_operand.vmem [shape: bf16[64,128], index: 7, kind: input, shape index: {}]   ;;  %s3659_s5 = inlined_call_operand.vmem [shape: f32[1,64], index: 5, kind: input, shape index: {}]   ;;  %s3660_s6 = inlined_call_operand.vmem [shape: f32[1,64], index: 6, kind: input, shape index: {}]   ;;  %s3661_s8 = inlined_call_operand.vmem [shape: f32[1,128], index: 8, kind: input, shape index: {}]   ;;  %s3662_s9 = inlined_call_operand.vmem [shape: f32[1,128], index: 9, kind: input, shape index: {}]   ;;  %s3663_s10 = inlined_call_operand.vmem [shape: bf16[64,128], index: 10, kind: output, shape index: {}]  }
   0x1   :  { %v2891_v0 = vld [vmem:[%s3653_s1] sm:$0xff]   ;;  %v2892_v1 = vld [vmem:[%s3653_s1 + $0x8] sm:$0xff]   ;;  %v2893_v2 = vld [vmem:[%s3653_s1 + $0x10] sm:$0xff]   ;;  %v404_v6 = vsel %vm402_vm0, 4294967295, %v2936_v5  ;;  %vm968_vm3 = vcmask 523264  }
   0x2   :  { %2664 = vmatprep.subr.bf16.mxu0 %v2891_v0  ;;  %v2896_v3 = vld [vmem:[%s3654_s0] sm:$0xff]   ;;  %v2894_v7 = vld [vmem:[%s3653_s1 + $0x18] sm:$0xff]   ;;  %v405_v8 = vsel %vm403_vm2, %v404_v6, 0  ;;  %v2897_v10 = vld [vmem:[%s3654_s0 + $0x8] sm:$0xff]  }
   0x3   :  { %2665 = vmatpush3.bf16.msra.mxu0 %v2891_v0  ;;  %v2895_v4 = vld [vmem:[%s3653_s1 + $0x20] ss:$0 sps:$4 sm:$0x33]   ;;  %2674 = vmatprep.mubr.msk.bf16.mxu0 %vm305_vm1, %v2896_v3  ;;  %v2898_v11 = vld [vmem:[%s3654_s0 + $0x10] sm:$0xff]   ;;  %v2899_v12 = vld [vmem:[%s3654_s0 + $0x18] sm:$0xff]  }
   0x4   :  { %2666 = vmatprep.subr.bf16.mxu0 %v2892_v1  ;;  %v407_v9 = vand.u32 %v2895_v4, %v405_v8  ;;  %v2900_v13 = vld [vmem:[%s3654_s0 + $0x20] sm:$0xff]   ;;  %v2901_v15 = vld [vmem:[%s3654_s0 + $0x28] sm:$0xff]   ;;  %v2902_v16 = vld [vmem:[%s3654_s0 + $0x30] sm:$0xff]  }
   0x5   :  { %v2921_v14 = vld [vmem:[%s3655_s4] sm:$0xff]   ;;  %v2929_v17 = vld [vmem:[%s3655_s4 + $0x8] sm:$0xff]   ;;  %v2930_v18 = vld [vmem:[%s3655_s4 + $0x10] sm:$0xff]  }
   0x6   :  { %2882 = vmatprep.subr.bf16.mxu1 %v2921_v14  ;;  %v2903_v19 = vld [vmem:[%s3654_s0 + $0x38] sm:$0xff]   ;;  %v2904_v21 = vld [vmem:[%s3654_s0 + $0x40] sm:$0xff]   ;;  %v2905_v22 = vld [vmem:[%s3654_s0 + $0x48] sm:$0xff]  }
   0x7   :  { %2667 = vmatpush3.bf16.msra.mxu0 %v2892_v1  ;;  %2886 = vmatpush3.bf16.msra.mxu1 %v2921_v14  ;;  %v2931_v20 = vld [vmem:[%s3655_s4 + $0x18] sm:$0xff]   ;;  %v2906_v23 = vld [vmem:[%s3654_s0 + $0x50] sm:$0xff]   ;;  %v2908_v25 = vld [vmem:[%s3654_s0 + $0x60] sm:$0xff]  }
   0x8   :  { %2668 = vmatprep.subr.bf16.mxu0 %v2893_v2  ;;  %2883 = vmatprep.subr.bf16.mxu1 %v2929_v17  ;;  %v2907_v24 = vld [vmem:[%s3654_s0 + $0x58] sm:$0xff]   ;;  %v2909_v26 = vld [vmem:[%s3654_s0 + $0x68] sm:$0xff]   ;;  %v2910_v27 = vld [vmem:[%s3654_s0 + $0x70] sm:$0xff]  }
   0x9   :  { %v2911_v28 = vld [vmem:[%s3654_s0 + $0x78] sm:$0xff]   ;;  %v2912_v29 = vld [vmem:[%s3654_s0 + $0x80] sm:$0xff]   ;;  %v2913_v30 = vld [vmem:[%s3654_s0 + $0x88] sm:$0xff]  }
   0xa   :  { %v2914_v31 = vld [vmem:[%s3654_s0 + $0x90] sm:$0xff]   ;;  %v2915_v32 = vld [vmem:[%s3654_s0 + $0x98] sm:$0xff]   ;;  %v2916_v33 = vld [vmem:[%s3654_s0 + $0xa0] sm:$0xff]  }
   0xb   :  { %2669 = vmatpush3.bf16.msra.mxu0 %v2893_v2  ;;  %2887 = vmatpush3.bf16.msra.mxu1 %v2929_v17  ;;  %v2917_v34 = vld [vmem:[%s3654_s0 + $0xa8] sm:$0xff]   ;;  %v2918_v35 = vld [vmem:[%s3654_s0 + $0xb0] sm:$0xff]   ;;  %v2919_v36 = vld [vmem:[%s3654_s0 + $0xb8] sm:$0xff]  }
   0xc   :  { %2670 = vmatprep.subr.bf16.mxu0 %v2894_v7  ;;  %2884 = vmatprep.subr.bf16.mxu1 %v2930_v18  ;;  %v2920_v37 = vld [vmem:[%s3654_s0 + $0xc0] sm:$0xff]   ;;  %v2922_v38 = vld [vmem:[%s3654_s0 + $0xc8] sm:$0xff]   ;;  %v2923_v39 = vld [vmem:[%s3654_s0 + $0xd0] sm:$0xff]  }
   0xd   :  { %v2924_v40 = vld [vmem:[%s3654_s0 + $0xd8] sm:$0xff]   ;;  %v2925_v41 = vld [vmem:[%s3654_s0 + $0xe0] sm:$0xff]   ;;  %v2926_v42 = vld [vmem:[%s3654_s0 + $0xe8] sm:$0xff]  }
   0xe   :  { %v2927_v43 = vld [vmem:[%s3654_s0 + $0xf0] sm:$0xff]   ;;  %v2928_v44 = vld [vmem:[%s3654_s0 + $0xf8] sm:$0xff]   ;;  %v3150_v45 = vld [vmem:[%s3656_s2] ss:$0 sm:$0xff] }
   0xf   :  { %2671 = vmatpush3.bf16.msra.mxu0 %v2894_v7  ;;  %2888 = vmatpush3.bf16.msra.mxu1 %v2930_v18  ;;  %v3155_v46 = vld [vmem:[%s3657_s3] ss:$0 sm:$0xff] }
  0x10   :  { %2672 = vmatprep.subr.bf16.mxu0 %v407_v9  ;;  %2885 = vmatprep.subr.bf16.mxu1 %v2931_v20  ;;  %v3168_v60 = vld [vmem:[%s3658_s7] sm:$0xff]  }
  0x13   :  { %2673 = vmatpush3.bf16.msra.mxu0 %v407_v9  ;;  %2889 = vmatpush3.bf16.msra.mxu1 %v2931_v20 }
  0x14   :  { %2738 = vmatprep.subr.bf16.mxu0 %v2921_v14  ;;  %2810 = vmatprep.subr.bf16.mxu1 %v3168_v60 }
  0x16   :  { %2675 = vmatmul.mubr.msk.bf16.vlgmr.msra.gmra.mrb[0].mxu0 %vm305_vm1, %v2897_v10 }
  0x17   :  { %2678 = vmatprep.mubr.msk.bf16.mxu0 %vm305_vm1, %v2898_v11  ;;  %2739 = vmatpush3.bf16.msra.mxu0 %v2921_v14 }
  0x18   :  { %2740 = vmatprep.subr.bf16.mxu0 %v2929_v17 }
  0x1b   :  { %2741 = vmatpush3.bf16.msra.mxu0 %v2929_v17 }
  0x1c   :  { %2742 = vmatprep.subr.bf16.mxu0 %v2930_v18 }
  0x1e   :  { %2679 = vmatmul.mubr.msk.bf16.gmra.mrb[4].mxu0 %vm305_vm1, %v2899_v12 }
  0x1f   :  { %2682 = vmatprep.mubr.msk.bf16.mxu0 %vm305_vm1, %v2900_v13  ;;  %2743 = vmatpush3.bf16.msra.mxu0 %v2930_v18 }
  0x20   :  { %2744 = vmatprep.subr.bf16.mxu0 %v2931_v20 }
  0x23   :  { %2745 = vmatpush3.bf16.msra.mxu0 %v2931_v20 }
  0x26   :  { %2683 = vmatmul.mubr.msk.bf16.gmra.mrb[8].mxu0 %vm305_vm1, %v2901_v15 }
  0x27   :  { %2686 = vmatprep.mubr.msk.bf16.mxu0 %vm305_vm1, %v2902_v16 }
  0x2e   :  { %2687 = vmatmul.mubr.msk.bf16.gmra.mrb[12].mxu0 %vm305_vm1, %v2903_v19 }
  0x2f   :  { %2690 = vmatprep.mubr.msk.bf16.mxu0 %vm305_vm1, %v2904_v21 }
  0x36   :  { %2691 = vmatmul.mubr.msk.bf16.gmra.mrb[16].mxu0 %vm305_vm1, %v2905_v22 }
  0x37   :  { %2694 = vmatprep.mubr.msk.bf16.mxu0 %vm305_vm1, %v2906_v23 }
  0x3e   :  { %2695 = vmatmul.mubr.msk.bf16.gmra.mrb[20].mxu0 %vm305_vm1, %v2907_v24 }
  0x3f   :  { %2698 = vmatprep.mubr.msk.bf16.mxu0 %vm305_vm1, %v2908_v25 }
  0x46   :  { %2699 = vmatmul.mubr.msk.bf16.gmra.mrb[24].mxu0 %vm305_vm1, %v2909_v26 }
  0x47   :  { %2702 = vmatprep.mubr.msk.bf16.mxu0 %vm305_vm1, %v2910_v27 }
  0x4e   :  { %2703 = vmatmul.mubr.msk.bf16.gmra.mrb[28].mxu0 %vm305_vm1, %v2911_v28 }
  0x4f   :  { %2706 = vmatprep.mubr.msk.bf16.mxu0 %vm305_vm1, %v2912_v29 }
  0x56   :  { %2707 = vmatmul.mubr.msk.bf16.gmra.mrb[32].mxu0 %vm305_vm1, %v2913_v30 }
  0x57   :  { %2710 = vmatprep.mubr.msk.bf16.mxu0 %vm305_vm1, %v2914_v31 }
  0x5e   :  { %2711 = vmatmul.mubr.msk.bf16.gmra.mrb[36].mxu0 %vm305_vm1, %v2915_v32 }
  0x5f   :  { %2714 = vmatprep.mubr.msk.bf16.mxu0 %vm305_vm1, %v2916_v33 }
  0x66   :  { %2715 = vmatmul.mubr.msk.bf16.gmra.mrb[40].mxu0 %vm305_vm1, %v2917_v34 }
  0x67   :  { %2718 = vmatprep.mubr.msk.bf16.mxu0 %vm305_vm1, %v2918_v35 }
  0x6e   :  { %2719 = vmatmul.mubr.msk.bf16.gmra.mrb[44].mxu0 %vm305_vm1, %v2919_v36 }
  0x6f   :  { %2722 = vmatprep.mubr.msk.bf16.mxu0 %vm305_vm1, %v2920_v37 }
  0x76   :  { %2723 = vmatmul.mubr.msk.bf16.gmra.mrb[48].mxu0 %vm305_vm1, %v2922_v38 }
  0x77   :  { %2726 = vmatprep.mubr.msk.bf16.mxu0 %vm305_vm1, %v2923_v39 }
  0x7e   :  { %2727 = vmatmul.mubr.msk.bf16.gmra.mrb[52].mxu0 %vm305_vm1, %v2924_v40 }
  0x7f   :  { %2730 = vmatprep.mubr.msk.bf16.mxu0 %vm305_vm1, %v2925_v41 }
  0x86   :  { %2731 = vmatmul.mubr.msk.bf16.gmra.mrb[56].mxu0 %vm305_vm1, %v2926_v42 }
  0x87   :  { %2734 = vmatprep.mubr.msk.bf16.mxu0 %vm305_vm1, %v2927_v43 }
  0x8e   :  { %2735 = vmatmul.mubr.msk.bf16.gmra.mrb[60].mxu0 %vm305_vm1, %v2928_v44 }
  0xe9   :  { %v2676_v47 = vpop.f32.mrb[0].mxu0 }
  0xea   :  { %v706_v48 = vmul.f32 %v2676_v47, %v3150_v45  ;;  %v443_v49 = vpop.f32.mrb[1].mxu0 }
  0xeb   :  { %v704_v50 = vmul.f32 %v3150_v45, %v443_v49  ;;  %v2677_v51 = vpop.f32.mrb[2].mxu0 }
  0xec   :  { %v776_v52 = vadd.f32 %v3155_v46, %v706_v48  ;;  %v707_v53 = vmul.f32 %v2677_v51, %v3150_v45  ;;  %v446_v54 = vpop.f32.mrb[3].mxu0 }
  0xed   :  { %v774_v55 = vadd.f32 %v3155_v46, %v704_v50  ;;  %v705_v56 = vmul.f32 %v3150_v45, %v446_v54 }
  0xee   :  { %v777_v57 = vadd.f32 %v3155_v46, %v707_v53  ;;  %v840_v58 = vmax.f32 %v776_v52, 0.0 }
  0xef   :  { %v775_v59 = vadd.f32 %v3155_v46, %v705_v56  ;;  %v838_v61 = vmax.f32 %v774_v55, 0.0 }
  0xf0   :  { %v841_v62 = vmax.f32 %v777_v57, 0.0 }
  0xf1   :  { %v839_v63 = vmax.f32 %v775_v59, 0.0  ;;  %v2680_v0 = vpop.f32.mrb[4].mxu0 }
  0xf2   :  { %v903_v1 = vpack.c.bf16 %v841_v62, %v840_v58  ;;  %v710_v2 = vmul.f32 %v2680_v0, %v3150_v45  ;;  %v459_v3 = vpop.f32.mrb[5].mxu0 }
  0xf3   :  { %v902_v4 = vpack.c.bf16 %v839_v63, %v838_v61  ;;  %v708_v5 = vmul.f32 %v3150_v45, %v459_v3  ;;  %v2681_v6 = vpop.f32.mrb[6].mxu0 }
  0xf4   :  { %v780_v7 = vadd.f32 %v3155_v46, %v710_v2  ;;  %v711_v8 = vmul.f32 %v2681_v6, %v3150_v45  ;;  %v462_v9 = vpop.f32.mrb[7].mxu0 }
  0xf5   :  { %v778_v10 = vadd.f32 %v3155_v46, %v708_v5  ;;  %v709_v11 = vmul.f32 %v3150_v45, %v462_v9  ;;  %2746 = vmatprep.mubr.msk.bf16.mxu0 %vm968_vm3, %v902_v4 }
  0xf6   :  { %v781_v12 = vadd.f32 %v3155_v46, %v711_v8  ;;  %2747 = vmatmul.mubr.msk.bf16.vlgmr.msra.gmra.mrb[64].mxu0 %vm968_vm3, %v903_v1  ;;  %v844_v14 = vmax.f32 %v780_v7, 0.0 }
  0xf7   :  { %v779_v13 = vadd.f32 %v3155_v46, %v709_v11  ;;  %v842_v16 = vmax.f32 %v778_v10, 0.0 }
  0xf8   :  { %v845_v15 = vmax.f32 %v781_v12, 0.0 }
  0xf9   :  { %v843_v17 = vmax.f32 %v779_v13, 0.0  ;;  %v2684_v18 = vpop.f32.mrb[8].mxu0 }
  0xfa   :  { %v905_v19 = vpack.c.bf16 %v845_v15, %v844_v14  ;;  %v714_v20 = vmul.f32 %v2684_v18, %v3150_v45  ;;  %v475_v21 = vpop.f32.mrb[9].mxu0 }
  0xfb   :  { %v904_v22 = vpack.c.bf16 %v843_v17, %v842_v16  ;;  %v712_v23 = vmul.f32 %v3150_v45, %v475_v21  ;;  %v2685_v24 = vpop.f32.mrb[10].mxu0 }
  0xfc   :  { %v784_v25 = vadd.f32 %v3155_v46, %v714_v20  ;;  %v715_v26 = vmul.f32 %v2685_v24, %v3150_v45  ;;  %v478_v27 = vpop.f32.mrb[11].mxu0 }
  0xfd   :  { %v782_v28 = vadd.f32 %v3155_v46, %v712_v23  ;;  %v713_v29 = vmul.f32 %v3150_v45, %v478_v27  ;;  %2750 = vmatprep.mubr.msk.bf16.mxu0 %vm968_vm3, %v904_v22 }
  0xfe   :  { %v785_v30 = vadd.f32 %v3155_v46, %v715_v26  ;;  %2751 = vmatmul.mubr.msk.bf16.gmra.mrb[68].mxu0 %vm968_vm3, %v905_v19  ;;  %v848_v32 = vmax.f32 %v784_v25, 0.0 }
  0xff   :  { %v783_v31 = vadd.f32 %v3155_v46, %v713_v29  ;;  %v846_v34 = vmax.f32 %v782_v28, 0.0 }
 0x100   :  { %v849_v33 = vmax.f32 %v785_v30, 0.0 }
 0x101   :  { %v847_v35 = vmax.f32 %v783_v31, 0.0  ;;  %v2688_v36 = vpop.f32.mrb[12].mxu0 }
 0x102   :  { %v907_v37 = vpack.c.bf16 %v849_v33, %v848_v32  ;;  %v718_v38 = vmul.f32 %v2688_v36, %v3150_v45  ;;  %v491_v39 = vpop.f32.mrb[13].mxu0 }
 0x103   :  { %v906_v40 = vpack.c.bf16 %v847_v35, %v846_v34  ;;  %v716_v41 = vmul.f32 %v3150_v45, %v491_v39  ;;  %v2689_v42 = vpop.f32.mrb[14].mxu0 }
 0x104   :  { %v788_v43 = vadd.f32 %v3155_v46, %v718_v38  ;;  %v719_v44 = vmul.f32 %v2689_v42, %v3150_v45  ;;  %v494_v47 = vpop.f32.mrb[15].mxu0 }
 0x105   :  { %v786_v48 = vadd.f32 %v3155_v46, %v716_v41  ;;  %v717_v49 = vmul.f32 %v3150_v45, %v494_v47  ;;  %2754 = vmatprep.mubr.msk.bf16.mxu0 %vm968_vm3, %v906_v40 }
 0x106   :  { %v789_v50 = vadd.f32 %v3155_v46, %v719_v44  ;;  %2755 = vmatmul.mubr.msk.bf16.gmra.mrb[72].mxu0 %vm968_vm3, %v907_v37  ;;  %v852_v52 = vmax.f32 %v788_v43, 0.0 }
 0x107   :  { %v787_v51 = vadd.f32 %v3155_v46, %v717_v49  ;;  %v850_v54 = vmax.f32 %v786_v48, 0.0 }
 0x108   :  { %v853_v53 = vmax.f32 %v789_v50, 0.0 }
 0x109   :  { %v851_v55 = vmax.f32 %v787_v51, 0.0  ;;  %v2692_v56 = vpop.f32.mrb[16].mxu0 }
 0x10a   :  { %v909_v57 = vpack.c.bf16 %v853_v53, %v852_v52  ;;  %v722_v58 = vmul.f32 %v2692_v56, %v3150_v45  ;;  %v507_v59 = vpop.f32.mrb[17].mxu0 }
 0x10b   :  { %v908_v61 = vpack.c.bf16 %v851_v55, %v850_v54  ;;  %v720_v62 = vmul.f32 %v3150_v45, %v507_v59  ;;  %v2693_v63 = vpop.f32.mrb[18].mxu0 }
 0x10c   :  { %v792_v0 = vadd.f32 %v3155_v46, %v722_v58  ;;  %v723_v1 = vmul.f32 %v2693_v63, %v3150_v45  ;;  %v510_v2 = vpop.f32.mrb[19].mxu0 }
 0x10d   :  { %v790_v3 = vadd.f32 %v3155_v46, %v720_v62  ;;  %v721_v4 = vmul.f32 %v3150_v45, %v510_v2  ;;  %2758 = vmatprep.mubr.msk.bf16.mxu0 %vm968_vm3, %v908_v61 }
 0x10e   :  { %v793_v5 = vadd.f32 %v3155_v46, %v723_v1  ;;  %2759 = vmatmul.mubr.msk.bf16.gmra.mrb[76].mxu0 %vm968_vm3, %v909_v57  ;;  %v856_v7 = vmax.f32 %v792_v0, 0.0 }
 0x10f   :  { %v791_v6 = vadd.f32 %v3155_v46, %v721_v4  ;;  %v854_v9 = vmax.f32 %v790_v3, 0.0 }
 0x110   :  { %v857_v8 = vmax.f32 %v793_v5, 0.0 }
 0x111   :  { %v855_v10 = vmax.f32 %v791_v6, 0.0  ;;  %v2696_v11 = vpop.f32.mrb[20].mxu0 }
 0x112   :  { %v911_v12 = vpack.c.bf16 %v857_v8, %v856_v7  ;;  %v726_v13 = vmul.f32 %v2696_v11, %v3150_v45  ;;  %v523_v14 = vpop.f32.mrb[21].mxu0 }
 0x113   :  { %v910_v15 = vpack.c.bf16 %v855_v10, %v854_v9  ;;  %v724_v16 = vmul.f32 %v3150_v45, %v523_v14  ;;  %v2697_v17 = vpop.f32.mrb[22].mxu0  ;;  %v2933_v14 = vld [vmem:[%s3658_s7 + $0x8] sm:$0xff]  }
 0x114   :  { %v796_v18 = vadd.f32 %v3155_v46, %v726_v13  ;;  %v727_v19 = vmul.f32 %v2697_v17, %v3150_v45  ;;  %v526_v20 = vpop.f32.mrb[23].mxu0 }
 0x115   :  { %v794_v21 = vadd.f32 %v3155_v46, %v724_v16  ;;  %v725_v22 = vmul.f32 %v3150_v45, %v526_v20  ;;  %2762 = vmatprep.mubr.msk.bf16.mxu0 %vm968_vm3, %v910_v15 }
 0x116   :  { %v797_v23 = vadd.f32 %v3155_v46, %v727_v19  ;;  %2763 = vmatmul.mubr.msk.bf16.gmra.mrb[80].mxu0 %vm968_vm3, %v911_v12  ;;  %v860_v25 = vmax.f32 %v796_v18, 0.0 }
 0x117   :  { %v795_v24 = vadd.f32 %v3155_v46, %v725_v22  ;;  %v858_v27 = vmax.f32 %v794_v21, 0.0  ;;  %v2934_v21 = vld [vmem:[%s3658_s7 + $0x10] sm:$0xff]  }
 0x118   :  { %v861_v26 = vmax.f32 %v797_v23, 0.0 }
 0x119   :  { %v859_v28 = vmax.f32 %v795_v24, 0.0  ;;  %v2700_v29 = vpop.f32.mrb[24].mxu0 }
 0x11a   :  { %v913_v30 = vpack.c.bf16 %v861_v26, %v860_v25  ;;  %v730_v31 = vmul.f32 %v2700_v29, %v3150_v45  ;;  %v539_v32 = vpop.f32.mrb[25].mxu0 }
 0x11b   :  { %v912_v33 = vpack.c.bf16 %v859_v28, %v858_v27  ;;  %v728_v34 = vmul.f32 %v3150_v45, %v539_v32  ;;  %v2701_v35 = vpop.f32.mrb[26].mxu0 }
 0x11c   :  { %v800_v36 = vadd.f32 %v3155_v46, %v730_v31  ;;  %v731_v37 = vmul.f32 %v2701_v35, %v3150_v45  ;;  %v542_v38 = vpop.f32.mrb[27].mxu0 }
 0x11d   :  { %v798_v39 = vadd.f32 %v3155_v46, %v728_v34  ;;  %v729_v40 = vmul.f32 %v3150_v45, %v542_v38  ;;  %2766 = vmatprep.mubr.msk.bf16.mxu0 %vm968_vm3, %v912_v33  ;;  %v2935_v33 = vld [vmem:[%s3658_s7 + $0x18] sm:$0xff]  }
 0x11e   :  { %v801_v41 = vadd.f32 %v3155_v46, %v731_v37  ;;  %2767 = vmatmul.mubr.msk.bf16.gmra.mrb[84].mxu0 %vm968_vm3, %v913_v30  ;;  %v864_v43 = vmax.f32 %v800_v36, 0.0 }
 0x11f   :  { %v799_v42 = vadd.f32 %v3155_v46, %v729_v40  ;;  %v862_v47 = vmax.f32 %v798_v39, 0.0 }
 0x120   :  { %v865_v44 = vmax.f32 %v801_v41, 0.0 }
 0x121   :  { %v863_v48 = vmax.f32 %v799_v42, 0.0  ;;  %v2704_v49 = vpop.f32.mrb[28].mxu0 }
 0x122   :  { %v915_v50 = vpack.c.bf16 %v865_v44, %v864_v43  ;;  %v734_v51 = vmul.f32 %v2704_v49, %v3150_v45  ;;  %v555_v52 = vpop.f32.mrb[29].mxu0 }
 0x123   :  { %v914_v53 = vpack.c.bf16 %v863_v48, %v862_v47  ;;  %v732_v54 = vmul.f32 %v3150_v45, %v555_v52  ;;  %v2705_v55 = vpop.f32.mrb[30].mxu0 }
 0x124   :  { %v804_v56 = vadd.f32 %v3155_v46, %v734_v51  ;;  %v735_v57 = vmul.f32 %v2705_v55, %v3150_v45  ;;  %v558_v58 = vpop.f32.mrb[31].mxu0 }
 0x125   :  { %v802_v59 = vadd.f32 %v3155_v46, %v732_v54  ;;  %v733_v61 = vmul.f32 %v3150_v45, %v558_v58  ;;  %2770 = vmatprep.mubr.msk.bf16.mxu0 %vm968_vm3, %v914_v53 }
 0x126   :  { %v805_v62 = vadd.f32 %v3155_v46, %v735_v57  ;;  %2771 = vmatmul.mubr.msk.bf16.gmra.mrb[88].mxu0 %vm968_vm3, %v915_v50  ;;  %v868_v0 = vmax.f32 %v804_v56, 0.0 }
 0x127   :  { %v803_v63 = vadd.f32 %v3155_v46, %v733_v61  ;;  %v866_v2 = vmax.f32 %v802_v59, 0.0 }
 0x128   :  { %v869_v1 = vmax.f32 %v805_v62, 0.0 }
 0x129   :  { %v867_v3 = vmax.f32 %v803_v63, 0.0  ;;  %v2708_v4 = vpop.f32.mrb[32].mxu0 }
 0x12a   :  { %v917_v5 = vpack.c.bf16 %v869_v1, %v868_v0  ;;  %v738_v6 = vmul.f32 %v2708_v4, %v3150_v45  ;;  %v571_v7 = vpop.f32.mrb[33].mxu0 }
 0x12b   :  { %v736_v8 = vmul.f32 %v3150_v45, %v571_v7  ;;  %v2709_v9 = vpop.f32.mrb[34].mxu0  ;;  %v916_v10 = vpack.c.bf16 %v867_v3, %v866_v2 }
 0x12c   :  { %v808_v11 = vadd.f32 %v3155_v46, %v738_v6  ;;  %v739_v12 = vmul.f32 %v2709_v9, %v3150_v45  ;;  %v574_v13 = vpop.f32.mrb[35].mxu0 }
 0x12d   :  { %v806_v15 = vadd.f32 %v3155_v46, %v736_v8  ;;  %v737_v16 = vmul.f32 %v3150_v45, %v574_v13  ;;  %2774 = vmatprep.mubr.msk.bf16.mxu1 %vm968_vm3, %v916_v10 }
 0x12e   :  { %v809_v17 = vadd.f32 %v3155_v46, %v739_v12  ;;  %2775 = vmatmul.mubr.msk.bf16.vlgmr.msra.gmra.mrb[0].mxu1 %vm968_vm3, %v917_v5  ;;  %v872_v19 = vmax.f32 %v808_v11, 0.0 }
 0x12f   :  { %v807_v18 = vadd.f32 %v3155_v46, %v737_v16  ;;  %2811 = vmatpush3.bf16.msra.mxu1 %v3168_v60  ;;  %v870_v22 = vmax.f32 %v806_v15, 0.0 }
 0x130   :  { %v873_v20 = vmax.f32 %v809_v17, 0.0  ;;  %2812 = vmatprep.subr.bf16.mxu1 %v2933_v14 }
 0x131   :  { %v871_v23 = vmax.f32 %v807_v18, 0.0  ;;  %v2712_v24 = vpop.f32.mrb[36].mxu0 }
 0x132   :  { %v919_v25 = vpack.c.bf16 %v873_v20, %v872_v19  ;;  %v742_v26 = vmul.f32 %v2712_v24, %v3150_v45  ;;  %v587_v27 = vpop.f32.mrb[37].mxu0 }
 0x133   :  { %v918_v28 = vpack.c.bf16 %v871_v23, %v870_v22  ;;  %v740_v29 = vmul.f32 %v3150_v45, %v587_v27  ;;  %v2713_v30 = vpop.f32.mrb[38].mxu0  ;;  %2813 = vmatpush3.bf16.msra.mxu1 %v2933_v14 }
 0x134   :  { %v812_v60 = vadd.f32 %v3155_v46, %v742_v26  ;;  %v743_v31 = vmul.f32 %v2713_v30, %v3150_v45  ;;  %v590_v32 = vpop.f32.mrb[39].mxu0  ;;  %2814 = vmatprep.subr.bf16.mxu1 %v2934_v21 }
 0x135   :  { %v810_v34 = vadd.f32 %v3155_v46, %v740_v29  ;;  %v741_v35 = vmul.f32 %v3150_v45, %v590_v32  ;;  %2778 = vmatprep.mubr.msk.bf16.mxu1 %vm968_vm3, %v918_v28 }
 0x136   :  { %v813_v36 = vadd.f32 %v3155_v46, %v743_v31  ;;  %2779 = vmatmul.mubr.msk.bf16.gmra.mrb[4].mxu1 %vm968_vm3, %v919_v25  ;;  %v876_v38 = vmax.f32 %v812_v60, 0.0 }
 0x137   :  { %v811_v37 = vadd.f32 %v3155_v46, %v741_v35  ;;  %2815 = vmatpush3.bf16.msra.mxu1 %v2934_v21  ;;  %v874_v40 = vmax.f32 %v810_v34, 0.0 }
 0x138   :  { %v877_v39 = vmax.f32 %v813_v36, 0.0  ;;  %2816 = vmatprep.subr.bf16.mxu1 %v2935_v33 }
 0x139   :  { %v875_v41 = vmax.f32 %v811_v37, 0.0  ;;  %v2716_v42 = vpop.f32.mrb[40].mxu0 }
 0x13a   :  { %v921_v43 = vpack.c.bf16 %v877_v39, %v876_v38  ;;  %v746_v44 = vmul.f32 %v2716_v42, %v3150_v45  ;;  %v603_v47 = vpop.f32.mrb[41].mxu0 }
 0x13b   :  { %v920_v48 = vpack.c.bf16 %v875_v41, %v874_v40  ;;  %v744_v49 = vmul.f32 %v3150_v45, %v603_v47  ;;  %v2717_v50 = vpop.f32.mrb[42].mxu0  ;;  %2817 = vmatpush3.bf16.msra.mxu1 %v2935_v33 }
 0x13c   :  { %v816_v51 = vadd.f32 %v3155_v46, %v746_v44  ;;  %v747_v52 = vmul.f32 %v2717_v50, %v3150_v45  ;;  %v606_v53 = vpop.f32.mrb[43].mxu0 }
 0x13d   :  { %v814_v54 = vadd.f32 %v3155_v46, %v744_v49  ;;  %v745_v55 = vmul.f32 %v3150_v45, %v606_v53  ;;  %2782 = vmatprep.mubr.msk.bf16.mxu1 %vm968_vm3, %v920_v48 }
 0x13e   :  { %v817_v56 = vadd.f32 %v3155_v46, %v747_v52  ;;  %2783 = vmatmul.mubr.msk.bf16.gmra.mrb[8].mxu1 %vm968_vm3, %v921_v43  ;;  %v880_v58 = vmax.f32 %v816_v51, 0.0 }
 0x13f   :  { %v815_v57 = vadd.f32 %v3155_v46, %v745_v55  ;;  %v878_v61 = vmax.f32 %v814_v54, 0.0 }
 0x140   :  { %v881_v59 = vmax.f32 %v817_v56, 0.0 }
 0x141   :  { %v879_v62 = vmax.f32 %v815_v57, 0.0  ;;  %v2720_v63 = vpop.f32.mrb[44].mxu0 }
 0x142   :  { %v923_v0 = vpack.c.bf16 %v881_v59, %v880_v58  ;;  %v750_v1 = vmul.f32 %v2720_v63, %v3150_v45  ;;  %v619_v2 = vpop.f32.mrb[45].mxu0 }
 0x143   :  { %v922_v3 = vpack.c.bf16 %v879_v62, %v878_v61  ;;  %v748_v4 = vmul.f32 %v3150_v45, %v619_v2  ;;  %v2721_v5 = vpop.f32.mrb[46].mxu0 }
 0x144   :  { %v820_v6 = vadd.f32 %v3155_v46, %v750_v1  ;;  %v751_v7 = vmul.f32 %v2721_v5, %v3150_v45  ;;  %v622_v8 = vpop.f32.mrb[47].mxu0 }
 0x145   :  { %v818_v9 = vadd.f32 %v3155_v46, %v748_v4  ;;  %v749_v10 = vmul.f32 %v3150_v45, %v622_v8  ;;  %2786 = vmatprep.mubr.msk.bf16.mxu1 %vm968_vm3, %v922_v3 }
 0x146   :  { %v821_v11 = vadd.f32 %v3155_v46, %v751_v7  ;;  %2787 = vmatmul.mubr.msk.bf16.gmra.mrb[12].mxu1 %vm968_vm3, %v923_v0  ;;  %v884_v13 = vmax.f32 %v820_v6, 0.0 }
 0x147   :  { %v819_v12 = vadd.f32 %v3155_v46, %v749_v10  ;;  %v882_v15 = vmax.f32 %v818_v9, 0.0 }
 0x148   :  { %v885_v14 = vmax.f32 %v821_v11, 0.0 }
 0x149   :  { %v883_v16 = vmax.f32 %v819_v12, 0.0  ;;  %v2724_v17 = vpop.f32.mrb[48].mxu0 }
 0x14a   :  { %v925_v18 = vpack.c.bf16 %v885_v14, %v884_v13  ;;  %v754_v19 = vmul.f32 %v2724_v17, %v3150_v45  ;;  %v635_v20 = vpop.f32.mrb[49].mxu0 }
 0x14b   :  { %v924_v21 = vpack.c.bf16 %v883_v16, %v882_v15  ;;  %v752_v22 = vmul.f32 %v3150_v45, %v635_v20  ;;  %v2725_v23 = vpop.f32.mrb[50].mxu0 }
 0x14c   :  { %v824_v24 = vadd.f32 %v3155_v46, %v754_v19  ;;  %v755_v25 = vmul.f32 %v2725_v23, %v3150_v45  ;;  %v638_v26 = vpop.f32.mrb[51].mxu0 }
 0x14d   :  { %v822_v27 = vadd.f32 %v3155_v46, %v752_v22  ;;  %v753_v28 = vmul.f32 %v3150_v45, %v638_v26  ;;  %2790 = vmatprep.mubr.msk.bf16.mxu1 %vm968_vm3, %v924_v21 }
 0x14e   :  { %v825_v29 = vadd.f32 %v3155_v46, %v755_v25  ;;  %2791 = vmatmul.mubr.msk.bf16.gmra.mrb[16].mxu1 %vm968_vm3, %v925_v18  ;;  %v888_v60 = vmax.f32 %v824_v24, 0.0 }
 0x14f   :  { %v823_v30 = vadd.f32 %v3155_v46, %v753_v28  ;;  %v886_v32 = vmax.f32 %v822_v27, 0.0 }
 0x150   :  { %v889_v31 = vmax.f32 %v825_v29, 0.0  ;;  %v3341_v29 = vld [vmem:[%s3660_s6] ss:$0 sm:$0xff] }
 0x151   :  { %v887_v33 = vmax.f32 %v823_v30, 0.0  ;;  %v2728_v34 = vpop.f32.mrb[52].mxu0 }
 0x152   :  { %v927_v35 = vpack.c.bf16 %v889_v31, %v888_v60  ;;  %v758_v36 = vmul.f32 %v2728_v34, %v3150_v45  ;;  %v651_v37 = vpop.f32.mrb[53].mxu0 }
 0x153   :  { %v926_v38 = vpack.c.bf16 %v887_v33, %v886_v32  ;;  %v756_v39 = vmul.f32 %v3150_v45, %v651_v37  ;;  %v2729_v40 = vpop.f32.mrb[54].mxu0 }
 0x154   :  { %v828_v41 = vadd.f32 %v3155_v46, %v758_v36  ;;  %v759_v42 = vmul.f32 %v2729_v40, %v3150_v45  ;;  %v654_v43 = vpop.f32.mrb[55].mxu0 }
 0x155   :  { %v826_v44 = vadd.f32 %v3155_v46, %v756_v39  ;;  %v757_v47 = vmul.f32 %v3150_v45, %v654_v43  ;;  %2794 = vmatprep.mubr.msk.bf16.mxu1 %vm968_vm3, %v926_v38 }
 0x156   :  { %v829_v48 = vadd.f32 %v3155_v46, %v759_v42  ;;  %2795 = vmatmul.mubr.msk.bf16.gmra.mrb[20].mxu1 %vm968_vm3, %v927_v35  ;;  %v892_v50 = vmax.f32 %v828_v41, 0.0 }
 0x157   :  { %v827_v49 = vadd.f32 %v3155_v46, %v757_v47  ;;  %v890_v52 = vmax.f32 %v826_v44, 0.0 }
 0x158   :  { %v893_v51 = vmax.f32 %v829_v48, 0.0 }
 0x159   :  { %v891_v53 = vmax.f32 %v827_v49, 0.0  ;;  %v2732_v54 = vpop.f32.mrb[56].mxu0 }
 0x15a   :  { %v929_v55 = vpack.c.bf16 %v893_v51, %v892_v50  ;;  %v762_v56 = vmul.f32 %v2732_v54, %v3150_v45  ;;  %v667_v57 = vpop.f32.mrb[57].mxu0 }
 0x15b   :  { %v928_v58 = vpack.c.bf16 %v891_v53, %v890_v52  ;;  %v760_v59 = vmul.f32 %v3150_v45, %v667_v57  ;;  %v2733_v61 = vpop.f32.mrb[58].mxu0 }
 0x15c   :  { %v832_v62 = vadd.f32 %v3155_v46, %v762_v56  ;;  %v763_v63 = vmul.f32 %v2733_v61, %v3150_v45  ;;  %v670_v0 = vpop.f32.mrb[59].mxu0 }
 0x15d   :  { %v830_v1 = vadd.f32 %v3155_v46, %v760_v59  ;;  %v761_v2 = vmul.f32 %v3150_v45, %v670_v0  ;;  %2798 = vmatprep.mubr.msk.bf16.mxu1 %vm968_vm3, %v928_v58 }
 0x15e   :  { %v833_v3 = vadd.f32 %v3155_v46, %v763_v63  ;;  %2799 = vmatmul.mubr.msk.bf16.gmra.mrb[24].mxu1 %vm968_vm3, %v929_v55  ;;  %v896_v5 = vmax.f32 %v832_v62, 0.0 }
 0x15f   :  { %v831_v4 = vadd.f32 %v3155_v46, %v761_v2  ;;  %v894_v7 = vmax.f32 %v830_v1, 0.0 }
 0x160   :  { %v897_v6 = vmax.f32 %v833_v3, 0.0 }
 0x161   :  { %v895_v8 = vmax.f32 %v831_v4, 0.0  ;;  %v2736_v9 = vpop.f32.mrb[60].mxu0 }
 0x162   :  { %v931_v10 = vpack.c.bf16 %v897_v6, %v896_v5  ;;  %v766_v11 = vmul.f32 %v2736_v9, %v3150_v45  ;;  %v683_v12 = vpop.f32.mrb[61].mxu0 }
 0x163   :  { %v930_v13 = vpack.c.bf16 %v895_v8, %v894_v7  ;;  %v764_v14 = vmul.f32 %v3150_v45, %v683_v12  ;;  %v2737_v15 = vpop.f32.mrb[62].mxu0 }
 0x164   :  { %v836_v16 = vadd.f32 %v3155_v46, %v766_v11  ;;  %v767_v17 = vmul.f32 %v2737_v15, %v3150_v45  ;;  %v686_v18 = vpop.f32.mrb[63].mxu0 }
 0x165   :  { %v834_v19 = vadd.f32 %v3155_v46, %v764_v14  ;;  %v765_v20 = vmul.f32 %v3150_v45, %v686_v18  ;;  %2802 = vmatprep.mubr.msk.bf16.mxu1 %vm968_vm3, %v930_v13  ;;  %v3336_v45 = vld [vmem:[%s3659_s5] ss:$0 sm:$0xff] }
 0x166   :  { %v837_v21 = vadd.f32 %v3155_v46, %v767_v17  ;;  %2803 = vmatmul.mubr.msk.bf16.gmra.mrb[28].mxu1 %vm968_vm3, %v931_v10  ;;  %v900_v23 = vmax.f32 %v836_v16, 0.0 }
 0x167   :  { %v835_v22 = vadd.f32 %v3155_v46, %v765_v20  ;;  %v898_v25 = vmax.f32 %v834_v19, 0.0 }
 0x168   :  { %v901_v24 = vmax.f32 %v837_v21, 0.0 }
 0x169   :  { %v899_v26 = vmax.f32 %v835_v22, 0.0 }
 0x16a   :  { %v933_v27 = vpack.c.bf16 %v901_v24, %v900_v23 }
 0x16b   :  { %v932_v28 = vpack.c.bf16 %v899_v26, %v898_v25 }
 0x16d   :  { %2806 = vmatprep.mubr.msk.bf16.mxu1 %vm968_vm3, %v932_v28 }
 0x16e   :  { %2807 = vmatmul.mubr.msk.bf16.gmra.mrb[32].mxu1 %vm968_vm3, %v933_v27 }
 0x1c9   :  { %v2748_v46 = vpop.f32.mrb[64].mxu0 }
 0x1ca   :  { %v1362_v30 = vmul.f32 %v2748_v46, %v3336_v45  ;;  %v1099_v60 = vpop.f32.mrb[65].mxu0 }
 0x1cb   :  { %v1360_v31 = vmul.f32 %v3336_v45, %v1099_v60  ;;  %v2749_v32 = vpop.f32.mrb[66].mxu0 }
 0x1cc   :  { %v1432_v33 = vadd.f32 %v3341_v29, %v1362_v30  ;;  %v1363_v34 = vmul.f32 %v2749_v32, %v3336_v45  ;;  %v1102_v35 = vpop.f32.mrb[67].mxu0 }
 0x1cd   :  { %v1430_v36 = vadd.f32 %v3341_v29, %v1360_v31  ;;  %v1361_v37 = vmul.f32 %v3336_v45, %v1102_v35 }
 0x1ce   :  { %v1433_v38 = vadd.f32 %v3341_v29, %v1363_v34  ;;  %v1496_v40 = vmax.f32 %v1432_v33, 0.0 }
 0x1cf   :  { %v1431_v39 = vadd.f32 %v3341_v29, %v1361_v37  ;;  %v1494_v42 = vmax.f32 %v1430_v36, 0.0 }
 0x1d0   :  { %v1497_v41 = vmax.f32 %v1433_v38, 0.0 }
 0x1d1   :  { %v1495_v43 = vmax.f32 %v1431_v39, 0.0  ;;  %v2752_v44 = vpop.f32.mrb[68].mxu0 }
 0x1d2   :  { %v1559_v47 = vpack.c.bf16 %v1497_v41, %v1496_v40  ;;  %v1366_v48 = vmul.f32 %v2752_v44, %v3336_v45  ;;  %v1115_v49 = vpop.f32.mrb[69].mxu0 }
 0x1d3   :  { %v1558_v50 = vpack.c.bf16 %v1495_v43, %v1494_v42  ;;  %v1364_v51 = vmul.f32 %v3336_v45, %v1115_v49  ;;  %v2753_v52 = vpop.f32.mrb[70].mxu0 }
 0x1d4   :  { %v1436_v53 = vadd.f32 %v3341_v29, %v1366_v48  ;;  %v1367_v54 = vmul.f32 %v2753_v52, %v3336_v45  ;;  %v1118_v55 = vpop.f32.mrb[71].mxu0 }
 0x1d5   :  { %v1434_v56 = vadd.f32 %v3341_v29, %v1364_v51  ;;  %v1365_v57 = vmul.f32 %v3336_v45, %v1118_v55  ;;  %2818 = vmatprep.mubr.msk.bf16.mxu1 %vm968_vm3, %v1558_v50 }
 0x1d6   :  { %v1437_v58 = vadd.f32 %v3341_v29, %v1367_v54  ;;  %2819 = vmatmul.mubr.msk.bf16.vlgmr.msra.gmra.mrb[36].mxu1 %vm968_vm3, %v1559_v47  ;;  %v1500_v61 = vmax.f32 %v1436_v53, 0.0 }
 0x1d7   :  { %v1435_v59 = vadd.f32 %v3341_v29, %v1365_v57  ;;  %v1498_v63 = vmax.f32 %v1434_v56, 0.0 }
 0x1d8   :  { %v1501_v62 = vmax.f32 %v1437_v58, 0.0 }
 0x1d9   :  { %v1499_v0 = vmax.f32 %v1435_v59, 0.0  ;;  %v2756_v1 = vpop.f32.mrb[72].mxu0 }
 0x1da   :  { %v1561_v2 = vpack.c.bf16 %v1501_v62, %v1500_v61  ;;  %v1370_v3 = vmul.f32 %v2756_v1, %v3336_v45  ;;  %v1131_v4 = vpop.f32.mrb[73].mxu0 }
 0x1db   :  { %v1560_v5 = vpack.c.bf16 %v1499_v0, %v1498_v63  ;;  %v1368_v6 = vmul.f32 %v3336_v45, %v1131_v4  ;;  %v2757_v7 = vpop.f32.mrb[74].mxu0 }
 0x1dc   :  { %v1440_v8 = vadd.f32 %v3341_v29, %v1370_v3  ;;  %v1371_v9 = vmul.f32 %v2757_v7, %v3336_v45  ;;  %v1134_v10 = vpop.f32.mrb[75].mxu0 }
 0x1dd   :  { %v1438_v11 = vadd.f32 %v3341_v29, %v1368_v6  ;;  %v1369_v12 = vmul.f32 %v3336_v45, %v1134_v10  ;;  %2822 = vmatprep.mubr.msk.bf16.mxu1 %vm968_vm3, %v1560_v5 }
 0x1de   :  { %v1441_v13 = vadd.f32 %v3341_v29, %v1371_v9  ;;  %2823 = vmatmul.mubr.msk.bf16.gmra.mrb[40].mxu1 %vm968_vm3, %v1561_v2  ;;  %v1504_v15 = vmax.f32 %v1440_v8, 0.0 }
 0x1df   :  { %v1439_v14 = vadd.f32 %v3341_v29, %v1369_v12  ;;  %v1502_v17 = vmax.f32 %v1438_v11, 0.0 }
 0x1e0   :  { %v1505_v16 = vmax.f32 %v1441_v13, 0.0 }
 0x1e1   :  { %v1503_v18 = vmax.f32 %v1439_v14, 0.0  ;;  %v2760_v19 = vpop.f32.mrb[76].mxu0 }
 0x1e2   :  { %v1563_v20 = vpack.c.bf16 %v1505_v16, %v1504_v15  ;;  %v1374_v21 = vmul.f32 %v2760_v19, %v3336_v45  ;;  %v1147_v22 = vpop.f32.mrb[77].mxu0 }
 0x1e3   :  { %v1562_v23 = vpack.c.bf16 %v1503_v18, %v1502_v17  ;;  %v1372_v24 = vmul.f32 %v3336_v45, %v1147_v22  ;;  %v2761_v25 = vpop.f32.mrb[78].mxu0 }
 0x1e4   :  { %v1444_v26 = vadd.f32 %v3341_v29, %v1374_v21  ;;  %v1375_v27 = vmul.f32 %v2761_v25, %v3336_v45  ;;  %v1150_v28 = vpop.f32.mrb[79].mxu0 }
 0x1e5   :  { %v1442_v46 = vadd.f32 %v3341_v29, %v1372_v24  ;;  %v1373_v30 = vmul.f32 %v3336_v45, %v1150_v28  ;;  %2826 = vmatprep.mubr.msk.bf16.mxu1 %vm968_vm3, %v1562_v23 }
 0x1e6   :  { %v1445_v60 = vadd.f32 %v3341_v29, %v1375_v27  ;;  %2827 = vmatmul.mubr.msk.bf16.gmra.mrb[44].mxu1 %vm968_vm3, %v1563_v20  ;;  %v1508_v32 = vmax.f32 %v1444_v26, 0.0 }
 0x1e7   :  { %v1443_v31 = vadd.f32 %v3341_v29, %v1373_v30  ;;  %v1506_v34 = vmax.f32 %v1442_v46, 0.0 }
 0x1e8   :  { %v1509_v33 = vmax.f32 %v1445_v60, 0.0 }
 0x1e9   :  { %v1507_v35 = vmax.f32 %v1443_v31, 0.0  ;;  %v2764_v36 = vpop.f32.mrb[80].mxu0 }
 0x1ea   :  { %v1565_v37 = vpack.c.bf16 %v1509_v33, %v1508_v32  ;;  %v1378_v38 = vmul.f32 %v2764_v36, %v3336_v45  ;;  %v1163_v39 = vpop.f32.mrb[81].mxu0 }
 0x1eb   :  { %v1564_v40 = vpack.c.bf16 %v1507_v35, %v1506_v34  ;;  %v1376_v41 = vmul.f32 %v3336_v45, %v1163_v39  ;;  %v2765_v42 = vpop.f32.mrb[82].mxu0 }
 0x1ec   :  { %v1448_v43 = vadd.f32 %v3341_v29, %v1378_v38  ;;  %v1379_v44 = vmul.f32 %v2765_v42, %v3336_v45  ;;  %v1166_v47 = vpop.f32.mrb[83].mxu0 }
 0x1ed   :  { %v1446_v48 = vadd.f32 %v3341_v29, %v1376_v41  ;;  %v1377_v49 = vmul.f32 %v3336_v45, %v1166_v47  ;;  %2830 = vmatprep.mubr.msk.bf16.mxu1 %vm968_vm3, %v1564_v40 }
 0x1ee   :  { %v1449_v50 = vadd.f32 %v3341_v29, %v1379_v44  ;;  %2831 = vmatmul.mubr.msk.bf16.gmra.mrb[48].mxu1 %vm968_vm3, %v1565_v37  ;;  %v1512_v52 = vmax.f32 %v1448_v43, 0.0 }
 0x1ef   :  { %v1447_v51 = vadd.f32 %v3341_v29, %v1377_v49  ;;  %v1510_v54 = vmax.f32 %v1446_v48, 0.0 }
 0x1f0   :  { %v1513_v53 = vmax.f32 %v1449_v50, 0.0 }
 0x1f1   :  { %v1511_v55 = vmax.f32 %v1447_v51, 0.0  ;;  %v2768_v56 = vpop.f32.mrb[84].mxu0 }
 0x1f2   :  { %v1567_v57 = vpack.c.bf16 %v1513_v53, %v1512_v52  ;;  %v1382_v58 = vmul.f32 %v2768_v56, %v3336_v45  ;;  %v1179_v59 = vpop.f32.mrb[85].mxu0 }
 0x1f3   :  { %v1566_v61 = vpack.c.bf16 %v1511_v55, %v1510_v54  ;;  %v1380_v62 = vmul.f32 %v3336_v45, %v1179_v59  ;;  %v2769_v63 = vpop.f32.mrb[86].mxu0 }
 0x1f4   :  { %v1452_v0 = vadd.f32 %v3341_v29, %v1382_v58  ;;  %v1383_v1 = vmul.f32 %v2769_v63, %v3336_v45  ;;  %v1182_v2 = vpop.f32.mrb[87].mxu0 }
 0x1f5   :  { %v1450_v3 = vadd.f32 %v3341_v29, %v1380_v62  ;;  %v1381_v4 = vmul.f32 %v3336_v45, %v1182_v2  ;;  %2834 = vmatprep.mubr.msk.bf16.mxu1 %vm968_vm3, %v1566_v61 }
 0x1f6   :  { %v1453_v5 = vadd.f32 %v3341_v29, %v1383_v1  ;;  %2835 = vmatmul.mubr.msk.bf16.gmra.mrb[52].mxu1 %vm968_vm3, %v1567_v57  ;;  %v1516_v7 = vmax.f32 %v1452_v0, 0.0 }
 0x1f7   :  { %v1451_v6 = vadd.f32 %v3341_v29, %v1381_v4  ;;  %v1514_v9 = vmax.f32 %v1450_v3, 0.0 }
 0x1f8   :  { %v1517_v8 = vmax.f32 %v1453_v5, 0.0 }
 0x1f9   :  { %v1515_v10 = vmax.f32 %v1451_v6, 0.0  ;;  %v2772_v11 = vpop.f32.mrb[88].mxu0 }
 0x1fa   :  { %v1569_v12 = vpack.c.bf16 %v1517_v8, %v1516_v7  ;;  %v1386_v13 = vmul.f32 %v2772_v11, %v3336_v45  ;;  %v1195_v14 = vpop.f32.mrb[89].mxu0 }
 0x1fb   :  { %v1568_v15 = vpack.c.bf16 %v1515_v10, %v1514_v9  ;;  %v1384_v16 = vmul.f32 %v3336_v45, %v1195_v14  ;;  %v2773_v17 = vpop.f32.mrb[90].mxu0 }
 0x1fc   :  { %v1456_v18 = vadd.f32 %v3341_v29, %v1386_v13  ;;  %v1387_v19 = vmul.f32 %v2773_v17, %v3336_v45  ;;  %v1198_v20 = vpop.f32.mrb[91].mxu0 }
 0x1fd   :  { %v1454_v21 = vadd.f32 %v3341_v29, %v1384_v16  ;;  %v1385_v22 = vmul.f32 %v3336_v45, %v1198_v20  ;;  %2838 = vmatprep.mubr.msk.bf16.mxu1 %vm968_vm3, %v1568_v15 }
 0x1fe   :  { %v1457_v23 = vadd.f32 %v3341_v29, %v1387_v19  ;;  %2839 = vmatmul.mubr.msk.bf16.gmra.mrb[56].mxu1 %vm968_vm3, %v1569_v12  ;;  %v1520_v25 = vmax.f32 %v1456_v18, 0.0 }
 0x1ff   :  { %v1455_v24 = vadd.f32 %v3341_v29, %v1385_v22  ;;  %v1518_v27 = vmax.f32 %v1454_v21, 0.0 }
 0x200   :  { %v1521_v26 = vmax.f32 %v1457_v23, 0.0 }
 0x201   :  { %v1519_v28 = vmax.f32 %v1455_v24, 0.0  ;;  %v2776_v46 = vpop.f32.mrb[0].mxu1 }
 0x202   :  { %v1571_v30 = vpack.c.bf16 %v1521_v26, %v1520_v25  ;;  %v1390_v60 = vmul.f32 %v2776_v46, %v3336_v45  ;;  %v1211_v31 = vpop.f32.mrb[1].mxu1 }
 0x203   :  { %v1570_v32 = vpack.c.bf16 %v1519_v28, %v1518_v27  ;;  %v1388_v33 = vmul.f32 %v3336_v45, %v1211_v31  ;;  %v2777_v34 = vpop.f32.mrb[2].mxu1 }
 0x204   :  { %v1460_v35 = vadd.f32 %v3341_v29, %v1390_v60  ;;  %v1391_v36 = vmul.f32 %v2777_v34, %v3336_v45  ;;  %v1214_v37 = vpop.f32.mrb[3].mxu1 }
 0x205   :  { %v1458_v38 = vadd.f32 %v3341_v29, %v1388_v33  ;;  %v1389_v39 = vmul.f32 %v3336_v45, %v1214_v37  ;;  %2842 = vmatprep.mubr.msk.bf16.mxu1 %vm968_vm3, %v1570_v32 }
 0x206   :  { %v1461_v40 = vadd.f32 %v3341_v29, %v1391_v36  ;;  %2843 = vmatmul.mubr.msk.bf16.gmra.mrb[60].mxu1 %vm968_vm3, %v1571_v30  ;;  %v1524_v42 = vmax.f32 %v1460_v35, 0.0 }
 0x207   :  { %v1459_v41 = vadd.f32 %v3341_v29, %v1389_v39  ;;  %v1522_v44 = vmax.f32 %v1458_v38, 0.0 }
 0x208   :  { %v1525_v43 = vmax.f32 %v1461_v40, 0.0 }
 0x209   :  { %v1523_v47 = vmax.f32 %v1459_v41, 0.0  ;;  %v2780_v48 = vpop.f32.mrb[4].mxu1 }
 0x20a   :  { %v1573_v49 = vpack.c.bf16 %v1525_v43, %v1524_v42  ;;  %v1394_v50 = vmul.f32 %v2780_v48, %v3336_v45  ;;  %v1227_v51 = vpop.f32.mrb[5].mxu1 }
 0x20b   :  { %v1572_v52 = vpack.c.bf16 %v1523_v47, %v1522_v44  ;;  %v1392_v53 = vmul.f32 %v3336_v45, %v1227_v51  ;;  %v2781_v54 = vpop.f32.mrb[6].mxu1 }
 0x20c   :  { %v1464_v55 = vadd.f32 %v3341_v29, %v1394_v50  ;;  %v1395_v56 = vmul.f32 %v2781_v54, %v3336_v45  ;;  %v1230_v57 = vpop.f32.mrb[7].mxu1 }
 0x20d   :  { %v1462_v58 = vadd.f32 %v3341_v29, %v1392_v53  ;;  %v1393_v59 = vmul.f32 %v3336_v45, %v1230_v57  ;;  %2846 = vmatprep.mubr.msk.bf16.mxu1 %vm968_vm3, %v1572_v52 }
 0x20e   :  { %v1465_v61 = vadd.f32 %v3341_v29, %v1395_v56  ;;  %2847 = vmatmul.mubr.msk.bf16.gmra.mrb[64].mxu1 %vm968_vm3, %v1573_v49  ;;  %v1528_v63 = vmax.f32 %v1464_v55, 0.0 }
 0x20f   :  { %v1463_v62 = vadd.f32 %v3341_v29, %v1393_v59  ;;  %v1526_v1 = vmax.f32 %v1462_v58, 0.0 }
 0x210   :  { %v1529_v0 = vmax.f32 %v1465_v61, 0.0 }
 0x211   :  { %v1527_v2 = vmax.f32 %v1463_v62, 0.0  ;;  %v2784_v3 = vpop.f32.mrb[8].mxu1 }
 0x212   :  { %v1575_v4 = vpack.c.bf16 %v1529_v0, %v1528_v63  ;;  %v1398_v5 = vmul.f32 %v2784_v3, %v3336_v45  ;;  %v1243_v6 = vpop.f32.mrb[9].mxu1 }
 0x213   :  { %v1574_v7 = vpack.c.bf16 %v1527_v2, %v1526_v1  ;;  %v1396_v8 = vmul.f32 %v3336_v45, %v1243_v6  ;;  %v2785_v9 = vpop.f32.mrb[10].mxu1 }
 0x214   :  { %v1468_v10 = vadd.f32 %v3341_v29, %v1398_v5  ;;  %v1399_v11 = vmul.f32 %v2785_v9, %v3336_v45  ;;  %v1246_v12 = vpop.f32.mrb[11].mxu1 }
 0x215   :  { %v1466_v13 = vadd.f32 %v3341_v29, %v1396_v8  ;;  %v1397_v14 = vmul.f32 %v3336_v45, %v1246_v12  ;;  %2850 = vmatprep.mubr.msk.bf16.mxu1 %vm968_vm3, %v1574_v7 }
 0x216   :  { %v1469_v15 = vadd.f32 %v3341_v29, %v1399_v11  ;;  %2851 = vmatmul.mubr.msk.bf16.gmra.mrb[68].mxu1 %vm968_vm3, %v1575_v4  ;;  %v1532_v17 = vmax.f32 %v1468_v10, 0.0 }
 0x217   :  { %v1467_v16 = vadd.f32 %v3341_v29, %v1397_v14  ;;  %v1530_v19 = vmax.f32 %v1466_v13, 0.0 }
 0x218   :  { %v1533_v18 = vmax.f32 %v1469_v15, 0.0 }
 0x219   :  { %v1531_v20 = vmax.f32 %v1467_v16, 0.0  ;;  %v2788_v21 = vpop.f32.mrb[12].mxu1 }
 0x21a   :  { %v1577_v22 = vpack.c.bf16 %v1533_v18, %v1532_v17  ;;  %v1402_v23 = vmul.f32 %v2788_v21, %v3336_v45  ;;  %v1259_v24 = vpop.f32.mrb[13].mxu1 }
 0x21b   :  { %v1576_v25 = vpack.c.bf16 %v1531_v20, %v1530_v19  ;;  %v1400_v26 = vmul.f32 %v3336_v45, %v1259_v24  ;;  %v2789_v27 = vpop.f32.mrb[14].mxu1 }
 0x21c   :  { %v1472_v28 = vadd.f32 %v3341_v29, %v1402_v23  ;;  %v1403_v46 = vmul.f32 %v2789_v27, %v3336_v45  ;;  %v1262_v30 = vpop.f32.mrb[15].mxu1 }
 0x21d   :  { %v1470_v60 = vadd.f32 %v3341_v29, %v1400_v26  ;;  %v1401_v31 = vmul.f32 %v3336_v45, %v1262_v30  ;;  %2854 = vmatprep.mubr.msk.bf16.mxu1 %vm968_vm3, %v1576_v25 }
 0x21e   :  { %v1473_v32 = vadd.f32 %v3341_v29, %v1403_v46  ;;  %2855 = vmatmul.mubr.msk.bf16.gmra.mrb[72].mxu1 %vm968_vm3, %v1577_v22  ;;  %v1536_v34 = vmax.f32 %v1472_v28, 0.0 }
 0x21f   :  { %v1471_v33 = vadd.f32 %v3341_v29, %v1401_v31  ;;  %v1534_v36 = vmax.f32 %v1470_v60, 0.0 }
 0x220   :  { %v1537_v35 = vmax.f32 %v1473_v32, 0.0 }
 0x221   :  { %v1535_v37 = vmax.f32 %v1471_v33, 0.0  ;;  %v2792_v38 = vpop.f32.mrb[16].mxu1 }
 0x222   :  { %v1579_v39 = vpack.c.bf16 %v1537_v35, %v1536_v34  ;;  %v1406_v40 = vmul.f32 %v2792_v38, %v3336_v45  ;;  %v1275_v41 = vpop.f32.mrb[17].mxu1 }
 0x223   :  { %v1578_v42 = vpack.c.bf16 %v1535_v37, %v1534_v36  ;;  %v1404_v43 = vmul.f32 %v3336_v45, %v1275_v41  ;;  %v2793_v44 = vpop.f32.mrb[18].mxu1 }
 0x224   :  { %v1476_v47 = vadd.f32 %v3341_v29, %v1406_v40  ;;  %v1407_v48 = vmul.f32 %v2793_v44, %v3336_v45  ;;  %v1278_v49 = vpop.f32.mrb[19].mxu1 }
 0x225   :  { %v1474_v50 = vadd.f32 %v3341_v29, %v1404_v43  ;;  %v1405_v51 = vmul.f32 %v3336_v45, %v1278_v49  ;;  %2858 = vmatprep.mubr.msk.bf16.mxu1 %vm968_vm3, %v1578_v42 }
 0x226   :  { %v1477_v52 = vadd.f32 %v3341_v29, %v1407_v48  ;;  %2859 = vmatmul.mubr.msk.bf16.gmra.mrb[76].mxu1 %vm968_vm3, %v1579_v39  ;;  %v1540_v54 = vmax.f32 %v1476_v47, 0.0 }
 0x227   :  { %v1475_v53 = vadd.f32 %v3341_v29, %v1405_v51  ;;  %v1538_v56 = vmax.f32 %v1474_v50, 0.0 }
 0x228   :  { %v1541_v55 = vmax.f32 %v1477_v52, 0.0 }
 0x229   :  { %v1539_v57 = vmax.f32 %v1475_v53, 0.0  ;;  %v2796_v58 = vpop.f32.mrb[20].mxu1 }
 0x22a   :  { %v1581_v59 = vpack.c.bf16 %v1541_v55, %v1540_v54  ;;  %v1410_v61 = vmul.f32 %v2796_v58, %v3336_v45  ;;  %v1291_v62 = vpop.f32.mrb[21].mxu1 }
 0x22b   :  { %v1580_v63 = vpack.c.bf16 %v1539_v57, %v1538_v56  ;;  %v1408_v0 = vmul.f32 %v3336_v45, %v1291_v62  ;;  %v2797_v1 = vpop.f32.mrb[22].mxu1 }
 0x22c   :  { %v1480_v2 = vadd.f32 %v3341_v29, %v1410_v61  ;;  %v1411_v3 = vmul.f32 %v2797_v1, %v3336_v45  ;;  %v1294_v4 = vpop.f32.mrb[23].mxu1 }
 0x22d   :  { %v1478_v5 = vadd.f32 %v3341_v29, %v1408_v0  ;;  %v1409_v6 = vmul.f32 %v3336_v45, %v1294_v4  ;;  %2862 = vmatprep.mubr.msk.bf16.mxu1 %vm968_vm3, %v1580_v63 }
 0x22e   :  { %v1481_v7 = vadd.f32 %v3341_v29, %v1411_v3  ;;  %2863 = vmatmul.mubr.msk.bf16.gmra.mrb[80].mxu1 %vm968_vm3, %v1581_v59  ;;  %v1544_v9 = vmax.f32 %v1480_v2, 0.0 }
 0x22f   :  { %v1479_v8 = vadd.f32 %v3341_v29, %v1409_v6  ;;  %v1542_v11 = vmax.f32 %v1478_v5, 0.0 }
 0x230   :  { %v1545_v10 = vmax.f32 %v1481_v7, 0.0 }
 0x231   :  { %v1543_v12 = vmax.f32 %v1479_v8, 0.0  ;;  %v2800_v13 = vpop.f32.mrb[24].mxu1 }
 0x232   :  { %v1583_v14 = vpack.c.bf16 %v1545_v10, %v1544_v9  ;;  %v1414_v15 = vmul.f32 %v2800_v13, %v3336_v45  ;;  %v1307_v16 = vpop.f32.mrb[25].mxu1 }
 0x233   :  { %v1582_v17 = vpack.c.bf16 %v1543_v12, %v1542_v11  ;;  %v1412_v18 = vmul.f32 %v3336_v45, %v1307_v16  ;;  %v2801_v19 = vpop.f32.mrb[26].mxu1 }
 0x234   :  { %v1484_v20 = vadd.f32 %v3341_v29, %v1414_v15  ;;  %v1415_v21 = vmul.f32 %v2801_v19, %v3336_v45  ;;  %v1310_v22 = vpop.f32.mrb[27].mxu1  ;;  %v3512_v15 = vld [vmem:[%s3662_s9] ss:$0 sm:$0xff] }
 0x235   :  { %v1482_v23 = vadd.f32 %v3341_v29, %v1412_v18  ;;  %v1413_v24 = vmul.f32 %v3336_v45, %v1310_v22  ;;  %2866 = vmatprep.mubr.msk.bf16.mxu1 %vm968_vm3, %v1582_v17 }
 0x236   :  { %v1485_v25 = vadd.f32 %v3341_v29, %v1415_v21  ;;  %2867 = vmatmul.mubr.msk.bf16.gmra.mrb[84].mxu1 %vm968_vm3, %v1583_v14  ;;  %v1548_v27 = vmax.f32 %v1484_v20, 0.0 }
 0x237   :  { %v1483_v26 = vadd.f32 %v3341_v29, %v1413_v24  ;;  %v1546_v46 = vmax.f32 %v1482_v23, 0.0 }
 0x238   :  { %v1549_v28 = vmax.f32 %v1485_v25, 0.0 }
 0x239   :  { %v1547_v30 = vmax.f32 %v1483_v26, 0.0  ;;  %v2804_v60 = vpop.f32.mrb[28].mxu1 }
 0x23a   :  { %v1585_v31 = vpack.c.bf16 %v1549_v28, %v1548_v27  ;;  %v1418_v32 = vmul.f32 %v2804_v60, %v3336_v45  ;;  %v1323_v33 = vpop.f32.mrb[29].mxu1 }
 0x23b   :  { %v1584_v34 = vpack.c.bf16 %v1547_v30, %v1546_v46  ;;  %v1416_v35 = vmul.f32 %v3336_v45, %v1323_v33  ;;  %v2805_v36 = vpop.f32.mrb[30].mxu1 }
 0x23c   :  { %v1488_v37 = vadd.f32 %v3341_v29, %v1418_v32  ;;  %v1419_v38 = vmul.f32 %v2805_v36, %v3336_v45  ;;  %v1326_v39 = vpop.f32.mrb[31].mxu1 }
 0x23d   :  { %v1486_v40 = vadd.f32 %v3341_v29, %v1416_v35  ;;  %v1417_v41 = vmul.f32 %v3336_v45, %v1326_v39  ;;  %2870 = vmatprep.mubr.msk.bf16.mxu1 %vm968_vm3, %v1584_v34 }
 0x23e   :  { %v1489_v42 = vadd.f32 %v3341_v29, %v1419_v38  ;;  %2871 = vmatmul.mubr.msk.bf16.gmra.mrb[88].mxu1 %vm968_vm3, %v1585_v31  ;;  %v1552_v44 = vmax.f32 %v1488_v37, 0.0 }
 0x23f   :  { %v1487_v43 = vadd.f32 %v3341_v29, %v1417_v41  ;;  %v1550_v48 = vmax.f32 %v1486_v40, 0.0 }
 0x240   :  { %v1553_v47 = vmax.f32 %v1489_v42, 0.0 }
 0x241   :  { %v1551_v49 = vmax.f32 %v1487_v43, 0.0  ;;  %v2808_v50 = vpop.f32.mrb[32].mxu1 }
 0x242   :  { %v1587_v51 = vpack.c.bf16 %v1553_v47, %v1552_v44  ;;  %v1422_v52 = vmul.f32 %v2808_v50, %v3336_v45  ;;  %v1339_v53 = vpop.f32.mrb[33].mxu1 }
 0x243   :  { %v1586_v54 = vpack.c.bf16 %v1551_v49, %v1550_v48  ;;  %v1420_v55 = vmul.f32 %v3336_v45, %v1339_v53  ;;  %v2809_v56 = vpop.f32.mrb[34].mxu1 }
 0x244   :  { %v1492_v57 = vadd.f32 %v3341_v29, %v1422_v52  ;;  %v1423_v58 = vmul.f32 %v2809_v56, %v3336_v45  ;;  %v1342_v59 = vpop.f32.mrb[35].mxu1 }
 0x245   :  { %v1490_v61 = vadd.f32 %v3341_v29, %v1420_v55  ;;  %v1421_v62 = vmul.f32 %v3336_v45, %v1342_v59  ;;  %2874 = vmatprep.mubr.msk.bf16.mxu1 %vm968_vm3, %v1586_v54 }
 0x246   :  { %v1493_v63 = vadd.f32 %v3341_v29, %v1423_v58  ;;  %2875 = vmatmul.mubr.msk.bf16.gmra.mrb[92].mxu1 %vm968_vm3, %v1587_v51  ;;  %v1556_v1 = vmax.f32 %v1492_v57, 0.0 }
 0x247   :  { %v1491_v0 = vadd.f32 %v3341_v29, %v1421_v62  ;;  %v1554_v3 = vmax.f32 %v1490_v61, 0.0  ;;  %v3506_v29 = vld [vmem:[%s3661_s8] ss:$0 sm:$0xff] }
 0x248   :  { %v1557_v2 = vmax.f32 %v1493_v63, 0.0 }
 0x249   :  { %v1555_v4 = vmax.f32 %v1491_v0, 0.0 }
 0x24a   :  { %v1589_v5 = vpack.c.bf16 %v1557_v2, %v1556_v1 }
 0x24b   :  { %v1588_v6 = vpack.c.bf16 %v1555_v4, %v1554_v3 }
 0x24d   :  { %2878 = vmatprep.mubr.msk.bf16.mxu1 %vm968_vm3, %v1588_v6 }
 0x24e   :  { %2879 = vmatmul.mubr.msk.bf16.gmra.mrb[96].mxu1 %vm968_vm3, %v1589_v5 }
 0x2a9   :  { %v2820_v7 = vpop.f32.mrb[36].mxu1 }
 0x2aa   :  { %v1754_v45 = vpop.f32.mrb[37].mxu1  ;;  %v2017_v14 = vmul.f32 %v2820_v7, %v3506_v29 }
 0x2ab   :  { %v2821_v8 = vpop.f32.mrb[38].mxu1  ;;  %v2015_v16 = vmul.f32 %v3506_v29, %v1754_v45 }
 0x2ac   :  { %v1757_v9 = vpop.f32.mrb[39].mxu1  ;;  %v2018_v17 = vmul.f32 %v2821_v8, %v3506_v29  ;;  %v2087_v20 = vadd.f32 %v3512_v15, %v2017_v14 }
 0x2ad   :  { %v2016_v18 = vmul.f32 %v3506_v29, %v1757_v9  ;;  %v2085_v23 = vadd.f32 %v3512_v15, %v2015_v16 }
 0x2ae   :  { %v2088_v26 = vadd.f32 %v3512_v15, %v2018_v17  ;;  %v2151_v32 = vmax.f32 %v2087_v20, 0.0 }
 0x2af   :  { %v2086_v30 = vadd.f32 %v3512_v15, %v2016_v18  ;;  %v2149_v36 = vmax.f32 %v2085_v23, 0.0 }
 0x2b0   :  { %v2152_v40 = vmax.f32 %v2088_v26, 0.0 }
 0x2b1   :  { %v2824_v10 = vpop.f32.mrb[40].mxu1  ;;  %v2150_v44 = vmax.f32 %v2086_v30, 0.0 }
 0x2b2   :  { %v1770_v11 = vpop.f32.mrb[41].mxu1  ;;  %v2021_v33 = vmul.f32 %v2824_v10, %v3506_v29 }
 0x2b3   :  { %v2825_v12 = vpop.f32.mrb[42].mxu1  ;;  %v2019_v37 = vmul.f32 %v3506_v29, %v1770_v11 }
 0x2b4   :  { %v1773_v13 = vpop.f32.mrb[43].mxu1  ;;  %v2022_v41 = vmul.f32 %v2825_v12, %v3506_v29  ;;  %v2091_v51 = vadd.f32 %v3512_v15, %v2021_v33 }
 0x2b5   :  { %v2020_v47 = vmul.f32 %v3506_v29, %v1773_v13  ;;  %v2089_v55 = vadd.f32 %v3512_v15, %v2019_v37 }
 0x2b6   :  { %v2092_v59 = vadd.f32 %v3512_v15, %v2022_v41  ;;  %v2155_v3 = vmax.f32 %v2091_v51, 0.0 }
 0x2b7   :  { %v2090_v0 = vadd.f32 %v3512_v15, %v2020_v47  ;;  %v2153_v6 = vmax.f32 %v2089_v55, 0.0 }
 0x2b8   :  { %v2156_v8 = vmax.f32 %v2092_v59, 0.0 }
 0x2b9   :  { %v2828_v19 = vpop.f32.mrb[44].mxu1  ;;  %v2154_v11 = vmax.f32 %v2090_v0, 0.0 }
 0x2ba   :  { %v2025_v21 = vmul.f32 %v2828_v19, %v3506_v29  ;;  %v1786_v22 = vpop.f32.mrb[45].mxu1 }
 0x2bb   :  { %v2023_v24 = vmul.f32 %v3506_v29, %v1786_v22  ;;  %v2829_v25 = vpop.f32.mrb[46].mxu1 }
 0x2bc   :  { %v2095_v27 = vadd.f32 %v3512_v15, %v2025_v21  ;;  %v2026_v28 = vmul.f32 %v2829_v25, %v3506_v29  ;;  %v1789_v46 = vpop.f32.mrb[47].mxu1 }
 0x2bd   :  { %v2093_v60 = vadd.f32 %v3512_v15, %v2023_v24  ;;  %v2024_v31 = vmul.f32 %v3506_v29, %v1789_v46 }
 0x2be   :  { %v2159_v34 = vmax.f32 %v2095_v27, 0.0  ;;  %v2096_v35 = vadd.f32 %v3512_v15, %v2026_v28 }
 0x2bf   :  { %v2157_v38 = vmax.f32 %v2093_v60, 0.0  ;;  %v2094_v39 = vadd.f32 %v3512_v15, %v2024_v31 }
 0x2c0   :  { %v2215_v42 = vmax.f32 %v2151_v32, %v2159_v34  ;;  %v2160_v43 = vmax.f32 %v2096_v35, 0.0 }
 0x2c1   :  { %v2213_v48 = vmax.f32 %v2149_v36, %v2157_v38  ;;  %v2158_v49 = vmax.f32 %v2094_v39, 0.0  ;;  %v2832_v50 = vpop.f32.mrb[48].mxu1 }
 0x2c2   :  { %v2216_v52 = vmax.f32 %v2152_v40, %v2160_v43  ;;  %v2029_v53 = vmul.f32 %v2832_v50, %v3506_v29  ;;  %v1802_v54 = vpop.f32.mrb[49].mxu1 }
 0x2c3   :  { %v2214_v56 = vmax.f32 %v2150_v44, %v2158_v49  ;;  %v2027_v57 = vmul.f32 %v3506_v29, %v1802_v54  ;;  %v2833_v58 = vpop.f32.mrb[50].mxu1 }
 0x2c4   :  { %v2099_v61 = vadd.f32 %v3512_v15, %v2029_v53  ;;  %v2030_v62 = vmul.f32 %v2833_v58, %v3506_v29  ;;  %v1805_v63 = vpop.f32.mrb[51].mxu1 }
 0x2c5   :  { %v2097_v1 = vadd.f32 %v3512_v15, %v2027_v57  ;;  %v2028_v2 = vmul.f32 %v3506_v29, %v1805_v63 }
 0x2c6   :  { %v2163_v4 = vmax.f32 %v2099_v61, 0.0  ;;  %v2100_v5 = vadd.f32 %v3512_v15, %v2030_v62 }
 0x2c7   :  { %v2161_v7 = vmax.f32 %v2097_v1, 0.0  ;;  %v2098_v45 = vadd.f32 %v3512_v15, %v2028_v2 }
 0x2c8   :  { %v2219_v9 = vmax.f32 %v2155_v3, %v2163_v4  ;;  %v2164_v10 = vmax.f32 %v2100_v5, 0.0 }
 0x2c9   :  { %v2217_v12 = vmax.f32 %v2153_v6, %v2161_v7  ;;  %v2162_v13 = vmax.f32 %v2098_v45, 0.0  ;;  %v2836_v14 = vpop.f32.mrb[52].mxu1 }
 0x2ca   :  { %v2220_v16 = vmax.f32 %v2156_v8, %v2164_v10  ;;  %v2033_v17 = vmul.f32 %v2836_v14, %v3506_v29  ;;  %v1818_v18 = vpop.f32.mrb[53].mxu1 }
 0x2cb   :  { %v2218_v19 = vmax.f32 %v2154_v11, %v2162_v13  ;;  %v2031_v20 = vmul.f32 %v3506_v29, %v1818_v18  ;;  %v2837_v21 = vpop.f32.mrb[54].mxu1 }
 0x2cc   :  { %v2103_v22 = vadd.f32 %v3512_v15, %v2033_v17  ;;  %v2034_v23 = vmul.f32 %v2837_v21, %v3506_v29  ;;  %v1821_v24 = vpop.f32.mrb[55].mxu1 }
 0x2cd   :  { %v2101_v25 = vadd.f32 %v3512_v15, %v2031_v20  ;;  %v2032_v26 = vmul.f32 %v3506_v29, %v1821_v24 }
 0x2ce   :  { %v2167_v27 = vmax.f32 %v2103_v22, 0.0  ;;  %v2104_v28 = vadd.f32 %v3512_v15, %v2034_v23 }
 0x2cf   :  { %v2165_v46 = vmax.f32 %v2101_v25, 0.0  ;;  %v2102_v30 = vadd.f32 %v3512_v15, %v2032_v26 }
 0x2d0   :  { %v2223_v60 = vmax.f32 %v2215_v42, %v2167_v27  ;;  %v2168_v31 = vmax.f32 %v2104_v28, 0.0 }
 0x2d1   :  { %v2221_v32 = vmax.f32 %v2213_v48, %v2165_v46  ;;  %v2166_v33 = vmax.f32 %v2102_v30, 0.0  ;;  %v2840_v34 = vpop.f32.mrb[56].mxu1 }
 0x2d2   :  { %v2224_v35 = vmax.f32 %v2216_v52, %v2168_v31  ;;  %v2037_v36 = vmul.f32 %v2840_v34, %v3506_v29  ;;  %v1834_v37 = vpop.f32.mrb[57].mxu1 }
 0x2d3   :  { %v2222_v38 = vmax.f32 %v2214_v56, %v2166_v33  ;;  %v2035_v39 = vmul.f32 %v3506_v29, %v1834_v37  ;;  %v2841_v40 = vpop.f32.mrb[58].mxu1 }
 0x2d4   :  { %v2107_v41 = vadd.f32 %v3512_v15, %v2037_v36  ;;  %v2038_v43 = vmul.f32 %v2841_v40, %v3506_v29  ;;  %v1837_v44 = vpop.f32.mrb[59].mxu1 }
 0x2d5   :  { %v2105_v47 = vadd.f32 %v3512_v15, %v2035_v39  ;;  %v2036_v42 = vmul.f32 %v3506_v29, %v1837_v44 }
 0x2d6   :  { %v2171_v48 = vmax.f32 %v2107_v41, 0.0  ;;  %v2108_v49 = vadd.f32 %v3512_v15, %v2038_v43 }
 0x2d7   :  { %v2169_v50 = vmax.f32 %v2105_v47, 0.0  ;;  %v2106_v51 = vadd.f32 %v3512_v15, %v2036_v42 }
 0x2d8   :  { %v2227_v52 = vmax.f32 %v2219_v9, %v2171_v48  ;;  %v2172_v53 = vmax.f32 %v2108_v49, 0.0 }
 0x2d9   :  { %v2225_v54 = vmax.f32 %v2217_v12, %v2169_v50  ;;  %v2170_v55 = vmax.f32 %v2106_v51, 0.0  ;;  %v2844_v56 = vpop.f32.mrb[60].mxu1 }
 0x2da   :  { %v2228_v57 = vmax.f32 %v2220_v16, %v2172_v53  ;;  %v2041_v58 = vmul.f32 %v2844_v56, %v3506_v29  ;;  %v1850_v59 = vpop.f32.mrb[61].mxu1 }
 0x2db   :  { %v2226_v61 = vmax.f32 %v2218_v19, %v2170_v55  ;;  %v2039_v62 = vmul.f32 %v3506_v29, %v1850_v59  ;;  %v2845_v63 = vpop.f32.mrb[62].mxu1 }
 0x2dc   :  { %v2111_v0 = vadd.f32 %v3512_v15, %v2041_v58  ;;  %v2042_v1 = vmul.f32 %v2845_v63, %v3506_v29  ;;  %v1853_v2 = vpop.f32.mrb[63].mxu1 }
 0x2dd   :  { %v2109_v3 = vadd.f32 %v3512_v15, %v2039_v62  ;;  %v2040_v4 = vmul.f32 %v3506_v29, %v1853_v2 }
 0x2de   :  { %v2175_v5 = vmax.f32 %v2111_v0, 0.0  ;;  %v2112_v6 = vadd.f32 %v3512_v15, %v2042_v1 }
 0x2df   :  { %v2173_v7 = vmax.f32 %v2109_v3, 0.0  ;;  %v2110_v45 = vadd.f32 %v3512_v15, %v2040_v4 }
 0x2e0   :  { %v2231_v8 = vmax.f32 %v2223_v60, %v2175_v5  ;;  %v2176_v9 = vmax.f32 %v2112_v6, 0.0 }
 0x2e1   :  { %v2229_v10 = vmax.f32 %v2221_v32, %v2173_v7  ;;  %v2174_v11 = vmax.f32 %v2110_v45, 0.0  ;;  %v2848_v12 = vpop.f32.mrb[64].mxu1 }
 0x2e2   :  { %v2232_v13 = vmax.f32 %v2224_v35, %v2176_v9  ;;  %v2045_v14 = vmul.f32 %v2848_v12, %v3506_v29  ;;  %v1866_v16 = vpop.f32.mrb[65].mxu1 }
 0x2e3   :  { %v2230_v17 = vmax.f32 %v2222_v38, %v2174_v11  ;;  %v2043_v18 = vmul.f32 %v3506_v29, %v1866_v16  ;;  %v2849_v19 = vpop.f32.mrb[66].mxu1 }
 0x2e4   :  { %v2115_v20 = vadd.f32 %v3512_v15, %v2045_v14  ;;  %v2046_v21 = vmul.f32 %v2849_v19, %v3506_v29  ;;  %v1869_v22 = vpop.f32.mrb[67].mxu1 }
 0x2e5   :  { %v2113_v23 = vadd.f32 %v3512_v15, %v2043_v18  ;;  %v2044_v24 = vmul.f32 %v3506_v29, %v1869_v22 }
 0x2e6   :  { %v2179_v25 = vmax.f32 %v2115_v20, 0.0  ;;  %v2116_v26 = vadd.f32 %v3512_v15, %v2046_v21 }
 0x2e7   :  { %v2177_v27 = vmax.f32 %v2113_v23, 0.0  ;;  %v2114_v28 = vadd.f32 %v3512_v15, %v2044_v24 }
 0x2e8   :  { %v2235_v46 = vmax.f32 %v2227_v52, %v2179_v25  ;;  %v2180_v30 = vmax.f32 %v2116_v26, 0.0 }
 0x2e9   :  { %v2233_v60 = vmax.f32 %v2225_v54, %v2177_v27  ;;  %v2178_v31 = vmax.f32 %v2114_v28, 0.0  ;;  %v2852_v32 = vpop.f32.mrb[68].mxu1 }
 0x2ea   :  { %v2236_v33 = vmax.f32 %v2228_v57, %v2180_v30  ;;  %v2049_v34 = vmul.f32 %v2852_v32, %v3506_v29  ;;  %v1882_v35 = vpop.f32.mrb[69].mxu1 }
 0x2eb   :  { %v2234_v36 = vmax.f32 %v2226_v61, %v2178_v31  ;;  %v2047_v37 = vmul.f32 %v3506_v29, %v1882_v35  ;;  %v2853_v38 = vpop.f32.mrb[70].mxu1 }
 0x2ec   :  { %v2119_v39 = vadd.f32 %v3512_v15, %v2049_v34  ;;  %v2050_v40 = vmul.f32 %v2853_v38, %v3506_v29  ;;  %v1885_v41 = vpop.f32.mrb[71].mxu1 }
 0x2ed   :  { %v2117_v43 = vadd.f32 %v3512_v15, %v2047_v37  ;;  %v2048_v44 = vmul.f32 %v3506_v29, %v1885_v41 }
 0x2ee   :  { %v2183_v47 = vmax.f32 %v2119_v39, 0.0  ;;  %v2120_v42 = vadd.f32 %v3512_v15, %v2050_v40 }
 0x2ef   :  { %v2181_v48 = vmax.f32 %v2117_v43, 0.0  ;;  %v2118_v49 = vadd.f32 %v3512_v15, %v2048_v44 }
 0x2f0   :  { %v2239_v50 = vmax.f32 %v2231_v8, %v2183_v47  ;;  %v2184_v51 = vmax.f32 %v2120_v42, 0.0 }
 0x2f1   :  { %v2237_v52 = vmax.f32 %v2229_v10, %v2181_v48  ;;  %v2182_v53 = vmax.f32 %v2118_v49, 0.0  ;;  %v2856_v54 = vpop.f32.mrb[72].mxu1 }
 0x2f2   :  { %v2240_v55 = vmax.f32 %v2232_v13, %v2184_v51  ;;  %v2053_v56 = vmul.f32 %v2856_v54, %v3506_v29  ;;  %v1898_v57 = vpop.f32.mrb[73].mxu1 }
 0x2f3   :  { %v2238_v58 = vmax.f32 %v2230_v17, %v2182_v53  ;;  %v2051_v59 = vmul.f32 %v3506_v29, %v1898_v57  ;;  %v2857_v61 = vpop.f32.mrb[74].mxu1 }
 0x2f4   :  { %v2123_v62 = vadd.f32 %v3512_v15, %v2053_v56  ;;  %v2054_v63 = vmul.f32 %v2857_v61, %v3506_v29  ;;  %v1901_v0 = vpop.f32.mrb[75].mxu1 }
 0x2f5   :  { %v2121_v1 = vadd.f32 %v3512_v15, %v2051_v59  ;;  %v2052_v2 = vmul.f32 %v3506_v29, %v1901_v0 }
 0x2f6   :  { %v2187_v3 = vmax.f32 %v2123_v62, 0.0  ;;  %v2124_v4 = vadd.f32 %v3512_v15, %v2054_v63 }
 0x2f7   :  { %v2185_v5 = vmax.f32 %v2121_v1, 0.0  ;;  %v2122_v6 = vadd.f32 %v3512_v15, %v2052_v2 }
 0x2f8   :  { %v2243_v7 = vmax.f32 %v2235_v46, %v2187_v3  ;;  %v2188_v45 = vmax.f32 %v2124_v4, 0.0 }
 0x2f9   :  { %v2241_v8 = vmax.f32 %v2233_v60, %v2185_v5  ;;  %v2186_v9 = vmax.f32 %v2122_v6, 0.0  ;;  %v2860_v10 = vpop.f32.mrb[76].mxu1 }
 0x2fa   :  { %v2244_v11 = vmax.f32 %v2236_v33, %v2188_v45  ;;  %v2057_v12 = vmul.f32 %v2860_v10, %v3506_v29  ;;  %v1914_v13 = vpop.f32.mrb[77].mxu1 }
 0x2fb   :  { %v2242_v14 = vmax.f32 %v2234_v36, %v2186_v9  ;;  %v2055_v16 = vmul.f32 %v3506_v29, %v1914_v13  ;;  %v2861_v17 = vpop.f32.mrb[78].mxu1 }
 0x2fc   :  { %v2127_v18 = vadd.f32 %v3512_v15, %v2057_v12  ;;  %v2058_v19 = vmul.f32 %v2861_v17, %v3506_v29  ;;  %v1917_v20 = vpop.f32.mrb[79].mxu1 }
 0x2fd   :  { %v2125_v21 = vadd.f32 %v3512_v15, %v2055_v16  ;;  %v2056_v22 = vmul.f32 %v3506_v29, %v1917_v20 }
 0x2fe   :  { %v2191_v23 = vmax.f32 %v2127_v18, 0.0  ;;  %v2128_v24 = vadd.f32 %v3512_v15, %v2058_v19 }
 0x2ff   :  { %v2189_v25 = vmax.f32 %v2125_v21, 0.0  ;;  %v2126_v26 = vadd.f32 %v3512_v15, %v2056_v22 }
 0x300   :  { %v2247_v27 = vmax.f32 %v2239_v50, %v2191_v23  ;;  %v2192_v28 = vmax.f32 %v2128_v24, 0.0 }
 0x301   :  { %v2245_v46 = vmax.f32 %v2237_v52, %v2189_v25  ;;  %v2190_v30 = vmax.f32 %v2126_v26, 0.0  ;;  %v2864_v60 = vpop.f32.mrb[80].mxu1 }
 0x302   :  { %v2248_v31 = vmax.f32 %v2240_v55, %v2192_v28  ;;  %v2061_v32 = vmul.f32 %v2864_v60, %v3506_v29  ;;  %v1930_v33 = vpop.f32.mrb[81].mxu1 }
 0x303   :  { %v2246_v34 = vmax.f32 %v2238_v58, %v2190_v30  ;;  %v2059_v35 = vmul.f32 %v3506_v29, %v1930_v33  ;;  %v2865_v36 = vpop.f32.mrb[82].mxu1 }
 0x304   :  { %v2131_v37 = vadd.f32 %v3512_v15, %v2061_v32  ;;  %v2062_v38 = vmul.f32 %v2865_v36, %v3506_v29  ;;  %v1933_v39 = vpop.f32.mrb[83].mxu1 }
 0x305   :  { %v2129_v40 = vadd.f32 %v3512_v15, %v2059_v35  ;;  %v2060_v41 = vmul.f32 %v3506_v29, %v1933_v39 }
 0x306   :  { %v2195_v43 = vmax.f32 %v2131_v37, 0.0  ;;  %v2132_v44 = vadd.f32 %v3512_v15, %v2062_v38 }
 0x307   :  { %v2193_v47 = vmax.f32 %v2129_v40, 0.0  ;;  %v2130_v42 = vadd.f32 %v3512_v15, %v2060_v41 }
 0x308   :  { %v2251_v48 = vmax.f32 %v2243_v7, %v2195_v43  ;;  %v2196_v49 = vmax.f32 %v2132_v44, 0.0 }
 0x309   :  { %v2249_v50 = vmax.f32 %v2241_v8, %v2193_v47  ;;  %v2194_v51 = vmax.f32 %v2130_v42, 0.0  ;;  %v2868_v52 = vpop.f32.mrb[84].mxu1 }
 0x30a   :  { %v2252_v53 = vmax.f32 %v2244_v11, %v2196_v49  ;;  %v2065_v54 = vmul.f32 %v2868_v52, %v3506_v29  ;;  %v1946_v55 = vpop.f32.mrb[85].mxu1 }
 0x30b   :  { %v2250_v56 = vmax.f32 %v2242_v14, %v2194_v51  ;;  %v2063_v57 = vmul.f32 %v3506_v29, %v1946_v55  ;;  %v2869_v58 = vpop.f32.mrb[86].mxu1 }
 0x30c   :  { %v2135_v59 = vadd.f32 %v3512_v15, %v2065_v54  ;;  %v2066_v61 = vmul.f32 %v2869_v58, %v3506_v29  ;;  %v1949_v62 = vpop.f32.mrb[87].mxu1 }
 0x30d   :  { %v2133_v63 = vadd.f32 %v3512_v15, %v2063_v57  ;;  %v2064_v0 = vmul.f32 %v3506_v29, %v1949_v62 }
 0x30e   :  { %v2199_v1 = vmax.f32 %v2135_v59, 0.0  ;;  %v2136_v2 = vadd.f32 %v3512_v15, %v2066_v61 }
 0x30f   :  { %v2197_v3 = vmax.f32 %v2133_v63, 0.0  ;;  %v2134_v4 = vadd.f32 %v3512_v15, %v2064_v0 }
 0x310   :  { %v2255_v5 = vmax.f32 %v2247_v27, %v2199_v1  ;;  %v2200_v6 = vmax.f32 %v2136_v2, 0.0 }
 0x311   :  { %v2253_v7 = vmax.f32 %v2245_v46, %v2197_v3  ;;  %v2198_v45 = vmax.f32 %v2134_v4, 0.0  ;;  %v2872_v8 = vpop.f32.mrb[88].mxu1 }
 0x312   :  { %v2256_v9 = vmax.f32 %v2248_v31, %v2200_v6  ;;  %v2069_v10 = vmul.f32 %v2872_v8, %v3506_v29  ;;  %v1962_v11 = vpop.f32.mrb[89].mxu1 }
 0x313   :  { %v2254_v12 = vmax.f32 %v2246_v34, %v2198_v45  ;;  %v2067_v13 = vmul.f32 %v3506_v29, %v1962_v11  ;;  %v2873_v14 = vpop.f32.mrb[90].mxu1 }
 0x314   :  { %v2139_v16 = vadd.f32 %v3512_v15, %v2069_v10  ;;  %v2070_v17 = vmul.f32 %v2873_v14, %v3506_v29  ;;  %v1965_v18 = vpop.f32.mrb[91].mxu1 }
 0x315   :  { %v2137_v19 = vadd.f32 %v3512_v15, %v2067_v13  ;;  %v2068_v20 = vmul.f32 %v3506_v29, %v1965_v18 }
 0x316   :  { %v2203_v21 = vmax.f32 %v2139_v16, 0.0  ;;  %v2140_v22 = vadd.f32 %v3512_v15, %v2070_v17 }
 0x317   :  { %v2201_v23 = vmax.f32 %v2137_v19, 0.0  ;;  %v2138_v24 = vadd.f32 %v3512_v15, %v2068_v20 }
 0x318   :  { %v2259_v25 = vmax.f32 %v2251_v48, %v2203_v21  ;;  %v2204_v26 = vmax.f32 %v2140_v22, 0.0 }
 0x319   :  { %v2257_v27 = vmax.f32 %v2249_v50, %v2201_v23  ;;  %v2202_v28 = vmax.f32 %v2138_v24, 0.0  ;;  %v2876_v46 = vpop.f32.mrb[92].mxu1 }
 0x31a   :  { %v2260_v30 = vmax.f32 %v2252_v53, %v2204_v26  ;;  %v2073_v60 = vmul.f32 %v2876_v46, %v3506_v29  ;;  %v1978_v31 = vpop.f32.mrb[93].mxu1 }
 0x31b   :  { %v2258_v32 = vmax.f32 %v2250_v56, %v2202_v28  ;;  %v2071_v33 = vmul.f32 %v3506_v29, %v1978_v31  ;;  %v2877_v34 = vpop.f32.mrb[94].mxu1 }
 0x31c   :  { %v2143_v35 = vadd.f32 %v3512_v15, %v2073_v60  ;;  %v2074_v36 = vmul.f32 %v2877_v34, %v3506_v29  ;;  %v1981_v37 = vpop.f32.mrb[95].mxu1 }
 0x31d   :  { %v2141_v38 = vadd.f32 %v3512_v15, %v2071_v33  ;;  %v2072_v39 = vmul.f32 %v3506_v29, %v1981_v37 }
 0x31e   :  { %v2207_v40 = vmax.f32 %v2143_v35, 0.0  ;;  %v2144_v41 = vadd.f32 %v3512_v15, %v2074_v36 }
 0x31f   :  { %v2205_v43 = vmax.f32 %v2141_v38, 0.0  ;;  %v2142_v44 = vadd.f32 %v3512_v15, %v2072_v39 }
 0x320   :  { %v2263_v47 = vmax.f32 %v2255_v5, %v2207_v40  ;;  %v2208_v42 = vmax.f32 %v2144_v41, 0.0 }
 0x321   :  { %v2261_v48 = vmax.f32 %v2253_v7, %v2205_v43  ;;  %v2206_v49 = vmax.f32 %v2142_v44, 0.0  ;;  %v2880_v50 = vpop.f32.mrb[96].mxu1 }
 0x322   :  { %v2264_v51 = vmax.f32 %v2256_v9, %v2208_v42  ;;  %v2077_v52 = vmul.f32 %v2880_v50, %v3506_v29  ;;  %v1994_v53 = vpop.f32.mrb[97].mxu1 }
 0x323   :  { %v2262_v54 = vmax.f32 %v2254_v12, %v2206_v49  ;;  %v2075_v55 = vmul.f32 %v3506_v29, %v1994_v53  ;;  %v2881_v56 = vpop.f32.mrb[98].mxu1 }
 0x324   :  { %v2540_v57 = vpack.c.bf16 %v2264_v51, %v2263_v47  ;;  %v2147_v58 = vadd.f32 %v3512_v15, %v2077_v52  ;;  %v2078_v59 = vmul.f32 %v2881_v56, %v3506_v29  ;;  %v1997_v61 = vpop.f32.mrb[99].mxu1 }
 0x325   :  { %v2535_v62 = vpack.c.bf16 %v2262_v54, %v2261_v48  ;;  %v2145_v63 = vadd.f32 %v3512_v15, %v2075_v55  ;;  %v2076_v0 = vmul.f32 %v3506_v29, %v1997_v61 }
 0x326   :  { %2552 = vst [vmem:[%s3663_s10 + $0x8] sm:$0xff] %v2540_v57   ;;  %v2211_v1 = vmax.f32 %v2147_v58, 0.0  ;;  %v2148_v2 = vadd.f32 %v3512_v15, %v2078_v59 }
 0x327   :  { %2536 = vst [vmem:[%s3663_s10] sm:$0xff] %v2535_v62   ;;  %v2209_v3 = vmax.f32 %v2145_v63, 0.0  ;;  %v2146_v4 = vadd.f32 %v3512_v15, %v2076_v0 }
 0x328   :  { %v2267_v5 = vmax.f32 %v2259_v25, %v2211_v1  ;;  %v2212_v6 = vmax.f32 %v2148_v2, 0.0 }
 0x329   :  { %v2265_v7 = vmax.f32 %v2257_v27, %v2209_v3  ;;  %v2210_v45 = vmax.f32 %v2146_v4, 0.0 }
 0x32a   :  { %v2268_v8 = vmax.f32 %v2260_v30, %v2212_v6 }
 0x32b   :  { %v2266_v29 = vmax.f32 %v2258_v32, %v2210_v45 }
 0x32c   :  { %v2550_v9 = vpack.c.bf16 %v2268_v8, %v2267_v5 }
 0x32d   :  { %v2545_v10 = vpack.c.bf16 %v2266_v29, %v2265_v7 }
 0x32e   :  { %2554 = vst [vmem:[%s3663_s10 + $0x18] sm:$0xff] %v2550_v9  }
 0x32f   :  { %2553 = vst [vmem:[%s3663_s10 + $0x10] sm:$0xff] %v2545_v10  }

// kernel: pointnet2_seg_forward.8
= control target key start
LH: loop header
LB: loop body
LE: loop exit
PB: predicated region body
PF: predicated region fallthrough
CT: control target
= control target key end

     0   :  { %v1874_v0 = vmov 0   ;;  %vm289_vm0 = vcmask 23552   ;;  %vm338_vm1 = vcmask 1040384   ;;  %vm339_vm2 = vcmask 1041408   ;;  %s2469_s1 = inlined_call_operand.vmem [shape: bf16[131,128], index: 1, kind: input, shape index: {}]   ;;  %s2470_s0 = inlined_call_operand.vmem [shape: bf16[8,32,131], index: 0, kind: input, shape index: {}]   ;;  %s2471_s4 = inlined_call_operand.vmem [shape: bf16[128,128], index: 4, kind: input, shape index: {}]   ;;  %s2472_s2 = inlined_call_operand.vmem [shape: f32[1,128], index: 2, kind: input, shape index: {}]   ;;  %s2473_s3 = inlined_call_operand.vmem [shape: f32[1,128], index: 3, kind: input, shape index: {}]   ;;  %s2474_s7 = inlined_call_operand.vmem [shape: bf16[128,256], index: 7, kind: input, shape index: {}]   ;;  %s2475_s5 = inlined_call_operand.vmem [shape: f32[1,128], index: 5, kind: input, shape index: {}]   ;;  %s2476_s6 = inlined_call_operand.vmem [shape: f32[1,128], index: 6, kind: input, shape index: {}]   ;;  %s2477_s8 = inlined_call_operand.vmem [shape: f32[1,256], index: 8, kind: input, shape index: {}]   ;;  %s2478_s9 = inlined_call_operand.vmem [shape: f32[1,256], index: 9, kind: input, shape index: {}]   ;;  %s2479_s10 = inlined_call_operand.vmem [shape: bf16[32,256], index: 10, kind: output, shape index: {}]  }
   0x1   :  { %345 = vmatprep.subr.bf16.mxu0 %v1874_v0  ;;  %v1785_v1 = vld [vmem:[%s2469_s1] sm:$0xff]   ;;  %v1786_v2 = vld [vmem:[%s2469_s1 + $0x8] sm:$0xff]   ;;  %v1787_v3 = vld [vmem:[%s2469_s1 + $0x10] sm:$0xff]   ;;  %v1875_v9 = vmov 65535  }
   0x2   :  { %346 = vmatpush1.bf16.msra.mxu0 %v1785_v1  ;;  %v1796_v4 = vld [vmem:[%s2470_s0 + $0x4] ss:$8 sps:$4 sm:$0xff]   ;;  %v1788_v5 = vld [vmem:[%s2469_s1 + $0x18] sm:$0xff]   ;;  %v1791_v8 = vld [vmem:[%s2469_s1 + $0x30] sm:$0xff]   ;;  %v340_v10 = vsel %vm338_vm1, 4294967295, %v1875_v9 }
   0x3   :  { %347 = vmatprep.subr.bf16.mxu0 %v1874_v0  ;;  %1643 = vmatprep.mubr.msk.bf16.mxu0 %vm289_vm0, %v1796_v4  ;;  %v1789_v6 = vld [vmem:[%s2469_s1 + $0x20] sm:$0xff]   ;;  %v1790_v7 = vld [vmem:[%s2469_s1 + $0x28] sm:$0xff]   ;;  %v1792_v11 = vld [vmem:[%s2469_s1 + $0x38] sm:$0xff]   ;;  %v341_v14 = vsel %vm339_vm2, %v340_v10, 0 }
   0x4   :  { %v1793_v12 = vld [vmem:[%s2469_s1 + $0x40] ss:$0 sps:$4 sm:$0x33]   ;;  %v1840_v16 = vld [vmem:[%s2471_s4 + $0x8] sm:$0xff]   ;;  %v1844_v17 = vld [vmem:[%s2471_s4 + $0x10] sm:$0xff]  }
   0x5   :  { %v1833_v13 = vld [vmem:[%s2471_s4] sm:$0xff]   ;;  %v343_v15 = vand.u32 %v1793_v12, %v341_v14  ;;  %v1797_v19 = vld [vmem:[%s2470_s0 + $0x14] ss:$8 sps:$4 sm:$0xff]   ;;  %v1799_v22 = vld [vmem:[%s2470_s0 + $0x10] ss:$8 sps:$4 sm:$0xff]  }
   0x6   :  { %348 = vmatpush1.bf16.msra.mxu0 %v1786_v2  ;;  %1767 = vmatprep.subr.bf16.mxu1 %v1833_v13  ;;  %v1794_v18 = vld [vmem:[%s2470_s0] ss:$8 sps:$4 sm:$0xff]   ;;  %v1845_v20 = vld [vmem:[%s2471_s4 + $0x18] sm:$0xff]   ;;  %v1800_v23 = vld [vmem:[%s2470_s0 + $0x24] ss:$8 sps:$4 sm:$0xff]  }
   0x7   :  { %349 = vmatprep.subr.bf16.mxu0 %v1874_v0  ;;  %1775 = vmatpush3.bf16.msra.mxu1 %v1833_v13  ;;  %v1846_v21 = vld [vmem:[%s2471_s4 + $0x20] sm:$0xff]   ;;  %v1847_v24 = vld [vmem:[%s2471_s4 + $0x28] sm:$0xff]   ;;  %v1848_v25 = vld [vmem:[%s2471_s4 + $0x30] sm:$0xff]  }
   0x8   :  { %1768 = vmatprep.subr.bf16.mxu1 %v1840_v16  ;;  %v1802_v26 = vld [vmem:[%s2470_s0 + $0x20] ss:$8 sps:$4 sm:$0xff]   ;;  %v1803_v27 = vld [vmem:[%s2470_s0 + $0x34] ss:$8 sps:$4 sm:$0xff]   ;;  %v1805_v28 = vld [vmem:[%s2470_s0 + $0x30] ss:$8 sps:$4 sm:$0xff]  }
   0x9   :  { %v1806_v29 = vld [vmem:[%s2470_s0 + $0x44] ss:$8 sps:$4 sm:$0xff]   ;;  %v1808_v30 = vld [vmem:[%s2470_s0 + $0x40] ss:$8 sps:$4 sm:$0xff]   ;;  %v1809_v31 = vld [vmem:[%s2470_s0 + $0x54] ss:$8 sps:$4 sm:$0xff]  }
   0xa   :  { %350 = vmatpush1.bf16.msra.mxu0 %v1787_v3  ;;  %v1811_v32 = vld [vmem:[%s2470_s0 + $0x50] ss:$8 sps:$4 sm:$0xff]   ;;  %v1812_v33 = vld [vmem:[%s2470_s0 + $0x64] ss:$8 sps:$4 sm:$0xff]   ;;  %v1814_v34 = vld [vmem:[%s2470_s0 + $0x60] ss:$8 sps:$4 sm:$0xff]  }
   0xb   :  { %351 = vmatprep.subr.bf16.mxu0 %v1874_v0  ;;  %1776 = vmatpush3.bf16.msra.mxu1 %v1840_v16  ;;  %v1815_v35 = vld [vmem:[%s2470_s0 + $0x74] ss:$8 sps:$4 sm:$0xff]   ;;  %v1817_v36 = vld [vmem:[%s2470_s0 + $0x70] ss:$8 sps:$4 sm:$0xff]   ;;  %v1818_v37 = vld [vmem:[%s2470_s0 + $0x84] ss:$8 sps:$4 sm:$0xff]  }
   0xc   :  { %1769 = vmatprep.subr.bf16.mxu1 %v1844_v17  ;;  %v1820_v38 = vld [vmem:[%s2470_s0 + $0x80] ss:$8 sps:$4 sm:$0xff]   ;;  %v1821_v39 = vld [vmem:[%s2470_s0 + $0x94] ss:$8 sps:$4 sm:$0xff]   ;;  %v1823_v40 = vld [vmem:[%s2470_s0 + $0x90] ss:$8 sps:$4 sm:$0xff]  }
   0xd   :  { %v1824_v41 = vld [vmem:[%s2470_s0 + $0xa4] ss:$8 sps:$4 sm:$0xff]   ;;  %v1826_v42 = vld [vmem:[%s2470_s0 + $0xa0] ss:$8 sps:$4 sm:$0xff]   ;;  %v1827_v43 = vld [vmem:[%s2470_s0 + $0xb4] ss:$8 sps:$4 sm:$0xff]  }
   0xe   :  { %352 = vmatpush1.bf16.msra.mxu0 %v1788_v5  ;;  %v1829_v44 = vld [vmem:[%s2470_s0 + $0xb0] ss:$8 sps:$4 sm:$0xff]   ;;  %v1830_v45 = vld [vmem:[%s2470_s0 + $0xc4] ss:$8 sps:$4 sm:$0xff]   ;;  %v1832_v47 = vld [vmem:[%s2470_s0 + $0xc0] ss:$8 sps:$4 sm:$0xff]  }
   0xf   :  { %353 = vmatprep.subr.bf16.mxu0 %v1874_v0  ;;  %1777 = vmatpush3.bf16.msra.mxu1 %v1844_v17  ;;  %v1849_v46 = vld [vmem:[%s2471_s4 + $0x38] sm:$0xff]   ;;  %v1837_v50 = vld [vmem:[%s2470_s0 + $0xe4] ss:$8 sps:$4 sm:$0xff]   ;;  %v1839_v51 = vld [vmem:[%s2470_s0 + $0xe0] ss:$8 sps:$4 sm:$0xff]  }
  0x10   :  { %1770 = vmatprep.subr.bf16.mxu1 %v1845_v20  ;;  %v1834_v48 = vld [vmem:[%s2470_s0 + $0xd4] ss:$8 sps:$4 sm:$0xff]   ;;  %v1836_v49 = vld [vmem:[%s2470_s0 + $0xd0] ss:$8 sps:$4 sm:$0xff]   ;;  %v2106_v54 = vld [vmem:[%s2472_s2] ss:$0 sm:$0xff] }
  0x11   :  { %v1841_v52 = vld [vmem:[%s2470_s0 + $0xf4] ss:$8 sps:$4 sm:$0xff]   ;;  %v1843_v53 = vld [vmem:[%s2470_s0 + $0xf0] ss:$8 sps:$4 sm:$0xff]   ;;  %v2111_v55 = vld [vmem:[%s2473_s3] ss:$0 sm:$0xff] }
  0x12   :  { %354 = vmatpush1.bf16.msra.mxu0 %v1789_v6  ;;  %v1852_v1 = vld [vmem:[%s2474_s7 + $0x4] ss:$8 sps:$4 sm:$0xff]  }
  0x13   :  { %355 = vmatprep.subr.bf16.mxu0 %v1874_v0  ;;  %1778 = vmatpush3.bf16.msra.mxu1 %v1845_v20 }
  0x14   :  { %1771 = vmatprep.subr.bf16.mxu1 %v1846_v21 }
  0x16   :  { %356 = vmatpush1.bf16.msra.mxu0 %v1790_v7 }
  0x17   :  { %357 = vmatprep.subr.bf16.mxu0 %v1874_v0  ;;  %1779 = vmatpush3.bf16.msra.mxu1 %v1846_v21 }
  0x18   :  { %1772 = vmatprep.subr.bf16.mxu1 %v1847_v24 }
  0x1a   :  { %358 = vmatpush1.bf16.msra.mxu0 %v1791_v8 }
  0x1b   :  { %359 = vmatprep.subr.bf16.mxu0 %v1874_v0  ;;  %1780 = vmatpush3.bf16.msra.mxu1 %v1847_v24 }
  0x1c   :  { %1773 = vmatprep.subr.bf16.mxu1 %v1848_v25 }
  0x1e   :  { %360 = vmatpush1.bf16.msra.mxu0 %v1792_v11 }
  0x1f   :  { %361 = vmatprep.subr.bf16.mxu0 %v1874_v0  ;;  %1781 = vmatpush3.bf16.msra.mxu1 %v1848_v25 }
  0x20   :  { %1774 = vmatprep.subr.bf16.mxu1 %v1849_v46 }
  0x22   :  { %362 = vmatpush1.bf16.msra.mxu0 %v343_v15 }
  0x23   :  { %1719 = vmatprep.subr.bf16.mxu0 %v1833_v13  ;;  %1782 = vmatpush3.bf16.msra.mxu1 %v1849_v46 }
  0x24   :  { %1079 = vmatprep.subr.bf16.mxu1 %v1852_v1 }
  0x25   :  { %378 = vmatmul.mubr.bf16.vlgmr.msra.gmra.mrb[0].mxu0 %v1794_v18 }
  0x26   :  { %1644 = vmatprep.mubr.msk.bf16.mxu0 %vm289_vm0, %v1797_v19  ;;  %1720 = vmatpush3.bf16.msra.mxu0 %v1833_v13 }
  0x27   :  { %1721 = vmatprep.subr.bf16.mxu0 %v1840_v16 }
  0x2a   :  { %1722 = vmatpush3.bf16.msra.mxu0 %v1840_v16 }
  0x2b   :  { %1723 = vmatprep.subr.bf16.mxu0 %v1844_v17 }
  0x2d   :  { %386 = vmatmul.mubr.bf16.gmra.mrb[4].mxu0 %v1799_v22 }
  0x2e   :  { %1645 = vmatprep.mubr.msk.bf16.mxu0 %vm289_vm0, %v1800_v23  ;;  %1724 = vmatpush3.bf16.msra.mxu0 %v1844_v17 }
  0x2f   :  { %1725 = vmatprep.subr.bf16.mxu0 %v1845_v20 }
  0x32   :  { %1726 = vmatpush3.bf16.msra.mxu0 %v1845_v20 }
  0x33   :  { %1727 = vmatprep.subr.bf16.mxu0 %v1846_v21 }
  0x35   :  { %394 = vmatmul.mubr.bf16.gmra.mrb[8].mxu0 %v1802_v26 }
  0x36   :  { %1646 = vmatprep.mubr.msk.bf16.mxu0 %vm289_vm0, %v1803_v27  ;;  %1728 = vmatpush3.bf16.msra.mxu0 %v1846_v21 }
  0x37   :  { %1729 = vmatprep.subr.bf16.mxu0 %v1847_v24 }
  0x3a   :  { %1730 = vmatpush3.bf16.msra.mxu0 %v1847_v24 }
  0x3b   :  { %1731 = vmatprep.subr.bf16.mxu0 %v1848_v25 }
  0x3d   :  { %402 = vmatmul.mubr.bf16.gmra.mrb[12].mxu0 %v1805_v28 }
  0x3e   :  { %1647 = vmatprep.mubr.msk.bf16.mxu0 %vm289_vm0, %v1806_v29  ;;  %1732 = vmatpush3.bf16.msra.mxu0 %v1848_v25 }
  0x3f   :  { %1733 = vmatprep.subr.bf16.mxu0 %v1849_v46 }
  0x42   :  { %1734 = vmatpush3.bf16.msra.mxu0 %v1849_v46 }
  0x45   :  { %410 = vmatmul.mubr.bf16.gmra.mrb[16].mxu0 %v1808_v30 }
  0x46   :  { %1648 = vmatprep.mubr.msk.bf16.mxu0 %vm289_vm0, %v1809_v31 }
  0x4d   :  { %418 = vmatmul.mubr.bf16.gmra.mrb[20].mxu0 %v1811_v32 }
  0x4e   :  { %1649 = vmatprep.mubr.msk.bf16.mxu0 %vm289_vm0, %v1812_v33 }
  0x55   :  { %426 = vmatmul.mubr.bf16.gmra.mrb[24].mxu0 %v1814_v34 }
  0x56   :  { %1650 = vmatprep.mubr.msk.bf16.mxu0 %vm289_vm0, %v1815_v35 }
  0x5d   :  { %434 = vmatmul.mubr.bf16.gmra.mrb[28].mxu0 %v1817_v36 }
  0x5e   :  { %1651 = vmatprep.mubr.msk.bf16.mxu0 %vm289_vm0, %v1818_v37 }
  0x65   :  { %442 = vmatmul.mubr.bf16.gmra.mrb[32].mxu0 %v1820_v38 }
  0x66   :  { %1652 = vmatprep.mubr.msk.bf16.mxu0 %vm289_vm0, %v1821_v39 }
  0x6d   :  { %450 = vmatmul.mubr.bf16.gmra.mrb[36].mxu0 %v1823_v40 }
  0x6e   :  { %1653 = vmatprep.mubr.msk.bf16.mxu0 %vm289_vm0, %v1824_v41 }
  0x75   :  { %458 = vmatmul.mubr.bf16.gmra.mrb[40].mxu0 %v1826_v42 }
  0x76   :  { %1654 = vmatprep.mubr.msk.bf16.mxu0 %vm289_vm0, %v1827_v43 }
  0x7d   :  { %466 = vmatmul.mubr.bf16.gmra.mrb[44].mxu0 %v1829_v44 }
  0x7e   :  { %1655 = vmatprep.mubr.msk.bf16.mxu0 %vm289_vm0, %v1830_v45 }
  0x85   :  { %474 = vmatmul.mubr.bf16.gmra.mrb[48].mxu0 %v1832_v47 }
  0x86   :  { %1656 = vmatprep.mubr.msk.bf16.mxu0 %vm289_vm0, %v1834_v48 }
  0x8d   :  { %482 = vmatmul.mubr.bf16.gmra.mrb[52].mxu0 %v1836_v49 }
  0x8e   :  { %1657 = vmatprep.mubr.msk.bf16.mxu0 %vm289_vm0, %v1837_v50 }
  0x95   :  { %490 = vmatmul.mubr.bf16.gmra.mrb[56].mxu0 %v1839_v51 }
  0x96   :  { %1658 = vmatprep.mubr.msk.bf16.mxu0 %vm289_vm0, %v1841_v52 }
  0x9d   :  { %498 = vmatmul.mubr.bf16.gmra.mrb[60].mxu0 %v1843_v53 }
  0xf8   :  { %v379_v56 = vpop.f32.mrb[0].mxu0 }
  0xf9   :  { %v512_v57 = vmul.f32 %v2106_v54, %v379_v56  ;;  %v381_v58 = vpop.f32.mrb[1].mxu0 }
  0xfa   :  { %v382_v59 = vpop.f32.mrb[2].mxu0 }
  0xfb   :  { %v550_v60 = vadd.f32 %v2111_v55, %v512_v57  ;;  %v513_v61 = vmul.f32 %v2106_v54, %v382_v59  ;;  %v384_v62 = vpop.f32.mrb[3].mxu0 }
  0xfd   :  { %v551_v63 = vadd.f32 %v2111_v55, %v513_v61  ;;  %v582_v2 = vmax.f32 %v550_v60, 0.0 }
  0xff   :  { %v583_v3 = vmax.f32 %v551_v63, 0.0 }
 0x100   :  { %v387_v4 = vpop.f32.mrb[4].mxu0 }
 0x101   :  { %v514_v5 = vmul.f32 %v2106_v54, %v387_v4  ;;  %v389_v6 = vpop.f32.mrb[5].mxu0  ;;  %v614_v7 = vpack.c.bf16 %v583_v3, %v582_v2 }
 0x102   :  { %v390_v8 = vpop.f32.mrb[6].mxu0 }
 0x103   :  { %v552_v9 = vadd.f32 %v2111_v55, %v514_v5  ;;  %v515_v10 = vmul.f32 %v2106_v54, %v390_v8  ;;  %v392_v11 = vpop.f32.mrb[7].mxu0  ;;  %1735 = vmatprep.mubr.bf16.mxu0 %v614_v7 }
 0x105   :  { %v553_v12 = vadd.f32 %v2111_v55, %v515_v10  ;;  %v584_v13 = vmax.f32 %v552_v9, 0.0 }
 0x107   :  { %v585_v14 = vmax.f32 %v553_v12, 0.0 }
 0x108   :  { %v395_v15 = vpop.f32.mrb[8].mxu0 }
 0x109   :  { %v615_v16 = vpack.c.bf16 %v585_v14, %v584_v13  ;;  %v516_v17 = vmul.f32 %v2106_v54, %v395_v15  ;;  %v397_v18 = vpop.f32.mrb[9].mxu0 }
 0x10a   :  { %v398_v19 = vpop.f32.mrb[10].mxu0 }
 0x10b   :  { %v554_v20 = vadd.f32 %v2111_v55, %v516_v17  ;;  %v517_v21 = vmul.f32 %v2106_v54, %v398_v19  ;;  %v400_v22 = vpop.f32.mrb[11].mxu0  ;;  %1736 = vmatmul.mubr.bf16.vlgmr.msra.gmra.mrb[64].mxu0 %v615_v16 }
 0x10d   :  { %v555_v23 = vadd.f32 %v2111_v55, %v517_v21  ;;  %v586_v24 = vmax.f32 %v554_v20, 0.0 }
 0x10f   :  { %v587_v25 = vmax.f32 %v555_v23, 0.0 }
 0x110   :  { %v403_v26 = vpop.f32.mrb[12].mxu0 }
 0x111   :  { %v518_v27 = vmul.f32 %v2106_v54, %v403_v26  ;;  %v405_v28 = vpop.f32.mrb[13].mxu0  ;;  %v616_v29 = vpack.c.bf16 %v587_v25, %v586_v24 }
 0x112   :  { %v406_v30 = vpop.f32.mrb[14].mxu0 }
 0x113   :  { %v556_v31 = vadd.f32 %v2111_v55, %v518_v27  ;;  %v519_v32 = vmul.f32 %v2106_v54, %v406_v30  ;;  %v408_v33 = vpop.f32.mrb[15].mxu0  ;;  %1739 = vmatprep.mubr.bf16.mxu0 %v616_v29 }
 0x115   :  { %v557_v34 = vadd.f32 %v2111_v55, %v519_v32  ;;  %v588_v35 = vmax.f32 %v556_v31, 0.0 }
 0x117   :  { %v589_v36 = vmax.f32 %v557_v34, 0.0 }
 0x118   :  { %v411_v37 = vpop.f32.mrb[16].mxu0 }
 0x119   :  { %v520_v38 = vmul.f32 %v2106_v54, %v411_v37  ;;  %v413_v39 = vpop.f32.mrb[17].mxu0  ;;  %v617_v40 = vpack.c.bf16 %v589_v36, %v588_v35 }
 0x11a   :  { %v414_v41 = vpop.f32.mrb[18].mxu0 }
 0x11b   :  { %v558_v42 = vadd.f32 %v2111_v55, %v520_v38  ;;  %v521_v43 = vmul.f32 %v2106_v54, %v414_v41  ;;  %v416_v44 = vpop.f32.mrb[19].mxu0  ;;  %1740 = vmatmul.mubr.bf16.gmra.mrb[68].mxu0 %v617_v40 }
 0x11d   :  { %v559_v45 = vadd.f32 %v2111_v55, %v521_v43  ;;  %v590_v46 = vmax.f32 %v558_v42, 0.0  ;;  %v1850_v43 = vld [vmem:[%s2474_s7] ss:$8 sps:$4 sm:$0xff]  }
 0x11f   :  { %v591_v47 = vmax.f32 %v559_v45, 0.0 }
 0x120   :  { %v419_v48 = vpop.f32.mrb[20].mxu0 }
 0x121   :  { %v522_v49 = vmul.f32 %v2106_v54, %v419_v48  ;;  %v421_v50 = vpop.f32.mrb[21].mxu0  ;;  %v618_v51 = vpack.c.bf16 %v591_v47, %v590_v46  ;;  %v1855_v47 = vld [vmem:[%s2474_s7 + $0x14] ss:$8 sps:$4 sm:$0xff]  }
 0x122   :  { %v422_v52 = vpop.f32.mrb[22].mxu0 }
 0x123   :  { %v560_v53 = vadd.f32 %v2111_v55, %v522_v49  ;;  %v523_v56 = vmul.f32 %v2106_v54, %v422_v52  ;;  %v424_v57 = vpop.f32.mrb[23].mxu0  ;;  %1743 = vmatprep.mubr.bf16.mxu0 %v618_v51  ;;  %v1853_v52 = vld [vmem:[%s2474_s7 + $0x10] ss:$8 sps:$4 sm:$0xff]  }
 0x125   :  { %v561_v58 = vadd.f32 %v2111_v55, %v523_v56  ;;  %v592_v59 = vmax.f32 %v560_v53, 0.0  ;;  %v1858_v56 = vld [vmem:[%s2474_s7 + $0x24] ss:$8 sps:$4 sm:$0xff]  }
 0x127   :  { %v593_v60 = vmax.f32 %v561_v58, 0.0 }
 0x128   :  { %v427_v61 = vpop.f32.mrb[24].mxu0 }
 0x129   :  { %v524_v62 = vmul.f32 %v2106_v54, %v427_v61  ;;  %v429_v63 = vpop.f32.mrb[25].mxu0  ;;  %v619_v1 = vpack.c.bf16 %v593_v60, %v592_v59  ;;  %v1856_v60 = vld [vmem:[%s2474_s7 + $0x20] ss:$8 sps:$4 sm:$0xff]  }
 0x12a   :  { %v430_v2 = vpop.f32.mrb[26].mxu0 }
 0x12b   :  { %v562_v3 = vadd.f32 %v2111_v55, %v524_v62  ;;  %v525_v4 = vmul.f32 %v2106_v54, %v430_v2  ;;  %v432_v5 = vpop.f32.mrb[27].mxu0  ;;  %1744 = vmatmul.mubr.bf16.gmra.mrb[72].mxu0 %v619_v1  ;;  %v1861_v1 = vld [vmem:[%s2474_s7 + $0x34] ss:$8 sps:$4 sm:$0xff]  }
 0x12d   :  { %v563_v6 = vadd.f32 %v2111_v55, %v525_v4  ;;  %v594_v7 = vmax.f32 %v562_v3, 0.0 }
 0x12f   :  { %v595_v8 = vmax.f32 %v563_v6, 0.0  ;;  %v1859_v6 = vld [vmem:[%s2474_s7 + $0x30] ss:$8 sps:$4 sm:$0xff]  }
 0x130   :  { %v435_v9 = vpop.f32.mrb[28].mxu0 }
 0x131   :  { %v526_v10 = vmul.f32 %v2106_v54, %v435_v9  ;;  %v437_v11 = vpop.f32.mrb[29].mxu0  ;;  %v620_v12 = vpack.c.bf16 %v595_v8, %v594_v7  ;;  %v1864_v8 = vld [vmem:[%s2474_s7 + $0x44] ss:$8 sps:$4 sm:$0xff]  }
 0x132   :  { %v438_v13 = vpop.f32.mrb[30].mxu0 }
 0x133   :  { %v564_v14 = vadd.f32 %v2111_v55, %v526_v10  ;;  %v527_v15 = vmul.f32 %v2106_v54, %v438_v13  ;;  %v440_v16 = vpop.f32.mrb[31].mxu0  ;;  %1747 = vmatprep.mubr.bf16.mxu0 %v620_v12  ;;  %v1862_v12 = vld [vmem:[%s2474_s7 + $0x40] ss:$8 sps:$4 sm:$0xff]  }
 0x134   :  { %v1867_v16 = vld [vmem:[%s2474_s7 + $0x54] ss:$8 sps:$4 sm:$0xff]  }
 0x135   :  { %v565_v17 = vadd.f32 %v2111_v55, %v527_v15  ;;  %v596_v18 = vmax.f32 %v564_v14, 0.0 }
 0x137   :  { %v597_v19 = vmax.f32 %v565_v17, 0.0 }
 0x138   :  { %v443_v20 = vpop.f32.mrb[32].mxu0 }
 0x139   :  { %v528_v21 = vmul.f32 %v2106_v54, %v443_v20  ;;  %v445_v22 = vpop.f32.mrb[33].mxu0  ;;  %v621_v23 = vpack.c.bf16 %v597_v19, %v596_v18 }
 0x13a   :  { %v446_v24 = vpop.f32.mrb[34].mxu0 }
 0x13b   :  { %v529_v25 = vmul.f32 %v2106_v54, %v446_v24  ;;  %v448_v26 = vpop.f32.mrb[35].mxu0  ;;  %1748 = vmatmul.mubr.bf16.gmra.mrb[76].mxu0 %v621_v23  ;;  %v566_v27 = vadd.f32 %v2111_v55, %v528_v21  ;;  %v1865_v21 = vld [vmem:[%s2474_s7 + $0x50] ss:$8 sps:$4 sm:$0xff]  }
 0x13c   :  { %v1870_v26 = vld [vmem:[%s2474_s7 + $0x64] ss:$8 sps:$4 sm:$0xff]  }
 0x13d   :  { %v567_v28 = vadd.f32 %v2111_v55, %v529_v25  ;;  %v598_v29 = vmax.f32 %v566_v27, 0.0 }
 0x13f   :  { %v599_v30 = vmax.f32 %v567_v28, 0.0 }
 0x140   :  { %v451_v31 = vpop.f32.mrb[36].mxu0 }
 0x141   :  { %v530_v32 = vmul.f32 %v2106_v54, %v451_v31  ;;  %v453_v33 = vpop.f32.mrb[37].mxu0  ;;  %v622_v34 = vpack.c.bf16 %v599_v30, %v598_v29  ;;  %v1868_v30 = vld [vmem:[%s2474_s7 + $0x60] ss:$8 sps:$4 sm:$0xff]  }
 0x142   :  { %v454_v35 = vpop.f32.mrb[38].mxu0 }
 0x143   :  { %v568_v36 = vadd.f32 %v2111_v55, %v530_v32  ;;  %v531_v37 = vmul.f32 %v2106_v54, %v454_v35  ;;  %v456_v38 = vpop.f32.mrb[39].mxu0  ;;  %1751 = vmatprep.mubr.bf16.mxu1 %v622_v34  ;;  %v1873_v35 = vld [vmem:[%s2474_s7 + $0x74] ss:$8 sps:$4 sm:$0xff]  }
 0x145   :  { %v569_v39 = vadd.f32 %v2111_v55, %v531_v37  ;;  %v600_v40 = vmax.f32 %v568_v36, 0.0  ;;  %v1871_v37 = vld [vmem:[%s2474_s7 + $0x70] ss:$8 sps:$4 sm:$0xff]  }
 0x147   :  { %v601_v41 = vmax.f32 %v569_v39, 0.0 }
 0x148   :  { %v459_v42 = vpop.f32.mrb[40].mxu0 }
 0x149   :  { %v532_v44 = vmul.f32 %v2106_v54, %v459_v42  ;;  %v461_v45 = vpop.f32.mrb[41].mxu0  ;;  %v623_v46 = vpack.c.bf16 %v601_v41, %v600_v40 }
 0x14a   :  { %v462_v48 = vpop.f32.mrb[42].mxu0 }
 0x14b   :  { %v570_v49 = vadd.f32 %v2111_v55, %v532_v44  ;;  %v533_v50 = vmul.f32 %v2106_v54, %v462_v48  ;;  %v464_v51 = vpop.f32.mrb[43].mxu0  ;;  %1752 = vmatmul.mubr.bf16.vlgmr.msra.gmra.mrb[0].mxu1 %v623_v46 }
 0x14c   :  { %1080 = vmatpush1.bf16.msra.mxu1 %v1850_v43 }
 0x14d   :  { %v571_v53 = vadd.f32 %v2111_v55, %v533_v50  ;;  %1081 = vmatprep.subr.bf16.mxu1 %v1855_v47  ;;  %v602_v57 = vmax.f32 %v570_v49, 0.0 }
 0x14f   :  { %v603_v58 = vmax.f32 %v571_v53, 0.0 }
 0x150   :  { %v467_v59 = vpop.f32.mrb[44].mxu0  ;;  %1082 = vmatpush1.bf16.msra.mxu1 %v1853_v52 }
 0x151   :  { %v534_v61 = vmul.f32 %v2106_v54, %v467_v59  ;;  %v469_v62 = vpop.f32.mrb[45].mxu0  ;;  %v624_v63 = vpack.c.bf16 %v603_v58, %v602_v57  ;;  %1083 = vmatprep.subr.bf16.mxu1 %v1858_v56 }
 0x152   :  { %v470_v2 = vpop.f32.mrb[46].mxu0 }
 0x153   :  { %v572_v3 = vadd.f32 %v2111_v55, %v534_v61  ;;  %v535_v4 = vmul.f32 %v2106_v54, %v470_v2  ;;  %v472_v5 = vpop.f32.mrb[47].mxu0  ;;  %1755 = vmatprep.mubr.bf16.mxu1 %v624_v63  ;;  %v2229_v2 = vld [vmem:[%s2475_s5] ss:$0 sm:$0xff] }
 0x154   :  { %1084 = vmatpush1.bf16.msra.mxu1 %v1856_v60 }
 0x155   :  { %v573_v7 = vadd.f32 %v2111_v55, %v535_v4  ;;  %1085 = vmatprep.subr.bf16.mxu1 %v1861_v1  ;;  %v604_v9 = vmax.f32 %v572_v3, 0.0  ;;  %v2234_v3 = vld [vmem:[%s2476_s6] ss:$0 sm:$0xff] }
 0x157   :  { %v605_v10 = vmax.f32 %v573_v7, 0.0 }
 0x158   :  { %v475_v11 = vpop.f32.mrb[48].mxu0  ;;  %1086 = vmatpush1.bf16.msra.mxu1 %v1859_v6 }
 0x159   :  { %v536_v13 = vmul.f32 %v2106_v54, %v475_v11  ;;  %v477_v14 = vpop.f32.mrb[49].mxu0  ;;  %v625_v15 = vpack.c.bf16 %v605_v10, %v604_v9  ;;  %1087 = vmatprep.subr.bf16.mxu1 %v1864_v8 }
 0x15a   :  { %v478_v17 = vpop.f32.mrb[50].mxu0 }
 0x15b   :  { %v574_v18 = vadd.f32 %v2111_v55, %v536_v13  ;;  %v537_v19 = vmul.f32 %v2106_v54, %v478_v17  ;;  %v480_v20 = vpop.f32.mrb[51].mxu0  ;;  %1756 = vmatmul.mubr.bf16.gmra.mrb[4].mxu1 %v625_v15 }
 0x15c   :  { %1088 = vmatpush1.bf16.msra.mxu1 %v1862_v12 }
 0x15d   :  { %v575_v22 = vadd.f32 %v2111_v55, %v537_v19  ;;  %1089 = vmatprep.subr.bf16.mxu1 %v1867_v16  ;;  %v606_v23 = vmax.f32 %v574_v18, 0.0 }
 0x15f   :  { %v607_v24 = vmax.f32 %v575_v22, 0.0 }
 0x160   :  { %v483_v25 = vpop.f32.mrb[52].mxu0  ;;  %1090 = vmatpush1.bf16.msra.mxu1 %v1865_v21 }
 0x161   :  { %v538_v27 = vmul.f32 %v2106_v54, %v483_v25  ;;  %v485_v28 = vpop.f32.mrb[53].mxu0  ;;  %v626_v29 = vpack.c.bf16 %v607_v24, %v606_v23  ;;  %1091 = vmatprep.subr.bf16.mxu1 %v1870_v26 }
 0x162   :  { %v486_v31 = vpop.f32.mrb[54].mxu0 }
 0x163   :  { %v576_v32 = vadd.f32 %v2111_v55, %v538_v27  ;;  %v539_v33 = vmul.f32 %v2106_v54, %v486_v31  ;;  %v488_v34 = vpop.f32.mrb[55].mxu0  ;;  %1759 = vmatprep.mubr.bf16.mxu1 %v626_v29 }
 0x164   :  { %1092 = vmatpush1.bf16.msra.mxu1 %v1868_v30 }
 0x165   :  { %v577_v36 = vadd.f32 %v2111_v55, %v539_v33  ;;  %1093 = vmatprep.subr.bf16.mxu1 %v1873_v35  ;;  %v608_v38 = vmax.f32 %v576_v32, 0.0 }
 0x167   :  { %v609_v39 = vmax.f32 %v577_v36, 0.0 }
 0x168   :  { %v491_v40 = vpop.f32.mrb[56].mxu0  ;;  %1094 = vmatpush1.bf16.msra.mxu1 %v1871_v37 }
 0x169   :  { %v540_v41 = vmul.f32 %v2106_v54, %v491_v40  ;;  %v493_v42 = vpop.f32.mrb[57].mxu0  ;;  %v627_v43 = vpack.c.bf16 %v609_v39, %v608_v38 }
 0x16a   :  { %v494_v44 = vpop.f32.mrb[58].mxu0 }
 0x16b   :  { %v578_v45 = vadd.f32 %v2111_v55, %v540_v41  ;;  %v541_v46 = vmul.f32 %v2106_v54, %v494_v44  ;;  %v496_v47 = vpop.f32.mrb[59].mxu0  ;;  %1760 = vmatmul.mubr.bf16.gmra.mrb[8].mxu1 %v627_v43 }
 0x16d   :  { %v579_v48 = vadd.f32 %v2111_v55, %v541_v46  ;;  %v610_v49 = vmax.f32 %v578_v45, 0.0 }
 0x16f   :  { %v611_v50 = vmax.f32 %v579_v48, 0.0 }
 0x170   :  { %v499_v51 = vpop.f32.mrb[60].mxu0 }
 0x171   :  { %v542_v52 = vmul.f32 %v2106_v54, %v499_v51  ;;  %v501_v53 = vpop.f32.mrb[61].mxu0  ;;  %v628_v56 = vpack.c.bf16 %v611_v50, %v610_v49 }
 0x172   :  { %v502_v57 = vpop.f32.mrb[62].mxu0 }
 0x173   :  { %v580_v58 = vadd.f32 %v2111_v55, %v542_v52  ;;  %v543_v59 = vmul.f32 %v2106_v54, %v502_v57  ;;  %v504_v60 = vpop.f32.mrb[63].mxu0  ;;  %1763 = vmatprep.mubr.bf16.mxu1 %v628_v56 }
 0x175   :  { %v581_v61 = vadd.f32 %v2111_v55, %v543_v59  ;;  %v612_v62 = vmax.f32 %v580_v58, 0.0 }
 0x177   :  { %v613_v63 = vmax.f32 %v581_v61, 0.0 }
 0x179   :  { %v629_v1 = vpack.c.bf16 %v613_v63, %v612_v62 }
 0x17b   :  { %1764 = vmatmul.mubr.bf16.gmra.mrb[12].mxu1 %v629_v1 }
 0x17c   :  { %1111 = vmatprep.mubr.bf16.mxu1 %v1874_v0 }
 0x1de   :  { %v1737_v54 = vpop.f32.mrb[64].mxu0 }
 0x1df   :  { %v865_v4 = vmul.f32 %v1737_v54, %v2229_v2  ;;  %v730_v55 = vpop.f32.mrb[65].mxu0 }
 0x1e0   :  { %v863_v5 = vmul.f32 %v2229_v2, %v730_v55  ;;  %v1738_v6 = vpop.f32.mrb[66].mxu0 }
 0x1e1   :  { %v903_v7 = vadd.f32 %v2234_v3, %v865_v4  ;;  %v866_v8 = vmul.f32 %v1738_v6, %v2229_v2  ;;  %v733_v9 = vpop.f32.mrb[67].mxu0 }
 0x1e2   :  { %v901_v10 = vadd.f32 %v2234_v3, %v863_v5  ;;  %v864_v11 = vmul.f32 %v2229_v2, %v733_v9 }
 0x1e3   :  { %v904_v12 = vadd.f32 %v2234_v3, %v866_v8  ;;  %v935_v14 = vmax.f32 %v903_v7, 0.0 }
 0x1e4   :  { %v902_v13 = vadd.f32 %v2234_v3, %v864_v11  ;;  %v933_v16 = vmax.f32 %v901_v10, 0.0 }
 0x1e5   :  { %v936_v15 = vmax.f32 %v904_v12, 0.0 }
 0x1e6   :  { %v934_v17 = vmax.f32 %v902_v13, 0.0 }
 0x1e7   :  { %v966_v18 = vpack.c.bf16 %v936_v15, %v935_v14 }
 0x1e8   :  { %v965_v19 = vpack.c.bf16 %v934_v17, %v933_v16 }
 0x1ea   :  { %1112 = vmatmul.mubr.bf16.vlgmr.msra.gmra.mrb[16].mxu1 %v965_v19 }
 0x1eb   :  { %1121 = vmatprep.mubr.bf16.mxu1 %v1874_v0 }
 0x1ee   :  { %v1741_v20 = vpop.f32.mrb[68].mxu0 }
 0x1ef   :  { %v869_v21 = vmul.f32 %v1741_v20, %v2229_v2  ;;  %v746_v22 = vpop.f32.mrb[69].mxu0 }
 0x1f0   :  { %v867_v23 = vmul.f32 %v2229_v2, %v746_v22  ;;  %v1742_v24 = vpop.f32.mrb[70].mxu0 }
 0x1f1   :  { %v907_v25 = vadd.f32 %v2234_v3, %v869_v21  ;;  %v870_v26 = vmul.f32 %v1742_v24, %v2229_v2  ;;  %v749_v27 = vpop.f32.mrb[71].mxu0 }
 0x1f2   :  { %v905_v28 = vadd.f32 %v2234_v3, %v867_v23  ;;  %v868_v29 = vmul.f32 %v2229_v2, %v749_v27  ;;  %1122 = vmatmul.mubr.bf16.gmra.mrb[20].mxu1 %v966_v18 }
 0x1f3   :  { %v908_v30 = vadd.f32 %v2234_v3, %v870_v26  ;;  %1131 = vmatprep.mubr.bf16.mxu1 %v1874_v0  ;;  %v939_v32 = vmax.f32 %v907_v25, 0.0 }
 0x1f4   :  { %v906_v31 = vadd.f32 %v2234_v3, %v868_v29  ;;  %v937_v34 = vmax.f32 %v905_v28, 0.0 }
 0x1f5   :  { %v940_v33 = vmax.f32 %v908_v30, 0.0 }
 0x1f6   :  { %v938_v35 = vmax.f32 %v906_v31, 0.0 }
 0x1f7   :  { %v968_v36 = vpack.c.bf16 %v940_v33, %v939_v32 }
 0x1f8   :  { %v967_v37 = vpack.c.bf16 %v938_v35, %v937_v34 }
 0x1fa   :  { %1132 = vmatmul.mubr.bf16.gmra.mrb[24].mxu1 %v967_v37 }
 0x1fb   :  { %1141 = vmatprep.mubr.bf16.mxu1 %v1874_v0 }
 0x1fe   :  { %v1745_v38 = vpop.f32.mrb[72].mxu0 }
 0x1ff   :  { %v873_v39 = vmul.f32 %v1745_v38, %v2229_v2  ;;  %v762_v40 = vpop.f32.mrb[73].mxu0 }
 0x200   :  { %v871_v41 = vmul.f32 %v2229_v2, %v762_v40  ;;  %v1746_v42 = vpop.f32.mrb[74].mxu0 }
 0x201   :  { %v911_v43 = vadd.f32 %v2234_v3, %v873_v39  ;;  %v874_v44 = vmul.f32 %v1746_v42, %v2229_v2  ;;  %v765_v45 = vpop.f32.mrb[75].mxu0 }
 0x202   :  { %v909_v46 = vadd.f32 %v2234_v3, %v871_v41  ;;  %v872_v47 = vmul.f32 %v2229_v2, %v765_v45  ;;  %1142 = vmatmul.mubr.bf16.gmra.mrb[28].mxu1 %v968_v36 }
 0x203   :  { %v912_v48 = vadd.f32 %v2234_v3, %v874_v44  ;;  %1151 = vmatprep.mubr.bf16.mxu1 %v1874_v0  ;;  %v943_v50 = vmax.f32 %v911_v43, 0.0 }
 0x204   :  { %v910_v49 = vadd.f32 %v2234_v3, %v872_v47  ;;  %v941_v52 = vmax.f32 %v909_v46, 0.0 }
 0x205   :  { %v944_v51 = vmax.f32 %v912_v48, 0.0 }
 0x206   :  { %v942_v53 = vmax.f32 %v910_v49, 0.0 }
 0x207   :  { %v970_v56 = vpack.c.bf16 %v944_v51, %v943_v50 }
 0x208   :  { %v969_v57 = vpack.c.bf16 %v942_v53, %v941_v52 }
 0x20a   :  { %1152 = vmatmul.mubr.bf16.gmra.mrb[32].mxu1 %v969_v57 }
 0x20b   :  { %1161 = vmatprep.mubr.bf16.mxu1 %v1874_v0 }
 0x20e   :  { %v1749_v58 = vpop.f32.mrb[76].mxu0 }
 0x20f   :  { %v877_v59 = vmul.f32 %v1749_v58, %v2229_v2  ;;  %v778_v60 = vpop.f32.mrb[77].mxu0 }
 0x210   :  { %v875_v61 = vmul.f32 %v2229_v2, %v778_v60  ;;  %v1750_v62 = vpop.f32.mrb[78].mxu0 }
 0x211   :  { %v915_v63 = vadd.f32 %v2234_v3, %v877_v59  ;;  %v878_v1 = vmul.f32 %v1750_v62, %v2229_v2  ;;  %v781_v54 = vpop.f32.mrb[79].mxu0 }
 0x212   :  { %v913_v4 = vadd.f32 %v2234_v3, %v875_v61  ;;  %v876_v55 = vmul.f32 %v2229_v2, %v781_v54  ;;  %1162 = vmatmul.mubr.bf16.gmra.mrb[36].mxu1 %v970_v56 }
 0x213   :  { %v916_v5 = vadd.f32 %v2234_v3, %v878_v1  ;;  %1171 = vmatprep.mubr.bf16.mxu1 %v1874_v0  ;;  %v947_v7 = vmax.f32 %v915_v63, 0.0 }
 0x214   :  { %v914_v6 = vadd.f32 %v2234_v3, %v876_v55  ;;  %v945_v9 = vmax.f32 %v913_v4, 0.0 }
 0x215   :  { %v948_v8 = vmax.f32 %v916_v5, 0.0 }
 0x216   :  { %v946_v10 = vmax.f32 %v914_v6, 0.0 }
 0x217   :  { %v972_v11 = vpack.c.bf16 %v948_v8, %v947_v7 }
 0x218   :  { %v971_v12 = vpack.c.bf16 %v946_v10, %v945_v9 }
 0x21a   :  { %1172 = vmatmul.mubr.bf16.gmra.mrb[40].mxu1 %v971_v12 }
 0x21b   :  { %1181 = vmatprep.mubr.bf16.mxu1 %v1874_v0 }
 0x21e   :  { %v1753_v13 = vpop.f32.mrb[0].mxu1 }
 0x21f   :  { %v881_v14 = vmul.f32 %v1753_v13, %v2229_v2  ;;  %v794_v15 = vpop.f32.mrb[1].mxu1 }
 0x220   :  { %v879_v16 = vmul.f32 %v2229_v2, %v794_v15  ;;  %v1754_v17 = vpop.f32.mrb[2].mxu1 }
 0x221   :  { %v919_v18 = vadd.f32 %v2234_v3, %v881_v14  ;;  %v882_v19 = vmul.f32 %v1754_v17, %v2229_v2  ;;  %v797_v20 = vpop.f32.mrb[3].mxu1 }
 0x222   :  { %v917_v21 = vadd.f32 %v2234_v3, %v879_v16  ;;  %v880_v22 = vmul.f32 %v2229_v2, %v797_v20  ;;  %1182 = vmatmul.mubr.bf16.gmra.mrb[44].mxu1 %v972_v11 }
 0x223   :  { %v920_v23 = vadd.f32 %v2234_v3, %v882_v19  ;;  %1191 = vmatprep.mubr.bf16.mxu1 %v1874_v0  ;;  %v951_v25 = vmax.f32 %v919_v18, 0.0 }
 0x224   :  { %v918_v24 = vadd.f32 %v2234_v3, %v880_v22  ;;  %v949_v27 = vmax.f32 %v917_v21, 0.0 }
 0x225   :  { %v952_v26 = vmax.f32 %v920_v23, 0.0 }
 0x226   :  { %v950_v28 = vmax.f32 %v918_v24, 0.0  ;;  %v1273_v24 = vlaneseq }
 0x227   :  { %v974_v29 = vpack.c.bf16 %v952_v26, %v951_v25 }
 0x228   :  { %v973_v30 = vpack.c.bf16 %v950_v28, %v949_v27 }
 0x22a   :  { %1192 = vmatmul.mubr.bf16.gmra.mrb[48].mxu1 %v973_v30 }
 0x22b   :  { %1201 = vmatprep.mubr.bf16.mxu1 %v1874_v0 }
 0x22e   :  { %v1757_v31 = vpop.f32.mrb[4].mxu1 }
 0x22f   :  { %v885_v32 = vmul.f32 %v1757_v31, %v2229_v2  ;;  %v810_v33 = vpop.f32.mrb[5].mxu1 }
 0x230   :  { %v883_v34 = vmul.f32 %v2229_v2, %v810_v33  ;;  %v1758_v35 = vpop.f32.mrb[6].mxu1 }
 0x231   :  { %v923_v36 = vadd.f32 %v2234_v3, %v885_v32  ;;  %v886_v37 = vmul.f32 %v1758_v35, %v2229_v2  ;;  %v813_v38 = vpop.f32.mrb[7].mxu1 }
 0x232   :  { %v921_v39 = vadd.f32 %v2234_v3, %v883_v34  ;;  %v884_v40 = vmul.f32 %v2229_v2, %v813_v38  ;;  %1202 = vmatmul.mubr.bf16.gmra.mrb[52].mxu1 %v974_v29 }
 0x233   :  { %v924_v41 = vadd.f32 %v2234_v3, %v886_v37  ;;  %1211 = vmatprep.mubr.bf16.mxu1 %v1874_v0  ;;  %v955_v43 = vmax.f32 %v923_v36, 0.0 }
 0x234   :  { %v922_v42 = vadd.f32 %v2234_v3, %v884_v40  ;;  %v953_v45 = vmax.f32 %v921_v39, 0.0 }
 0x235   :  { %v956_v44 = vmax.f32 %v924_v41, 0.0 }
 0x236   :  { %v954_v46 = vmax.f32 %v922_v42, 0.0 }
 0x237   :  { %v976_v47 = vpack.c.bf16 %v956_v44, %v955_v43 }
 0x238   :  { %v975_v48 = vpack.c.bf16 %v954_v46, %v953_v45 }
 0x23a   :  { %1212 = vmatmul.mubr.bf16.gmra.mrb[56].mxu1 %v975_v48 }
 0x23b   :  { %1221 = vmatprep.mubr.bf16.mxu1 %v1874_v0 }
 0x23e   :  { %v1761_v49 = vpop.f32.mrb[8].mxu1 }
 0x23f   :  { %v889_v50 = vmul.f32 %v1761_v49, %v2229_v2  ;;  %v826_v51 = vpop.f32.mrb[9].mxu1 }
 0x240   :  { %v887_v52 = vmul.f32 %v2229_v2, %v826_v51  ;;  %v1762_v53 = vpop.f32.mrb[10].mxu1 }
 0x241   :  { %v927_v56 = vadd.f32 %v2234_v3, %v889_v50  ;;  %v890_v57 = vmul.f32 %v1762_v53, %v2229_v2  ;;  %v829_v58 = vpop.f32.mrb[11].mxu1 }
 0x242   :  { %v925_v59 = vadd.f32 %v2234_v3, %v887_v52  ;;  %v888_v60 = vmul.f32 %v2229_v2, %v829_v58  ;;  %1222 = vmatmul.mubr.bf16.gmra.mrb[60].mxu1 %v976_v47 }
 0x243   :  { %v928_v61 = vadd.f32 %v2234_v3, %v890_v57  ;;  %1231 = vmatprep.mubr.bf16.mxu1 %v1874_v0  ;;  %v959_v63 = vmax.f32 %v927_v56, 0.0 }
 0x244   :  { %v926_v62 = vadd.f32 %v2234_v3, %v888_v60  ;;  %v957_v54 = vmax.f32 %v925_v59, 0.0 }
 0x245   :  { %v960_v1 = vmax.f32 %v928_v61, 0.0 }
 0x246   :  { %v958_v4 = vmax.f32 %v926_v62, 0.0 }
 0x247   :  { %v978_v55 = vpack.c.bf16 %v960_v1, %v959_v63 }
 0x248   :  { %v977_v5 = vpack.c.bf16 %v958_v4, %v957_v54 }
 0x24a   :  { %1232 = vmatmul.mubr.bf16.gmra.mrb[64].mxu1 %v977_v5 }
 0x24b   :  { %1241 = vmatprep.mubr.bf16.mxu1 %v1874_v0 }
 0x24e   :  { %v1765_v6 = vpop.f32.mrb[12].mxu1 }
 0x24f   :  { %v893_v7 = vmul.f32 %v1765_v6, %v2229_v2  ;;  %v842_v8 = vpop.f32.mrb[13].mxu1 }
 0x250   :  { %v891_v9 = vmul.f32 %v2229_v2, %v842_v8  ;;  %v1766_v10 = vpop.f32.mrb[14].mxu1 }
 0x251   :  { %v931_v11 = vadd.f32 %v2234_v3, %v893_v7  ;;  %v894_v12 = vmul.f32 %v1766_v10, %v2229_v2  ;;  %v845_v13 = vpop.f32.mrb[15].mxu1 }
 0x252   :  { %v929_v14 = vadd.f32 %v2234_v3, %v891_v9  ;;  %v892_v15 = vmul.f32 %v2229_v2, %v845_v13  ;;  %1242 = vmatmul.mubr.bf16.gmra.mrb[68].mxu1 %v978_v55  ;;  %v1274_v2 = vshrl.u32 %v1273_v24, 7 }
 0x253   :  { %v932_v16 = vadd.f32 %v2234_v3, %v894_v12  ;;  %1251 = vmatprep.mubr.bf16.mxu1 %v1874_v0  ;;  %v963_v18 = vmax.f32 %v931_v11, 0.0 }
 0x254   :  { %v930_v17 = vadd.f32 %v2234_v3, %v892_v15  ;;  %v961_v20 = vmax.f32 %v929_v14, 0.0  ;;  %v1275_v29 = vsub.s32 0, %v1274_v2  ;;  %v997_v3 = vld [vmem:[%s2477_s8] sm:$0x3]  ;;  %v1279_v30 = vsub.s32 1, %v1274_v2 }
 0x255   :  { %v964_v19 = vmax.f32 %v932_v16, 0.0 }
 0x256   :  { %v962_v21 = vmax.f32 %v930_v17, 0.0  ;;  %v2318_v32 = vrot.slane %v997_v3, %v1275_v29  ;;  %v2323_v34 = vrot.slane %v997_v3, %v1279_v30 }
 0x257   :  { %v980_v22 = vpack.c.bf16 %v964_v19, %v963_v18 }
 0x258   :  { %v979_v23 = vpack.c.bf16 %v962_v21, %v961_v20 }
 0x25a   :  { %1252 = vmatmul.mubr.bf16.gmra.mrb[72].mxu1 %v979_v23 }
 0x25b   :  { %1261 = vmatprep.mubr.bf16.mxu1 %v1874_v0  ;;  %v998_v0 = vld [vmem:[%s2478_s9] sm:$0x3] }
 0x25c   :  { %v2326_v38 = vrot.slane %v998_v0, %v1275_v29  ;;  %v2329_v40 = vrot.slane %v998_v0, %v1279_v30 }
 0x262   :  { %1262 = vmatmul.mubr.bf16.gmra.mrb[76].mxu1 %v980_v22 }
 0x2bd   :  { %v1113_v25 = vpop.f32.mrb[16].mxu1 }
 0x2be   :  { %v1115_v26 = vpop.f32.mrb[17].mxu1  ;;  %v1283_v37 = vmul.f32 %v2318_v32, %v1113_v25 }
 0x2bf   :  { %v1117_v27 = vpop.f32.mrb[18].mxu1  ;;  %v1284_v39 = vmul.f32 %v2323_v34, %v1115_v26 }
 0x2c0   :  { %v1119_v28 = vpop.f32.mrb[19].mxu1  ;;  %v1285_v41 = vmul.f32 %v2318_v32, %v1117_v27  ;;  %v1358_v44 = vadd.f32 %v2326_v38, %v1283_v37 }
 0x2c1   :  { %v1286_v42 = vmul.f32 %v2323_v34, %v1119_v28  ;;  %v1359_v47 = vadd.f32 %v2329_v40, %v1284_v39 }
 0x2c2   :  { %v1360_v50 = vadd.f32 %v2326_v38, %v1285_v41  ;;  %v1422_v59 = vmax.f32 %v1358_v44, 0.0 }
 0x2c3   :  { %v1361_v56 = vadd.f32 %v2329_v40, %v1286_v42  ;;  %v1423_v63 = vmax.f32 %v1359_v47, 0.0 }
 0x2c4   :  { %v1424_v55 = vmax.f32 %v1360_v50, 0.0 }
 0x2c5   :  { %v1123_v31 = vpop.f32.mrb[20].mxu1  ;;  %v1425_v8 = vmax.f32 %v1361_v56, 0.0 }
 0x2c6   :  { %v1125_v33 = vpop.f32.mrb[21].mxu1  ;;  %v1287_v60 = vmul.f32 %v2318_v32, %v1123_v31 }
 0x2c7   :  { %v1127_v35 = vpop.f32.mrb[22].mxu1  ;;  %v1288_v1 = vmul.f32 %v2323_v34, %v1125_v33 }
 0x2c8   :  { %v1129_v36 = vpop.f32.mrb[23].mxu1  ;;  %v1289_v5 = vmul.f32 %v2318_v32, %v1127_v35  ;;  %v1362_v13 = vadd.f32 %v2326_v38, %v1287_v60 }
 0x2c9   :  { %v1290_v9 = vmul.f32 %v2323_v34, %v1129_v36  ;;  %v1363_v17 = vadd.f32 %v2329_v40, %v1288_v1 }
 0x2ca   :  { %v1364_v21 = vadd.f32 %v2326_v38, %v1289_v5  ;;  %v1426_v27 = vmax.f32 %v1362_v13, 0.0 }
 0x2cb   :  { %v1365_v25 = vadd.f32 %v2329_v40, %v1290_v9  ;;  %v1427_v3 = vmax.f32 %v1363_v17, 0.0 }
 0x2cc   :  { %v1428_v33 = vmax.f32 %v1364_v21, 0.0 }
 0x2cd   :  { %v1133_v43 = vpop.f32.mrb[24].mxu1  ;;  %v1429_v36 = vmax.f32 %v1365_v25, 0.0 }
 0x2ce   :  { %v1291_v45 = vmul.f32 %v2318_v32, %v1133_v43  ;;  %v1135_v46 = vpop.f32.mrb[25].mxu1 }
 0x2cf   :  { %v1292_v48 = vmul.f32 %v2323_v34, %v1135_v46  ;;  %v1137_v49 = vpop.f32.mrb[26].mxu1 }
 0x2d0   :  { %v1366_v51 = vadd.f32 %v2326_v38, %v1291_v45  ;;  %v1293_v52 = vmul.f32 %v2318_v32, %v1137_v49  ;;  %v1139_v53 = vpop.f32.mrb[27].mxu1 }
 0x2d1   :  { %v1367_v57 = vadd.f32 %v2329_v40, %v1292_v48  ;;  %v1294_v58 = vmul.f32 %v2323_v34, %v1139_v53 }
 0x2d2   :  { %v1430_v61 = vmax.f32 %v1366_v51, 0.0  ;;  %v1368_v62 = vadd.f32 %v2326_v38, %v1293_v52 }
 0x2d3   :  { %v1431_v54 = vmax.f32 %v1367_v57, 0.0  ;;  %v1369_v4 = vadd.f32 %v2329_v40, %v1294_v58 }
 0x2d4   :  { %v1486_v6 = vmax.f32 %v1422_v59, %v1430_v61  ;;  %v1432_v7 = vmax.f32 %v1368_v62, 0.0 }
 0x2d5   :  { %v1487_v10 = vmax.f32 %v1423_v63, %v1431_v54  ;;  %v1433_v11 = vmax.f32 %v1369_v4, 0.0  ;;  %v1143_v12 = vpop.f32.mrb[28].mxu1 }
 0x2d6   :  { %v1488_v14 = vmax.f32 %v1424_v55, %v1432_v7  ;;  %v1295_v15 = vmul.f32 %v2318_v32, %v1143_v12  ;;  %v1145_v16 = vpop.f32.mrb[29].mxu1 }
 0x2d7   :  { %v1489_v18 = vmax.f32 %v1425_v8, %v1433_v11  ;;  %v1296_v19 = vmul.f32 %v2323_v34, %v1145_v16  ;;  %v1147_v20 = vpop.f32.mrb[30].mxu1 }
 0x2d8   :  { %v1370_v22 = vadd.f32 %v2326_v38, %v1295_v15  ;;  %v1297_v23 = vmul.f32 %v2318_v32, %v1147_v20  ;;  %v1149_v24 = vpop.f32.mrb[31].mxu1 }
 0x2d9   :  { %v1371_v2 = vadd.f32 %v2329_v40, %v1296_v19  ;;  %v1298_v26 = vmul.f32 %v2323_v34, %v1149_v24 }
 0x2da   :  { %v1434_v28 = vmax.f32 %v1370_v22, 0.0  ;;  %v1372_v29 = vadd.f32 %v2326_v38, %v1297_v23 }
 0x2db   :  { %v1435_v30 = vmax.f32 %v1371_v2, 0.0  ;;  %v1373_v31 = vadd.f32 %v2329_v40, %v1298_v26 }
 0x2dc   :  { %v1490_v0 = vmax.f32 %v1426_v27, %v1434_v28  ;;  %v1436_v35 = vmax.f32 %v1372_v29, 0.0 }
 0x2dd   :  { %v1491_v37 = vmax.f32 %v1427_v3, %v1435_v30  ;;  %v1437_v39 = vmax.f32 %v1373_v31, 0.0  ;;  %v1153_v41 = vpop.f32.mrb[32].mxu1 }
 0x2de   :  { %v1492_v42 = vmax.f32 %v1428_v33, %v1436_v35  ;;  %v1299_v43 = vmul.f32 %v2318_v32, %v1153_v41  ;;  %v1155_v44 = vpop.f32.mrb[33].mxu1 }
 0x2df   :  { %v1493_v45 = vmax.f32 %v1429_v36, %v1437_v39  ;;  %v1300_v46 = vmul.f32 %v2323_v34, %v1155_v44  ;;  %v1157_v47 = vpop.f32.mrb[34].mxu1 }
 0x2e0   :  { %v1374_v48 = vadd.f32 %v2326_v38, %v1299_v43  ;;  %v1301_v49 = vmul.f32 %v2318_v32, %v1157_v47  ;;  %v1159_v50 = vpop.f32.mrb[35].mxu1 }
 0x2e1   :  { %v1375_v51 = vadd.f32 %v2329_v40, %v1300_v46  ;;  %v1302_v52 = vmul.f32 %v2323_v34, %v1159_v50 }
 0x2e2   :  { %v1438_v53 = vmax.f32 %v1374_v48, 0.0  ;;  %v1376_v56 = vadd.f32 %v2326_v38, %v1301_v49 }
 0x2e3   :  { %v1439_v57 = vmax.f32 %v1375_v51, 0.0  ;;  %v1377_v58 = vadd.f32 %v2329_v40, %v1302_v52 }
 0x2e4   :  { %v1494_v59 = vmax.f32 %v1486_v6, %v1438_v53  ;;  %v1440_v60 = vmax.f32 %v1376_v56, 0.0 }
 0x2e5   :  { %v1495_v61 = vmax.f32 %v1487_v10, %v1439_v57  ;;  %v1441_v62 = vmax.f32 %v1377_v58, 0.0  ;;  %v1163_v63 = vpop.f32.mrb[36].mxu1 }
 0x2e6   :  { %v1496_v1 = vmax.f32 %v1488_v14, %v1440_v60  ;;  %v1303_v54 = vmul.f32 %v2318_v32, %v1163_v63  ;;  %v1165_v4 = vpop.f32.mrb[37].mxu1 }
 0x2e7   :  { %v1497_v55 = vmax.f32 %v1489_v18, %v1441_v62  ;;  %v1304_v5 = vmul.f32 %v2323_v34, %v1165_v4  ;;  %v1167_v7 = vpop.f32.mrb[38].mxu1 }
 0x2e8   :  { %v1378_v8 = vadd.f32 %v2326_v38, %v1303_v54  ;;  %v1305_v9 = vmul.f32 %v2318_v32, %v1167_v7  ;;  %v1169_v11 = vpop.f32.mrb[39].mxu1 }
 0x2e9   :  { %v1379_v12 = vadd.f32 %v2329_v40, %v1304_v5  ;;  %v1306_v6 = vmul.f32 %v2323_v34, %v1169_v11 }
 0x2ea   :  { %v1442_v10 = vmax.f32 %v1378_v8, 0.0  ;;  %v1380_v13 = vadd.f32 %v2326_v38, %v1305_v9 }
 0x2eb   :  { %v1443_v14 = vmax.f32 %v1379_v12, 0.0  ;;  %v1381_v15 = vadd.f32 %v2329_v40, %v1306_v6 }
 0x2ec   :  { %v1498_v16 = vmax.f32 %v1490_v0, %v1442_v10  ;;  %v1444_v17 = vmax.f32 %v1380_v13, 0.0 }
 0x2ed   :  { %v1499_v18 = vmax.f32 %v1491_v37, %v1443_v14  ;;  %v1445_v19 = vmax.f32 %v1381_v15, 0.0  ;;  %v1173_v20 = vpop.f32.mrb[40].mxu1 }
 0x2ee   :  { %v1500_v21 = vmax.f32 %v1492_v42, %v1444_v17  ;;  %v1307_v22 = vmul.f32 %v2318_v32, %v1173_v20  ;;  %v1175_v23 = vpop.f32.mrb[41].mxu1 }
 0x2ef   :  { %v1501_v24 = vmax.f32 %v1493_v45, %v1445_v19  ;;  %v1308_v25 = vmul.f32 %v2323_v34, %v1175_v23  ;;  %v1177_v2 = vpop.f32.mrb[42].mxu1 }
 0x2f0   :  { %v1382_v26 = vadd.f32 %v2326_v38, %v1307_v22  ;;  %v1309_v27 = vmul.f32 %v2318_v32, %v1177_v2  ;;  %v1179_v28 = vpop.f32.mrb[43].mxu1 }
 0x2f1   :  { %v1383_v29 = vadd.f32 %v2329_v40, %v1308_v25  ;;  %v1310_v3 = vmul.f32 %v2323_v34, %v1179_v28 }
 0x2f2   :  { %v1446_v30 = vmax.f32 %v1382_v26, 0.0  ;;  %v1384_v31 = vadd.f32 %v2326_v38, %v1309_v27 }
 0x2f3   :  { %v1447_v33 = vmax.f32 %v1383_v29, 0.0  ;;  %v1385_v0 = vadd.f32 %v2329_v40, %v1310_v3 }
 0x2f4   :  { %v1502_v35 = vmax.f32 %v1494_v59, %v1446_v30  ;;  %v1448_v36 = vmax.f32 %v1384_v31, 0.0 }
 0x2f5   :  { %v1503_v37 = vmax.f32 %v1495_v61, %v1447_v33  ;;  %v1449_v39 = vmax.f32 %v1385_v0, 0.0  ;;  %v1183_v41 = vpop.f32.mrb[44].mxu1 }
 0x2f6   :  { %v1504_v42 = vmax.f32 %v1496_v1, %v1448_v36  ;;  %v1311_v43 = vmul.f32 %v2318_v32, %v1183_v41  ;;  %v1185_v44 = vpop.f32.mrb[45].mxu1 }
 0x2f7   :  { %v1505_v45 = vmax.f32 %v1497_v55, %v1449_v39  ;;  %v1312_v46 = vmul.f32 %v2323_v34, %v1185_v44  ;;  %v1187_v47 = vpop.f32.mrb[46].mxu1 }
 0x2f8   :  { %v1386_v48 = vadd.f32 %v2326_v38, %v1311_v43  ;;  %v1313_v49 = vmul.f32 %v2318_v32, %v1187_v47  ;;  %v1189_v50 = vpop.f32.mrb[47].mxu1 }
 0x2f9   :  { %v1387_v51 = vadd.f32 %v2329_v40, %v1312_v46  ;;  %v1314_v52 = vmul.f32 %v2323_v34, %v1189_v50 }
 0x2fa   :  { %v1450_v53 = vmax.f32 %v1386_v48, 0.0  ;;  %v1388_v56 = vadd.f32 %v2326_v38, %v1313_v49 }
 0x2fb   :  { %v1451_v57 = vmax.f32 %v1387_v51, 0.0  ;;  %v1389_v58 = vadd.f32 %v2329_v40, %v1314_v52 }
 0x2fc   :  { %v1506_v59 = vmax.f32 %v1498_v16, %v1450_v53  ;;  %v1452_v60 = vmax.f32 %v1388_v56, 0.0 }
 0x2fd   :  { %v1507_v61 = vmax.f32 %v1499_v18, %v1451_v57  ;;  %v1453_v62 = vmax.f32 %v1389_v58, 0.0  ;;  %v1193_v63 = vpop.f32.mrb[48].mxu1 }
 0x2fe   :  { %v1508_v1 = vmax.f32 %v1500_v21, %v1452_v60  ;;  %v1315_v54 = vmul.f32 %v2318_v32, %v1193_v63  ;;  %v1195_v4 = vpop.f32.mrb[49].mxu1 }
 0x2ff   :  { %v1509_v55 = vmax.f32 %v1501_v24, %v1453_v62  ;;  %v1316_v5 = vmul.f32 %v2323_v34, %v1195_v4  ;;  %v1197_v7 = vpop.f32.mrb[50].mxu1 }
 0x300   :  { %v1390_v8 = vadd.f32 %v2326_v38, %v1315_v54  ;;  %v1317_v9 = vmul.f32 %v2318_v32, %v1197_v7  ;;  %v1199_v11 = vpop.f32.mrb[51].mxu1 }
 0x301   :  { %v1391_v12 = vadd.f32 %v2329_v40, %v1316_v5  ;;  %v1318_v6 = vmul.f32 %v2323_v34, %v1199_v11 }
 0x302   :  { %v1454_v10 = vmax.f32 %v1390_v8, 0.0  ;;  %v1392_v13 = vadd.f32 %v2326_v38, %v1317_v9 }
 0x303   :  { %v1455_v14 = vmax.f32 %v1391_v12, 0.0  ;;  %v1393_v15 = vadd.f32 %v2329_v40, %v1318_v6 }
 0x304   :  { %v1510_v16 = vmax.f32 %v1502_v35, %v1454_v10  ;;  %v1456_v17 = vmax.f32 %v1392_v13, 0.0 }
 0x305   :  { %v1511_v18 = vmax.f32 %v1503_v37, %v1455_v14  ;;  %v1457_v19 = vmax.f32 %v1393_v15, 0.0  ;;  %v1203_v20 = vpop.f32.mrb[52].mxu1 }
 0x306   :  { %v1512_v21 = vmax.f32 %v1504_v42, %v1456_v17  ;;  %v1319_v22 = vmul.f32 %v2318_v32, %v1203_v20  ;;  %v1205_v23 = vpop.f32.mrb[53].mxu1 }
 0x307   :  { %v1513_v24 = vmax.f32 %v1505_v45, %v1457_v19  ;;  %v1320_v25 = vmul.f32 %v2323_v34, %v1205_v23  ;;  %v1207_v2 = vpop.f32.mrb[54].mxu1 }
 0x308   :  { %v1394_v26 = vadd.f32 %v2326_v38, %v1319_v22  ;;  %v1321_v27 = vmul.f32 %v2318_v32, %v1207_v2  ;;  %v1209_v28 = vpop.f32.mrb[55].mxu1 }
 0x309   :  { %v1395_v29 = vadd.f32 %v2329_v40, %v1320_v25  ;;  %v1322_v3 = vmul.f32 %v2323_v34, %v1209_v28 }
 0x30a   :  { %v1458_v30 = vmax.f32 %v1394_v26, 0.0  ;;  %v1396_v31 = vadd.f32 %v2326_v38, %v1321_v27 }
 0x30b   :  { %v1459_v33 = vmax.f32 %v1395_v29, 0.0  ;;  %v1397_v0 = vadd.f32 %v2329_v40, %v1322_v3 }
 0x30c   :  { %v1514_v35 = vmax.f32 %v1506_v59, %v1458_v30  ;;  %v1460_v36 = vmax.f32 %v1396_v31, 0.0 }
 0x30d   :  { %v1515_v37 = vmax.f32 %v1507_v61, %v1459_v33  ;;  %v1461_v39 = vmax.f32 %v1397_v0, 0.0  ;;  %v1213_v41 = vpop.f32.mrb[56].mxu1 }
 0x30e   :  { %v1516_v42 = vmax.f32 %v1508_v1, %v1460_v36  ;;  %v1323_v43 = vmul.f32 %v2318_v32, %v1213_v41  ;;  %v1215_v44 = vpop.f32.mrb[57].mxu1 }
 0x30f   :  { %v1517_v45 = vmax.f32 %v1509_v55, %v1461_v39  ;;  %v1324_v46 = vmul.f32 %v2323_v34, %v1215_v44  ;;  %v1217_v47 = vpop.f32.mrb[58].mxu1 }
 0x310   :  { %v1398_v48 = vadd.f32 %v2326_v38, %v1323_v43  ;;  %v1325_v49 = vmul.f32 %v2318_v32, %v1217_v47  ;;  %v1219_v50 = vpop.f32.mrb[59].mxu1 }
 0x311   :  { %v1399_v51 = vadd.f32 %v2329_v40, %v1324_v46  ;;  %v1326_v52 = vmul.f32 %v2323_v34, %v1219_v50 }
 0x312   :  { %v1462_v53 = vmax.f32 %v1398_v48, 0.0  ;;  %v1400_v56 = vadd.f32 %v2326_v38, %v1325_v49 }
 0x313   :  { %v1463_v57 = vmax.f32 %v1399_v51, 0.0  ;;  %v1401_v58 = vadd.f32 %v2329_v40, %v1326_v52 }
 0x314   :  { %v1518_v59 = vmax.f32 %v1510_v16, %v1462_v53  ;;  %v1464_v60 = vmax.f32 %v1400_v56, 0.0 }
 0x315   :  { %v1519_v61 = vmax.f32 %v1511_v18, %v1463_v57  ;;  %v1465_v62 = vmax.f32 %v1401_v58, 0.0  ;;  %v1223_v63 = vpop.f32.mrb[60].mxu1 }
 0x316   :  { %v1520_v1 = vmax.f32 %v1512_v21, %v1464_v60  ;;  %v1327_v54 = vmul.f32 %v2318_v32, %v1223_v63  ;;  %v1225_v4 = vpop.f32.mrb[61].mxu1 }
 0x317   :  { %v1521_v55 = vmax.f32 %v1513_v24, %v1465_v62  ;;  %v1328_v5 = vmul.f32 %v2323_v34, %v1225_v4  ;;  %v1227_v7 = vpop.f32.mrb[62].mxu1 }
 0x318   :  { %v1402_v8 = vadd.f32 %v2326_v38, %v1327_v54  ;;  %v1329_v9 = vmul.f32 %v2318_v32, %v1227_v7  ;;  %v1229_v11 = vpop.f32.mrb[63].mxu1 }
 0x319   :  { %v1403_v12 = vadd.f32 %v2329_v40, %v1328_v5  ;;  %v1330_v6 = vmul.f32 %v2323_v34, %v1229_v11 }
 0x31a   :  { %v1466_v10 = vmax.f32 %v1402_v8, 0.0  ;;  %v1404_v13 = vadd.f32 %v2326_v38, %v1329_v9 }
 0x31b   :  { %v1467_v14 = vmax.f32 %v1403_v12, 0.0  ;;  %v1405_v15 = vadd.f32 %v2329_v40, %v1330_v6 }
 0x31c   :  { %v1522_v16 = vmax.f32 %v1514_v35, %v1466_v10  ;;  %v1468_v17 = vmax.f32 %v1404_v13, 0.0 }
 0x31d   :  { %v1523_v18 = vmax.f32 %v1515_v37, %v1467_v14  ;;  %v1469_v19 = vmax.f32 %v1405_v15, 0.0  ;;  %v1233_v20 = vpop.f32.mrb[64].mxu1 }
 0x31e   :  { %v1524_v21 = vmax.f32 %v1516_v42, %v1468_v17  ;;  %v1331_v22 = vmul.f32 %v2318_v32, %v1233_v20  ;;  %v1235_v23 = vpop.f32.mrb[65].mxu1 }
 0x31f   :  { %v1525_v24 = vmax.f32 %v1517_v45, %v1469_v19  ;;  %v1332_v25 = vmul.f32 %v2323_v34, %v1235_v23  ;;  %v1237_v2 = vpop.f32.mrb[66].mxu1 }
 0x320   :  { %v1406_v26 = vadd.f32 %v2326_v38, %v1331_v22  ;;  %v1333_v27 = vmul.f32 %v2318_v32, %v1237_v2  ;;  %v1239_v28 = vpop.f32.mrb[67].mxu1 }
 0x321   :  { %v1407_v29 = vadd.f32 %v2329_v40, %v1332_v25  ;;  %v1334_v3 = vmul.f32 %v2323_v34, %v1239_v28 }
 0x322   :  { %v1470_v30 = vmax.f32 %v1406_v26, 0.0  ;;  %v1408_v31 = vadd.f32 %v2326_v38, %v1333_v27 }
 0x323   :  { %v1471_v33 = vmax.f32 %v1407_v29, 0.0  ;;  %v1409_v0 = vadd.f32 %v2329_v40, %v1334_v3 }
 0x324   :  { %v1526_v35 = vmax.f32 %v1518_v59, %v1470_v30  ;;  %v1472_v36 = vmax.f32 %v1408_v31, 0.0 }
 0x325   :  { %v1527_v37 = vmax.f32 %v1519_v61, %v1471_v33  ;;  %v1473_v39 = vmax.f32 %v1409_v0, 0.0  ;;  %v1243_v41 = vpop.f32.mrb[68].mxu1 }
 0x326   :  { %v1528_v42 = vmax.f32 %v1520_v1, %v1472_v36  ;;  %v1335_v43 = vmul.f32 %v2318_v32, %v1243_v41  ;;  %v1245_v44 = vpop.f32.mrb[69].mxu1 }
 0x327   :  { %v1529_v45 = vmax.f32 %v1521_v55, %v1473_v39  ;;  %v1336_v46 = vmul.f32 %v2323_v34, %v1245_v44  ;;  %v1247_v47 = vpop.f32.mrb[70].mxu1 }
 0x328   :  { %v1410_v48 = vadd.f32 %v2326_v38, %v1335_v43  ;;  %v1337_v49 = vmul.f32 %v2318_v32, %v1247_v47  ;;  %v1249_v50 = vpop.f32.mrb[71].mxu1 }
 0x329   :  { %v1411_v51 = vadd.f32 %v2329_v40, %v1336_v46  ;;  %v1338_v52 = vmul.f32 %v2323_v34, %v1249_v50 }
 0x32a   :  { %v1474_v53 = vmax.f32 %v1410_v48, 0.0  ;;  %v1412_v56 = vadd.f32 %v2326_v38, %v1337_v49 }
 0x32b   :  { %v1475_v57 = vmax.f32 %v1411_v51, 0.0  ;;  %v1413_v58 = vadd.f32 %v2329_v40, %v1338_v52 }
 0x32c   :  { %v1530_v59 = vmax.f32 %v1522_v16, %v1474_v53  ;;  %v1476_v60 = vmax.f32 %v1412_v56, 0.0 }
 0x32d   :  { %v1531_v61 = vmax.f32 %v1523_v18, %v1475_v57  ;;  %v1477_v62 = vmax.f32 %v1413_v58, 0.0  ;;  %v1253_v63 = vpop.f32.mrb[72].mxu1 }
 0x32e   :  { %v1532_v1 = vmax.f32 %v1524_v21, %v1476_v60  ;;  %v1339_v54 = vmul.f32 %v2318_v32, %v1253_v63  ;;  %v1255_v4 = vpop.f32.mrb[73].mxu1 }
 0x32f   :  { %v1533_v55 = vmax.f32 %v1525_v24, %v1477_v62  ;;  %v1340_v5 = vmul.f32 %v2323_v34, %v1255_v4  ;;  %v1257_v7 = vpop.f32.mrb[74].mxu1 }
 0x330   :  { %v1414_v8 = vadd.f32 %v2326_v38, %v1339_v54  ;;  %v1341_v9 = vmul.f32 %v2318_v32, %v1257_v7  ;;  %v1259_v11 = vpop.f32.mrb[75].mxu1 }
 0x331   :  { %v1415_v12 = vadd.f32 %v2329_v40, %v1340_v5  ;;  %v1342_v6 = vmul.f32 %v2323_v34, %v1259_v11 }
 0x332   :  { %v1478_v10 = vmax.f32 %v1414_v8, 0.0  ;;  %v1416_v13 = vadd.f32 %v2326_v38, %v1341_v9 }
 0x333   :  { %v1479_v14 = vmax.f32 %v1415_v12, 0.0  ;;  %v1417_v15 = vadd.f32 %v2329_v40, %v1342_v6 }
 0x334   :  { %v1534_v16 = vmax.f32 %v1526_v35, %v1478_v10  ;;  %v1480_v17 = vmax.f32 %v1416_v13, 0.0 }
 0x335   :  { %v1535_v18 = vmax.f32 %v1527_v37, %v1479_v14  ;;  %v1481_v19 = vmax.f32 %v1417_v15, 0.0  ;;  %v1263_v20 = vpop.f32.mrb[76].mxu1 }
 0x336   :  { %v1536_v21 = vmax.f32 %v1528_v42, %v1480_v17  ;;  %v1343_v22 = vmul.f32 %v2318_v32, %v1263_v20  ;;  %v1265_v23 = vpop.f32.mrb[77].mxu1 }
 0x337   :  { %v1691_v24 = vpack.c.bf16 %v1535_v18, %v1534_v16  ;;  %v1537_v25 = vmax.f32 %v1529_v45, %v1481_v19  ;;  %v1344_v2 = vmul.f32 %v2323_v34, %v1265_v23  ;;  %v1267_v26 = vpop.f32.mrb[78].mxu1 }
 0x338   :  { %v1418_v27 = vadd.f32 %v2326_v38, %v1343_v22  ;;  %v1345_v28 = vmul.f32 %v2318_v32, %v1267_v26  ;;  %v1269_v29 = vpop.f32.mrb[79].mxu1 }
 0x339   :  { %1566 = vst [vmem:[%s2479_s10] sm:$0xff] %v1691_v24  ;;  %v1692_v3 = vpack.c.bf16 %v1537_v25, %v1536_v21  ;;  %v1419_v30 = vadd.f32 %v2329_v40, %v1344_v2  ;;  %v1346_v31 = vmul.f32 %v2323_v34, %v1269_v29 }
 0x33a   :  { %v1482_v33 = vmax.f32 %v1418_v27, 0.0  ;;  %v1420_v0 = vadd.f32 %v2326_v38, %v1345_v28 }
 0x33b   :  { %1567 = vst [vmem:[%s2479_s10 + $0x8] sm:$0xff] %v1692_v3  ;;  %v1483_v35 = vmax.f32 %v1419_v30, 0.0  ;;  %v1421_v32 = vadd.f32 %v2329_v40, %v1346_v31 }
 0x33c   :  { %v1538_v36 = vmax.f32 %v1530_v59, %v1482_v33  ;;  %v1484_v37 = vmax.f32 %v1420_v0, 0.0 }
 0x33d   :  { %v1539_v39 = vmax.f32 %v1531_v61, %v1483_v35  ;;  %v1485_v41 = vmax.f32 %v1421_v32, 0.0 }
 0x33e   :  { %v1540_v42 = vmax.f32 %v1532_v1, %v1484_v37 }
 0x33f   :  { %v1693_v43 = vpack.c.bf16 %v1539_v39, %v1538_v36  ;;  %v1541_v44 = vmax.f32 %v1533_v55, %v1485_v41 }
 0x341   :  { %1568 = vst [vmem:[%s2479_s10 + $0x10] sm:$0xff] %v1693_v43  ;;  %v1694_v34 = vpack.c.bf16 %v1541_v44, %v1540_v42 }
 0x343   :  { %1569 = vst [vmem:[%s2479_s10 + $0x18] sm:$0xff] %v1694_v34 }

// kernel: pointnet2_seg_forward.9
= control target key start
LH: loop header
LB: loop body
LE: loop exit
PB: predicated region body
PF: predicated region fallthrough
CT: control target
= control target key end

     0   :  { %s1724_s1 = inlined_call_operand.vmem [shape: bf16[384,256], index: 1, kind: input, shape index: {}]   ;;  %s1725_s0 = inlined_call_operand.vmem [shape: bf16[64,384], index: 0, kind: input, shape index: {}]   ;;  %s1726_s4 = inlined_call_operand.vmem [shape: bf16[256,256], index: 4, kind: input, shape index: {}]   ;;  %s1727_s2 = inlined_call_operand.vmem [shape: f32[1,256], index: 2, kind: input, shape index: {}]   ;;  %s1728_s3 = inlined_call_operand.vmem [shape: f32[1,256], index: 3, kind: input, shape index: {}]   ;;  %s1729_s5 = inlined_call_operand.vmem [shape: f32[1,256], index: 5, kind: input, shape index: {}]   ;;  %s1730_s6 = inlined_call_operand.vmem [shape: f32[1,256], index: 6, kind: input, shape index: {}]   ;;  %s1731_s7 = inlined_call_operand.vmem [shape: bf16[64,256], index: 7, kind: output, shape index: {}]  }
   0x1   :  { %v1143_v0 = vld [vmem:[%s1724_s1 + $0x4] ss:$8 sps:$4 sm:$0xff]   ;;  %v1145_v1 = vld [vmem:[%s1724_s1] ss:$8 sps:$4 sm:$0xff]   ;;  %v1146_v2 = vld [vmem:[%s1724_s1 + $0x14] ss:$8 sps:$4 sm:$0xff]  }
   0x2   :  { %397 = vmatprep.subr.bf16.mxu0 %v1143_v0  ;;  %v1148_v3 = vld [vmem:[%s1724_s1 + $0x10] ss:$8 sps:$4 sm:$0xff]   ;;  %v1149_v4 = vld [vmem:[%s1724_s1 + $0x24] ss:$8 sps:$4 sm:$0xff]   ;;  %v1151_v5 = vld [vmem:[%s1724_s1 + $0x20] ss:$8 sps:$4 sm:$0xff]  }
   0x3   :  { %398 = vmatpush1.bf16.msra.mxu0 %v1145_v1  ;;  %v1152_v6 = vld [vmem:[%s1724_s1 + $0x34] ss:$8 sps:$4 sm:$0xff]   ;;  %v1154_v7 = vld [vmem:[%s1724_s1 + $0x30] ss:$8 sps:$4 sm:$0xff]   ;;  %v1155_v8 = vld [vmem:[%s1724_s1 + $0x44] ss:$8 sps:$4 sm:$0xff]  }
   0x4   :  { %399 = vmatprep.subr.bf16.mxu0 %v1146_v2  ;;  %v1157_v9 = vld [vmem:[%s1724_s1 + $0x40] ss:$8 sps:$4 sm:$0xff]   ;;  %v1158_v10 = vld [vmem:[%s1724_s1 + $0x54] ss:$8 sps:$4 sm:$0xff]   ;;  %v1160_v11 = vld [vmem:[%s1724_s1 + $0x50] ss:$8 sps:$4 sm:$0xff]  }
   0x5   :  { %v1161_v12 = vld [vmem:[%s1724_s1 + $0x64] ss:$8 sps:$4 sm:$0xff]   ;;  %v1163_v14 = vld [vmem:[%s1724_s1 + $0x60] ss:$8 sps:$4 sm:$0xff]   ;;  %v1164_v15 = vld [vmem:[%s1724_s1 + $0x74] ss:$8 sps:$4 sm:$0xff]  }
   0x6   :  { %v1193_v13 = vld [vmem:[%s1725_s0 + $0x4] ss:$12 sps:$4 sm:$0xff]   ;;  %v1169_v18 = vld [vmem:[%s1724_s1 + $0x80] ss:$8 sps:$4 sm:$0xff]   ;;  %v1170_v19 = vld [vmem:[%s1724_s1 + $0x94] ss:$8 sps:$4 sm:$0xff]  }
   0x7   :  { %400 = vmatpush1.bf16.msra.mxu0 %v1148_v3  ;;  %429 = vmatprep.mubr.bf16.mxu0 %v1193_v13  ;;  %v1166_v16 = vld [vmem:[%s1724_s1 + $0x70] ss:$8 sps:$4 sm:$0xff]   ;;  %v1167_v17 = vld [vmem:[%s1724_s1 + $0x84] ss:$8 sps:$4 sm:$0xff]   ;;  %v1175_v22 = vld [vmem:[%s1724_s1 + $0xa0] ss:$8 sps:$4 sm:$0xff]  }
   0x8   :  { %401 = vmatprep.subr.bf16.mxu0 %v1149_v4  ;;  %v1172_v20 = vld [vmem:[%s1724_s1 + $0x90] ss:$8 sps:$4 sm:$0xff]   ;;  %v1173_v21 = vld [vmem:[%s1724_s1 + $0xa4] ss:$8 sps:$4 sm:$0xff]   ;;  %v1176_v23 = vld [vmem:[%s1724_s1 + $0xb4] ss:$8 sps:$4 sm:$0xff]  }
   0x9   :  { %v1231_v24 = vld [vmem:[%s1726_s4 + $0x4] ss:$8 sps:$4 sm:$0xff]   ;;  %v1233_v25 = vld [vmem:[%s1726_s4] ss:$8 sps:$4 sm:$0xff]   ;;  %v1178_v26 = vld [vmem:[%s1724_s1 + $0xb0] ss:$8 sps:$4 sm:$0xff]  }
   0xa   :  { %v1234_v27 = vld [vmem:[%s1726_s4 + $0x14] ss:$8 sps:$4 sm:$0xff]   ;;  %v1179_v28 = vld [vmem:[%s1724_s1 + $0xc4] ss:$8 sps:$4 sm:$0xff]   ;;  %815 = vmatprep.subr.bf16.mxu1 %v1231_v24  ;;  %v1236_v29 = vld [vmem:[%s1726_s4 + $0x10] ss:$8 sps:$4 sm:$0xff]  }
   0xb   :  { %402 = vmatpush1.bf16.msra.mxu0 %v1151_v5  ;;  %816 = vmatpush1.bf16.msra.mxu1 %v1233_v25  ;;  %v1237_v30 = vld [vmem:[%s1726_s4 + $0x24] ss:$8 sps:$4 sm:$0xff]   ;;  %v1181_v31 = vld [vmem:[%s1724_s1 + $0xc0] ss:$8 sps:$4 sm:$0xff]   ;;  %v1182_v32 = vld [vmem:[%s1724_s1 + $0xd4] ss:$8 sps:$4 sm:$0xff]  }
   0xc   :  { %403 = vmatprep.subr.bf16.mxu0 %v1152_v6  ;;  %817 = vmatprep.subr.bf16.mxu1 %v1234_v27  ;;  %v1239_v33 = vld [vmem:[%s1726_s4 + $0x20] ss:$8 sps:$4 sm:$0xff]   ;;  %v1240_v34 = vld [vmem:[%s1726_s4 + $0x34] ss:$8 sps:$4 sm:$0xff]   ;;  %v1184_v35 = vld [vmem:[%s1724_s1 + $0xd0] ss:$8 sps:$4 sm:$0xff]  }
   0xd   :  { %v1185_v36 = vld [vmem:[%s1724_s1 + $0xe4] ss:$8 sps:$4 sm:$0xff]   ;;  %v1242_v37 = vld [vmem:[%s1726_s4 + $0x30] ss:$8 sps:$4 sm:$0xff]   ;;  %v1187_v39 = vld [vmem:[%s1724_s1 + $0xe0] ss:$8 sps:$4 sm:$0xff]  }
   0xe   :  { %v1243_v38 = vld [vmem:[%s1726_s4 + $0x44] ss:$8 sps:$4 sm:$0xff]   ;;  %v1188_v40 = vld [vmem:[%s1724_s1 + $0xf4] ss:$8 sps:$4 sm:$0xff]   ;;  %v1245_v41 = vld [vmem:[%s1726_s4 + $0x40] ss:$8 sps:$4 sm:$0xff]  }
   0xf   :  { %404 = vmatpush1.bf16.msra.mxu0 %v1154_v7  ;;  %818 = vmatpush1.bf16.msra.mxu1 %v1236_v29  ;;  %v1190_v42 = vld [vmem:[%s1724_s1 + $0xf0] ss:$8 sps:$4 sm:$0xff]   ;;  %v1246_v43 = vld [vmem:[%s1726_s4 + $0x54] ss:$8 sps:$4 sm:$0xff]   ;;  %v1196_v44 = vld [vmem:[%s1724_s1 + $0x104] ss:$8 sps:$4 sm:$0xff]   ;;  %v544_v29 = vlaneseq }
  0x10   :  { %405 = vmatprep.subr.bf16.mxu0 %v1155_v8  ;;  %819 = vmatprep.subr.bf16.mxu1 %v1237_v30  ;;  %v1248_v45 = vld [vmem:[%s1726_s4 + $0x50] ss:$8 sps:$4 sm:$0xff]   ;;  %v1191_v46 = vld [vmem:[%s1725_s0] ss:$12 sps:$4 sm:$0xff]   ;;  %v1200_v49 = vld [vmem:[%s1725_s0 + $0x1c] ss:$12 sps:$4 sm:$0xff]  }
  0x11   :  { %v1249_v47 = vld [vmem:[%s1726_s4 + $0x64] ss:$8 sps:$4 sm:$0xff]   ;;  %v1194_v48 = vld [vmem:[%s1724_s1 + $0x100] ss:$8 sps:$4 sm:$0xff]   ;;  %v1199_v50 = vld [vmem:[%s1724_s1 + $0x114] ss:$8 sps:$4 sm:$0xff]  }
  0x12   :  { %v1251_v51 = vld [vmem:[%s1726_s4 + $0x60] ss:$8 sps:$4 sm:$0xff]   ;;  %v1252_v52 = vld [vmem:[%s1726_s4 + $0x74] ss:$8 sps:$4 sm:$0xff]   ;;  %v1197_v53 = vld [vmem:[%s1724_s1 + $0x110] ss:$8 sps:$4 sm:$0xff]  }
  0x13   :  { %406 = vmatpush1.bf16.msra.mxu0 %v1157_v9  ;;  %820 = vmatpush1.bf16.msra.mxu1 %v1239_v33  ;;  %v1205_v54 = vld [vmem:[%s1724_s1 + $0x124] ss:$8 sps:$4 sm:$0xff]   ;;  %v1254_v55 = vld [vmem:[%s1726_s4 + $0x70] ss:$8 sps:$4 sm:$0xff]   ;;  %v1203_v58 = vld [vmem:[%s1724_s1 + $0x120] ss:$8 sps:$4 sm:$0xff]  }
  0x14   :  { %407 = vmatprep.subr.bf16.mxu0 %v1158_v10  ;;  %821 = vmatprep.subr.bf16.mxu1 %v1240_v34  ;;  %v1202_v56 = vld [vmem:[%s1725_s0 + $0x18] ss:$12 sps:$4 sm:$0xff]   ;;  %v1209_v59 = vld [vmem:[%s1725_s0 + $0x34] ss:$12 sps:$4 sm:$0xff]   ;;  %v1211_v2 = vld [vmem:[%s1725_s0 + $0x30] ss:$12 sps:$4 sm:$0xff]  }
  0x15   :  { %v1255_v57 = vld [vmem:[%s1726_s4 + $0x84] ss:$8 sps:$4 sm:$0xff]   ;;  %v1208_v60 = vld [vmem:[%s1724_s1 + $0x134] ss:$8 sps:$4 sm:$0xff]   ;;  %v1257_v61 = vld [vmem:[%s1726_s4 + $0x80] ss:$8 sps:$4 sm:$0xff]  }
  0x16   :  { %v1258_v62 = vld [vmem:[%s1726_s4 + $0x94] ss:$8 sps:$4 sm:$0xff]   ;;  %v1206_v63 = vld [vmem:[%s1724_s1 + $0x130] ss:$8 sps:$4 sm:$0xff]   ;;  %v1214_v0 = vld [vmem:[%s1724_s1 + $0x144] ss:$8 sps:$4 sm:$0xff]  }
  0x17   :  { %408 = vmatpush1.bf16.msra.mxu0 %v1160_v11  ;;  %822 = vmatpush1.bf16.msra.mxu1 %v1242_v37  ;;  %v1260_v1 = vld [vmem:[%s1726_s4 + $0x90] ss:$8 sps:$4 sm:$0xff]   ;;  %v1261_v3 = vld [vmem:[%s1726_s4 + $0xa4] ss:$8 sps:$4 sm:$0xff]   ;;  %v1212_v4 = vld [vmem:[%s1724_s1 + $0x140] ss:$8 sps:$4 sm:$0xff]  }
  0x18   :  { %409 = vmatprep.subr.bf16.mxu0 %v1161_v12  ;;  %823 = vmatprep.subr.bf16.mxu1 %v1243_v38  ;;  %v1218_v5 = vld [vmem:[%s1725_s0 + $0x4c] ss:$12 sps:$4 sm:$0xff]   ;;  %v1217_v6 = vld [vmem:[%s1724_s1 + $0x154] ss:$8 sps:$4 sm:$0xff]   ;;  %v1263_v7 = vld [vmem:[%s1726_s4 + $0xa0] ss:$8 sps:$4 sm:$0xff]  }
  0x19   :  { %v1264_v8 = vld [vmem:[%s1726_s4 + $0xb4] ss:$8 sps:$4 sm:$0xff]   ;;  %v1215_v9 = vld [vmem:[%s1724_s1 + $0x150] ss:$8 sps:$4 sm:$0xff]   ;;  %v1223_v10 = vld [vmem:[%s1724_s1 + $0x164] ss:$8 sps:$4 sm:$0xff]  }
  0x1a   :  { %v1266_v11 = vld [vmem:[%s1726_s4 + $0xb0] ss:$8 sps:$4 sm:$0xff]   ;;  %v1220_v12 = vld [vmem:[%s1725_s0 + $0x48] ss:$12 sps:$4 sm:$0xff]   ;;  %v1267_v13 = vld [vmem:[%s1726_s4 + $0xc4] ss:$8 sps:$4 sm:$0xff]  }
  0x1b   :  { %410 = vmatpush1.bf16.msra.mxu0 %v1163_v14  ;;  %824 = vmatpush1.bf16.msra.mxu1 %v1245_v41  ;;  %v1221_v14 = vld [vmem:[%s1724_s1 + $0x160] ss:$8 sps:$4 sm:$0xff]   ;;  %v1272_v24 = vld [vmem:[%s1726_s4 + $0xd0] ss:$8 sps:$4 sm:$0xff]   ;;  %v1273_v25 = vld [vmem:[%s1726_s4 + $0xe4] ss:$8 sps:$4 sm:$0xff]  }
  0x1c   :  { %411 = vmatprep.subr.bf16.mxu0 %v1164_v15  ;;  %825 = vmatprep.subr.bf16.mxu1 %v1246_v43  ;;  %v1226_v15 = vld [vmem:[%s1724_s1 + $0x174] ss:$8 sps:$4 sm:$0xff]   ;;  %v545_v30 = vshrl.u32 %v544_v29, 7  ;;  %v92_v34 = vld [vmem:[%s1728_s3] sm:$0x3] }
  0x1d   :  { %v1276_v27 = vld [vmem:[%s1726_s4 + $0xf4] ss:$8 sps:$4 sm:$0xff]  }
  0x1e   :  { %v1601_v33 = vsub.s32 1, %v545_v30 }
  0x1f   :  { %412 = vmatpush1.bf16.msra.mxu0 %v1166_v16  ;;  %826 = vmatpush1.bf16.msra.mxu1 %v1248_v45  ;;  %v1269_v16 = vld [vmem:[%s1726_s4 + $0xc0] ss:$8 sps:$4 sm:$0xff]  }
  0x20   :  { %413 = vmatprep.subr.bf16.mxu0 %v1167_v17  ;;  %827 = vmatprep.subr.bf16.mxu1 %v1249_v47  ;;  %v1224_v17 = vld [vmem:[%s1724_s1 + $0x170] ss:$8 sps:$4 sm:$0xff]  }
  0x23   :  { %414 = vmatpush1.bf16.msra.mxu0 %v1169_v18  ;;  %828 = vmatpush1.bf16.msra.mxu1 %v1251_v51  ;;  %v1279_v18 = vmov 0  }
  0x24   :  { %415 = vmatprep.subr.bf16.mxu0 %v1170_v19  ;;  %829 = vmatprep.subr.bf16.mxu1 %v1252_v52  ;;  %v1227_v19 = vld [vmem:[%s1725_s0 + $0x8] ss:$12 sps:$4 sm:$0xff]  }
  0x27   :  { %416 = vmatpush1.bf16.msra.mxu0 %v1172_v20  ;;  %830 = vmatpush1.bf16.msra.mxu1 %v1254_v55  ;;  %v1228_v20 = vld [vmem:[%s1725_s0 + $0x20] ss:$12 sps:$4 sm:$0xff]  }
  0x28   :  { %417 = vmatprep.subr.bf16.mxu0 %v1173_v21  ;;  %831 = vmatprep.subr.bf16.mxu1 %v1255_v57  ;;  %v1229_v21 = vld [vmem:[%s1725_s0 + $0x38] ss:$12 sps:$4 sm:$0xff]  }
  0x2b   :  { %418 = vmatpush1.bf16.msra.mxu0 %v1175_v22  ;;  %832 = vmatpush1.bf16.msra.mxu1 %v1257_v61  ;;  %v1230_v22 = vld [vmem:[%s1725_s0 + $0x50] ss:$12 sps:$4 sm:$0xff]  }
  0x2c   :  { %419 = vmatprep.subr.bf16.mxu0 %v1176_v23  ;;  %833 = vmatprep.subr.bf16.mxu1 %v1258_v62  ;;  %v1270_v23 = vld [vmem:[%s1726_s4 + $0xd4] ss:$8 sps:$4 sm:$0xff]  }
  0x2f   :  { %420 = vmatpush1.bf16.msra.mxu0 %v1178_v26  ;;  %834 = vmatpush1.bf16.msra.mxu1 %v1260_v1  ;;  %v1275_v26 = vld [vmem:[%s1726_s4 + $0xe0] ss:$8 sps:$4 sm:$0xff]  }
  0x30   :  { %421 = vmatprep.subr.bf16.mxu0 %v1179_v28  ;;  %835 = vmatprep.subr.bf16.mxu1 %v1261_v3  ;;  %v1278_v28 = vld [vmem:[%s1726_s4 + $0xf0] ss:$8 sps:$4 sm:$0xff]  }
  0x33   :  { %422 = vmatpush1.bf16.msra.mxu0 %v1181_v31  ;;  %836 = vmatpush1.bf16.msra.mxu1 %v1263_v7  ;;  %v1596_v31 = vsub.s32 0, %v545_v30 }
  0x34   :  { %423 = vmatprep.subr.bf16.mxu0 %v1182_v32  ;;  %837 = vmatprep.subr.bf16.mxu1 %v1264_v8  ;;  %v91_v32 = vld [vmem:[%s1727_s2] sm:$0x3] }
  0x35   :  { %v1613_v37 = vrot.slane %v92_v34, %v1596_v31 }
  0x37   :  { %424 = vmatpush1.bf16.msra.mxu0 %v1184_v35  ;;  %838 = vmatpush1.bf16.msra.mxu1 %v1266_v11  ;;  %v1607_v35 = vrot.slane %v91_v32, %v1596_v31 }
  0x38   :  { %425 = vmatprep.subr.bf16.mxu0 %v1185_v36  ;;  %839 = vmatprep.subr.bf16.mxu1 %v1267_v13  ;;  %v1610_v36 = vrot.slane %v91_v32, %v1601_v33 }
  0x3b   :  { %426 = vmatpush1.bf16.msra.mxu0 %v1187_v39  ;;  %840 = vmatpush1.bf16.msra.mxu1 %v1269_v16  ;;  %v1616_v39 = vrot.slane %v92_v34, %v1601_v33 }
  0x3c   :  { %427 = vmatprep.subr.bf16.mxu0 %v1188_v40  ;;  %841 = vmatprep.subr.bf16.mxu1 %v1270_v23 }
  0x3f   :  { %428 = vmatpush1.bf16.msra.mxu0 %v1190_v42  ;;  %842 = vmatpush1.bf16.msra.mxu1 %v1272_v24 }
  0x40   :  { %470 = vmatprep.subr.bf16.mxu0 %v1196_v44  ;;  %843 = vmatprep.subr.bf16.mxu1 %v1273_v25 }
  0x42   :  { %430 = vmatmul.mubr.bf16.vlgmr.msra.gmra.mrb[0].mxu0 %v1191_v46 }
  0x43   :  { %471 = vmatpush1.bf16.msra.mxu0 %v1194_v48  ;;  %439 = vmatprep.mubr.bf16.mxu0 %v1200_v49 }
  0x44   :  { %472 = vmatprep.subr.bf16.mxu0 %v1199_v50  ;;  %844 = vmatpush1.bf16.msra.mxu1 %v1275_v26 }
  0x45   :  { %845 = vmatprep.subr.bf16.mxu1 %v1276_v27 }
  0x47   :  { %473 = vmatpush1.bf16.msra.mxu0 %v1197_v53 }
  0x48   :  { %474 = vmatprep.subr.bf16.mxu0 %v1205_v54  ;;  %846 = vmatpush1.bf16.msra.mxu1 %v1278_v28 }
  0x4a   :  { %440 = vmatmul.mubr.bf16.gmra.mrb[4].mxu0 %v1202_v56 }
  0x4b   :  { %475 = vmatpush1.bf16.msra.mxu0 %v1203_v58  ;;  %449 = vmatprep.mubr.bf16.mxu0 %v1209_v59 }
  0x4c   :  { %476 = vmatprep.subr.bf16.mxu0 %v1208_v60 }
  0x4f   :  { %477 = vmatpush1.bf16.msra.mxu0 %v1206_v63 }
  0x50   :  { %478 = vmatprep.subr.bf16.mxu0 %v1214_v0 }
  0x52   :  { %450 = vmatmul.mubr.bf16.gmra.mrb[8].mxu0 %v1211_v2 }
  0x53   :  { %479 = vmatpush1.bf16.msra.mxu0 %v1212_v4  ;;  %459 = vmatprep.mubr.bf16.mxu0 %v1218_v5 }
  0x54   :  { %480 = vmatprep.subr.bf16.mxu0 %v1217_v6 }
  0x57   :  { %481 = vmatpush1.bf16.msra.mxu0 %v1215_v9 }
  0x58   :  { %482 = vmatprep.subr.bf16.mxu0 %v1223_v10 }
  0x5a   :  { %460 = vmatmul.mubr.bf16.gmra.mrb[12].mxu0 %v1220_v12 }
  0x5b   :  { %483 = vmatpush1.bf16.msra.mxu0 %v1221_v14  ;;  %502 = vmatprep.mubr.bf16.mxu0 %v1279_v18 }
  0x5c   :  { %484 = vmatprep.subr.bf16.mxu0 %v1226_v15 }
  0x5f   :  { %485 = vmatpush1.bf16.msra.mxu0 %v1224_v17 }
  0x62   :  { %503 = vmatmul.mubr.bf16.vlgmr.msra.gmra.mrb[0].mxu0 %v1227_v19 }
  0x63   :  { %512 = vmatprep.mubr.bf16.mxu0 %v1279_v18 }
  0x6a   :  { %513 = vmatmul.mubr.bf16.gmra.mrb[4].mxu0 %v1228_v20 }
  0x6b   :  { %522 = vmatprep.mubr.bf16.mxu0 %v1279_v18 }
  0x72   :  { %523 = vmatmul.mubr.bf16.gmra.mrb[8].mxu0 %v1229_v21 }
  0x73   :  { %532 = vmatprep.mubr.bf16.mxu0 %v1279_v18 }
  0x7a   :  { %533 = vmatmul.mubr.bf16.gmra.mrb[12].mxu0 %v1230_v22 }
 0x135   :  { %v504_v38 = vpop.f32.mrb[0].mxu0 }
 0x136   :  { %v554_v40 = vmul.f32 %v1607_v35, %v504_v38  ;;  %v506_v41 = vpop.f32.mrb[1].mxu0 }
 0x137   :  { %v555_v42 = vmul.f32 %v1610_v36, %v506_v41  ;;  %v508_v43 = vpop.f32.mrb[2].mxu0 }
 0x138   :  { %v581_v44 = vadd.f32 %v1613_v37, %v554_v40  ;;  %v556_v45 = vmul.f32 %v1607_v35, %v508_v43  ;;  %v510_v46 = vpop.f32.mrb[3].mxu0 }
 0x139   :  { %v557_v47 = vmul.f32 %v1610_v36, %v510_v46  ;;  %v582_v48 = vadd.f32 %v1616_v39, %v555_v42 }
 0x13a   :  { %v583_v49 = vadd.f32 %v1613_v37, %v556_v45  ;;  %v597_v51 = vmax.f32 %v581_v44, 0.0 }
 0x13b   :  { %v584_v50 = vadd.f32 %v1616_v39, %v557_v47  ;;  %v598_v54 = vmax.f32 %v582_v48, 0.0 }
 0x13c   :  { %v599_v52 = vmax.f32 %v583_v49, 0.0 }
 0x13d   :  { %v514_v53 = vpop.f32.mrb[4].mxu0  ;;  %v600_v55 = vmax.f32 %v584_v50, 0.0 }
 0x13e   :  { %v558_v56 = vmul.f32 %v1607_v35, %v514_v53  ;;  %v516_v57 = vpop.f32.mrb[5].mxu0  ;;  %v613_v58 = vpack.c.bf16 %v599_v52, %v597_v51 }
 0x13f   :  { %v559_v59 = vmul.f32 %v1610_v36, %v516_v57  ;;  %v518_v60 = vpop.f32.mrb[6].mxu0  ;;  %v614_v61 = vpack.c.bf16 %v600_v55, %v598_v54 }
 0x140   :  { %v585_v62 = vadd.f32 %v1613_v37, %v558_v56  ;;  %v560_v63 = vmul.f32 %v1607_v35, %v518_v60  ;;  %v520_v0 = vpop.f32.mrb[7].mxu0 }
 0x141   :  { %v586_v1 = vadd.f32 %v1616_v39, %v559_v59  ;;  %v561_v2 = vmul.f32 %v1610_v36, %v520_v0  ;;  %847 = vmatprep.mubr.bf16.mxu1 %v614_v61 }
 0x142   :  { %v587_v3 = vadd.f32 %v1613_v37, %v560_v63  ;;  %848 = vmatmul.mubr.bf16.vlgmr.msra.gmra.mrb[0].mxu1 %v613_v58  ;;  %v601_v5 = vmax.f32 %v585_v62, 0.0 }
 0x143   :  { %v588_v4 = vadd.f32 %v1616_v39, %v561_v2  ;;  %v602_v7 = vmax.f32 %v586_v1, 0.0 }
 0x144   :  { %v603_v6 = vmax.f32 %v587_v3, 0.0 }
 0x145   :  { %v604_v8 = vmax.f32 %v588_v4, 0.0  ;;  %v524_v9 = vpop.f32.mrb[8].mxu0 }
 0x146   :  { %v562_v10 = vmul.f32 %v1607_v35, %v524_v9  ;;  %v526_v11 = vpop.f32.mrb[9].mxu0  ;;  %v615_v12 = vpack.c.bf16 %v603_v6, %v601_v5 }
 0x147   :  { %v563_v13 = vmul.f32 %v1610_v36, %v526_v11  ;;  %v528_v14 = vpop.f32.mrb[10].mxu0  ;;  %v616_v15 = vpack.c.bf16 %v604_v8, %v602_v7 }
 0x148   :  { %v589_v16 = vadd.f32 %v1613_v37, %v562_v10  ;;  %v564_v17 = vmul.f32 %v1607_v35, %v528_v14  ;;  %v530_v18 = vpop.f32.mrb[11].mxu0 }
 0x149   :  { %v590_v19 = vadd.f32 %v1616_v39, %v563_v13  ;;  %v565_v20 = vmul.f32 %v1610_v36, %v530_v18  ;;  %857 = vmatprep.mubr.bf16.mxu1 %v616_v15 }
 0x14a   :  { %v591_v21 = vadd.f32 %v1613_v37, %v564_v17  ;;  %858 = vmatmul.mubr.bf16.gmra.mrb[4].mxu1 %v615_v12  ;;  %v605_v23 = vmax.f32 %v589_v16, 0.0 }
 0x14b   :  { %v592_v22 = vadd.f32 %v1616_v39, %v565_v20  ;;  %v606_v25 = vmax.f32 %v590_v19, 0.0 }
 0x14c   :  { %v607_v24 = vmax.f32 %v591_v21, 0.0 }
 0x14d   :  { %v608_v26 = vmax.f32 %v592_v22, 0.0  ;;  %v534_v27 = vpop.f32.mrb[12].mxu0 }
 0x14e   :  { %v566_v28 = vmul.f32 %v1607_v35, %v534_v27  ;;  %v536_v29 = vpop.f32.mrb[13].mxu0  ;;  %v617_v30 = vpack.c.bf16 %v607_v24, %v605_v23 }
 0x14f   :  { %v567_v32 = vmul.f32 %v1610_v36, %v536_v29  ;;  %v538_v34 = vpop.f32.mrb[14].mxu0  ;;  %v618_v38 = vpack.c.bf16 %v608_v26, %v606_v25 }
 0x150   :  { %v593_v40 = vadd.f32 %v1613_v37, %v566_v28  ;;  %v568_v41 = vmul.f32 %v1607_v35, %v538_v34  ;;  %v540_v42 = vpop.f32.mrb[15].mxu0  ;;  %v653_v35 = vld [vmem:[%s1729_s5] sm:$0x3] }
 0x151   :  { %v594_v43 = vadd.f32 %v1616_v39, %v567_v32  ;;  %v569_v44 = vmul.f32 %v1610_v36, %v540_v42  ;;  %867 = vmatprep.mubr.bf16.mxu1 %v618_v38  ;;  %v654_v36 = vld [vmem:[%s1730_s6] sm:$0x3] }
 0x152   :  { %v595_v45 = vadd.f32 %v1613_v37, %v568_v41  ;;  %868 = vmatmul.mubr.bf16.gmra.mrb[8].mxu1 %v617_v30  ;;  %v609_v47 = vmax.f32 %v593_v40, 0.0  ;;  %v1657_v37 = vrot.slane %v653_v35, %v1596_v31  ;;  %v1663_v53 = vrot.slane %v654_v36, %v1596_v31 }
 0x153   :  { %v596_v46 = vadd.f32 %v1616_v39, %v569_v44  ;;  %v610_v49 = vmax.f32 %v594_v43, 0.0  ;;  %v1660_v39 = vrot.slane %v653_v35, %v1601_v33  ;;  %v1666_v55 = vrot.slane %v654_v36, %v1601_v33 }
 0x154   :  { %v611_v48 = vmax.f32 %v595_v45, 0.0 }
 0x155   :  { %v612_v50 = vmax.f32 %v596_v46, 0.0 }
 0x156   :  { %v619_v51 = vpack.c.bf16 %v611_v48, %v609_v47 }
 0x157   :  { %v620_v52 = vpack.c.bf16 %v612_v50, %v610_v49 }
 0x159   :  { %877 = vmatprep.mubr.bf16.mxu1 %v620_v52 }
 0x15a   :  { %878 = vmatmul.mubr.bf16.gmra.mrb[12].mxu1 %v619_v51 }
 0x215   :  { %v849_v54 = vpop.f32.mrb[0].mxu1 }
 0x216   :  { %v899_v56 = vmul.f32 %v1657_v37, %v849_v54  ;;  %v851_v57 = vpop.f32.mrb[1].mxu1 }
 0x217   :  { %v900_v58 = vmul.f32 %v1660_v39, %v851_v57  ;;  %v853_v59 = vpop.f32.mrb[2].mxu1 }
 0x218   :  { %v926_v60 = vadd.f32 %v1663_v53, %v899_v56  ;;  %v901_v61 = vmul.f32 %v1657_v37, %v853_v59  ;;  %v855_v62 = vpop.f32.mrb[3].mxu1 }
 0x219   :  { %v927_v63 = vadd.f32 %v1666_v55, %v900_v58  ;;  %v902_v31 = vmul.f32 %v1660_v39, %v855_v62 }
 0x21a   :  { %v942_v0 = vmax.f32 %v926_v60, 0.0  ;;  %v928_v1 = vadd.f32 %v1663_v53, %v901_v61 }
 0x21b   :  { %v943_v33 = vmax.f32 %v927_v63, 0.0  ;;  %v929_v2 = vadd.f32 %v1666_v55, %v902_v31 }
 0x21c   :  { %v944_v3 = vmax.f32 %v928_v1, 0.0 }
 0x21d   :  { %v1118_v4 = vpack.c.bf16 %v943_v33, %v942_v0  ;;  %v945_v5 = vmax.f32 %v929_v2, 0.0  ;;  %v859_v6 = vpop.f32.mrb[4].mxu1 }
 0x21e   :  { %v903_v7 = vmul.f32 %v1657_v37, %v859_v6  ;;  %v861_v8 = vpop.f32.mrb[5].mxu1 }
 0x21f   :  { %1006 = vst [vmem:[%s1731_s7] sm:$0xff] %v1118_v4  ;;  %v1119_v9 = vpack.c.bf16 %v945_v5, %v944_v3  ;;  %v904_v10 = vmul.f32 %v1660_v39, %v861_v8  ;;  %v863_v11 = vpop.f32.mrb[6].mxu1 }
 0x220   :  { %v930_v12 = vadd.f32 %v1663_v53, %v903_v7  ;;  %v905_v13 = vmul.f32 %v1657_v37, %v863_v11  ;;  %v865_v14 = vpop.f32.mrb[7].mxu1 }
 0x221   :  { %1007 = vst [vmem:[%s1731_s7 + $0x8] sm:$0xff] %v1119_v9  ;;  %v931_v15 = vadd.f32 %v1666_v55, %v904_v10  ;;  %v906_v16 = vmul.f32 %v1660_v39, %v865_v14 }
 0x222   :  { %v946_v17 = vmax.f32 %v930_v12, 0.0  ;;  %v932_v18 = vadd.f32 %v1663_v53, %v905_v13 }
 0x223   :  { %v947_v19 = vmax.f32 %v931_v15, 0.0  ;;  %v933_v20 = vadd.f32 %v1666_v55, %v906_v16 }
 0x224   :  { %v948_v21 = vmax.f32 %v932_v18, 0.0 }
 0x225   :  { %v1120_v22 = vpack.c.bf16 %v947_v19, %v946_v17  ;;  %v949_v23 = vmax.f32 %v933_v20, 0.0  ;;  %v869_v24 = vpop.f32.mrb[8].mxu1 }
 0x226   :  { %v907_v25 = vmul.f32 %v1657_v37, %v869_v24  ;;  %v871_v26 = vpop.f32.mrb[9].mxu1 }
 0x227   :  { %1008 = vst [vmem:[%s1731_s7 + $0x10] sm:$0xff] %v1120_v22  ;;  %v1121_v27 = vpack.c.bf16 %v949_v23, %v948_v21  ;;  %v908_v28 = vmul.f32 %v1660_v39, %v871_v26  ;;  %v873_v29 = vpop.f32.mrb[10].mxu1 }
 0x228   :  { %v934_v30 = vadd.f32 %v1663_v53, %v907_v25  ;;  %v909_v32 = vmul.f32 %v1657_v37, %v873_v29  ;;  %v875_v34 = vpop.f32.mrb[11].mxu1 }
 0x229   :  { %1009 = vst [vmem:[%s1731_s7 + $0x18] sm:$0xff] %v1121_v27  ;;  %v935_v38 = vadd.f32 %v1666_v55, %v908_v28  ;;  %v910_v40 = vmul.f32 %v1660_v39, %v875_v34 }
 0x22a   :  { %v950_v41 = vmax.f32 %v934_v30, 0.0  ;;  %v936_v42 = vadd.f32 %v1663_v53, %v909_v32 }
 0x22b   :  { %v951_v43 = vmax.f32 %v935_v38, 0.0  ;;  %v937_v44 = vadd.f32 %v1666_v55, %v910_v40 }
 0x22c   :  { %v952_v45 = vmax.f32 %v936_v42, 0.0 }
 0x22d   :  { %v1122_v46 = vpack.c.bf16 %v951_v43, %v950_v41  ;;  %v953_v47 = vmax.f32 %v937_v44, 0.0  ;;  %v879_v48 = vpop.f32.mrb[12].mxu1 }
 0x22e   :  { %v911_v49 = vmul.f32 %v1657_v37, %v879_v48  ;;  %v881_v50 = vpop.f32.mrb[13].mxu1 }
 0x22f   :  { %1010 = vst [vmem:[%s1731_s7 + $0x20] sm:$0xff] %v1122_v46  ;;  %v1123_v51 = vpack.c.bf16 %v953_v47, %v952_v45  ;;  %v912_v52 = vmul.f32 %v1660_v39, %v881_v50  ;;  %v883_v35 = vpop.f32.mrb[14].mxu1 }
 0x230   :  { %v938_v36 = vadd.f32 %v1663_v53, %v911_v49  ;;  %v913_v54 = vmul.f32 %v1657_v37, %v883_v35  ;;  %v885_v56 = vpop.f32.mrb[15].mxu1 }
 0x231   :  { %1011 = vst [vmem:[%s1731_s7 + $0x28] sm:$0xff] %v1123_v51  ;;  %v939_v57 = vadd.f32 %v1666_v55, %v912_v52  ;;  %v914_v58 = vmul.f32 %v1660_v39, %v885_v56 }
 0x232   :  { %v954_v59 = vmax.f32 %v938_v36, 0.0  ;;  %v940_v60 = vadd.f32 %v1663_v53, %v913_v54 }
 0x233   :  { %v955_v61 = vmax.f32 %v939_v57, 0.0  ;;  %v941_v62 = vadd.f32 %v1666_v55, %v914_v58 }
 0x234   :  { %v956_v63 = vmax.f32 %v940_v60, 0.0 }
 0x235   :  { %v1124_v31 = vpack.c.bf16 %v955_v61, %v954_v59  ;;  %v957_v0 = vmax.f32 %v941_v62, 0.0 }
 0x237   :  { %1012 = vst [vmem:[%s1731_s7 + $0x30] sm:$0xff] %v1124_v31  ;;  %v1125_v37 = vpack.c.bf16 %v957_v0, %v956_v63 }
 0x239   :  { %1013 = vst [vmem:[%s1731_s7 + $0x38] sm:$0xff] %v1125_v37 }

// kernel: pointnet2_seg_forward.10
= control target key start
LH: loop header
LB: loop body
LE: loop exit
PB: predicated region body
PF: predicated region fallthrough
CT: control target
= control target key end

     0   :  { %vm341_vm0 = vcmask 523264   ;;  %s1616_s1 = inlined_call_operand.vmem [shape: bf16[320,128], index: 1, kind: input, shape index: {}]   ;;  %s1617_s0 = inlined_call_operand.vmem [shape: bf16[128,320], index: 0, kind: input, shape index: {}]   ;;  %s1618_s4 = inlined_call_operand.vmem [shape: bf16[128,128], index: 4, kind: input, shape index: {}]   ;;  %s1619_s2 = inlined_call_operand.vmem [shape: f32[1,128], index: 2, kind: input, shape index: {}]   ;;  %s1620_s3 = inlined_call_operand.vmem [shape: f32[1,128], index: 3, kind: input, shape index: {}]   ;;  %s1621_s5 = inlined_call_operand.vmem [shape: f32[1,128], index: 5, kind: input, shape index: {}]   ;;  %s1622_s6 = inlined_call_operand.vmem [shape: f32[1,128], index: 6, kind: input, shape index: {}]   ;;  %s1623_s7 = inlined_call_operand.vmem [shape: bf16[128,128], index: 7, kind: output, shape index: {}]  }
   0x1   :  { %v1226_v0 = vld [vmem:[%s1616_s1 + $0x40] sm:$0xff]   ;;  %v1228_v2 = vld [vmem:[%s1616_s1 + $0x48] sm:$0xff]   ;;  %v1230_v4 = vld [vmem:[%s1616_s1 + $0x50] sm:$0xff]  }
   0x2   :  { %v1227_v1 = vld [vmem:[%s1616_s1] sm:$0xff]   ;;  %1078 = vmatprep.subr.bf16.mxu0 %v1226_v0  ;;  %v1229_v3 = vld [vmem:[%s1616_s1 + $0x8] sm:$0xff]   ;;  %v1231_v5 = vld [vmem:[%s1616_s1 + $0x10] sm:$0xff]  }
   0x3   :  { %1079 = vmatpush3.bf16.msra.mxu0 %v1227_v1  ;;  %v1232_v6 = vld [vmem:[%s1616_s1 + $0x58] sm:$0xff]   ;;  %v1236_v7 = vld [vmem:[%s1616_s1 + $0x80] sm:$0xff]   ;;  %v1239_v10 = vld [vmem:[%s1616_s1 + $0x88] sm:$0xff]  }
   0x4   :  { %1080 = vmatprep.subr.bf16.mxu0 %v1228_v2  ;;  %v1233_v8 = vld [vmem:[%s1616_s1 + $0x18] sm:$0xff]   ;;  %v1234_v9 = vld [vmem:[%s1616_s1 + $0x60] sm:$0xff]   ;;  %1170 = vmatprep.subr.bf16.mxu1 %v1236_v7  ;;  %v1237_v12 = vld [vmem:[%s1616_s1 + $0x68] sm:$0xff]  }
   0x5   :  { %1171 = vmatpush3.bf16.msra.mxu1 %v1236_v7  ;;  %v1235_v11 = vld [vmem:[%s1616_s1 + $0x20] sm:$0xff]   ;;  %v1242_v13 = vld [vmem:[%s1616_s1 + $0x90] sm:$0xff]   ;;  %v1238_v14 = vld [vmem:[%s1616_s1 + $0x28] sm:$0xff]  }
   0x6   :  { %1172 = vmatprep.subr.bf16.mxu1 %v1239_v10  ;;  %v1245_v15 = vld [vmem:[%s1616_s1 + $0x98] sm:$0xff]   ;;  %v1240_v16 = vld [vmem:[%s1616_s1 + $0x70] sm:$0xff]   ;;  %v1250_v21 = vld [vmem:[%s1617_s0 + $0x20] ss:$12 sps:$4 sm:$0xff]  }
   0x7   :  { %1081 = vmatpush3.bf16.msra.mxu0 %v1229_v3  ;;  %v1248_v17 = vld [vmem:[%s1617_s0 + $0x4] ss:$12 sps:$4 sm:$0xff]   ;;  %v1249_v18 = vld [vmem:[%s1617_s0 + $0x8] ss:$12 sps:$4 sm:$0xff]   ;;  %v1243_v20 = vld [vmem:[%s1616_s1 + $0x78] sm:$0xff]  }
   0x8   :  { %1082 = vmatprep.subr.bf16.mxu0 %v1230_v4  ;;  %v1241_v19 = vld [vmem:[%s1616_s1 + $0x30] sm:$0xff]   ;;  %398 = vmatprep.mubr.bf16.mxu0 %v1248_v17  ;;  %v1257_v22 = vld [vmem:[%s1617_s0 + $0x38] ss:$12 sps:$4 sm:$0xff]   ;;  %v1246_v24 = vld [vmem:[%s1617_s0] ss:$12 sps:$4 sm:$0xff]  }
   0x9   :  { %1173 = vmatpush3.bf16.msra.mxu1 %v1239_v10  ;;  %1178 = vmatprep.mubr.msk.bf16.mxu1 %vm341_vm0, %v1249_v18  ;;  %v1244_v23 = vld [vmem:[%s1616_s1 + $0x38] sm:$0xff]   ;;  %v1265_v27 = vld [vmem:[%s1617_s0 + $0x68] ss:$12 sps:$4 sm:$0xff]   ;;  %v1266_v30 = vld [vmem:[%s1617_s0 + $0x80] ss:$12 sps:$4 sm:$0xff]  }
   0xa   :  { %1174 = vmatprep.subr.bf16.mxu1 %v1242_v13  ;;  %v1251_v25 = vld [vmem:[%s1617_s0 + $0x1c] ss:$12 sps:$4 sm:$0xff]   ;;  %v1253_v28 = vld [vmem:[%s1617_s0 + $0x18] ss:$12 sps:$4 sm:$0xff]   ;;  %v1254_v29 = vld [vmem:[%s1617_s0 + $0x34] ss:$12 sps:$4 sm:$0xff]  }
   0xb   :  { %1083 = vmatpush3.bf16.msra.mxu0 %v1231_v5  ;;  %v1258_v26 = vld [vmem:[%s1617_s0 + $0x50] ss:$12 sps:$4 sm:$0xff]   ;;  %v1273_v31 = vld [vmem:[%s1617_s0 + $0x98] ss:$12 sps:$4 sm:$0xff]   ;;  %v1279_v33 = vld [vmem:[%s1618_s4 + $0x8] sm:$0xff]  }
   0xc   :  { %1084 = vmatprep.subr.bf16.mxu0 %v1232_v6  ;;  %v1278_v32 = vld [vmem:[%s1618_s4] sm:$0xff]   ;;  %v1256_v34 = vld [vmem:[%s1617_s0 + $0x30] ss:$12 sps:$4 sm:$0xff]   ;;  %v1259_v35 = vld [vmem:[%s1617_s0 + $0x4c] ss:$12 sps:$4 sm:$0xff]  }
   0xd   :  { %1175 = vmatpush3.bf16.msra.mxu1 %v1242_v13  ;;  %v1274_v36 = vld [vmem:[%s1617_s0 + $0xb0] ss:$12 sps:$4 sm:$0xff]   ;;  %v1261_v37 = vld [vmem:[%s1617_s0 + $0x48] ss:$12 sps:$4 sm:$0xff]   ;;  %v1264_v39 = vld [vmem:[%s1617_s0 + $0x60] ss:$12 sps:$4 sm:$0xff]  }
   0xe   :  { %1176 = vmatprep.subr.bf16.mxu1 %v1245_v15  ;;  %v1262_v38 = vld [vmem:[%s1617_s0 + $0x64] ss:$12 sps:$4 sm:$0xff]   ;;  %v1267_v40 = vld [vmem:[%s1617_s0 + $0x7c] ss:$12 sps:$4 sm:$0xff]   ;;  %v1270_v42 = vld [vmem:[%s1617_s0 + $0x94] ss:$12 sps:$4 sm:$0xff]  }
   0xf   :  { %1085 = vmatpush3.bf16.msra.mxu0 %v1233_v8  ;;  %v1269_v41 = vld [vmem:[%s1617_s0 + $0x78] ss:$12 sps:$4 sm:$0xff]   ;;  %v1272_v43 = vld [vmem:[%s1617_s0 + $0x90] ss:$12 sps:$4 sm:$0xff]   ;;  %v1277_v45 = vld [vmem:[%s1617_s0 + $0xa8] ss:$12 sps:$4 sm:$0xff]  }
  0x10   :  { %1086 = vmatprep.subr.bf16.mxu0 %v1234_v9  ;;  %v1275_v44 = vld [vmem:[%s1617_s0 + $0xac] ss:$12 sps:$4 sm:$0xff]   ;;  %v1280_v46 = vld [vmem:[%s1618_s4 + $0x10] sm:$0xff]   ;;  %v1282_v48 = vld [vmem:[%s1618_s4 + $0x20] sm:$0xff]  }
  0x11   :  { %1177 = vmatpush3.bf16.msra.mxu1 %v1245_v15  ;;  %v1281_v47 = vld [vmem:[%s1618_s4 + $0x18] sm:$0xff]   ;;  %v1283_v49 = vld [vmem:[%s1618_s4 + $0x28] sm:$0xff]   ;;  %v1284_v50 = vld [vmem:[%s1618_s4 + $0x30] sm:$0xff]  }
  0x12   :  { %1194 = vmatprep.subr.bf16.mxu1 %v1278_v32  ;;  %v1285_v51 = vld [vmem:[%s1618_s4 + $0x38] sm:$0xff]   ;;  %v1493_v62 = vld [vmem:[%s1619_s2] ss:$0 sm:$0xff] }
  0x13   :  { %1087 = vmatpush3.bf16.msra.mxu0 %v1235_v11  ;;  %v1498_v3 = vld [vmem:[%s1620_s3] ss:$0 sm:$0xff] }
  0x14   :  { %1088 = vmatprep.subr.bf16.mxu0 %v1237_v12  ;;  %1179 = vmatmul.mubr.msk.bf16.vlgmr.msra.gmra.mrb[0].mxu1 %vm341_vm0, %v1250_v21 }
  0x15   :  { %1182 = vmatprep.mubr.msk.bf16.mxu1 %vm341_vm0, %v1257_v22  ;;  %1195 = vmatpush3.bf16.msra.mxu1 %v1278_v32 }
  0x16   :  { %1196 = vmatprep.subr.bf16.mxu1 %v1279_v33 }
  0x17   :  { %1089 = vmatpush3.bf16.msra.mxu0 %v1238_v14 }
  0x18   :  { %1090 = vmatprep.subr.bf16.mxu0 %v1240_v16 }
  0x19   :  { %1197 = vmatpush3.bf16.msra.mxu1 %v1279_v33 }
  0x1a   :  { %1198 = vmatprep.subr.bf16.mxu1 %v1280_v46 }
  0x1b   :  { %1091 = vmatpush3.bf16.msra.mxu0 %v1241_v19 }
  0x1c   :  { %1092 = vmatprep.subr.bf16.mxu0 %v1243_v20  ;;  %1183 = vmatmul.mubr.msk.bf16.gmra.mrb[4].mxu1 %vm341_vm0, %v1258_v26 }
  0x1d   :  { %1186 = vmatprep.mubr.msk.bf16.mxu1 %vm341_vm0, %v1265_v27  ;;  %1199 = vmatpush3.bf16.msra.mxu1 %v1280_v46 }
  0x1e   :  { %1200 = vmatprep.subr.bf16.mxu1 %v1281_v47 }
  0x1f   :  { %1093 = vmatpush3.bf16.msra.mxu0 %v1244_v23 }
  0x21   :  { %1201 = vmatpush3.bf16.msra.mxu1 %v1281_v47 }
  0x22   :  { %399 = vmatmul.mubr.bf16.vlgmr.msra.gmra.mrb[0].mxu0 %v1246_v24  ;;  %1202 = vmatprep.subr.bf16.mxu1 %v1282_v48 }
  0x23   :  { %406 = vmatprep.mubr.bf16.mxu0 %v1251_v25 }
  0x24   :  { %1187 = vmatmul.mubr.msk.bf16.gmra.mrb[8].mxu1 %vm341_vm0, %v1266_v30 }
  0x25   :  { %1190 = vmatprep.mubr.msk.bf16.mxu1 %vm341_vm0, %v1273_v31  ;;  %1203 = vmatpush3.bf16.msra.mxu1 %v1282_v48 }
  0x26   :  { %1204 = vmatprep.subr.bf16.mxu1 %v1283_v49 }
  0x29   :  { %1205 = vmatpush3.bf16.msra.mxu1 %v1283_v49 }
  0x2a   :  { %407 = vmatmul.mubr.bf16.gmra.mrb[4].mxu0 %v1253_v28  ;;  %1206 = vmatprep.subr.bf16.mxu1 %v1284_v50 }
  0x2b   :  { %414 = vmatprep.mubr.bf16.mxu0 %v1254_v29 }
  0x2c   :  { %1191 = vmatmul.mubr.msk.bf16.gmra.mrb[12].mxu1 %vm341_vm0, %v1274_v36 }
  0x2d   :  { %1207 = vmatpush3.bf16.msra.mxu1 %v1284_v50 }
  0x2e   :  { %1208 = vmatprep.subr.bf16.mxu1 %v1285_v51 }
  0x31   :  { %1209 = vmatpush3.bf16.msra.mxu1 %v1285_v51 }
  0x32   :  { %415 = vmatmul.mubr.bf16.gmra.mrb[8].mxu0 %v1256_v34 }
  0x33   :  { %422 = vmatprep.mubr.bf16.mxu0 %v1259_v35 }
  0x3a   :  { %423 = vmatmul.mubr.bf16.gmra.mrb[12].mxu0 %v1261_v37 }
  0x3b   :  { %430 = vmatprep.mubr.bf16.mxu0 %v1262_v38 }
  0x42   :  { %431 = vmatmul.mubr.bf16.gmra.mrb[16].mxu0 %v1264_v39 }
  0x43   :  { %438 = vmatprep.mubr.bf16.mxu0 %v1267_v40 }
  0x4a   :  { %439 = vmatmul.mubr.bf16.gmra.mrb[20].mxu0 %v1269_v41 }
  0x4b   :  { %446 = vmatprep.mubr.bf16.mxu0 %v1270_v42 }
  0x52   :  { %447 = vmatmul.mubr.bf16.gmra.mrb[24].mxu0 %v1272_v43 }
  0x53   :  { %454 = vmatprep.mubr.bf16.mxu0 %v1275_v44 }
  0x5a   :  { %455 = vmatmul.mubr.bf16.gmra.mrb[28].mxu0 %v1277_v45 }
  0xe7   :  { %v1180_v52 = vpop.f32.mrb[0].mxu1 }
  0xe8   :  { %v497_v53 = vpop.f32.mrb[1].mxu1 }
  0xe9   :  { %v1181_v54 = vpop.f32.mrb[2].mxu1 }
  0xea   :  { %v500_v55 = vpop.f32.mrb[3].mxu1 }
  0xef   :  { %v1184_v60 = vpop.f32.mrb[4].mxu1 }
  0xf0   :  { %v513_v63 = vpop.f32.mrb[5].mxu1 }
  0xf1   :  { %v1185_v2 = vpop.f32.mrb[6].mxu1 }
  0xf2   :  { %v516_v4 = vpop.f32.mrb[7].mxu1 }
  0xf5   :  { %v1094_v56 = vpop.f32.mrb[0].mxu0 }
  0xf6   :  { %v1095_v57 = vpop.f32.mrb[1].mxu0 }
  0xf7   :  { %v1096_v58 = vadd.f32 %v1095_v57, %v1094_v56  ;;  %v1097_v59 = vpop.f32.mrb[2].mxu0  ;;  %v1504_v14 = vpop.f32.mrb[8].mxu1 }
  0xf8   :  { %v1098_v61 = vpop.f32.mrb[3].mxu0  ;;  %v529_v16 = vpop.f32.mrb[9].mxu1 }
  0xf9   :  { %v1099_v0 = vadd.f32 %v1098_v61, %v1097_v59  ;;  %v498_v1 = vadd.f32 %v1096_v58, %v497_v53  ;;  %v1506_v21 = vpop.f32.mrb[10].mxu1 }
  0xfa   :  { %v532_v22 = vpop.f32.mrb[11].mxu1 }
  0xfb   :  { %v566_v5 = vmul.f32 %v1493_v62, %v498_v1  ;;  %v501_v6 = vadd.f32 %v1099_v0, %v500_v55 }
  0xfd   :  { %v588_v7 = vadd.f32 %v1498_v3, %v566_v5  ;;  %v567_v8 = vmul.f32 %v1493_v62, %v501_v6  ;;  %v1100_v9 = vpop.f32.mrb[4].mxu0 }
  0xfe   :  { %v1101_v10 = vpop.f32.mrb[5].mxu0 }
  0xff   :  { %v589_v11 = vadd.f32 %v1498_v3, %v567_v8  ;;  %v1102_v12 = vadd.f32 %v1101_v10, %v1100_v9  ;;  %v1103_v13 = vpop.f32.mrb[6].mxu0  ;;  %v604_v17 = vmax.f32 %v588_v7, 0.0  ;;  %v1512_v33 = vpop.f32.mrb[12].mxu1 }
 0x100   :  { %v1104_v15 = vpop.f32.mrb[7].mxu0  ;;  %v1514_v35 = vpop.f32.mrb[13].mxu1 }
 0x101   :  { %v605_v18 = vmax.f32 %v589_v11, 0.0  ;;  %v506_v19 = vadd.f32 %v1180_v52, %v1102_v12  ;;  %v1105_v20 = vadd.f32 %v1104_v15, %v1103_v13  ;;  %v1516_v40 = vpop.f32.mrb[14].mxu1 }
 0x102   :  { %v1518_v41 = vpop.f32.mrb[15].mxu1 }
 0x103   :  { %v568_v23 = vmul.f32 %v1493_v62, %v506_v19  ;;  %v509_v24 = vadd.f32 %v1181_v54, %v1105_v20  ;;  %v620_v25 = vpack.c.bf16 %v605_v18, %v604_v17 }
 0x105   :  { %v590_v26 = vadd.f32 %v1498_v3, %v568_v23  ;;  %v569_v27 = vmul.f32 %v1493_v62, %v509_v24  ;;  %v1106_v28 = vpop.f32.mrb[8].mxu0  ;;  %1210 = vmatprep.mubr.bf16.mxu1 %v620_v25 }
 0x106   :  { %v1107_v29 = vpop.f32.mrb[9].mxu0 }
 0x107   :  { %v591_v30 = vadd.f32 %v1498_v3, %v569_v27  ;;  %v1108_v31 = vadd.f32 %v1107_v29, %v1106_v28  ;;  %v1109_v32 = vpop.f32.mrb[10].mxu0  ;;  %v606_v36 = vmax.f32 %v590_v26, 0.0 }
 0x108   :  { %v1110_v34 = vpop.f32.mrb[11].mxu0 }
 0x109   :  { %v607_v37 = vmax.f32 %v591_v30, 0.0  ;;  %v1111_v38 = vadd.f32 %v1110_v34, %v1109_v32  ;;  %v514_v39 = vadd.f32 %v1108_v31, %v513_v63 }
 0x10b   :  { %v621_v42 = vpack.c.bf16 %v607_v37, %v606_v36  ;;  %v570_v43 = vmul.f32 %v1493_v62, %v514_v39  ;;  %v517_v44 = vadd.f32 %v1111_v38, %v516_v4 }
 0x10d   :  { %v592_v45 = vadd.f32 %v1498_v3, %v570_v43  ;;  %v571_v46 = vmul.f32 %v1493_v62, %v517_v44  ;;  %v1112_v47 = vpop.f32.mrb[12].mxu0  ;;  %1211 = vmatmul.mubr.bf16.vlgmr.msra.gmra.mrb[16].mxu1 %v621_v42 }
 0x10e   :  { %v1113_v48 = vpop.f32.mrb[13].mxu0 }
 0x10f   :  { %v593_v49 = vadd.f32 %v1498_v3, %v571_v46  ;;  %v1114_v50 = vadd.f32 %v1113_v48, %v1112_v47  ;;  %v1115_v51 = vpop.f32.mrb[14].mxu0  ;;  %v608_v53 = vmax.f32 %v592_v45, 0.0 }
 0x110   :  { %v1116_v52 = vpop.f32.mrb[15].mxu0 }
 0x111   :  { %v609_v54 = vmax.f32 %v593_v49, 0.0  ;;  %v522_v55 = vadd.f32 %v1184_v60, %v1114_v50  ;;  %v1117_v56 = vadd.f32 %v1116_v52, %v1115_v51 }
 0x113   :  { %v572_v57 = vmul.f32 %v1493_v62, %v522_v55  ;;  %v525_v58 = vadd.f32 %v1185_v2, %v1117_v56  ;;  %v622_v59 = vpack.c.bf16 %v609_v54, %v608_v53 }
 0x115   :  { %v573_v61 = vmul.f32 %v1493_v62, %v525_v58  ;;  %v1118_v63 = vpop.f32.mrb[16].mxu0  ;;  %1214 = vmatprep.mubr.bf16.mxu1 %v622_v59  ;;  %v594_v0 = vadd.f32 %v1498_v3, %v572_v57 }
 0x116   :  { %v1119_v1 = vpop.f32.mrb[17].mxu0 }
 0x117   :  { %v1120_v4 = vadd.f32 %v1119_v1, %v1118_v63  ;;  %v1121_v5 = vpop.f32.mrb[18].mxu0  ;;  %v595_v6 = vadd.f32 %v1498_v3, %v573_v61  ;;  %v610_v60 = vmax.f32 %v594_v0, 0.0 }
 0x118   :  { %v1122_v7 = vpop.f32.mrb[19].mxu0 }
 0x119   :  { %v1123_v8 = vadd.f32 %v1122_v7, %v1121_v5  ;;  %v530_v9 = vadd.f32 %v1120_v4, %v529_v16  ;;  %v611_v10 = vmax.f32 %v595_v6, 0.0 }
 0x11b   :  { %v574_v11 = vmul.f32 %v1493_v62, %v530_v9  ;;  %v533_v2 = vadd.f32 %v1123_v8, %v532_v22  ;;  %v623_v12 = vpack.c.bf16 %v611_v10, %v610_v60 }
 0x11d   :  { %v596_v13 = vadd.f32 %v1498_v3, %v574_v11  ;;  %v575_v15 = vmul.f32 %v1493_v62, %v533_v2  ;;  %v1124_v17 = vpop.f32.mrb[20].mxu0  ;;  %1215 = vmatmul.mubr.bf16.gmra.mrb[20].mxu1 %v623_v12 }
 0x11e   :  { %v1125_v18 = vpop.f32.mrb[21].mxu0 }
 0x11f   :  { %v597_v19 = vadd.f32 %v1498_v3, %v575_v15  ;;  %v1126_v20 = vadd.f32 %v1125_v18, %v1124_v17  ;;  %v1127_v23 = vpop.f32.mrb[22].mxu0  ;;  %v612_v25 = vmax.f32 %v596_v13, 0.0 }
 0x120   :  { %v1128_v24 = vpop.f32.mrb[23].mxu0 }
 0x121   :  { %v613_v16 = vmax.f32 %v597_v19, 0.0  ;;  %v538_v26 = vadd.f32 %v1504_v14, %v1126_v20  ;;  %v1129_v27 = vadd.f32 %v1128_v24, %v1127_v23 }
 0x123   :  { %v576_v22 = vmul.f32 %v1493_v62, %v538_v26  ;;  %v541_v28 = vadd.f32 %v1506_v21, %v1129_v27  ;;  %v624_v29 = vpack.c.bf16 %v613_v16, %v612_v25 }
 0x125   :  { %v577_v30 = vmul.f32 %v1493_v62, %v541_v28  ;;  %v1130_v31 = vpop.f32.mrb[24].mxu0  ;;  %1218 = vmatprep.mubr.bf16.mxu1 %v624_v29  ;;  %v598_v32 = vadd.f32 %v1498_v3, %v576_v22 }
 0x126   :  { %v1131_v34 = vpop.f32.mrb[25].mxu0 }
 0x127   :  { %v1132_v36 = vadd.f32 %v1131_v34, %v1130_v31  ;;  %v1133_v37 = vpop.f32.mrb[26].mxu0  ;;  %v599_v38 = vadd.f32 %v1498_v3, %v577_v30  ;;  %v614_v43 = vmax.f32 %v598_v32, 0.0 }
 0x128   :  { %v1134_v39 = vpop.f32.mrb[27].mxu0 }
 0x129   :  { %v1135_v42 = vadd.f32 %v1134_v39, %v1133_v37  ;;  %v546_v14 = vadd.f32 %v1132_v36, %v1514_v35  ;;  %v615_v44 = vmax.f32 %v599_v38, 0.0 }
 0x12b   :  { %v578_v21 = vmul.f32 %v1493_v62, %v546_v14  ;;  %v549_v45 = vadd.f32 %v1135_v42, %v1518_v41  ;;  %v625_v46 = vpack.c.bf16 %v615_v44, %v614_v43 }
 0x12d   :  { %v600_v47 = vadd.f32 %v1498_v3, %v578_v21  ;;  %v579_v48 = vmul.f32 %v1493_v62, %v549_v45  ;;  %v1136_v49 = vpop.f32.mrb[28].mxu0  ;;  %1219 = vmatmul.mubr.bf16.gmra.mrb[24].mxu1 %v625_v46 }
 0x12e   :  { %v1137_v50 = vpop.f32.mrb[29].mxu0 }
 0x12f   :  { %v601_v51 = vadd.f32 %v1498_v3, %v579_v48  ;;  %v1138_v52 = vadd.f32 %v1137_v50, %v1136_v49  ;;  %v1139_v53 = vpop.f32.mrb[30].mxu0  ;;  %v616_v35 = vmax.f32 %v600_v47, 0.0 }
 0x130   :  { %v1140_v54 = vpop.f32.mrb[31].mxu0 }
 0x131   :  { %v617_v55 = vmax.f32 %v601_v51, 0.0  ;;  %v554_v56 = vadd.f32 %v1512_v33, %v1138_v52  ;;  %v1141_v57 = vadd.f32 %v1140_v54, %v1139_v53  ;;  %v1553_v33 = vld [vmem:[%s1621_s5] ss:$0 sm:$0xff] }
 0x133   :  { %v580_v41 = vmul.f32 %v1493_v62, %v554_v56  ;;  %v557_v58 = vadd.f32 %v1516_v40, %v1141_v57  ;;  %v626_v59 = vpack.c.bf16 %v617_v55, %v616_v35  ;;  %v1558_v40 = vld [vmem:[%s1622_s6] ss:$0 sm:$0xff] }
 0x135   :  { %v581_v61 = vmul.f32 %v1493_v62, %v557_v58  ;;  %1222 = vmatprep.mubr.bf16.mxu1 %v626_v59  ;;  %v602_v63 = vadd.f32 %v1498_v3, %v580_v41 }
 0x137   :  { %v603_v0 = vadd.f32 %v1498_v3, %v581_v61  ;;  %v618_v1 = vmax.f32 %v602_v63, 0.0 }
 0x139   :  { %v619_v4 = vmax.f32 %v603_v0, 0.0 }
 0x13b   :  { %v627_v5 = vpack.c.bf16 %v619_v4, %v618_v1 }
 0x13d   :  { %1223 = vmatmul.mubr.bf16.gmra.mrb[28].mxu1 %v627_v5 }
 0x1e0   :  { %v1212_v62 = vpop.f32.mrb[16].mxu1 }
 0x1e1   :  { %v799_v6 = vmul.f32 %v1212_v62, %v1553_v33  ;;  %v728_v7 = vpop.f32.mrb[17].mxu1 }
 0x1e2   :  { %v797_v3 = vmul.f32 %v1553_v33, %v728_v7  ;;  %v1213_v8 = vpop.f32.mrb[18].mxu1 }
 0x1e3   :  { %v821_v9 = vadd.f32 %v1558_v40, %v799_v6  ;;  %v800_v60 = vmul.f32 %v1213_v8, %v1553_v33  ;;  %v731_v10 = vpop.f32.mrb[19].mxu1 }
 0x1e4   :  { %v819_v11 = vadd.f32 %v1558_v40, %v797_v3  ;;  %v798_v2 = vmul.f32 %v1553_v33, %v731_v10 }
 0x1e5   :  { %v822_v12 = vadd.f32 %v1558_v40, %v800_v60  ;;  %v837_v15 = vmax.f32 %v821_v9, 0.0 }
 0x1e6   :  { %v820_v13 = vadd.f32 %v1558_v40, %v798_v2  ;;  %v835_v18 = vmax.f32 %v819_v11, 0.0 }
 0x1e7   :  { %v838_v17 = vmax.f32 %v822_v12, 0.0 }
 0x1e8   :  { %v836_v19 = vmax.f32 %v820_v13, 0.0 }
 0x1e9   :  { %v1039_v20 = vpack.c.bf16 %v838_v17, %v837_v15 }
 0x1ea   :  { %v1034_v23 = vpack.c.bf16 %v836_v19, %v835_v18 }
 0x1eb   :  { %1071 = vst [vmem:[%s1623_s7 + $0x8] sm:$0xff] %v1039_v20  }
 0x1ec   :  { %1035 = vst [vmem:[%s1623_s7] sm:$0xff] %v1034_v23  }
 0x1f0   :  { %v1216_v24 = vpop.f32.mrb[20].mxu1 }
 0x1f1   :  { %v803_v25 = vmul.f32 %v1216_v24, %v1553_v33  ;;  %v744_v16 = vpop.f32.mrb[21].mxu1 }
 0x1f2   :  { %v801_v26 = vmul.f32 %v1553_v33, %v744_v16  ;;  %v1217_v27 = vpop.f32.mrb[22].mxu1 }
 0x1f3   :  { %v825_v22 = vadd.f32 %v1558_v40, %v803_v25  ;;  %v804_v28 = vmul.f32 %v1217_v27, %v1553_v33  ;;  %v747_v29 = vpop.f32.mrb[23].mxu1 }
 0x1f4   :  { %v823_v30 = vadd.f32 %v1558_v40, %v801_v26  ;;  %v802_v31 = vmul.f32 %v1553_v33, %v747_v29 }
 0x1f5   :  { %v826_v32 = vadd.f32 %v1558_v40, %v804_v28  ;;  %v841_v36 = vmax.f32 %v825_v22, 0.0 }
 0x1f6   :  { %v824_v34 = vadd.f32 %v1558_v40, %v802_v31  ;;  %v839_v38 = vmax.f32 %v823_v30, 0.0 }
 0x1f7   :  { %v842_v37 = vmax.f32 %v826_v32, 0.0 }
 0x1f8   :  { %v840_v39 = vmax.f32 %v824_v34, 0.0 }
 0x1f9   :  { %v1049_v42 = vpack.c.bf16 %v842_v37, %v841_v36 }
 0x1fa   :  { %v1044_v14 = vpack.c.bf16 %v840_v39, %v839_v38 }
 0x1fb   :  { %1073 = vst [vmem:[%s1623_s7 + $0x18] sm:$0xff] %v1049_v42  }
 0x1fc   :  { %1072 = vst [vmem:[%s1623_s7 + $0x10] sm:$0xff] %v1044_v14  }
 0x200   :  { %v1220_v43 = vpop.f32.mrb[24].mxu1 }
 0x201   :  { %v807_v44 = vmul.f32 %v1220_v43, %v1553_v33  ;;  %v760_v21 = vpop.f32.mrb[25].mxu1 }
 0x202   :  { %v805_v45 = vmul.f32 %v1553_v33, %v760_v21  ;;  %v1221_v46 = vpop.f32.mrb[26].mxu1 }
 0x203   :  { %v829_v47 = vadd.f32 %v1558_v40, %v807_v44  ;;  %v808_v48 = vmul.f32 %v1221_v46, %v1553_v33  ;;  %v763_v49 = vpop.f32.mrb[27].mxu1 }
 0x204   :  { %v827_v50 = vadd.f32 %v1558_v40, %v805_v45  ;;  %v806_v51 = vmul.f32 %v1553_v33, %v763_v49 }
 0x205   :  { %v830_v52 = vadd.f32 %v1558_v40, %v808_v48  ;;  %v845_v54 = vmax.f32 %v829_v47, 0.0 }
 0x206   :  { %v828_v53 = vadd.f32 %v1558_v40, %v806_v51  ;;  %v843_v55 = vmax.f32 %v827_v50, 0.0 }
 0x207   :  { %v846_v35 = vmax.f32 %v830_v52, 0.0 }
 0x208   :  { %v844_v56 = vmax.f32 %v828_v53, 0.0 }
 0x209   :  { %v1059_v57 = vpack.c.bf16 %v846_v35, %v845_v54 }
 0x20a   :  { %v1054_v41 = vpack.c.bf16 %v844_v56, %v843_v55 }
 0x20b   :  { %1075 = vst [vmem:[%s1623_s7 + $0x28] sm:$0xff] %v1059_v57  }
 0x20c   :  { %1074 = vst [vmem:[%s1623_s7 + $0x20] sm:$0xff] %v1054_v41  }
 0x210   :  { %v1224_v58 = vpop.f32.mrb[28].mxu1 }
 0x211   :  { %v811_v59 = vmul.f32 %v1224_v58, %v1553_v33  ;;  %v776_v61 = vpop.f32.mrb[29].mxu1 }
 0x212   :  { %v809_v63 = vmul.f32 %v1553_v33, %v776_v61  ;;  %v1225_v0 = vpop.f32.mrb[30].mxu1 }
 0x213   :  { %v833_v1 = vadd.f32 %v1558_v40, %v811_v59  ;;  %v812_v4 = vmul.f32 %v1225_v0, %v1553_v33  ;;  %v779_v5 = vpop.f32.mrb[31].mxu1 }
 0x214   :  { %v831_v62 = vadd.f32 %v1558_v40, %v809_v63  ;;  %v810_v6 = vmul.f32 %v1553_v33, %v779_v5 }
 0x215   :  { %v834_v7 = vadd.f32 %v1558_v40, %v812_v4  ;;  %v849_v8 = vmax.f32 %v833_v1, 0.0 }
 0x216   :  { %v832_v3 = vadd.f32 %v1558_v40, %v810_v6  ;;  %v847_v60 = vmax.f32 %v831_v62, 0.0 }
 0x217   :  { %v850_v9 = vmax.f32 %v834_v7, 0.0 }
 0x218   :  { %v848_v10 = vmax.f32 %v832_v3, 0.0 }
 0x219   :  { %v1069_v11 = vpack.c.bf16 %v850_v9, %v849_v8 }
 0x21a   :  { %v1064_v2 = vpack.c.bf16 %v848_v10, %v847_v60 }
 0x21b   :  { %1077 = vst [vmem:[%s1623_s7 + $0x38] sm:$0xff] %v1069_v11  }
 0x21c   :  { %1076 = vst [vmem:[%s1623_s7 + $0x30] sm:$0xff] %v1064_v2  }

// kernel: pointnet2_seg_forward.11
= control target key start
LH: loop header
LB: loop body
LE: loop exit
PB: predicated region body
PF: predicated region fallthrough
CT: control target
= control target key end

     0   :  { %s4046_s0 = inlined_call_operand.vmem [shape: bf16[256,131], index: 0, kind: input, shape index: {}]   ;;  %s4047_s1 = inlined_call_operand.vmem [shape: bf16[131,64], index: 1, kind: input, shape index: {}]   ;;  %s4048_s2 = inlined_call_operand.vmem [shape: f32[1,64], index: 2, kind: input, shape index: {}]   ;;  %s4049_s3 = inlined_call_operand.vmem [shape: f32[1,64], index: 3, kind: input, shape index: {}]   ;;  %s4050_s4 = inlined_call_operand.vmem [shape: bf16[64,64], index: 4, kind: input, shape index: {}]   ;;  %s4051_s5 = inlined_call_operand.vmem [shape: f32[1,64], index: 5, kind: input, shape index: {}]   ;;  %s4052_s6 = inlined_call_operand.vmem [shape: f32[1,64], index: 6, kind: input, shape index: {}]   ;;  %s4053_s7 = inlined_call_operand.vmem [shape: bf16[64,64], index: 7, kind: input, shape index: {}]   ;;  %s4054_s8 = inlined_call_operand.vmem [shape: f32[1,64], index: 8, kind: input, shape index: {}]   ;;  %s4055_s9 = inlined_call_operand.vmem [shape: f32[1,64], index: 9, kind: input, shape index: {}]   ;;  %s4056_s10 = inlined_call_operand.vmem [shape: bf16[64,128], index: 10, kind: input, shape index: {}]   ;;  %s4057_s11 = inlined_call_operand.vmem [shape: f32[1,128], index: 11, kind: input, shape index: {}]   ;;  %s4058_s12 = inlined_call_operand.vmem [shape: f32[1,128], index: 12, kind: input, shape index: {}]   ;;  %s4059_s13 = inlined_call_operand.vmem [shape: bf16[128,64], index: 13, kind: input, shape index: {}]   ;;  %s4060_s14 = inlined_call_operand.vmem [shape: f32[1,64], index: 14, kind: input, shape index: {}]   ;;  %s4061_s15 = inlined_call_operand.vmem [shape: f32[1,64], index: 15, kind: input, shape index: {}]   ;;  %s4062_s16 = inlined_call_operand.vmem [shape: bf16[64,64], index: 16, kind: input, shape index: {}]   ;;  %s4063_s17 = inlined_call_operand.vmem [shape: f32[1,64], index: 17, kind: input, shape index: {}]   ;;  %s4064_s18 = inlined_call_operand.vmem [shape: f32[1,64], index: 18, kind: input, shape index: {}]   ;;  %s4065_s19 = inlined_call_operand.vmem [shape: bf16[64,32], index: 19, kind: input, shape index: {}]   ;;  %s4066_s20 = inlined_call_operand.vmem [shape: f32[1,32], index: 20, kind: input, shape index: {}]   ;;  %s4067_s21 = inlined_call_operand.vmem [shape: f32[1,32], index: 21, kind: input, shape index: {}]   ;;  %s4068_s22 = inlined_call_operand.vmem [shape: bf16[32,1], index: 22, kind: input, shape index: {}]   ;;  %s4069_s23 = inlined_call_operand.<no memory space> [shape: f32[1,1], index: 23, kind: input, shape index: {}]   ;;  %s4070_s25 = inlined_call_operand.vmem [shape: f32[256,64], index: 25, kind: output, shape index: {0}]   ;;  %s4071_s26 = inlined_call_operand.hbm [shape: f32[1,256], index: 26, kind: output, shape index: {1}]   ;;  %s4072_s24 = inlined_call_operand.<no memory space> [shape: f32[1,1], index: 24, kind: input, shape index: {}]  }
   0x1   :  { %4085 = sst [smem:[#allocation12_spill]] %s4046_s0  ;;  %v32_v0 = vstv %s4069_s23  ;;  %v34_v1 = vstv %s4072_s24 }
   0x2   :  { %4086 = sst [smem:[#allocation13_spill]] %s4047_s1  ;;  %33 = vst [vmem:[#allocation2] sm:$0x1] %v32_v0  ;;  %35 = vst [vmem:[#allocation3] sm:$0x1] %v34_v1 }
   0x3   :  { %4087 = sst [smem:[#allocation14_spill]] %s4048_s2 }
   0x4   :  { %4088 = sst [smem:[#allocation15_spill]] %s4049_s3 }
   0x5   :  { %4089 = sst [smem:[#allocation16_spill]] %s4050_s4 }
   0x6   :  { %4090 = sst [smem:[#allocation17_spill]] %s4051_s5 }
   0x7   :  { %4091 = sst [smem:[#allocation18_spill]] %s4052_s6 }
   0x8   :  { %4092 = sst [smem:[#allocation19_spill]] %s4053_s7 }
   0x9   :  { %4093 = sst [smem:[#allocation20_spill]] %s4054_s8 }
   0xa   :  { %4094 = sst [smem:[#allocation21_spill]] %s4055_s9 }
   0xb   :  { %4095 = sst [smem:[#allocation22_spill]] %s4056_s10 }
   0xc   :  { %36 = vsyncpa [#allocation5], 0 }
   0xd   :  { %38 = vsyncpa [#allocation5 + $0x1], 0  ;;  %s3426_s8 = smov 0   ;;  %s3428_s4 = smov 0  }
   0xe   :  { %s3430_s29 = smov 0   ;;  %s3432_s0 = smov 0  }
   0xf LB: > { %4096 = sst [smem:[#allocation7_spill]] %s3268_s8  ;;  %s2726_s23 = sadd.s32 4294967295, %s3280_s0   ;;  %s3280_s0 = sphi %s3432_s0, %s4117_s0   ;;  %s3276_s29 = sphi %s3430_s29, %s4119_s29   ;;  %s3272_s4 = sphi %s3428_s4, %s4121_s4   ;;  %s3268_s8 = sphi %s3426_s8, %s4120_s8  }
  0x10   : > { %4097 = sst [smem:[#allocation8_spill]] %s3276_s29  ;;  %s2727_s24 = sadd.s32 4294967294, %s3280_s0  }
  0x11   : > { %s3449_s9 = sadd.s32 1, %s3280_s0   ;;  %s607_s30 = sadd.s32 1, %s3276_s29 }
  0x12   : > { %4098 = sst [smem:[#allocation9_spill]] %s3449_s9  ;;  %s604_s2 = ssub.s32 %s3280_s0, %s3449_s9 }
  0x13   : > { %p617_p0 = scmp.ne.s32.totalorder %s3276_s29, %s3272_s4  ;;  %p605_p1 = scmp.eq.s32.totalorder %s604_s2, 0 }
  0x14   : > { %p618_p2 = scmp.eq.s32.totalorder %s2726_s23, 1  ;;  %p623_p3 = scmp.ne.s32.totalorder %s3272_s4, %s3268_s8 }
  0x15   : > { %p624_p4 = scmp.eq.s32.totalorder %s2727_s24, 1  ;;  %p2730_p7 = scmp.ge.s32.totalorder %s3280_s0, 1 }
  0x16   : > { %s3459_s5 = scalar_select %p605_p1, %s3276_s29, %s607_s30  }
  0x17   : > { %p3461_p5 = por %p618_p2, %p617_p0  ;;  %p3465_p6 = por %p624_p4, %p623_p3 }
  0x18   : > { %4099 = sst [smem:[#allocation10_spill]] %s3459_s5  ;;  %p724_p8 = scmp.lt.s32.totalorder %s3280_s0, 3 }
  0x19   : > { %s4101_s6 = scalar_select %p3465_p6, 1, 0 }
  0x1a   : > { %p725_p9 = pnand %p2730_p7, %p724_p8 }
  0x1b   : > { %4102 = sst [smem:[#allocation11_spill]] %s4101_s6  ;;  %s4103_s3 = sld [smem:[#allocation13_spill]] (!%p725_p9)  ;;  %v3282_v3 = vmov (!%p725_p9), 0   ;;  %vm971_vm0 = vcmask (!%p725_p9), 23552   ;;  %vm996_vm1 = vcmask (!%p725_p9), 1040384   ;;  %vm997_vm2 = vcmask (!%p725_p9), 1041408  }
  0x1c   : > { %728 = sbr.rel (%p725_p9) target bundleno = 1841 (0x731), region = 120  ;;  %1003 = vmatprep.subr.bf16.mxu0 (!%p725_p9), %v3282_v3  ;;  %3141 = vset.pattern.permute.xlu0 (!%p725_p9), %v3282_v3  ;;  %s3480_s2 = sshll.u32 (!%p725_p9), %s2726_s23, 4  ;;  %v3283_v10 = vmov (!%p725_p9), 65535   ;;  %vm1202_vm3 = vcmask (!%p725_p9), 523264  }
  0x1d   : > { %3152 = vset.pattern.permute.xlu1 (!%p725_p9), %v3282_v3  ;;  %p800_p10 = scmp.lt.s32.totalorder (!%p725_p9), %s3480_s2, 31  ;;  %s4104_s23 = sld [smem:[#allocation12_spill]] (!%p725_p9)  ;;  %v998_v11 = vsel (!%p725_p9), %vm996_vm1, 4294967295, %v3283_v10 }
  0x1e   : > { %v999_v13 = vsel (!%p725_p9), %vm997_vm2, %v998_v11, 0  ;;  %s4105_s9 = sld [smem:[#allocation16_spill]] (!%p725_p9)  ;;  %s4107_s6 = sld [smem:[#allocation14_spill]] (!%p725_p9) }
  0x1f   : > { %s4108_s8 = sld [smem:[#allocation15_spill]] (!%p725_p9)  ;;  %s4112_s29 = sld [smem:[#allocation20_spill]] (!%p725_p9) }
  0x20   : > { %s4113_s1 = sld [smem:[#allocation21_spill]] (!%p725_p9)  ;;  %s797_s24 = sand.u32 (!%p725_p9), 1, %s3272_s4  }
  0x21   : > { %v3153_v2 = vld [vmem:[%s4103_s3] sm:$0xff] (!%p725_p9)   ;;  %v3154_v4 = vld [vmem:[%s4103_s3 + $0x8] sm:$0xff] (!%p725_p9)   ;;  %v3155_v5 = vld [vmem:[%s4103_s3 + $0x10] sm:$0xff] (!%p725_p9)   ;;  %s3284_s27 = smov (!%p725_p9), [#allocation4]  }
  0x22   : > { %1004 = vmatpush1.bf16.msra.mxu0 (!%p725_p9), %v3153_v2  ;;  %v3156_v6 = vld [vmem:[%s4103_s3 + $0x18] sm:$0xff] (!%p725_p9)   ;;  %v3157_v7 = vld [vmem:[%s4103_s3 + $0x20] sm:$0xff] (!%p725_p9)   ;;  %v3158_v9 = vld [vmem:[%s4103_s3 + $0x28] sm:$0xff] (!%p725_p9)  }
  0x23   : > { %1005 = vmatprep.subr.bf16.mxu0 %v3282_v3  ;;  %s3487_s5 = scalar_select %p800_p10, %s3480_s2, 31  ;;  %v3159_v12 = vld [vmem:[%s4103_s3 + $0x30] sm:$0xff]   ;;  %v3160_v14 = vld [vmem:[%s4103_s3 + $0x38] sm:$0xff]   ;;  %v3161_v15 = vld [vmem:[%s4103_s3 + $0x40] ss:$0 sps:$4 sm:$0x33]  }
  0x24   : > { %v1001_v16 = vand.u32 %v3161_v15, %v999_v13  ;;  %v3186_v32 = vld [vmem:[%s4105_s9] sm:$0xff]   ;;  %v3187_v33 = vld [vmem:[%s4105_s9 + $0x8] sm:$0xff]   ;;  %v3188_v34 = vld [vmem:[%s4105_s9 + $0x10] sm:$0xff]   ;;  %s4106_s3 = sld [smem:[#allocation19_spill]] }
  0x25   : > { %s4080_s7 = sshll.u32 %s3487_s5, 3  ;;  %2940 = vmatprep.subr.bf16.mxu1 %v3186_v32  ;;  %v3189_v35 = vld [vmem:[%s4105_s9 + $0x18] sm:$0xff]   ;;  %v3554_v37 = vld [vmem:[%s4107_s6] ss:$0 sm:$0xff]  ;;  %s4110_s6 = sld [smem:[#allocation17_spill]] }
  0x26   : > { %1006 = vmatpush1.bf16.msra.mxu0 %v3154_v4  ;;  %s3495_s30 = scalar_lea.vmem %s4104_s23, %s4080_s7  ;;  %2941 = vmatpush3.bf16.msra.mxu1 %v3186_v32  ;;  %v3559_v38 = vld [vmem:[%s4108_s8] ss:$0 sm:$0xff]  ;;  %s4109_s23 = sld [smem:[#allocation22_spill]] }
  0x27   : > { %1007 = vmatprep.subr.bf16.mxu0 %v3282_v3  ;;  %v3164_v8 = vld [vmem:[%s3495_s30 + $0x4] ss:$8 sps:$4 sm:$0xff]   ;;  %v3162_v17 = vld [vmem:[%s3495_s30] ss:$8 sps:$4 sm:$0xff]   ;;  %v3165_v18 = vld [vmem:[%s3495_s30 + $0x14] ss:$8 sps:$4 sm:$0xff]   ;;  %2942 = vmatprep.subr.bf16.mxu1 %v3187_v33 }
  0x28   : > { %2761 = vmatprep.mubr.msk.bf16.mxu0 %vm971_vm0, %v3164_v8  ;;  %v3167_v19 = vld [vmem:[%s3495_s30 + $0x10] ss:$8 sps:$4 sm:$0xff]   ;;  %v3168_v20 = vld [vmem:[%s3495_s30 + $0x24] ss:$8 sps:$4 sm:$0xff]   ;;  %v3170_v21 = vld [vmem:[%s3495_s30 + $0x20] ss:$8 sps:$4 sm:$0xff]  }
  0x29   : > { %v3171_v22 = vld [vmem:[%s3495_s30 + $0x34] ss:$8 sps:$4 sm:$0xff]   ;;  %v3173_v23 = vld [vmem:[%s3495_s30 + $0x30] ss:$8 sps:$4 sm:$0xff]   ;;  %v3174_v24 = vld [vmem:[%s3495_s30 + $0x44] ss:$8 sps:$4 sm:$0xff]  }
  0x2a   : > { %1008 = vmatpush1.bf16.msra.mxu0 %v3155_v5  ;;  %v3176_v25 = vld [vmem:[%s3495_s30 + $0x40] ss:$8 sps:$4 sm:$0xff]   ;;  %v3177_v26 = vld [vmem:[%s3495_s30 + $0x54] ss:$8 sps:$4 sm:$0xff]   ;;  %v3179_v27 = vld [vmem:[%s3495_s30 + $0x50] ss:$8 sps:$4 sm:$0xff]   ;;  %2943 = vmatpush3.bf16.msra.mxu1 %v3187_v33 }
  0x2b   : > { %1009 = vmatprep.subr.bf16.mxu0 %v3282_v3  ;;  %v3180_v28 = vld [vmem:[%s3495_s30 + $0x64] ss:$8 sps:$4 sm:$0xff]   ;;  %v3182_v29 = vld [vmem:[%s3495_s30 + $0x60] ss:$8 sps:$4 sm:$0xff]   ;;  %v3183_v30 = vld [vmem:[%s3495_s30 + $0x74] ss:$8 sps:$4 sm:$0xff]   ;;  %2944 = vmatprep.subr.bf16.mxu1 %v3188_v34 }
  0x2c   : > { %v3185_v31 = vld [vmem:[%s3495_s30 + $0x70] ss:$8 sps:$4 sm:$0xff]   ;;  %v3190_v36 = vld [vmem:[%s4106_s3] sm:$0xff]   ;;  %v3191_v0 = vld [vmem:[%s4106_s3 + $0x8] sm:$0xff]   ;;  %s4111_s9 = sld [smem:[#allocation18_spill]]  ;;  %s4114_s8 = sshll.u32 %s3487_s5, 3 }
  0x2d   : > { %s3712_s30 = scalar_lea.vmem %s4070_s25, %s4114_s8  ;;  %s2631_s5 = scalar_lea.sflag [#allocation5], %s797_s24 }
  0x2e   : > { %1010 = vmatpush1.bf16.msra.mxu0 %v3156_v6  ;;  %2945 = vmatpush3.bf16.msra.mxu1 %v3188_v34  ;;  %v3192_v6 = vld [vmem:[%s4106_s3 + $0x10] sm:$0xff]  }
  0x2f   : > { %1011 = vmatprep.subr.bf16.mxu0 %v3282_v3  ;;  %2946 = vmatprep.subr.bf16.mxu1 %v3189_v35 }
  0x32   : > { %1012 = vmatpush1.bf16.msra.mxu0 %v3157_v7  ;;  %2947 = vmatpush3.bf16.msra.mxu1 %v3189_v35 }
  0x33   : > { %1013 = vmatprep.subr.bf16.mxu0 %v3282_v3  ;;  %2964 = vmatprep.subr.bf16.mxu1 %v3190_v36 }
  0x36   : > { %1014 = vmatpush1.bf16.msra.mxu0 %v3158_v9 }
  0x37   : > { %1015 = vmatprep.subr.bf16.mxu0 %v3282_v3 }
  0x3a   : > { %1016 = vmatpush1.bf16.msra.mxu0 %v3159_v12 }
  0x3b   : > { %1017 = vmatprep.subr.bf16.mxu0 %v3282_v3 }
  0x3e   : > { %1018 = vmatpush1.bf16.msra.mxu0 %v3160_v14 }
  0x3f   : > { %1019 = vmatprep.subr.bf16.mxu0 %v3282_v3 }
  0x42   : > { %1020 = vmatpush1.bf16.msra.mxu0 %v1001_v16 }
  0x45   : > { %1036 = vmatmul.mubr.bf16.vlgmr.msra.gmra.mrb[0].mxu0 %v3162_v17 }
  0x46   : > { %2762 = vmatprep.mubr.msk.bf16.mxu0 %vm971_vm0, %v3165_v18 }
  0x4d   : > { %1044 = vmatmul.mubr.bf16.gmra.mrb[4].mxu0 %v3167_v19 }
  0x4e   : > { %2763 = vmatprep.mubr.msk.bf16.mxu0 %vm971_vm0, %v3168_v20 }
  0x55   : > { %1052 = vmatmul.mubr.bf16.gmra.mrb[8].mxu0 %v3170_v21 }
  0x56   : > { %2764 = vmatprep.mubr.msk.bf16.mxu0 %vm971_vm0, %v3171_v22 }
  0x5d   : > { %1060 = vmatmul.mubr.bf16.gmra.mrb[12].mxu0 %v3173_v23 }
  0x5e   : > { %2765 = vmatprep.mubr.msk.bf16.mxu0 %vm971_vm0, %v3174_v24 }
  0x65   : > { %1068 = vmatmul.mubr.bf16.gmra.mrb[16].mxu0 %v3176_v25 }
  0x66   : > { %2766 = vmatprep.mubr.msk.bf16.mxu0 %vm971_vm0, %v3177_v26 }
  0x6d   : > { %1076 = vmatmul.mubr.bf16.gmra.mrb[20].mxu0 %v3179_v27 }
  0x6e   : > { %2767 = vmatprep.mubr.msk.bf16.mxu0 %vm971_vm0, %v3180_v28 }
  0x75   : > { %1084 = vmatmul.mubr.bf16.gmra.mrb[24].mxu0 %v3182_v29 }
  0x76   : > { %2768 = vmatprep.mubr.msk.bf16.mxu0 %vm971_vm0, %v3183_v30 }
  0x7d   : > { %1092 = vmatmul.mubr.bf16.gmra.mrb[28].mxu0 %v3185_v31 }
 0x118   : > { %v1037_v39 = vpop.f32.mrb[0].mxu0 }
 0x119   : > { %v1106_v40 = vmul.f32 %v3554_v37, %v1037_v39  ;;  %v1039_v41 = vpop.f32.mrb[1].mxu0 }
 0x11a   : > { %v1040_v42 = vpop.f32.mrb[2].mxu0 }
 0x11b   : > { %v1128_v43 = vadd.f32 %v3559_v38, %v1106_v40  ;;  %v1107_v44 = vmul.f32 %v3554_v37, %v1040_v42  ;;  %v1042_v45 = vpop.f32.mrb[3].mxu0 }
 0x11d   : > { %v1129_v46 = vadd.f32 %v3559_v38, %v1107_v44  ;;  %v1144_v47 = vmax.f32 %v1128_v43, 0.0 }
 0x11f   : > { %v1145_v48 = vmax.f32 %v1129_v46, 0.0 }
 0x120   : > { %v1045_v49 = vpop.f32.mrb[4].mxu0 }
 0x121   : > { %v1108_v50 = vmul.f32 %v3554_v37, %v1045_v49  ;;  %v1047_v51 = vpop.f32.mrb[5].mxu0  ;;  %v1160_v52 = vpack.c.bf16 %v1145_v48, %v1144_v47 }
 0x122   : > { %v1048_v53 = vpop.f32.mrb[6].mxu0 }
 0x123   : > { %v1130_v54 = vadd.f32 %v3559_v38, %v1108_v50  ;;  %v1109_v55 = vmul.f32 %v3554_v37, %v1048_v53  ;;  %v1050_v56 = vpop.f32.mrb[7].mxu0  ;;  %2948 = vmatprep.mubr.msk.bf16.mxu1 %vm1202_vm3, %v1160_v52 }
 0x125   : > { %v1131_v57 = vadd.f32 %v3559_v38, %v1109_v55  ;;  %v1146_v58 = vmax.f32 %v1130_v54, 0.0 }
 0x127   : > { %v1147_v59 = vmax.f32 %v1131_v57, 0.0 }
 0x128   : > { %v1053_v60 = vpop.f32.mrb[8].mxu0 }
 0x129   : > { %v1161_v61 = vpack.c.bf16 %v1147_v59, %v1146_v58  ;;  %v1110_v62 = vmul.f32 %v3554_v37, %v1053_v60  ;;  %v1055_v63 = vpop.f32.mrb[9].mxu0 }
 0x12a   : > { %v1056_v1 = vpop.f32.mrb[10].mxu0 }
 0x12b   : > { %v1132_v2 = vadd.f32 %v3559_v38, %v1110_v62  ;;  %v1111_v3 = vmul.f32 %v3554_v37, %v1056_v1  ;;  %v1058_v4 = vpop.f32.mrb[11].mxu0  ;;  %2949 = vmatmul.mubr.msk.bf16.vlgmr.msra.gmra.mrb[0].mxu1 %vm1202_vm3, %v1161_v61 }
 0x12c   : > { %2965 = vmatpush3.bf16.msra.mxu1 %v3190_v36  ;;  %v3621_v4 = vld [vmem:[%s4111_s9] ss:$0 sm:$0xff] }
 0x12d   : > { %v1133_v5 = vadd.f32 %v3559_v38, %v1111_v3  ;;  %2966 = vmatprep.subr.bf16.mxu1 %v3191_v0  ;;  %v1148_v7 = vmax.f32 %v1132_v2, 0.0  ;;  %v3193_v3 = vld [vmem:[%s4106_s3 + $0x18] sm:$0xff]  }
 0x12f   : > { %v1149_v8 = vmax.f32 %v1133_v5, 0.0 }
 0x130   : > { %v1061_v9 = vpop.f32.mrb[12].mxu0  ;;  %2967 = vmatpush3.bf16.msra.mxu1 %v3191_v0 }
 0x131   : > { %v1162_v10 = vpack.c.bf16 %v1149_v8, %v1148_v7  ;;  %v1112_v11 = vmul.f32 %v3554_v37, %v1061_v9  ;;  %v1063_v12 = vpop.f32.mrb[13].mxu0  ;;  %2968 = vmatprep.subr.bf16.mxu1 %v3192_v6 }
 0x132   : > { %v1064_v13 = vpop.f32.mrb[14].mxu0 }
 0x133   : > { %v1134_v14 = vadd.f32 %v3559_v38, %v1112_v11  ;;  %v1113_v15 = vmul.f32 %v3554_v37, %v1064_v13  ;;  %v1066_v16 = vpop.f32.mrb[15].mxu0  ;;  %2952 = vmatprep.mubr.msk.bf16.mxu1 %vm1202_vm3, %v1162_v10 }
 0x134   : > { %2969 = vmatpush3.bf16.msra.mxu1 %v3192_v6 }
 0x135   : > { %v1135_v17 = vadd.f32 %v3559_v38, %v1113_v15  ;;  %v1150_v18 = vmax.f32 %v1134_v14, 0.0  ;;  %2970 = vmatprep.subr.bf16.mxu1 %v3193_v3 }
 0x137   : > { %v1151_v19 = vmax.f32 %v1135_v17, 0.0 }
 0x138   : > { %v1069_v20 = vpop.f32.mrb[16].mxu0  ;;  %2971 = vmatpush3.bf16.msra.mxu1 %v3193_v3 }
 0x139   : > { %v1163_v21 = vpack.c.bf16 %v1151_v19, %v1150_v18  ;;  %v1114_v22 = vmul.f32 %v3554_v37, %v1069_v20  ;;  %v1071_v23 = vpop.f32.mrb[17].mxu0 }
 0x13a   : > { %v1072_v24 = vpop.f32.mrb[18].mxu0  ;;  %v3195_v23 = vld [vmem:[%s4109_s23 + $0x8] sm:$0xff]  }
 0x13b   : > { %v1136_v25 = vadd.f32 %v3559_v38, %v1114_v22  ;;  %v1115_v26 = vmul.f32 %v3554_v37, %v1072_v24  ;;  %v1074_v27 = vpop.f32.mrb[19].mxu0  ;;  %2953 = vmatmul.mubr.msk.bf16.gmra.mrb[4].mxu1 %vm1202_vm3, %v1163_v21  ;;  %v3196_v24 = vld [vmem:[%s4109_s23 + $0x10] sm:$0xff]  }
 0x13d   : > { %v1137_v28 = vadd.f32 %v3559_v38, %v1115_v26  ;;  %v1152_v29 = vmax.f32 %v1136_v25, 0.0 }
 0x13f   : > { %v1153_v30 = vmax.f32 %v1137_v28, 0.0 }
 0x140   : > { %v1077_v31 = vpop.f32.mrb[20].mxu0 }
 0x141   : > { %v1164_v32 = vpack.c.bf16 %v1153_v30, %v1152_v29  ;;  %v1116_v33 = vmul.f32 %v3554_v37, %v1077_v31  ;;  %v1079_v34 = vpop.f32.mrb[21].mxu0 }
 0x142   : > { %v1080_v35 = vpop.f32.mrb[22].mxu0 }
 0x143   : > { %v1138_v36 = vadd.f32 %v3559_v38, %v1116_v33  ;;  %v1117_v39 = vmul.f32 %v3554_v37, %v1080_v35  ;;  %v1082_v40 = vpop.f32.mrb[23].mxu0  ;;  %2956 = vmatprep.mubr.msk.bf16.mxu1 %vm1202_vm3, %v1164_v32 }
 0x145   : > { %v1139_v41 = vadd.f32 %v3559_v38, %v1117_v39  ;;  %v1154_v42 = vmax.f32 %v1138_v36, 0.0 }
 0x147   : > { %v1155_v43 = vmax.f32 %v1139_v41, 0.0 }
 0x148   : > { %v1085_v44 = vpop.f32.mrb[24].mxu0 }
 0x149   : > { %v1165_v45 = vpack.c.bf16 %v1155_v43, %v1154_v42  ;;  %v1118_v46 = vmul.f32 %v3554_v37, %v1085_v44  ;;  %v1087_v47 = vpop.f32.mrb[25].mxu0 }
 0x14a   : > { %v1088_v48 = vpop.f32.mrb[26].mxu0 }
 0x14b   : > { %v1140_v49 = vadd.f32 %v3559_v38, %v1118_v46  ;;  %v1119_v50 = vmul.f32 %v3554_v37, %v1088_v48  ;;  %v1090_v51 = vpop.f32.mrb[27].mxu0  ;;  %2957 = vmatmul.mubr.msk.bf16.gmra.mrb[8].mxu1 %vm1202_vm3, %v1165_v45 }
 0x14d   : > { %v1141_v52 = vadd.f32 %v3559_v38, %v1119_v50  ;;  %v1156_v53 = vmax.f32 %v1140_v49, 0.0 }
 0x14f   : > { %v1157_v54 = vmax.f32 %v1141_v52, 0.0 }
 0x150   : > { %v1093_v55 = vpop.f32.mrb[28].mxu0 }
 0x151   : > { %v1166_v56 = vpack.c.bf16 %v1157_v54, %v1156_v53  ;;  %v1120_v57 = vmul.f32 %v3554_v37, %v1093_v55  ;;  %v1095_v58 = vpop.f32.mrb[29].mxu0 }
 0x152   : > { %v1096_v59 = vpop.f32.mrb[30].mxu0 }
 0x153   : > { %v1142_v60 = vadd.f32 %v3559_v38, %v1120_v57  ;;  %v1121_v61 = vmul.f32 %v3554_v37, %v1096_v59  ;;  %v1098_v62 = vpop.f32.mrb[31].mxu0  ;;  %2960 = vmatprep.mubr.msk.bf16.mxu1 %vm1202_vm3, %v1166_v56  ;;  %v3194_v37 = vld [vmem:[%s4109_s23] sm:$0xff]  }
 0x154   : > { %2988 = vmatprep.subr.bf16.mxu1 %v3194_v37 }
 0x155   : > { %v1143_v63 = vadd.f32 %v3559_v38, %v1121_v61  ;;  %v1158_v0 = vmax.f32 %v1142_v60, 0.0  ;;  %v3616_v38 = vld [vmem:[%s4110_s6] ss:$0 sm:$0xff] }
 0x157   : > { %v1159_v1 = vmax.f32 %v1143_v63, 0.0 }
 0x159   : > { %v1167_v2 = vpack.c.bf16 %v1159_v1, %v1158_v0 }
 0x15b   : > { %2961 = vmatmul.mubr.msk.bf16.gmra.mrb[12].mxu1 %vm1202_vm3, %v1167_v2 }
 0x1fe   : > { %v2950_v5 = vpop.f32.mrb[0].mxu1 }
 0x1ff   : > { %v1332_v6 = vmul.f32 %v2950_v5, %v3616_v38  ;;  %v1261_v7 = vpop.f32.mrb[1].mxu1 }
 0x200   : > { %v1330_v8 = vmul.f32 %v3616_v38, %v1261_v7  ;;  %v2951_v9 = vpop.f32.mrb[2].mxu1 }
 0x201   : > { %v1354_v10 = vadd.f32 %v3621_v4, %v1332_v6  ;;  %v1333_v11 = vmul.f32 %v2951_v9, %v3616_v38  ;;  %v1264_v12 = vpop.f32.mrb[3].mxu1 }
 0x202   : > { %v1352_v13 = vadd.f32 %v3621_v4, %v1330_v8  ;;  %v1331_v14 = vmul.f32 %v3616_v38, %v1264_v12 }
 0x203   : > { %v1355_v15 = vadd.f32 %v3621_v4, %v1333_v11  ;;  %v1370_v17 = vmax.f32 %v1354_v10, 0.0 }
 0x204   : > { %v1353_v16 = vadd.f32 %v3621_v4, %v1331_v14  ;;  %v1368_v19 = vmax.f32 %v1352_v13, 0.0 }
 0x205   : > { %v1371_v18 = vmax.f32 %v1355_v15, 0.0 }
 0x206   : > { %v1369_v20 = vmax.f32 %v1353_v16, 0.0 }
 0x207   : > { %v1385_v21 = vpack.c.bf16 %v1371_v18, %v1370_v17  ;;  %v3197_v17 = vld [vmem:[%s4109_s23 + $0x18] sm:$0xff]   ;;  %v3200_v18 = vld [vmem:[%s4059_s13 + $0x10] sm:$0xff]  }
 0x208   : > { %v1384_v22 = vpack.c.bf16 %v1369_v20, %v1368_v19  ;;  %v3201_v19 = vld [vmem:[%s4059_s13 + $0x18] sm:$0xff]   ;;  %v3202_v20 = vld [vmem:[%s4059_s13 + $0x20] sm:$0xff]  }
 0x20a   : > { %2972 = vmatprep.mubr.msk.bf16.mxu1 %vm1202_vm3, %v1384_v22  ;;  %v3204_v22 = vld [vmem:[%s4059_s13 + $0x30] sm:$0xff]  }
 0x20b   : > { %2973 = vmatmul.mubr.msk.bf16.vlgmr.msra.gmra.mrb[16].mxu1 %vm1202_vm3, %v1385_v21  ;;  %v3203_v21 = vld [vmem:[%s4059_s13 + $0x28] sm:$0xff]  }
 0x20c   : > { %2989 = vmatpush3.bf16.msra.mxu1 %v3194_v37 }
 0x20d   : > { %2990 = vmatprep.subr.bf16.mxu1 %v3195_v23 }
 0x20e   : > { %v2954_v25 = vpop.f32.mrb[4].mxu1 }
 0x20f   : > { %v1336_v26 = vmul.f32 %v2954_v25, %v3616_v38  ;;  %v1277_v27 = vpop.f32.mrb[5].mxu1 }
 0x210   : > { %v1334_v28 = vmul.f32 %v3616_v38, %v1277_v27  ;;  %v2955_v29 = vpop.f32.mrb[6].mxu1  ;;  %2991 = vmatpush3.bf16.msra.mxu1 %v3195_v23  ;;  %v3696_v23 = vld [vmem:[%s4112_s29] ss:$0 sm:$0xff]  ;;  %s3222_s29 = sshll.u32 %s3284_s27, 4  ;;  %s3223_s29 = int_to_ptr.vmem [resolvable:$false] %s3222_s29 }
 0x211   : > { %v1358_v30 = vadd.f32 %v3621_v4, %v1336_v26  ;;  %v1337_v31 = vmul.f32 %v2955_v29, %v3616_v38  ;;  %v1280_v32 = vpop.f32.mrb[7].mxu1  ;;  %2992 = vmatprep.subr.bf16.mxu1 %v3196_v24  ;;  %s3224_s28 = scalar_lea.vmem %s3223_s29, 32 }
 0x212   : > { %v1356_v33 = vadd.f32 %v3621_v4, %v1334_v28  ;;  %v1335_v34 = vmul.f32 %v3616_v38, %v1280_v32 }
 0x213   : > { %v1359_v35 = vadd.f32 %v3621_v4, %v1337_v31  ;;  %v1374_v39 = vmax.f32 %v1358_v30, 0.0 }
 0x214   : > { %v1357_v36 = vadd.f32 %v3621_v4, %v1335_v34  ;;  %2993 = vmatpush3.bf16.msra.mxu1 %v3196_v24  ;;  %v1372_v41 = vmax.f32 %v1356_v33, 0.0  ;;  %v3701_v24 = vld [vmem:[%s4113_s1] ss:$0 sm:$0xff]  ;;  %s798_s1 = scalar_lea.vmem [#allocation4], %s797_s24 }
 0x215   : > { %v1375_v40 = vmax.f32 %v1359_v35, 0.0  ;;  %2994 = vmatprep.subr.bf16.mxu1 %v3197_v17  ;;  %s2647_s8 = sshll.u32 %s798_s1, 4  ;;  %s4006_s8 = int_to_ptr.vmem [resolvable:$true] %s2647_s8 }
 0x216   : > { %v1373_v42 = vmax.f32 %v1357_v36, 0.0  ;;  %s3218_s9 = scalar_lea.vmem %s4006_s8, 16  ;;  %p3225_p0 = scmp.lt.s32.totalorder %s4006_s8, %s3223_s29 }
 0x217   : > { %v1387_v43 = vpack.c.bf16 %v1375_v40, %v1374_v39  ;;  %p3219_p11 = scmp.ne.s32.totalorder %s4006_s8, %s3218_s9  ;;  %p3226_p1 = scmp.lt.s32.totalorder %s3224_s28, %s3218_s9 }
 0x218   : > { %v1386_v44 = vpack.c.bf16 %v1373_v42, %v1372_v41  ;;  %2995 = vmatpush3.bf16.msra.mxu1 %v3197_v17 }
 0x219   : > { %p3220_p12 = pnand %p3219_p11, %p3461_p5  ;;  %p3227_p2 = por %p3226_p1, %p3225_p0 }
 0x21a   : > { %2976 = vmatprep.mubr.msk.bf16.mxu1 %vm1202_vm3, %v1386_v44 }
 0x21b   : > { %2977 = vmatmul.mubr.msk.bf16.gmra.mrb[20].mxu1 %vm1202_vm3, %v1387_v43  ;;  %p3221_p13 = pneg %p3220_p12 }
 0x21d   : > { %p3228_p3 = pnand %p3227_p2, %p3221_p13 }
 0x21e   : > { %v2958_v45 = vpop.f32.mrb[8].mxu1 }
 0x21f   : > { %v1340_v46 = vmul.f32 %v2958_v45, %v3616_v38  ;;  %v1293_v47 = vpop.f32.mrb[9].mxu1 }
 0x220   : > { %v1338_v48 = vmul.f32 %v3616_v38, %v1293_v47  ;;  %v2959_v49 = vpop.f32.mrb[10].mxu1 }
 0x221   : > { %v1362_v50 = vadd.f32 %v3621_v4, %v1340_v46  ;;  %v1341_v51 = vmul.f32 %v2959_v49, %v3616_v38  ;;  %v1296_v52 = vpop.f32.mrb[11].mxu1 }
 0x222   : > { %v1360_v53 = vadd.f32 %v3621_v4, %v1338_v48  ;;  %v1339_v54 = vmul.f32 %v3616_v38, %v1296_v52 }
 0x223   : > { %v1363_v55 = vadd.f32 %v3621_v4, %v1341_v51  ;;  %v1378_v57 = vmax.f32 %v1362_v50, 0.0 }
 0x224   : > { %v1361_v56 = vadd.f32 %v3621_v4, %v1339_v54  ;;  %v1376_v59 = vmax.f32 %v1360_v53, 0.0 }
 0x225   : > { %v1379_v58 = vmax.f32 %v1363_v55, 0.0 }
 0x226   : > { %v1377_v60 = vmax.f32 %v1361_v56, 0.0 }
 0x227   : > { %v1389_v61 = vpack.c.bf16 %v1379_v58, %v1378_v57 }
 0x228   : > { %v1388_v62 = vpack.c.bf16 %v1377_v60, %v1376_v59 }
 0x22a   : > { %2980 = vmatprep.mubr.msk.bf16.mxu1 %vm1202_vm3, %v1388_v62 }
 0x22b   : > { %2981 = vmatmul.mubr.msk.bf16.gmra.mrb[24].mxu1 %vm1202_vm3, %v1389_v61 }
 0x22e   : > { %v2962_v63 = vpop.f32.mrb[12].mxu1 }
 0x22f   : > { %v1344_v0 = vmul.f32 %v2962_v63, %v3616_v38  ;;  %v1309_v1 = vpop.f32.mrb[13].mxu1 }
 0x230   : > { %v1342_v2 = vmul.f32 %v3616_v38, %v1309_v1  ;;  %v2963_v3 = vpop.f32.mrb[14].mxu1 }
 0x231   : > { %v1366_v37 = vadd.f32 %v3621_v4, %v1344_v0  ;;  %v1345_v5 = vmul.f32 %v2963_v3, %v3616_v38  ;;  %v1312_v6 = vpop.f32.mrb[15].mxu1 }
 0x232   : > { %v1364_v7 = vadd.f32 %v3621_v4, %v1342_v2  ;;  %v1343_v8 = vmul.f32 %v3616_v38, %v1312_v6  ;;  %v3198_v38 = vld [vmem:[%s4059_s13] sm:$0xff]  }
 0x233   : > { %v1367_v9 = vadd.f32 %v3621_v4, %v1345_v5  ;;  %v1382_v11 = vmax.f32 %v1366_v37, 0.0  ;;  %3012 = vmatprep.subr.bf16.mxu0 %v3198_v38 }
 0x234   : > { %v1365_v10 = vadd.f32 %v3621_v4, %v1343_v8  ;;  %v1380_v13 = vmax.f32 %v1364_v7, 0.0  ;;  %v3199_v4 = vld [vmem:[%s4059_s13 + $0x8] sm:$0xff]   ;;  %3013 = vmatpush3.bf16.msra.mxu0 %v3198_v38 }
 0x235   : > { %v1383_v12 = vmax.f32 %v1367_v9, 0.0  ;;  %3014 = vmatprep.subr.bf16.mxu0 %v3199_v4 }
 0x236   : > { %v1381_v14 = vmax.f32 %v1365_v10, 0.0 }
 0x237   : > { %v1391_v15 = vpack.c.bf16 %v1383_v12, %v1382_v11 }
 0x238   : > { %v1390_v16 = vpack.c.bf16 %v1381_v14, %v1380_v13  ;;  %3015 = vmatpush3.bf16.msra.mxu0 %v3199_v4 }
 0x239   : > { %3016 = vmatprep.subr.bf16.mxu0 %v3200_v18 }
 0x23a   : > { %2984 = vmatprep.mubr.msk.bf16.mxu1 %vm1202_vm3, %v1390_v16 }
 0x23b   : > { %2985 = vmatmul.mubr.msk.bf16.gmra.mrb[28].mxu1 %vm1202_vm3, %v1391_v15 }
 0x23c   : > { %3017 = vmatpush3.bf16.msra.mxu0 %v3200_v18 }
 0x23d   : > { %3018 = vmatprep.subr.bf16.mxu0 %v3201_v19 }
 0x240   : > { %3019 = vmatpush3.bf16.msra.mxu0 %v3201_v19 }
 0x241   : > { %3020 = vmatprep.subr.bf16.mxu0 %v3202_v20 }
 0x244   : > { %3021 = vmatpush3.bf16.msra.mxu0 %v3202_v20 }
 0x245   : > { %3022 = vmatprep.subr.bf16.mxu0 %v3203_v21 }
 0x248   : > { %3023 = vmatpush3.bf16.msra.mxu0 %v3203_v21 }
 0x249   : > { %3024 = vmatprep.subr.bf16.mxu0 %v3204_v22 }
 0x24c   : > { %3025 = vmatpush3.bf16.msra.mxu0 %v3204_v22 }
 0x2de   : > { %v2974_v25 = vpop.f32.mrb[16].mxu1 }
 0x2df   : > { %v1555_v26 = vmul.f32 %v2974_v25, %v3696_v23  ;;  %v1484_v27 = vpop.f32.mrb[17].mxu1 }
 0x2e0   : > { %v1553_v28 = vmul.f32 %v3696_v23, %v1484_v27  ;;  %v2975_v29 = vpop.f32.mrb[18].mxu1 }
 0x2e1   : > { %v1577_v30 = vadd.f32 %v3701_v24, %v1555_v26  ;;  %v1556_v31 = vmul.f32 %v2975_v29, %v3696_v23  ;;  %v1487_v32 = vpop.f32.mrb[19].mxu1 }
 0x2e2   : > { %v1575_v33 = vadd.f32 %v3701_v24, %v1553_v28  ;;  %v1554_v34 = vmul.f32 %v3696_v23, %v1487_v32 }
 0x2e3   : > { %v1593_v35 = vmax.f32 %v1577_v30, 0.0  ;;  %v1578_v36 = vadd.f32 %v3701_v24, %v1556_v31 }
 0x2e4   : > { %v1591_v39 = vmax.f32 %v1575_v33, 0.0  ;;  %v1576_v40 = vadd.f32 %v3701_v24, %v1554_v34 }
 0x2e5   : > { %1609 = vst.msk [vmem:[%s3712_s30 + $0x10] sm:$0xff] %vm1202_vm3, %v1593_v35  ;;  %v1594_v41 = vmax.f32 %v1578_v36, 0.0  ;;  %v3208_v36 = vld [vmem:[%s4062_s16 + $0x10] sm:$0xff]  }
 0x2e6   : > { %1607 = vst.msk [vmem:[%s3712_s30] sm:$0xff] %vm1202_vm3, %v1591_v39  ;;  %v1592_v42 = vmax.f32 %v1576_v40, 0.0  ;;  %v3802_v40 = vld [vmem:[%s4058_s12] ss:$0 sm:$0xff] }
 0x2e7   : > { %1610 = vst.msk [vmem:[%s3712_s30 + $0x18] sm:$0xff] %vm1202_vm3, %v1594_v41  ;;  %v1624_v43 = vpack.c.bf16 %v1594_v41, %v1593_v35  ;;  %v3207_v35 = vld [vmem:[%s4062_s16 + $0x8] sm:$0xff]  }
 0x2e8   : > { %1608 = vst.msk [vmem:[%s3712_s30 + $0x8] sm:$0xff] %vm1202_vm3, %v1592_v42  ;;  %v1623_v44 = vpack.c.bf16 %v1592_v42, %v1591_v39  ;;  %v3797_v39 = vld [vmem:[%s4057_s11] ss:$0 sm:$0xff] }
 0x2ea   : > { %2996 = vmatprep.mubr.msk.bf16.mxu1 %vm1202_vm3, %v1623_v44 }
 0x2eb   : > { %2997 = vmatmul.mubr.msk.bf16.vlgmr.msra.gmra.mrb[32].mxu1 %vm1202_vm3, %v1624_v43 }
 0x2ee   : > { %v2978_v45 = vpop.f32.mrb[20].mxu1 }
 0x2ef   : > { %v1559_v46 = vmul.f32 %v2978_v45, %v3696_v23  ;;  %v1500_v47 = vpop.f32.mrb[21].mxu1 }
 0x2f0   : > { %v1557_v48 = vmul.f32 %v3696_v23, %v1500_v47  ;;  %v2979_v49 = vpop.f32.mrb[22].mxu1 }
 0x2f1   : > { %v1581_v50 = vadd.f32 %v3701_v24, %v1559_v46  ;;  %v1560_v51 = vmul.f32 %v2979_v49, %v3696_v23  ;;  %v1503_v52 = vpop.f32.mrb[23].mxu1 }
 0x2f2   : > { %v1579_v53 = vadd.f32 %v3701_v24, %v1557_v48  ;;  %v1558_v54 = vmul.f32 %v3696_v23, %v1503_v52 }
 0x2f3   : > { %v1597_v55 = vmax.f32 %v1581_v50, 0.0  ;;  %v1582_v56 = vadd.f32 %v3701_v24, %v1560_v51 }
 0x2f4   : > { %v1595_v57 = vmax.f32 %v1579_v53, 0.0  ;;  %v1580_v58 = vadd.f32 %v3701_v24, %v1558_v54 }
 0x2f5   : > { %1613 = vst.msk [vmem:[%s3712_s30 + $0x30] sm:$0xff] %vm1202_vm3, %v1597_v55  ;;  %v1598_v59 = vmax.f32 %v1582_v56, 0.0 }
 0x2f6   : > { %1611 = vst.msk [vmem:[%s3712_s30 + $0x20] sm:$0xff] %vm1202_vm3, %v1595_v57  ;;  %v1596_v60 = vmax.f32 %v1580_v58, 0.0 }
 0x2f7   : > { %1614 = vst.msk [vmem:[%s3712_s30 + $0x38] sm:$0xff] %vm1202_vm3, %v1598_v59  ;;  %v1626_v61 = vpack.c.bf16 %v1598_v59, %v1597_v55 }
 0x2f8   : > { %1612 = vst.msk [vmem:[%s3712_s30 + $0x28] sm:$0xff] %vm1202_vm3, %v1596_v60  ;;  %v1625_v62 = vpack.c.bf16 %v1596_v60, %v1595_v57 }
 0x2fa   : > { %3000 = vmatprep.mubr.msk.bf16.mxu1 %vm1202_vm3, %v1625_v62 }
 0x2fb   : > { %3001 = vmatmul.mubr.msk.bf16.gmra.mrb[36].mxu1 %vm1202_vm3, %v1626_v61 }
 0x2fe   : > { %v2982_v63 = vpop.f32.mrb[24].mxu1 }
 0x2ff   : > { %v1563_v0 = vmul.f32 %v2982_v63, %v3696_v23  ;;  %v1516_v1 = vpop.f32.mrb[25].mxu1 }
 0x300   : > { %v1561_v2 = vmul.f32 %v3696_v23, %v1516_v1  ;;  %v2983_v3 = vpop.f32.mrb[26].mxu1 }
 0x301   : > { %v1585_v37 = vadd.f32 %v3701_v24, %v1563_v0  ;;  %v1564_v5 = vmul.f32 %v2983_v3, %v3696_v23  ;;  %v1519_v6 = vpop.f32.mrb[27].mxu1 }
 0x302   : > { %v1583_v7 = vadd.f32 %v3701_v24, %v1561_v2  ;;  %v1562_v8 = vmul.f32 %v3696_v23, %v1519_v6 }
 0x303   : > { %v1601_v9 = vmax.f32 %v1585_v37, 0.0  ;;  %v1586_v10 = vadd.f32 %v3701_v24, %v1564_v5 }
 0x304   : > { %v1599_v11 = vmax.f32 %v1583_v7, 0.0  ;;  %v1584_v12 = vadd.f32 %v3701_v24, %v1562_v8 }
 0x305   : > { %1617 = vst.msk [vmem:[%s3712_s30 + $0x50] sm:$0xff] %vm1202_vm3, %v1601_v9  ;;  %v1602_v13 = vmax.f32 %v1586_v10, 0.0 }
 0x306   : > { %1615 = vst.msk [vmem:[%s3712_s30 + $0x40] sm:$0xff] %vm1202_vm3, %v1599_v11  ;;  %v1600_v14 = vmax.f32 %v1584_v12, 0.0 }
 0x307   : > { %1618 = vst.msk [vmem:[%s3712_s30 + $0x58] sm:$0xff] %vm1202_vm3, %v1602_v13  ;;  %v1628_v15 = vpack.c.bf16 %v1602_v13, %v1601_v9 }
 0x308   : > { %1616 = vst.msk [vmem:[%s3712_s30 + $0x48] sm:$0xff] %vm1202_vm3, %v1600_v14  ;;  %v1627_v16 = vpack.c.bf16 %v1600_v14, %v1599_v11 }
 0x30a   : > { %3004 = vmatprep.mubr.msk.bf16.mxu1 %vm1202_vm3, %v1627_v16 }
 0x30b   : > { %3005 = vmatmul.mubr.msk.bf16.gmra.mrb[40].mxu1 %vm1202_vm3, %v1628_v15 }
 0x30e   : > { %v2986_v17 = vpop.f32.mrb[28].mxu1 }
 0x30f   : > { %v1567_v38 = vmul.f32 %v2986_v17, %v3696_v23  ;;  %v1532_v4 = vpop.f32.mrb[29].mxu1 }
 0x310   : > { %v1565_v18 = vmul.f32 %v3696_v23, %v1532_v4  ;;  %v2987_v19 = vpop.f32.mrb[30].mxu1 }
 0x311   : > { %v1589_v20 = vadd.f32 %v3701_v24, %v1567_v38  ;;  %v1568_v21 = vmul.f32 %v2987_v19, %v3696_v23  ;;  %v1535_v22 = vpop.f32.mrb[31].mxu1 }
 0x312   : > { %v1587_v25 = vadd.f32 %v3701_v24, %v1565_v18  ;;  %v1566_v26 = vmul.f32 %v3696_v23, %v1535_v22  ;;  %v3205_v23 = vld [vmem:[%s4059_s13 + $0x38] sm:$0xff]  }
 0x313   : > { %v1605_v27 = vmax.f32 %v1589_v20, 0.0  ;;  %v1590_v28 = vadd.f32 %v3701_v24, %v1568_v21  ;;  %3026 = vmatprep.subr.bf16.mxu0 %v3205_v23 }
 0x314   : > { %v1603_v29 = vmax.f32 %v1587_v25, 0.0  ;;  %v1588_v30 = vadd.f32 %v3701_v24, %v1566_v26  ;;  %3027 = vmatpush3.bf16.msra.mxu0 %v3205_v23  ;;  %v3206_v24 = vld [vmem:[%s4062_s16] sm:$0xff]  }
 0x315   : > { %1621 = vst.msk [vmem:[%s3712_s30 + $0x70] sm:$0xff] %vm1202_vm3, %v1605_v27  ;;  %v1606_v31 = vmax.f32 %v1590_v28, 0.0  ;;  %3044 = vmatprep.subr.bf16.mxu1 %v3206_v24 }
 0x316   : > { %1619 = vst.msk [vmem:[%s3712_s30 + $0x60] sm:$0xff] %vm1202_vm3, %v1603_v29  ;;  %v1604_v32 = vmax.f32 %v1588_v30, 0.0  ;;  %3045 = vmatpush3.bf16.msra.mxu1 %v3206_v24 }
 0x317   : > { %1622 = vst.msk [vmem:[%s3712_s30 + $0x78] sm:$0xff] %vm1202_vm3, %v1606_v31  ;;  %v1630_v33 = vpack.c.bf16 %v1606_v31, %v1605_v27  ;;  %3046 = vmatprep.subr.bf16.mxu1 %v3207_v35 }
 0x318   : > { %1620 = vst.msk [vmem:[%s3712_s30 + $0x68] sm:$0xff] %vm1202_vm3, %v1604_v32  ;;  %v1629_v34 = vpack.c.bf16 %v1604_v32, %v1603_v29  ;;  %s4004_s30 = scalar_lea.hbm %s4071_s26, %s3480_s2 }
 0x31a   : > { %3008 = vmatprep.mubr.msk.bf16.mxu1 %vm1202_vm3, %v1629_v34  ;;  %3047 = vmatpush3.bf16.msra.mxu1 %v3207_v35 }
 0x31b   : > { %3009 = vmatmul.mubr.msk.bf16.gmra.mrb[44].mxu1 %vm1202_vm3, %v1630_v33  ;;  %3048 = vmatprep.subr.bf16.mxu1 %v3208_v36 }
 0x31e   : > { %3049 = vmatpush3.bf16.msra.mxu1 %v3208_v36 }
 0x3be   : > { %v2998_v41 = vpop.f32.mrb[32].mxu1 }
 0x3bf   : > { %v1794_v42 = vmul.f32 %v2998_v41, %v3797_v39  ;;  %v1723_v43 = vpop.f32.mrb[33].mxu1 }
 0x3c0   : > { %v1792_v44 = vmul.f32 %v3797_v39, %v1723_v43  ;;  %v2999_v45 = vpop.f32.mrb[34].mxu1 }
 0x3c1   : > { %v1816_v46 = vadd.f32 %v3802_v40, %v1794_v42  ;;  %v1795_v47 = vmul.f32 %v2999_v45, %v3797_v39  ;;  %v1726_v48 = vpop.f32.mrb[35].mxu1 }
 0x3c2   : > { %v1814_v49 = vadd.f32 %v3802_v40, %v1792_v44  ;;  %v1793_v50 = vmul.f32 %v3797_v39, %v1726_v48 }
 0x3c3   : > { %v1817_v51 = vadd.f32 %v3802_v40, %v1795_v47  ;;  %v1832_v53 = vmax.f32 %v1816_v46, 0.0 }
 0x3c4   : > { %v1815_v52 = vadd.f32 %v3802_v40, %v1793_v50  ;;  %v1830_v55 = vmax.f32 %v1814_v49, 0.0 }
 0x3c5   : > { %v1833_v54 = vmax.f32 %v1817_v51, 0.0  ;;  %v3209_v51 = vld [vmem:[%s4062_s16 + $0x18] sm:$0xff]  }
 0x3c6   : > { %v1831_v56 = vmax.f32 %v1815_v52, 0.0  ;;  %3050 = vmatprep.subr.bf16.mxu1 %v3209_v51  ;;  %v3212_v52 = vld [vmem:[%s4065_s19 + $0x10] sm:$0xff]  }
 0x3c7   : > { %v1847_v57 = vpack.c.bf16 %v1833_v54, %v1832_v53  ;;  %3051 = vmatpush3.bf16.msra.mxu1 %v3209_v51  ;;  %v3851_v53 = vld [vmem:[%s4060_s14] ss:$0 sm:$0xff] }
 0x3c8   : > { %v1846_v58 = vpack.c.bf16 %v1831_v56, %v1830_v55  ;;  %v3856_v54 = vld [vmem:[%s4061_s15] ss:$0 sm:$0xff] }
 0x3ca   : > { %3028 = vmatprep.mubr.bf16.mxu0 %v1846_v58 }
 0x3cb   : > { %3029 = vmatmul.mubr.bf16.vlgmr.msra.gmra.mrb[32].mxu0 %v1847_v57 }
 0x3ce   : > { %v3002_v59 = vpop.f32.mrb[36].mxu1 }
 0x3cf   : > { %v1798_v60 = vmul.f32 %v3002_v59, %v3797_v39  ;;  %v1739_v61 = vpop.f32.mrb[37].mxu1 }
 0x3d0   : > { %v1796_v62 = vmul.f32 %v3797_v39, %v1739_v61  ;;  %v3003_v63 = vpop.f32.mrb[38].mxu1 }
 0x3d1   : > { %v1820_v0 = vadd.f32 %v3802_v40, %v1798_v60  ;;  %v1799_v1 = vmul.f32 %v3003_v63, %v3797_v39  ;;  %v1742_v2 = vpop.f32.mrb[39].mxu1 }
 0x3d2   : > { %v1818_v3 = vadd.f32 %v3802_v40, %v1796_v62  ;;  %v1797_v37 = vmul.f32 %v3797_v39, %v1742_v2 }
 0x3d3   : > { %v1821_v5 = vadd.f32 %v3802_v40, %v1799_v1  ;;  %v1836_v7 = vmax.f32 %v1820_v0, 0.0 }
 0x3d4   : > { %v1819_v6 = vadd.f32 %v3802_v40, %v1797_v37  ;;  %v1834_v9 = vmax.f32 %v1818_v3, 0.0 }
 0x3d5   : > { %v1837_v8 = vmax.f32 %v1821_v5, 0.0 }
 0x3d6   : > { %v1835_v10 = vmax.f32 %v1819_v6, 0.0 }
 0x3d7   : > { %v1849_v11 = vpack.c.bf16 %v1837_v8, %v1836_v7 }
 0x3d8   : > { %v1848_v12 = vpack.c.bf16 %v1835_v10, %v1834_v9 }
 0x3da   : > { %3032 = vmatprep.mubr.bf16.mxu0 %v1848_v12 }
 0x3db   : > { %3033 = vmatmul.mubr.bf16.gmra.mrb[36].mxu0 %v1849_v11 }
 0x3de   : > { %v3006_v13 = vpop.f32.mrb[40].mxu1 }
 0x3df   : > { %v1802_v14 = vmul.f32 %v3006_v13, %v3797_v39  ;;  %v1755_v15 = vpop.f32.mrb[41].mxu1 }
 0x3e0   : > { %v1800_v16 = vmul.f32 %v3797_v39, %v1755_v15  ;;  %v3007_v17 = vpop.f32.mrb[42].mxu1 }
 0x3e1   : > { %v1824_v38 = vadd.f32 %v3802_v40, %v1802_v14  ;;  %v1803_v4 = vmul.f32 %v3007_v17, %v3797_v39  ;;  %v1758_v18 = vpop.f32.mrb[43].mxu1 }
 0x3e2   : > { %v1822_v19 = vadd.f32 %v3802_v40, %v1800_v16  ;;  %v1801_v20 = vmul.f32 %v3797_v39, %v1758_v18 }
 0x3e3   : > { %v1825_v21 = vadd.f32 %v3802_v40, %v1803_v4  ;;  %v1840_v25 = vmax.f32 %v1824_v38, 0.0 }
 0x3e4   : > { %v1823_v22 = vadd.f32 %v3802_v40, %v1801_v20  ;;  %v1838_v27 = vmax.f32 %v1822_v19, 0.0 }
 0x3e5   : > { %v1841_v26 = vmax.f32 %v1825_v21, 0.0 }
 0x3e6   : > { %v1839_v28 = vmax.f32 %v1823_v22, 0.0 }
 0x3e7   : > { %v1851_v29 = vpack.c.bf16 %v1841_v26, %v1840_v25 }
 0x3e8   : > { %v1850_v30 = vpack.c.bf16 %v1839_v28, %v1838_v27 }
 0x3ea   : > { %3036 = vmatprep.mubr.bf16.mxu0 %v1850_v30 }
 0x3eb   : > { %3037 = vmatmul.mubr.bf16.gmra.mrb[40].mxu0 %v1851_v29 }
 0x3ee   : > { %v3010_v31 = vpop.f32.mrb[44].mxu1 }
 0x3ef   : > { %v1806_v32 = vmul.f32 %v3010_v31, %v3797_v39  ;;  %v1771_v33 = vpop.f32.mrb[45].mxu1 }
 0x3f0   : > { %v1804_v34 = vmul.f32 %v3797_v39, %v1771_v33  ;;  %v3011_v23 = vpop.f32.mrb[46].mxu1 }
 0x3f1   : > { %v1828_v24 = vadd.f32 %v3802_v40, %v1806_v32  ;;  %v1807_v35 = vmul.f32 %v3011_v23, %v3797_v39  ;;  %v1774_v36 = vpop.f32.mrb[47].mxu1 }
 0x3f2   : > { %v1826_v41 = vadd.f32 %v3802_v40, %v1804_v34  ;;  %v1805_v42 = vmul.f32 %v3797_v39, %v1774_v36  ;;  %v3210_v39 = vld [vmem:[%s4065_s19] sm:$0xff]  }
 0x3f3   : > { %v1829_v43 = vadd.f32 %v3802_v40, %v1807_v35  ;;  %v1844_v45 = vmax.f32 %v1828_v24, 0.0  ;;  %3068 = vmatprep.subr.bf16.mxu0 %v3210_v39  ;;  %3092 = vmatprep.subr.bf16.mxu1 %v3210_v39 }
 0x3f4   : > { %v1827_v44 = vadd.f32 %v3802_v40, %v1805_v42  ;;  %v1842_v47 = vmax.f32 %v1826_v41, 0.0  ;;  %v3211_v40 = vld [vmem:[%s4065_s19 + $0x8] sm:$0xff]   ;;  %3069 = vmatpush3.bf16.msra.mxu0 %v3210_v39 }
 0x3f5   : > { %v1845_v46 = vmax.f32 %v1829_v43, 0.0  ;;  %3070 = vmatprep.subr.bf16.mxu0 %v3211_v40 }
 0x3f6   : > { %v1843_v48 = vmax.f32 %v1827_v44, 0.0 }
 0x3f7   : > { %v1853_v49 = vpack.c.bf16 %v1845_v46, %v1844_v45 }
 0x3f8   : > { %v1852_v50 = vpack.c.bf16 %v1843_v48, %v1842_v47  ;;  %3071 = vmatpush3.bf16.msra.mxu0 %v3211_v40 }
 0x3f9   : > { %3072 = vmatprep.subr.bf16.mxu0 %v3212_v52 }
 0x3fa   : > { %3040 = vmatprep.mubr.bf16.mxu0 %v1852_v50 }
 0x3fb   : > { %3041 = vmatmul.mubr.bf16.gmra.mrb[44].mxu0 %v1853_v49 }
 0x3fc   : > { %3073 = vmatpush3.bf16.msra.mxu0 %v3212_v52 }
 0x49e   : > { %v3030_v55 = vpop.f32.mrb[32].mxu0 }
 0x49f   : > { %v2025_v56 = vmul.f32 %v3030_v55, %v3851_v53  ;;  %v1954_v57 = vpop.f32.mrb[33].mxu0 }
 0x4a0   : > { %v2023_v58 = vmul.f32 %v3851_v53, %v1954_v57  ;;  %v3031_v59 = vpop.f32.mrb[34].mxu0 }
 0x4a1   : > { %v2047_v60 = vadd.f32 %v3856_v54, %v2025_v56  ;;  %v2026_v61 = vmul.f32 %v3031_v59, %v3851_v53  ;;  %v1957_v62 = vpop.f32.mrb[35].mxu0 }
 0x4a2   : > { %v2045_v63 = vadd.f32 %v3856_v54, %v2023_v58  ;;  %v2024_v0 = vmul.f32 %v3851_v53, %v1957_v62 }
 0x4a3   : > { %v2048_v1 = vadd.f32 %v3856_v54, %v2026_v61  ;;  %v2063_v3 = vmax.f32 %v2047_v60, 0.0 }
 0x4a4   : > { %v2046_v2 = vadd.f32 %v3856_v54, %v2024_v0  ;;  %v2061_v5 = vmax.f32 %v2045_v63, 0.0 }
 0x4a5   : > { %v2064_v37 = vmax.f32 %v2048_v1, 0.0  ;;  %v3213_v1 = vld [vmem:[%s4065_s19 + $0x18] sm:$0xff]  }
 0x4a6   : > { %v2062_v6 = vmax.f32 %v2046_v2, 0.0  ;;  %3074 = vmatprep.subr.bf16.mxu0 %v3213_v1 }
 0x4a7   : > { %v2078_v7 = vpack.c.bf16 %v2064_v37, %v2063_v3  ;;  %3075 = vmatpush3.bf16.msra.mxu0 %v3213_v1 }
 0x4a8   : > { %v2077_v8 = vpack.c.bf16 %v2062_v6, %v2061_v5 }
 0x4aa   : > { %3052 = vmatprep.mubr.msk.bf16.mxu1 %vm1202_vm3, %v2077_v8  ;;  %v3910_v8 = vld [vmem:[%s4063_s17] ss:$0 sm:$0xff] }
 0x4ab   : > { %3053 = vmatmul.mubr.msk.bf16.vlgmr.msra.gmra.mrb[48].mxu1 %vm1202_vm3, %v2078_v7 }
 0x4ac   : > { %3096 = vmatpush3.bf16.msra.mxu1 %v3210_v39 }
 0x4ad   : > { %3093 = vmatprep.subr.bf16.mxu1 %v3211_v40 }
 0x4ae   : > { %v3034_v9 = vpop.f32.mrb[36].mxu0 }
 0x4af   : > { %v2029_v10 = vmul.f32 %v3034_v9, %v3851_v53  ;;  %v1970_v11 = vpop.f32.mrb[37].mxu0  ;;  %v3915_v9 = vld [vmem:[%s4064_s18] ss:$0 sm:$0xff] }
 0x4b0   : > { %v2027_v12 = vmul.f32 %v3851_v53, %v1970_v11  ;;  %v3035_v13 = vpop.f32.mrb[38].mxu0  ;;  %3097 = vmatpush3.bf16.msra.mxu1 %v3211_v40 }
 0x4b1   : > { %v2051_v14 = vadd.f32 %v3856_v54, %v2029_v10  ;;  %v2030_v15 = vmul.f32 %v3035_v13, %v3851_v53  ;;  %v1973_v16 = vpop.f32.mrb[39].mxu0  ;;  %3094 = vmatprep.subr.bf16.mxu1 %v3212_v52 }
 0x4b2   : > { %v2049_v17 = vadd.f32 %v3856_v54, %v2027_v12  ;;  %v2028_v38 = vmul.f32 %v3851_v53, %v1973_v16 }
 0x4b3   : > { %v2052_v4 = vadd.f32 %v3856_v54, %v2030_v15  ;;  %v2067_v19 = vmax.f32 %v2051_v14, 0.0 }
 0x4b4   : > { %v2050_v18 = vadd.f32 %v3856_v54, %v2028_v38  ;;  %3098 = vmatpush3.bf16.msra.mxu1 %v3212_v52  ;;  %v2065_v21 = vmax.f32 %v2049_v17, 0.0 }
 0x4b5   : > { %v2068_v20 = vmax.f32 %v2052_v4, 0.0  ;;  %3095 = vmatprep.subr.bf16.mxu1 %v3213_v1 }
 0x4b6   : > { %v2066_v22 = vmax.f32 %v2050_v18, 0.0 }
 0x4b7   : > { %v2080_v25 = vpack.c.bf16 %v2068_v20, %v2067_v19 }
 0x4b8   : > { %v2079_v26 = vpack.c.bf16 %v2066_v22, %v2065_v21  ;;  %3099 = vmatpush3.bf16.msra.mxu1 %v3213_v1 }
 0x4ba   : > { %3056 = vmatprep.mubr.msk.bf16.mxu1 %vm1202_vm3, %v2079_v26 }
 0x4bb   : > { %3057 = vmatmul.mubr.msk.bf16.gmra.mrb[52].mxu1 %vm1202_vm3, %v2080_v25 }
 0x4be   : > { %v3038_v27 = vpop.f32.mrb[40].mxu0 }
 0x4bf   : > { %v2033_v28 = vmul.f32 %v3038_v27, %v3851_v53  ;;  %v1986_v29 = vpop.f32.mrb[41].mxu0 }
 0x4c0   : > { %v2031_v30 = vmul.f32 %v3851_v53, %v1986_v29  ;;  %v3039_v31 = vpop.f32.mrb[42].mxu0 }
 0x4c1   : > { %v2055_v32 = vadd.f32 %v3856_v54, %v2033_v28  ;;  %v2034_v33 = vmul.f32 %v3039_v31, %v3851_v53  ;;  %v1989_v34 = vpop.f32.mrb[43].mxu0 }
 0x4c2   : > { %v2053_v23 = vadd.f32 %v3856_v54, %v2031_v30  ;;  %v2032_v24 = vmul.f32 %v3851_v53, %v1989_v34 }
 0x4c3   : > { %v2056_v35 = vadd.f32 %v3856_v54, %v2034_v33  ;;  %v2071_v41 = vmax.f32 %v2055_v32, 0.0 }
 0x4c4   : > { %v2054_v36 = vadd.f32 %v3856_v54, %v2032_v24  ;;  %v2069_v43 = vmax.f32 %v2053_v23, 0.0 }
 0x4c5   : > { %v2072_v42 = vmax.f32 %v2056_v35, 0.0 }
 0x4c6   : > { %v2070_v44 = vmax.f32 %v2054_v36, 0.0 }
 0x4c7   : > { %v2082_v45 = vpack.c.bf16 %v2072_v42, %v2071_v41 }
 0x4c8   : > { %v2081_v46 = vpack.c.bf16 %v2070_v44, %v2069_v43 }
 0x4ca   : > { %3060 = vmatprep.mubr.msk.bf16.mxu1 %vm1202_vm3, %v2081_v46 }
 0x4cb   : > { %3061 = vmatmul.mubr.msk.bf16.gmra.mrb[56].mxu1 %vm1202_vm3, %v2082_v45 }
 0x4ce   : > { %v3042_v47 = vpop.f32.mrb[44].mxu0 }
 0x4cf   : > { %v2037_v48 = vmul.f32 %v3042_v47, %v3851_v53  ;;  %v2002_v49 = vpop.f32.mrb[45].mxu0 }
 0x4d0   : > { %v2035_v50 = vmul.f32 %v3851_v53, %v2002_v49  ;;  %v3043_v51 = vpop.f32.mrb[46].mxu0 }
 0x4d1   : > { %v2059_v39 = vadd.f32 %v3856_v54, %v2037_v48  ;;  %v2038_v40 = vmul.f32 %v3043_v51, %v3851_v53  ;;  %v2005_v52 = vpop.f32.mrb[47].mxu0 }
 0x4d2   : > { %v2057_v55 = vadd.f32 %v3856_v54, %v2035_v50  ;;  %v2036_v56 = vmul.f32 %v3851_v53, %v2005_v52  ;;  %v2856_v53 = vld [vmem:[%s4068_s22] sm:$0xff]  }
 0x4d3   : > { %v2060_v57 = vadd.f32 %v3856_v54, %v2038_v40  ;;  %v2075_v59 = vmax.f32 %v2059_v39, 0.0  ;;  %v2857_v2 = vunpack.c.l.bf16 %v2856_v53  ;;  %v2858_v3 = vunpack.c.h.bf16 %v2856_v53 }
 0x4d4   : > { %v2058_v58 = vadd.f32 %v3856_v54, %v2036_v56  ;;  %v2073_v61 = vmax.f32 %v2057_v55, 0.0  ;;  %v2863_v54 = vld [vmem:[%s4068_s22 + $0x8] sm:$0xff]  }
 0x4d5   : > { %v2076_v60 = vmax.f32 %v2060_v57, 0.0  ;;  %v2861_v37 = vunpack.c.l.bf16 %v2863_v54  ;;  %v2862_v5 = vunpack.c.h.bf16 %v2863_v54  ;;  %v3142_v6 = vpack.i.bf16 %v2858_v3, %v2857_v2 }
 0x4d6   : > { %v2074_v62 = vmax.f32 %v2058_v58, 0.0 }
 0x4d7   : > { %v2084_v63 = vpack.c.bf16 %v2076_v60, %v2075_v59  ;;  %3143 = vperm.xlu0 %3141, %v3142_v6   ;;  %v3147_v7 = vpack.i.bf16 %v2862_v5, %v2861_v37 }
 0x4d8   : > { %v2083_v0 = vpack.c.bf16 %v2074_v62, %v2073_v61 }
 0x4da   : > { %3064 = vmatprep.mubr.msk.bf16.mxu1 %vm1202_vm3, %v2083_v0 }
 0x4db   : > { %3065 = vmatmul.mubr.msk.bf16.gmra.mrb[60].mxu1 %vm1202_vm3, %v2084_v63  ;;  %3148 = vperm.xlu0 %3141, %v3147_v7  }
 0x57e   : > { %v3054_v10 = vpop.f32.mrb[48].mxu1 }
 0x57f   : > { %v2248_v11 = vmul.f32 %v3054_v10, %v3910_v8  ;;  %v2177_v12 = vpop.f32.mrb[49].mxu1 }
 0x580   : > { %v2246_v13 = vmul.f32 %v3910_v8, %v2177_v12  ;;  %v3055_v14 = vpop.f32.mrb[50].mxu1 }
 0x581   : > { %v2270_v15 = vadd.f32 %v3915_v9, %v2248_v11  ;;  %v2249_v16 = vmul.f32 %v3055_v14, %v3910_v8  ;;  %v2180_v17 = vpop.f32.mrb[51].mxu1 }
 0x582   : > { %v2268_v38 = vadd.f32 %v3915_v9, %v2246_v13  ;;  %v2247_v4 = vmul.f32 %v3910_v8, %v2180_v17 }
 0x583   : > { %v2271_v18 = vadd.f32 %v3915_v9, %v2249_v16  ;;  %v2286_v20 = vmax.f32 %v2270_v15, 0.0 }
 0x584   : > { %v2269_v19 = vadd.f32 %v3915_v9, %v2247_v4  ;;  %v2284_v22 = vmax.f32 %v2268_v38, 0.0 }
 0x585   : > { %v2287_v21 = vmax.f32 %v2271_v18, 0.0  ;;  %v2531_v18 = vld [vmem:[#allocation2] sm:$0x1] }
 0x586   : > { %v2285_v25 = vmax.f32 %v2269_v19, 0.0  ;;  %2600 = vperm.xlu1 %3152, %v2531_v18   ;;  %v2532_v19 = vld [vmem:[#allocation3] sm:$0x1] }
 0x587   : > { %v2301_v26 = vpack.c.bf16 %v2287_v21, %v2286_v20  ;;  %v3965_v20 = vld [vmem:[%s4067_s21] ss:$0 sm:$0xff] }
 0x588   : > { %v2300_v27 = vpack.c.bf16 %v2285_v25, %v2284_v22 }
 0x58a   : > { %3076 = vmatprep.mubr.msk.bf16.mxu0 %vm1202_vm3, %v2300_v27  ;;  %2610 = vperm.xlu1 %3152, %v2532_v19  }
 0x58b   : > { %3077 = vmatmul.mubr.msk.bf16.vlgmr.msra.gmra.mrb[48].mxu0 %vm1202_vm3, %v2301_v26 }
 0x58e   : > { %v3058_v28 = vpop.f32.mrb[52].mxu1 }
 0x58f   : > { %v2252_v29 = vmul.f32 %v3058_v28, %v3910_v8  ;;  %v2193_v30 = vpop.f32.mrb[53].mxu1 }
 0x590   : > { %v2250_v31 = vmul.f32 %v3910_v8, %v2193_v30  ;;  %v3059_v32 = vpop.f32.mrb[54].mxu1 }
 0x591   : > { %v2274_v33 = vadd.f32 %v3915_v9, %v2252_v29  ;;  %v2253_v34 = vmul.f32 %v3059_v32, %v3910_v8  ;;  %v2196_v23 = vpop.f32.mrb[55].mxu1 }
 0x592   : > { %v2272_v24 = vadd.f32 %v3915_v9, %v2250_v31  ;;  %v2251_v35 = vmul.f32 %v3910_v8, %v2196_v23 }
 0x593   : > { %v2275_v36 = vadd.f32 %v3915_v9, %v2253_v34  ;;  %v2290_v42 = vmax.f32 %v2274_v33, 0.0 }
 0x594   : > { %v2273_v41 = vadd.f32 %v3915_v9, %v2251_v35  ;;  %v2288_v44 = vmax.f32 %v2272_v24, 0.0 }
 0x595   : > { %v2291_v43 = vmax.f32 %v2275_v36, 0.0 }
 0x596   : > { %v2289_v45 = vmax.f32 %v2273_v41, 0.0 }
 0x597   : > { %v2303_v46 = vpack.c.bf16 %v2291_v43, %v2290_v42 }
 0x598   : > { %v2302_v47 = vpack.c.bf16 %v2289_v45, %v2288_v44 }
 0x59a   : > { %3080 = vmatprep.mubr.msk.bf16.mxu0 %vm1202_vm3, %v2302_v47 }
 0x59b   : > { %3081 = vmatmul.mubr.msk.bf16.gmra.mrb[52].mxu0 %vm1202_vm3, %v2303_v46 }
 0x59e   : > { %v3062_v48 = vpop.f32.mrb[56].mxu1 }
 0x59f   : > { %v2256_v49 = vmul.f32 %v3062_v48, %v3910_v8  ;;  %v2209_v50 = vpop.f32.mrb[57].mxu1 }
 0x5a0   : > { %v2254_v51 = vmul.f32 %v3910_v8, %v2209_v50  ;;  %v3063_v39 = vpop.f32.mrb[58].mxu1 }
 0x5a1   : > { %v2278_v40 = vadd.f32 %v3915_v9, %v2256_v49  ;;  %v2257_v52 = vmul.f32 %v3063_v39, %v3910_v8  ;;  %v2212_v55 = vpop.f32.mrb[59].mxu1 }
 0x5a2   : > { %v2276_v56 = vadd.f32 %v3915_v9, %v2254_v51  ;;  %v2255_v57 = vmul.f32 %v3910_v8, %v2212_v55 }
 0x5a3   : > { %v2279_v58 = vadd.f32 %v3915_v9, %v2257_v52  ;;  %v2294_v60 = vmax.f32 %v2278_v40, 0.0 }
 0x5a4   : > { %v2277_v59 = vadd.f32 %v3915_v9, %v2255_v57  ;;  %v2292_v62 = vmax.f32 %v2276_v56, 0.0 }
 0x5a5   : > { %v2295_v61 = vmax.f32 %v2279_v58, 0.0 }
 0x5a6   : > { %v2293_v63 = vmax.f32 %v2277_v59, 0.0 }
 0x5a7   : > { %v2305_v0 = vpack.c.bf16 %v2295_v61, %v2294_v60 }
 0x5a8   : > { %v2304_v1 = vpack.c.bf16 %v2293_v63, %v2292_v62 }
 0x5aa   : > { %3084 = vmatprep.mubr.msk.bf16.mxu0 %vm1202_vm3, %v2304_v1 }
 0x5ab   : > { %3085 = vmatmul.mubr.msk.bf16.gmra.mrb[56].mxu0 %vm1202_vm3, %v2305_v0 }
 0x5ae   : > { %v3066_v53 = vpop.f32.mrb[60].mxu1 }
 0x5af   : > { %v2260_v54 = vmul.f32 %v3066_v53, %v3910_v8  ;;  %v2225_v2 = vpop.f32.mrb[61].mxu1 }
 0x5b0   : > { %v2258_v3 = vmul.f32 %v3910_v8, %v2225_v2  ;;  %v3067_v37 = vpop.f32.mrb[62].mxu1 }
 0x5b1   : > { %v2282_v5 = vadd.f32 %v3915_v9, %v2260_v54  ;;  %v2261_v6 = vmul.f32 %v3067_v37, %v3910_v8  ;;  %v2228_v7 = vpop.f32.mrb[63].mxu1 }
 0x5b2   : > { %v2280_v10 = vadd.f32 %v3915_v9, %v2258_v3  ;;  %v2259_v11 = vmul.f32 %v3910_v8, %v2228_v7  ;;  %v3960_v8 = vld [vmem:[%s4066_s20] ss:$0 sm:$0xff] }
 0x5b3   : > { %v2283_v12 = vadd.f32 %v3915_v9, %v2261_v6  ;;  %v2298_v14 = vmax.f32 %v2282_v5, 0.0 }
 0x5b4   : > { %v2281_v13 = vadd.f32 %v3915_v9, %v2259_v11  ;;  %v2296_v16 = vmax.f32 %v2280_v10, 0.0 }
 0x5b5   : > { %v2299_v15 = vmax.f32 %v2283_v12, 0.0 }
 0x5b6   : > { %v2297_v17 = vmax.f32 %v2281_v13, 0.0 }
 0x5b7   : > { %v2307_v38 = vpack.c.bf16 %v2299_v15, %v2298_v14 }
 0x5b8   : > { %v2306_v4 = vpack.c.bf16 %v2297_v17, %v2296_v16 }
 0x5ba   : > { %3088 = vmatprep.mubr.msk.bf16.mxu1 %vm1202_vm3, %v2306_v4 }
 0x5bb   : > { %3089 = vmatmul.mubr.msk.bf16.vlgmr.msra.gmra.mrb[64].mxu1 %vm1202_vm3, %v2307_v38 }
 0x65e   : > { %v3078_v9 = vpop.f32.mrb[48].mxu0 }
 0x65f   : > { %v2400_v21 = vpop.f32.mrb[49].mxu0  ;;  %v2471_v29 = vmul.f32 %v3078_v9, %v3960_v8 }
 0x660   : > { %v2469_v22 = vmul.f32 %v3960_v8, %v2400_v21  ;;  %v3079_v25 = vpop.f32.mrb[50].mxu0 }
 0x661   : > { %v2403_v26 = vpop.f32.mrb[51].mxu0  ;;  %v2493_v32 = vadd.f32 %v3965_v20, %v2471_v29  ;;  %v2472_v33 = vmul.f32 %v3079_v25, %v3960_v8 }
 0x662   : > { %v2491_v27 = vadd.f32 %v3965_v20, %v2469_v22  ;;  %v2470_v28 = vmul.f32 %v3960_v8, %v2403_v26  ;;  %v3144_v22 = vpop.permute.xlu0 %3143 }
 0x663   : > { %v2509_v23 = vmax.f32 %v2493_v32, 0.0  ;;  %v2494_v24 = vadd.f32 %v3965_v20, %v2472_v33  ;;  %v3145_v29 = vunpack.i.l.bf16 %v3144_v22 }
 0x664   : > { %v2507_v30 = vmax.f32 %v2491_v27, 0.0  ;;  %v2492_v31 = vadd.f32 %v3965_v20, %v2470_v28  ;;  %v3146_v28 = vunpack.i.h.bf16 %v3144_v22 }
 0x665   : > { %v2510_v41 = vmax.f32 %v2494_v24, 0.0 }
 0x666   : > { %2533 = vxpose.xlu0.b32.start [1/16] (narrow) %v2507_v30, 32  ;;  %v2508_v34 = vmax.f32 %v2492_v31, 0.0  ;;  %v3149_v25 = vpop.permute.xlu0 %3148 }
 0x667   : > { %v3150_v30 = vunpack.i.l.bf16 %v3149_v25 }
 0x66a   : > { %2534 = vxpose.xlu0.b32.cont [2/16] (narrow) %v2508_v34, 32 }
 0x66e   : > { %2535 = vxpose.xlu0.b32.cont [3/16] (narrow) %v2509_v23, 32  ;;  %v3082_v35 = vpop.f32.mrb[52].mxu0 }
 0x66f   : > { %v2416_v36 = vpop.f32.mrb[53].mxu0  ;;  %v2475_v47 = vmul.f32 %v3082_v35, %v3960_v8 }
 0x670   : > { %v2473_v42 = vmul.f32 %v3960_v8, %v2416_v36  ;;  %v3083_v43 = vpop.f32.mrb[54].mxu0 }
 0x671   : > { %v2419_v44 = vpop.f32.mrb[55].mxu0  ;;  %v2497_v50 = vadd.f32 %v3965_v20, %v2475_v47  ;;  %v2476_v51 = vmul.f32 %v3083_v43, %v3960_v8 }
 0x672   : > { %v2495_v45 = vadd.f32 %v3965_v20, %v2473_v42  ;;  %v2474_v46 = vmul.f32 %v3960_v8, %v2419_v44  ;;  %2536 = vxpose.xlu0.b32.cont [4/16] (narrow) %v2510_v41, 32  ;;  %v2603_v41 = vlaneseq }
 0x673   : > { %v2513_v40 = vmax.f32 %v2497_v50, 0.0  ;;  %v2498_v52 = vadd.f32 %v3965_v20, %v2476_v51 }
 0x674   : > { %v2511_v48 = vmax.f32 %v2495_v45, 0.0  ;;  %v2496_v49 = vadd.f32 %v3965_v20, %v2474_v46  ;;  %v2604_v44 = vshrl.u32 %v2603_v41, 7  ;;  %v2601_v45 = vpop.permute.xlu1 %2600 }
 0x675   : > { %v2514_v57 = vmax.f32 %v2498_v52, 0.0 }
 0x676   : > { %2537 = vxpose.xlu0.b32.cont [5/16] (narrow) %v2511_v48, 32  ;;  %v2512_v39 = vmax.f32 %v2496_v49, 0.0  ;;  %v2605_v47 = vsub.s32 0, %v2604_v44 }
 0x678   : > { %v2611_v50 = vpop.permute.xlu1 %2610 }
 0x679   : > { %v2616_v52 = vrot.slane %v2611_v50, %v2605_v47 }
 0x67a   : > { %2538 = vxpose.xlu0.b32.cont [6/16] (narrow) %v2512_v39, 32  ;;  %v2606_v39 = vrot.slane %v2601_v45, %v2605_v47 }
 0x67e   : > { %2539 = vxpose.xlu0.b32.cont [7/16] (narrow) %v2513_v40, 32  ;;  %v3086_v55 = vpop.f32.mrb[56].mxu0 }
 0x67f   : > { %v2432_v56 = vpop.f32.mrb[57].mxu0  ;;  %v2479_v63 = vmul.f32 %v3086_v55, %v3960_v8 }
 0x680   : > { %v2477_v58 = vmul.f32 %v3960_v8, %v2432_v56  ;;  %v3087_v59 = vpop.f32.mrb[58].mxu0 }
 0x681   : > { %v2435_v60 = vpop.f32.mrb[59].mxu0  ;;  %v2501_v53 = vadd.f32 %v3965_v20, %v2479_v63  ;;  %v2480_v54 = vmul.f32 %v3087_v59, %v3960_v8 }
 0x682   : > { %v2499_v61 = vadd.f32 %v3965_v20, %v2477_v58  ;;  %v2478_v62 = vmul.f32 %v3960_v8, %v2435_v60  ;;  %2540 = vxpose.xlu0.b32.cont [8/16] (narrow) %v2514_v57, 32 }
 0x683   : > { %v2517_v3 = vmax.f32 %v2501_v53, 0.0  ;;  %v2502_v37 = vadd.f32 %v3965_v20, %v2480_v54 }
 0x684   : > { %v2515_v0 = vmax.f32 %v2499_v61, 0.0  ;;  %v2500_v1 = vadd.f32 %v3965_v20, %v2478_v62 }
 0x685   : > { %v2518_v7 = vmax.f32 %v2502_v37, 0.0 }
 0x686   : > { %2541 = vxpose.xlu0.b32.cont [9/16] (narrow) %v2515_v0, 32  ;;  %v2516_v2 = vmax.f32 %v2500_v1, 0.0 }
 0x68a   : > { %2542 = vxpose.xlu0.b32.cont [10/16] (narrow) %v2516_v2, 32 }
 0x68e   : > { %2543 = vxpose.xlu0.b32.cont [11/16] (narrow) %v2517_v3, 32  ;;  %v3090_v5 = vpop.f32.mrb[64].mxu1 }
 0x68f   : > { %v2448_v6 = vpop.f32.mrb[65].mxu1  ;;  %v2483_v15 = vmul.f32 %v3090_v5, %v3960_v8 }
 0x690   : > { %v2481_v10 = vmul.f32 %v3960_v8, %v2448_v6  ;;  %v3091_v11 = vpop.f32.mrb[66].mxu1 }
 0x691   : > { %v2451_v12 = vpop.f32.mrb[67].mxu1  ;;  %v2505_v38 = vadd.f32 %v3965_v20, %v2483_v15  ;;  %v2484_v4 = vmul.f32 %v3091_v11, %v3960_v8 }
 0x692   : > { %v2503_v13 = vadd.f32 %v3965_v20, %v2481_v10  ;;  %v2482_v14 = vmul.f32 %v3960_v8, %v2451_v12  ;;  %2544 = vxpose.xlu0.b32.cont [12/16] (narrow) %v2518_v7, 32  ;;  %v3151_v8 = vunpack.i.h.bf16 %v3149_v25 }
 0x693   : > { %v2521_v19 = vmax.f32 %v2505_v38, 0.0  ;;  %v2506_v9 = vadd.f32 %v3965_v20, %v2484_v4 }
 0x694   : > { %v2519_v16 = vmax.f32 %v2503_v13, 0.0  ;;  %v2504_v17 = vadd.f32 %v3965_v20, %v2482_v14 }
 0x695   : > { %v2522_v21 = vmax.f32 %v2506_v9, 0.0 }
 0x696   : > { %2545 = vxpose.xlu0.b32.cont [13/16] (narrow) %v2519_v16, 32  ;;  %v2520_v18 = vmax.f32 %v2504_v17, 0.0 }
 0x69a   : > { %2546 = vxpose.xlu0.b32.cont [14/16] (narrow) %v2520_v18, 32 }
 0x69e   : > { %2547 = vxpose.xlu0.b32.cont [15/16] (narrow) %v2521_v19, 32 }
 0x6a2   : > { %2548 = vxpose.xlu0.b32.end [16/16] (narrow) %v2522_v21, 32 }
 0x6e6   : > { %v2549_v26 = vpop.trf.xlu0 }
 0x6e7   : > { %v2585_v33 = vmul.f32 %v3145_v29, %v2549_v26 }
 0x6ea   : > { %v2550_v27 = vpop.trf.xlu0 }
 0x6eb   : > { %v2586_v31 = vmul.f32 %v3146_v28, %v2550_v27 }
 0x6ed   : > { %v2589_v23 = vadd.f32 %v2586_v31, %v2585_v33 }
 0x6ee   : > { %v2551_v32 = vpop.trf.xlu0 }
 0x6ef   : > { %v2587_v34 = vmul.f32 %v3150_v30, %v2551_v32 }
 0x6f1   : > { %v2590_v35 = vadd.f32 %v2589_v23, %v2587_v34 }
 0x6f2   : > { %v2552_v24 = vpop.trf.xlu0 }
 0x6f3   : > { %v2588_v36 = vmul.f32 %v3151_v8, %v2552_v24 }
 0x6f5   : > { %v2591_v20 = vadd.f32 %v2590_v35, %v2588_v36 }
 0x6f7   : > { %v2592_v42 = vrot.slane %v2591_v20, 4 }
 0x6f9   : > { %v2593_v43 = vadd.f32 %v2592_v42, %v2591_v20 }
 0x6fb   : > { %v2594_v46 = vrot.slane %v2593_v43, 2 }
 0x6fd   : > { %v2595_v48 = vadd.f32 %v2594_v46, %v2593_v43 }
 0x6ff   : > { %v2596_v49 = vrot.slane %v2595_v48, 1 }
 0x701   : > { %v2597_v51 = vadd.f32 %v2596_v49, %v2595_v48 }
 0x703   : > { %v2607_v40 = vmul.f32 %v2606_v39, %v2597_v51 }
 0x705   : > { %v2617_v55 = vadd.f32 %v2616_v52, %v2607_v40 }
 0x707   : > { %v2618_v56 = vsub.f32 0.0, %v2617_v55 }
 0x709   : > { %v2619_v57 = vmul.f32 1.442695, %v2618_v56 }
 0x70b   : > { %3214 = vpow2.f32 %v2619_v57 }
 0x715   : > { %v3215_v58 = vpop.eup %3214 }
 0x716   : > { %v2621_v59 = vadd.f32 1.0, %v3215_v58 }
 0x718   : > { %3216 = vrcp.f32 %v2621_v59 }
 0x722   : > { %v3217_v60 = vpop.eup %3216 }
 0x723   : > { %2624 = vst [vmem:[%s798_s1] sm:$0x1] %v3217_v60 }
 0x724   : > { %3231 = shalt.err (!%p3228_p3)
}
 0x725   : > { %s3232_s2 = scalar_lea.hbm %s4004_s30, 16  ;;  %s3236_s6 = scalar_lea.hbm %s4071_s26, 32 }
 0x726   : > { %p3233_p4 = scmp.ne.s32.totalorder %s4004_s30, %s3232_s2  ;;  %p3237_p9 = scmp.lt.u32.totalorder %s4004_s30, %s4071_s26 }
 0x727   : > { %p3238_p10 = scmp.lt.u32.totalorder %s3236_s6, %s3232_s2  ;;  %p3240_p12 = scmp.lt.u32.totalorder %s3232_s2, %s4004_s30 }
 0x728   : > { %p3234_p7 = pnand %p3233_p4, %p3461_p5 }
 0x729   : > { %p3239_p11 = por %p3238_p10, %p3237_p9 }
 0x72a   : > { %p3235_p8 = pneg %p3234_p7 }
 0x72b   : > { %p3241_p13 = por %p3240_p12, %p3239_p11 }
 0x72d   : > { %p3242_p0 = pnand %p3241_p13, %p3235_p8 }
 0x72f   : > { %3245 = shalt.err (!%p3242_p0)
}
 0x730   : > { %3100 = dma.vmem_to_hbm [thread:$0]  (%p3461_p5), %s4006_s8, 16, %s4004_s30, %s2631_s5  }
 0x731 PF: > { %s4115_s9 = sld [smem:[#allocation7_spill]]  ;;  %p3106_p1 = scmp.ge.s32.totalorder %s3280_s0, 2 }
 0x733   : > { %p3103_p2 = pnand %p3106_p1, %p3465_p6 }
 0x737   : > { %s2667_s28 = sand.u32 1, %s4115_s9  }
 0x738   : > { %s2668_s24 = scalar_lea.sflag [#allocation5], %s2667_s28 }
 0x739   : > { %3263 = dma.done.wait (!%p3103_p2), %s2668_s24, 16  }
 0x73a   : > { %3265 = vsyncadd (!%p3103_p2), %s2668_s24, 4294967280  ;;  %s4117_s0 = sld [smem:[#allocation9_spill]]  ;;  %s4118_s2 = sld [smem:[#allocation8_spill]] }
 0x73b   : > { %s4119_s29 = sld [smem:[#allocation10_spill]]  ;;  %s4120_s8 = smov %s3272_s4 }
 0x740   : > { %p41_p3 = scmp.ge.s32.totalorder %s4117_s0, 4   ;;  %s4121_s4 = smov %s4118_s2 }
 0x742   :  { %43 = sbr.rel (!%p41_p3) target bundleno = 15 (0xf), region = 167 }
 0x749   :  { %2672 = vsyncpa [#allocation5], 1 }
 0x74a   :  { %2674 = vsyncpa [#allocation5 + $0x1], 1 }

</bundles_post_ra>
